<compile_context>
chip_gen: v7x
topology: tpu7x:2x2x1
jax: 0.10.0
libtpu: 0.0.40
codegen_flags: <defaults>
</compile_context>

<pallas_src>
import jax
import jax.numpy as jnp
import numpy as np
from jax.experimental import pallas as pl
from jax.experimental.pallas import tpu as pltpu

# ---- small, module-consistent sizes ---------------------------------------
DIM = 32            # model dim
HEAD_DIM = 16       # per-head dim
NUM_HEADS = 4
INNER = HEAD_DIM * NUM_HEADS          # 64
KV_WIDTH = 2 * INNER                  # 128 (fused K|V lanes)
FF_MULT = 4
FF_INNER = DIM * FF_MULT              # 128
NUM_LATENTS = 16    # m
DEPTH = 2
BATCH = 2
SEQ_N = 64          # n (tokens in x)
ROWS = SEQ_N + NUM_LATENTS            # n + m = 80 attention keys
EPS = 1e-5          # nn.LayerNorm default eps
ROPE_BASE = 10000.0
SCALE = HEAD_DIM ** -0.5              # folded into wq at pack time (power of 2)


# ---------------------------------------------------------------------------
# helpers usable both inside the kernel and in the pure-JAX reference
# ---------------------------------------------------------------------------
def _layer_norm(x, g, b):
    mu = jnp.mean(x, axis=-1, keepdims=True)
    xc = x - mu
    var = jnp.mean(xc * xc, axis=-1, keepdims=True)
    return xc * jax.lax.rsqrt(var + EPS) * g + b


def _erf(x):
    # f32 rational approximation (same coefficients XLA uses for erf) so the
    # exact (erf-based) GELU of nn.GELU() is reproduced without relying on a
    # dedicated erf lowering inside Mosaic.
    # TODO(synk): if Mosaic grows a native erf, use it directly here.
    alpha = (0.00022905065861350646, 0.0034082910107109506,
             0.050955695062380861, 0.18520832239976145, 1.128379143519084)
    beta = (-1.1791602954361697e-7, 2.3547966471313185e-5,
            0.0010179625278914885, 0.014070470171167667,
            0.11098505178285362, 0.49746925110067538, 1.0)
    x = jnp.clip(x, -4.0, 4.0)
    x2 = x * x
    p = alpha[0]
    for c in alpha[1:]:
        p = p * x2 + c
    q = beta[0]
    for c in beta[1:]:
        q = q * x2 + c
    return x * p / q


def _gelu_exact(x):
    return 0.5 * x * (1.0 + _erf(x * 0.7071067811865476))


# ---------------------------------------------------------------------------
# fused Pallas kernel: DEPTH x (PerceiverAttention + FeedForward) + final LN
# ---------------------------------------------------------------------------
def fused_resampler_kernel(x_ref, lat0_ref, rope_ref, ln_ref,
                           wq_ref, wkv_ref, wkneg_ref, wout_ref, w1_ref,
                           w2_ref, out_ref):
    f32 = jnp.float32
    x = x_ref[...]                                            # (B*n, dim)
    lat = jnp.concatenate([lat0_ref[...]] * BATCH, axis=0)    # (B*m, dim)
    cosp = rope_ref[0]                                        # (n, 2*inner)
    sinp = rope_ref[1]                                        # (n, 2*inner)
    lnw = ln_ref[...]                                         # (6*DEPTH+2, dim)

    # x LayerNorm statistics are independent of the per-layer affine params:
    # normalize once, re-affine per layer.
    mu = jnp.mean(x, axis=-1, keepdims=True)
    xc = x - mu
    x_hat = xc * jax.lax.rsqrt(jnp.mean(xc * xc, axis=-1, keepdims=True) + EPS)

    for l in range(DEPTH):                                    # static unroll
        gx, bx = lnw[6 * l + 0:6 * l + 1], lnw[6 * l + 1:6 * l + 2]
        gl_, bl_ = lnw[6 * l + 2:6 * l + 3], lnw[6 * l + 3:6 * l + 4]
        gf, bf = lnw[6 * l + 4:6 * l + 5], lnw[6 * l + 5:6 * l + 6]

        xn = x_hat * gx + bx                                  # (B*n, dim)
        latn = _layer_norm(lat, gl_, bl_)                     # (B*m, dim)

        # lane-dense 2-D projections (one MXU push each)
        kv_x = jnp.dot(xn, wkv_ref[l], preferred_element_type=f32)    # (B*n, 128)
        kng_x = jnp.dot(xn, wkneg_ref[l], preferred_element_type=f32) # (B*n, 128); V cols are 0
        kv_l = jnp.dot(latn, wkv_ref[l], preferred_element_type=f32)  # (B*m, 128)
        q = jnp.dot(latn, wq_ref[l], preferred_element_type=f32)      # (B*m, 64), scale folded

        o_rows = []
        for b in range(BATCH):                                # static unroll
            # RoPE on the x keys only; V lanes pass through (cos=1, sin=0);
            # latent keys (appended below) get no RoPE, matching the module.
            kvx_b = (kv_x[b * SEQ_N:(b + 1) * SEQ_N] * cosp
                     + kng_x[b * SEQ_N:(b + 1) * SEQ_N] * sinp)       # (n, 128)
            kv_b = jnp.concatenate(
                [kvx_b, kv_l[b * NUM_LATENTS:(b + 1) * NUM_LATENTS]],
                axis=0)                                               # (rows, 128)
            q_b = q[b * NUM_LATENTS:(b + 1) * NUM_LATENTS]            # (m, 64)

            heads = []
            for h in range(NUM_HEADS):                        # static unroll
                lo = h * HEAD_DIM
                qh = q_b[:, lo:lo + HEAD_DIM]                         # (m, hd)
                kh = kv_b[:, lo:lo + HEAD_DIM]                        # (rows, hd)
                vh = kv_b[:, INNER + lo:INNER + lo + HEAD_DIM]        # (rows, hd)
                sim = jax.lax.dot_general(
                    qh, kh, (((1,), (1,)), ((), ())),
                    preferred_element_type=f32)                       # (m, rows)
                sim = sim - jnp.max(sim, axis=-1, keepdims=True)
                p = jnp.exp(sim)
                attn = p * (1.0 / jnp.sum(p, axis=-1, keepdims=True)) # exact softmax
                heads.append(jnp.dot(attn, vh, preferred_element_type=f32))
            o_rows.append(jnp.concatenate(heads, axis=-1))            # (m, inner)

        # single lane-dense output projection over all batches / heads
        o_all = jnp.concatenate(o_rows, axis=0)                       # (B*m, inner)
        lat = lat + jnp.dot(o_all, wout_ref[l], preferred_element_type=f32)

        # FeedForward: LN -> Linear -> exact GELU -> Linear, residual
        hin = _layer_norm(lat, gf, bf)
        hid = _gelu_exact(jnp.dot(hin, w1_ref[l], preferred_element_type=f32))
        lat = lat + jnp.dot(hid, w2_ref[l], preferred_element_type=f32)

    gn, bn = lnw[6 * DEPTH:6 * DEPTH + 1], lnw[6 * DEPTH + 1:6 * DEPTH + 2]
    out_ref[...] = _layer_norm(lat, gn, bn)


# ---------------------------------------------------------------------------
# wrappers
# ---------------------------------------------------------------------------
def _full_spec(arr):
    nd = arr.ndim
    return pl.BlockSpec(arr.shape, lambda i, _nd=nd: (0,) * _nd)


def pack_params(params, cos, sin):
    """Repack PyTorch-layout weights into lane-dense, depth-stacked arrays."""
    half = HEAD_DIM // 2
    wq_l, wkv_l, wkn_l, wo_l, w1_l, w2_l, ln_rows = [], [], [], [], [], [], []
    for lw in params["layers"]:
        wq_l.append(lw["wq"] * SCALE)                 # q scale folded (power of 2)
        wkv_l.append(lw["wkv"])                       # (dim, 2*inner) fused K|V
        # rotate-half folded into the weight: kneg = x @ wkneg == neg_half(x @ wk)
        wk3 = lw["wkv"][:, :INNER].reshape(DIM, NUM_HEADS, HEAD_DIM)
        wkn = jnp.concatenate([-wk3[..., half:], wk3[..., :half]], axis=-1)
        wkn = wkn.reshape(DIM, INNER)
        wkn_l.append(jnp.concatenate(                 # zero V-columns -> same lane
            [wkn, jnp.zeros((DIM, INNER), jnp.float32)], axis=1))     # (dim, 128)
        wo_l.append(lw["wout"])
        w1_l.append(lw["w1"])
        w2_l.append(lw["w2"])
        ln_rows += [lw["gx"], lw["bx"], lw["gl"], lw["bl"], lw["gf"], lw["bf"]]
    ln_rows += [params["gn"], params["bn"]]
    ln2d = jnp.concatenate([r.reshape(1, DIM) for r in ln_rows], axis=0)  # (6D+2, dim)

    # RoPE tables tiled per head along lanes; V half of the slab is identity.
    cos_k = jnp.tile(cos, (1, NUM_HEADS))                             # (n, inner)
    sin_k = jnp.tile(sin, (1, NUM_HEADS))
    cosp = jnp.concatenate([cos_k, jnp.ones((SEQ_N, INNER), jnp.float32)], axis=1)
    sinp = jnp.concatenate([sin_k, jnp.zeros((SEQ_N, INNER), jnp.float32)], axis=1)
    rope = jnp.stack([cosp, sinp])                                    # (2, n, 128)

    return dict(lat0=params["latents"], rope=rope, ln=ln2d,
                wq=jnp.stack(wq_l), wkv=jnp.stack(wkv_l), wkneg=jnp.stack(wkn_l),
                wout=jnp.stack(wo_l), w1=jnp.stack(w1_l), w2=jnp.stack(w2_l))


@jax.jit
def perceiver_resampler(x, packed):
    B, n, dim = x.shape
    assert (B, n, dim) == (BATCH, SEQ_N, DIM)
    x2d = x.reshape(B * n, dim)                       # free reshape, lane-dense rows
    weights = [packed[k] for k in ("lat0", "rope", "ln", "wq", "wkv",
                                   "wkneg", "wout", "w1", "w2")]

    flops = 2 * DEPTH * (
        2 * B * n * DIM * KV_WIDTH                    # kv_x + kneg matmuls
        + B * NUM_LATENTS * DIM * KV_WIDTH            # kv_latents
        + B * NUM_LATENTS * DIM * INNER               # q
        + 2 * B * NUM_HEADS * NUM_LATENTS * ROWS * HEAD_DIM   # qk^T + attn@v
        + B * NUM_LATENTS * INNER * DIM               # out proj
        + 2 * B * NUM_LATENTS * DIM * FF_INNER)       # feed-forward
    trans = B * DEPTH * NUM_HEADS * NUM_LATENTS * ROWS        # softmax exps
    nbytes = 4 * (x.size + sum(int(w.size) for w in weights)
                  + B * NUM_LATENTS * DIM)

    out2d = pl.pallas_call(
        fused_resampler_kernel,
        out_shape=jax.ShapeDtypeStruct((B * NUM_LATENTS, DIM), jnp.float32),
        grid_spec=pltpu.PrefetchScalarGridSpec(
            num_scalar_prefetch=0,
            grid=(1,),
            in_specs=[_full_spec(x2d)] + [_full_spec(w) for w in weights],
            out_specs=pl.BlockSpec((B * NUM_LATENTS, DIM), lambda i: (0, 0)),
        ),
        compiler_params=pltpu.CompilerParams(dimension_semantics=("arbitrary",)),
        cost_estimate=pl.CostEstimate(flops=flops, transcendentals=trans,
                                      bytes_accessed=nbytes),
    )(x2d, *weights)
    return out2d.reshape(B, NUM_LATENTS, DIM)


# ---------------------------------------------------------------------------
# deterministic parameter init (synthetic, no checkpoint)
# ---------------------------------------------------------------------------
def init_params(key):
    keys = jax.random.split(key, DEPTH + 1)
    latents = jax.random.normal(keys[0], (NUM_LATENTS, DIM), jnp.float32)
    ones = jnp.ones((1, DIM), jnp.float32)
    zeros = jnp.zeros((1, DIM), jnp.float32)
    s = 0.05
    layers = []
    for i in range(DEPTH):
        ks = jax.random.split(keys[i + 1], 5)
        layers.append(dict(
            gx=ones, bx=zeros, gl=ones, bl=zeros,
            wq=s * jax.random.normal(ks[0], (DIM, INNER), jnp.float32),
            wkv=s * jax.random.normal(ks[1], (DIM, 2 * INNER), jnp.float32),
            wout=s * jax.random.normal(ks[2], (INNER, DIM), jnp.float32),
            gf=ones, bf=zeros,
            w1=s * jax.random.normal(ks[3], (DIM, FF_INNER), jnp.float32),
            w2=s * jax.random.normal(ks[4], (FF_INNER, DIM), jnp.float32),
        ))
    return dict(latents=latents, layers=layers, gn=ones, bn=zeros)


def rope_tables(seq_len, d, base=ROPE_BASE):
    inv = 1.0 / (base ** (jnp.arange(0, d, 2, dtype=jnp.float32) / d))
    t = jnp.arange(seq_len, dtype=jnp.float32)
    ang = jnp.einsum("n,j->nj", t, inv)                 # (n, d//2)
    ang = jnp.concatenate([ang, ang], axis=-1)          # (n, d)
    return jnp.cos(ang), jnp.sin(ang)


# ---------------------------------------------------------------------------
# pure-JAX reference (mirrors the PyTorch forward) for correctness checking
# ---------------------------------------------------------------------------
def reference(x, params, cos, sin):
    B = x.shape[0]
    lat = jnp.tile(params["latents"][None], (B, 1, 1))

    def split_heads(t):
        b, s_, _ = t.shape
        return t.reshape(b, s_, NUM_HEADS, HEAD_DIM).transpose(0, 2, 1, 3)

    half = HEAD_DIM // 2
    for lw in params["layers"]:
        xn = _layer_norm(x, lw["gx"], lw["bx"])
        ln = _layer_norm(lat, lw["gl"], lw["bl"])
        q = ln @ lw["wq"]
        kv_x = xn @ lw["wkv"]
        kv_l = ln @ lw["wkv"]
        k_x, v_x = kv_x[..., :INNER], kv_x[..., INNER:]
        k_l, v_l = kv_l[..., :INNER], kv_l[..., INNER:]
        qh, kxh, vxh = split_heads(q), split_heads(k_x), split_heads(v_x)
        klh, vlh = split_heads(k_l), split_heads(v_l)
        neg = jnp.concatenate([-kxh[..., half:], kxh[..., :half]], axis=-1)
        kxh = kxh * cos + neg * sin
        k = jnp.concatenate([kxh, klh], axis=2)
        v = jnp.concatenate([vxh, vlh], axis=2)
        qh = qh * HEAD_DIM ** (-0.5)
        sim = jnp.einsum("bhid,bhjd->bhij", qh, k)
        sim = sim - jnp.max(sim, axis=-1, keepdims=True)
        attn = jax.nn.softmax(sim, axis=-1)
        o = jnp.einsum("bhij,bhjd->bhid", attn, v)
        o = o.transpose(0, 2, 1, 3).reshape(B, -1, INNER)
        lat = o @ lw["wout"] + lat
        hin = _layer_norm(lat, lw["gf"], lw["bf"])
        lat = lat + _gelu_exact(hin @ lw["w1"]) @ lw["w2"]
    return _layer_norm(lat, params["gn"], params["bn"])


# ---------------------------------------------------------------------------
if __name__ == "__main__":
    key = jax.random.PRNGKey(0)
    k_in, k_p = jax.random.split(key)
    x = jax.random.normal(k_in, (BATCH, SEQ_N, DIM), dtype=jnp.float32)
    params = init_params(k_p)
    cos, sin = rope_tables(SEQ_N, HEAD_DIM)
    packed = pack_params(params, cos, sin)

    out = jax.block_until_ready(perceiver_resampler(x, packed))
    assert out.shape == (BATCH, NUM_LATENTS, DIM)

    ref = jax.block_until_ready(reference(x, params, cos, sin))
    np.testing.assert_allclose(np.asarray(out), np.asarray(ref),
                               rtol=2e-4, atol=2e-4)
    print("KERNEL_OK")
</pallas_src>

<mosaic_0001>
module attributes {stable_mosaic.version = 11 : i64} {
  func.func @fused_resampler_kernel(%arg0: i32, %arg1: memref<128x32xf32, #tpu.memory_space<vmem>>, %arg2: memref<16x32xf32, #tpu.memory_space<vmem>>, %arg3: memref<2x64x128xf32, #tpu.memory_space<vmem>>, %arg4: memref<14x32xf32, #tpu.memory_space<vmem>>, %arg5: memref<2x32x64xf32, #tpu.memory_space<vmem>>, %arg6: memref<2x32x128xf32, #tpu.memory_space<vmem>>, %arg7: memref<2x32x128xf32, #tpu.memory_space<vmem>>, %arg8: memref<2x64x32xf32, #tpu.memory_space<vmem>>, %arg9: memref<2x32x128xf32, #tpu.memory_space<vmem>>, %arg10: memref<2x128x32xf32, #tpu.memory_space<vmem>>, %arg11: memref<32x32xf32, #tpu.memory_space<vmem>>) attributes {dimension_semantics = [#tpu.dimension_semantics<arbitrary>], iteration_bounds = array<i64: 1>, scalar_prefetch = 0 : i64, scratch_operands = 0 : i64, tpu.core_type = #tpu.core_type<tc>, window_params = [{pipeline_mode = #tpu.pipeline_mode<synchronous>, transform_indices = @transform_0, window_bounds = array<i64: 128, 32>}, {pipeline_mode = #tpu.pipeline_mode<synchronous>, transform_indices = @transform_1, window_bounds = array<i64: 16, 32>}, {pipeline_mode = #tpu.pipeline_mode<synchronous>, transform_indices = @transform_2, window_bounds = array<i64: 2, 64, 128>}, {pipeline_mode = #tpu.pipeline_mode<synchronous>, transform_indices = @transform_3, window_bounds = array<i64: 14, 32>}, {pipeline_mode = #tpu.pipeline_mode<synchronous>, transform_indices = @transform_4, window_bounds = array<i64: 2, 32, 64>}, {pipeline_mode = #tpu.pipeline_mode<synchronous>, transform_indices = @transform_5, window_bounds = array<i64: 2, 32, 128>}, {pipeline_mode = #tpu.pipeline_mode<synchronous>, transform_indices = @transform_6, window_bounds = array<i64: 2, 32, 128>}, {pipeline_mode = #tpu.pipeline_mode<synchronous>, transform_indices = @transform_7, window_bounds = array<i64: 2, 64, 32>}, {pipeline_mode = #tpu.pipeline_mode<synchronous>, transform_indices = @transform_8, window_bounds = array<i64: 2, 32, 128>}, {pipeline_mode = #tpu.pipeline_mode<synchronous>, transform_indices = @transform_9, window_bounds = array<i64: 2, 128, 32>}, {pipeline_mode = #tpu.pipeline_mode<synchronous>, transform_indices = @transform_10, window_bounds = array<i64: 32, 32>}]} {
    %c0 = arith.constant 0 : index
    %c0_0 = arith.constant 0 : index
    %0 = vector.load %arg1[%c0, %c0_0] : memref<128x32xf32, #tpu.memory_space<vmem>>, vector<128x32xf32>
    %c0_1 = arith.constant 0 : index
    %c0_2 = arith.constant 0 : index
    %1 = vector.load %arg2[%c0_1, %c0_2] : memref<16x32xf32, #tpu.memory_space<vmem>>, vector<16x32xf32>
    %2 = tpu.concatenate %1, %1 in 0 : vector<16x32xf32>, vector<16x32xf32> -> vector<32x32xf32>
    %c0_3 = arith.constant 0 : index
    %c0_4 = arith.constant 0 : index
    %c0_5 = arith.constant 0 : index
    %3 = vector.load %arg3[%c0_3, %c0_4, %c0_5] : memref<2x64x128xf32, #tpu.memory_space<vmem>>, vector<1x64x128xf32>
    %4 = vector.shape_cast %3 : vector<1x64x128xf32> to vector<64x128xf32>
    %c1 = arith.constant 1 : index
    %c0_6 = arith.constant 0 : index
    %c0_7 = arith.constant 0 : index
    %5 = vector.load %arg3[%c1, %c0_6, %c0_7] : memref<2x64x128xf32, #tpu.memory_space<vmem>>, vector<1x64x128xf32>
    %6 = vector.shape_cast %5 : vector<1x64x128xf32> to vector<64x128xf32>
    %c0_8 = arith.constant 0 : index
    %c0_9 = arith.constant 0 : index
    %7 = vector.load %arg4[%c0_8, %c0_9] : memref<14x32xf32, #tpu.memory_space<vmem>>, vector<14x32xf32>
    %cst = arith.constant dense<0.000000e+00> : vector<128xf32>
    %8 = vector.multi_reduction <add>, %0, %cst [1] : vector<128x32xf32> to vector<128xf32>
    %9 = vector.shape_cast %8 : vector<128xf32> to vector<128x1xf32>
    %cst_10 = arith.constant 3.200000e+01 : f32
    %10 = vector.broadcast %cst_10 : f32 to vector<128x1xf32>
    %11 = arith.divf %9, %10 : vector<128x1xf32>
    %12 = vector.broadcast %11 : vector<128x1xf32> to vector<128x32xf32>
    %13 = arith.subf %0, %12 : vector<128x32xf32>
    %14 = arith.mulf %13, %13 : vector<128x32xf32>
    %cst_11 = arith.constant dense<0.000000e+00> : vector<128xf32>
    %15 = vector.multi_reduction <add>, %14, %cst_11 [1] : vector<128x32xf32> to vector<128xf32>
    %16 = vector.shape_cast %15 : vector<128xf32> to vector<128x1xf32>
    %cst_12 = arith.constant 3.200000e+01 : f32
    %17 = vector.broadcast %cst_12 : f32 to vector<128x1xf32>
    %18 = arith.divf %16, %17 : vector<128x1xf32>
    %cst_13 = arith.constant 9.99999974E-6 : f32
    %19 = vector.broadcast %cst_13 : f32 to vector<128x1xf32>
    %20 = arith.addf %18, %19 : vector<128x1xf32>
    %21 = math.rsqrt %20 : vector<128x1xf32>
    %22 = vector.broadcast %21 : vector<128x1xf32> to vector<128x32xf32>
    %23 = arith.mulf %13, %22 : vector<128x32xf32>
    %24 = vector.extract_strided_slice %7 {offsets = [0, 0], sizes = [1, 32], strides = [1, 1]} : vector<14x32xf32> to vector<1x32xf32>
    %25 = vector.extract_strided_slice %7 {offsets = [1, 0], sizes = [1, 32], strides = [1, 1]} : vector<14x32xf32> to vector<1x32xf32>
    %26 = vector.extract_strided_slice %7 {offsets = [2, 0], sizes = [1, 32], strides = [1, 1]} : vector<14x32xf32> to vector<1x32xf32>
    %27 = vector.extract_strided_slice %7 {offsets = [3, 0], sizes = [1, 32], strides = [1, 1]} : vector<14x32xf32> to vector<1x32xf32>
    %28 = vector.extract_strided_slice %7 {offsets = [4, 0], sizes = [1, 32], strides = [1, 1]} : vector<14x32xf32> to vector<1x32xf32>
    %29 = vector.extract_strided_slice %7 {offsets = [5, 0], sizes = [1, 32], strides = [1, 1]} : vector<14x32xf32> to vector<1x32xf32>
    %30 = vector.broadcast %24 : vector<1x32xf32> to vector<128x32xf32>
    %31 = arith.mulf %23, %30 : vector<128x32xf32>
    %32 = vector.broadcast %25 : vector<1x32xf32> to vector<128x32xf32>
    %33 = arith.addf %31, %32 : vector<128x32xf32>
    %cst_14 = arith.constant dense<0.000000e+00> : vector<32xf32>
    %34 = vector.multi_reduction <add>, %2, %cst_14 [1] : vector<32x32xf32> to vector<32xf32>
    %35 = vector.shape_cast %34 : vector<32xf32> to vector<32x1xf32>
    %cst_15 = arith.constant 3.200000e+01 : f32
    %36 = vector.broadcast %cst_15 : f32 to vector<32x1xf32>
    %37 = arith.divf %35, %36 : vector<32x1xf32>
    %38 = vector.broadcast %37 : vector<32x1xf32> to vector<32x32xf32>
    %39 = arith.subf %2, %38 : vector<32x32xf32>
    %40 = arith.mulf %39, %39 : vector<32x32xf32>
    %cst_16 = arith.constant dense<0.000000e+00> : vector<32xf32>
    %41 = vector.multi_reduction <add>, %40, %cst_16 [1] : vector<32x32xf32> to vector<32xf32>
    %42 = vector.shape_cast %41 : vector<32xf32> to vector<32x1xf32>
    %cst_17 = arith.constant 3.200000e+01 : f32
    %43 = vector.broadcast %cst_17 : f32 to vector<32x1xf32>
    %44 = arith.divf %42, %43 : vector<32x1xf32>
    %cst_18 = arith.constant 9.99999974E-6 : f32
    %45 = vector.broadcast %cst_18 : f32 to vector<32x1xf32>
    %46 = arith.addf %44, %45 : vector<32x1xf32>
    %47 = math.rsqrt %46 : vector<32x1xf32>
    %48 = vector.broadcast %47 : vector<32x1xf32> to vector<32x32xf32>
    %49 = arith.mulf %39, %48 : vector<32x32xf32>
    %50 = vector.broadcast %26 : vector<1x32xf32> to vector<32x32xf32>
    %51 = arith.mulf %49, %50 : vector<32x32xf32>
    %52 = vector.broadcast %27 : vector<1x32xf32> to vector<32x32xf32>
    %53 = arith.addf %51, %52 : vector<32x32xf32>
    %c0_19 = arith.constant 0 : index
    %c0_20 = arith.constant 0 : index
    %c0_21 = arith.constant 0 : index
    %54 = vector.load %arg6[%c0_19, %c0_20, %c0_21] : memref<2x32x128xf32, #tpu.memory_space<vmem>>, vector<1x32x128xf32>
    %55 = vector.shape_cast %54 : vector<1x32x128xf32> to vector<32x128xf32>
    %cst_22 = arith.constant dense<0.000000e+00> : vector<128x128xf32>
    %56 = tpu.matmul %33, %55, %cst_22 {dimension_numbers = #tpu.dot_dimension_numbers<[1], [0], [0], [1], [0, 0, 1, 1], [], []>} : vector<128x32xf32>, vector<32x128xf32>, vector<128x128xf32> -> vector<128x128xf32>
    %c0_23 = arith.constant 0 : index
    %c0_24 = arith.constant 0 : index
    %c0_25 = arith.constant 0 : index
    %57 = vector.load %arg7[%c0_23, %c0_24, %c0_25] : memref<2x32x128xf32, #tpu.memory_space<vmem>>, vector<1x32x128xf32>
    %58 = vector.shape_cast %57 : vector<1x32x128xf32> to vector<32x128xf32>
    %cst_26 = arith.constant dense<0.000000e+00> : vector<128x128xf32>
    %59 = tpu.matmul %33, %58, %cst_26 {dimension_numbers = #tpu.dot_dimension_numbers<[1], [0], [0], [1], [0, 0, 1, 1], [], []>} : vector<128x32xf32>, vector<32x128xf32>, vector<128x128xf32> -> vector<128x128xf32>
    %c0_27 = arith.constant 0 : index
    %c0_28 = arith.constant 0 : index
    %c0_29 = arith.constant 0 : index
    %60 = vector.load %arg6[%c0_27, %c0_28, %c0_29] : memref<2x32x128xf32, #tpu.memory_space<vmem>>, vector<1x32x128xf32>
    %61 = vector.shape_cast %60 : vector<1x32x128xf32> to vector<32x128xf32>
    %cst_30 = arith.constant dense<0.000000e+00> : vector<32x128xf32>
    %62 = tpu.matmul %53, %61, %cst_30 {dimension_numbers = #tpu.dot_dimension_numbers<[1], [0], [0], [1], [0, 0, 1, 1], [], []>} : vector<32x32xf32>, vector<32x128xf32>, vector<32x128xf32> -> vector<32x128xf32>
    %c0_31 = arith.constant 0 : index
    %c0_32 = arith.constant 0 : index
    %c0_33 = arith.constant 0 : index
    %63 = vector.load %arg5[%c0_31, %c0_32, %c0_33] : memref<2x32x64xf32, #tpu.memory_space<vmem>>, vector<1x32x64xf32>
    %64 = vector.shape_cast %63 : vector<1x32x64xf32> to vector<32x64xf32>
    %cst_34 = arith.constant dense<0.000000e+00> : vector<32x64xf32>
    %65 = tpu.matmul %53, %64, %cst_34 {dimension_numbers = #tpu.dot_dimension_numbers<[1], [0], [0], [1], [0, 0, 1, 1], [], []>} : vector<32x32xf32>, vector<32x64xf32>, vector<32x64xf32> -> vector<32x64xf32>
    %66 = vector.extract_strided_slice %56 {offsets = [0, 0], sizes = [64, 128], strides = [1, 1]} : vector<128x128xf32> to vector<64x128xf32>
    %67 = arith.mulf %66, %4 : vector<64x128xf32>
    %68 = vector.extract_strided_slice %59 {offsets = [0, 0], sizes = [64, 128], strides = [1, 1]} : vector<128x128xf32> to vector<64x128xf32>
    %69 = arith.mulf %68, %6 : vector<64x128xf32>
    %70 = arith.addf %67, %69 : vector<64x128xf32>
    %71 = vector.extract_strided_slice %62 {offsets = [0, 0], sizes = [16, 128], strides = [1, 1]} : vector<32x128xf32> to vector<16x128xf32>
    %72 = tpu.concatenate %70, %71 in 0 : vector<64x128xf32>, vector<16x128xf32> -> vector<80x128xf32>
    %73 = vector.extract_strided_slice %65 {offsets = [0, 0], sizes = [16, 64], strides = [1, 1]} : vector<32x64xf32> to vector<16x64xf32>
    %74 = vector.extract_strided_slice %73 {offsets = [0, 0], sizes = [16, 16], strides = [1, 1]} : vector<16x64xf32> to vector<16x16xf32>
    %75 = vector.extract_strided_slice %72 {offsets = [0, 0], sizes = [80, 16], strides = [1, 1]} : vector<80x128xf32> to vector<80x16xf32>
    %76 = vector.extract_strided_slice %72 {offsets = [0, 64], sizes = [80, 16], strides = [1, 1]} : vector<80x128xf32> to vector<80x16xf32>
    %cst_35 = arith.constant dense<0.000000e+00> : vector<16x80xf32>
    %77 = tpu.matmul %74, %75, %cst_35 {dimension_numbers = #tpu.dot_dimension_numbers<[1], [1], [0], [0], [0, 0, 1, 0], [], []>} : vector<16x16xf32>, vector<80x16xf32>, vector<16x80xf32> -> vector<16x80xf32>
    %cst_36 = arith.constant dense<0xFF800000> : vector<16xf32>
    %78 = vector.multi_reduction <maximumf>, %77, %cst_36 [1] : vector<16x80xf32> to vector<16xf32>
    %79 = vector.shape_cast %78 : vector<16xf32> to vector<16x1xf32>
    %80 = vector.broadcast %79 : vector<16x1xf32> to vector<16x80xf32>
    %81 = arith.subf %77, %80 : vector<16x80xf32>
    %82 = math.exp %81 : vector<16x80xf32>
    %cst_37 = arith.constant dense<0.000000e+00> : vector<16xf32>
    %83 = vector.multi_reduction <add>, %82, %cst_37 [1] : vector<16x80xf32> to vector<16xf32>
    %84 = vector.shape_cast %83 : vector<16xf32> to vector<16x1xf32>
    %cst_38 = arith.constant 1.000000e+00 : f32
    %85 = vector.broadcast %cst_38 : f32 to vector<16x1xf32>
    %86 = arith.divf %85, %84 : vector<16x1xf32>
    %87 = vector.broadcast %86 : vector<16x1xf32> to vector<16x80xf32>
    %88 = arith.mulf %82, %87 : vector<16x80xf32>
    %cst_39 = arith.constant dense<0.000000e+00> : vector<16x16xf32>
    %89 = tpu.matmul %88, %76, %cst_39 {dimension_numbers = #tpu.dot_dimension_numbers<[1], [0], [0], [1], [0, 0, 1, 1], [], []>} : vector<16x80xf32>, vector<80x16xf32>, vector<16x16xf32> -> vector<16x16xf32>
    %90 = vector.extract_strided_slice %73 {offsets = [0, 16], sizes = [16, 16], strides = [1, 1]} : vector<16x64xf32> to vector<16x16xf32>
    %91 = vector.extract_strided_slice %72 {offsets = [0, 16], sizes = [80, 16], strides = [1, 1]} : vector<80x128xf32> to vector<80x16xf32>
    %92 = vector.extract_strided_slice %72 {offsets = [0, 80], sizes = [80, 16], strides = [1, 1]} : vector<80x128xf32> to vector<80x16xf32>
    %cst_40 = arith.constant dense<0.000000e+00> : vector<16x80xf32>
    %93 = tpu.matmul %90, %91, %cst_40 {dimension_numbers = #tpu.dot_dimension_numbers<[1], [1], [0], [0], [0, 0, 1, 0], [], []>} : vector<16x16xf32>, vector<80x16xf32>, vector<16x80xf32> -> vector<16x80xf32>
    %cst_41 = arith.constant dense<0xFF800000> : vector<16xf32>
    %94 = vector.multi_reduction <maximumf>, %93, %cst_41 [1] : vector<16x80xf32> to vector<16xf32>
    %95 = vector.shape_cast %94 : vector<16xf32> to vector<16x1xf32>
    %96 = vector.broadcast %95 : vector<16x1xf32> to vector<16x80xf32>
    %97 = arith.subf %93, %96 : vector<16x80xf32>
    %98 = math.exp %97 : vector<16x80xf32>
    %cst_42 = arith.constant dense<0.000000e+00> : vector<16xf32>
    %99 = vector.multi_reduction <add>, %98, %cst_42 [1] : vector<16x80xf32> to vector<16xf32>
    %100 = vector.shape_cast %99 : vector<16xf32> to vector<16x1xf32>
    %cst_43 = arith.constant 1.000000e+00 : f32
    %101 = vector.broadcast %cst_43 : f32 to vector<16x1xf32>
    %102 = arith.divf %101, %100 : vector<16x1xf32>
    %103 = vector.broadcast %102 : vector<16x1xf32> to vector<16x80xf32>
    %104 = arith.mulf %98, %103 : vector<16x80xf32>
    %cst_44 = arith.constant dense<0.000000e+00> : vector<16x16xf32>
    %105 = tpu.matmul %104, %92, %cst_44 {dimension_numbers = #tpu.dot_dimension_numbers<[1], [0], [0], [1], [0, 0, 1, 1], [], []>} : vector<16x80xf32>, vector<80x16xf32>, vector<16x16xf32> -> vector<16x16xf32>
    %106 = vector.extract_strided_slice %73 {offsets = [0, 32], sizes = [16, 16], strides = [1, 1]} : vector<16x64xf32> to vector<16x16xf32>
    %107 = vector.extract_strided_slice %72 {offsets = [0, 32], sizes = [80, 16], strides = [1, 1]} : vector<80x128xf32> to vector<80x16xf32>
    %108 = vector.extract_strided_slice %72 {offsets = [0, 96], sizes = [80, 16], strides = [1, 1]} : vector<80x128xf32> to vector<80x16xf32>
    %cst_45 = arith.constant dense<0.000000e+00> : vector<16x80xf32>
    %109 = tpu.matmul %106, %107, %cst_45 {dimension_numbers = #tpu.dot_dimension_numbers<[1], [1], [0], [0], [0, 0, 1, 0], [], []>} : vector<16x16xf32>, vector<80x16xf32>, vector<16x80xf32> -> vector<16x80xf32>
    %cst_46 = arith.constant dense<0xFF800000> : vector<16xf32>
    %110 = vector.multi_reduction <maximumf>, %109, %cst_46 [1] : vector<16x80xf32> to vector<16xf32>
    %111 = vector.shape_cast %110 : vector<16xf32> to vector<16x1xf32>
    %112 = vector.broadcast %111 : vector<16x1xf32> to vector<16x80xf32>
    %113 = arith.subf %109, %112 : vector<16x80xf32>
    %114 = math.exp %113 : vector<16x80xf32>
    %cst_47 = arith.constant dense<0.000000e+00> : vector<16xf32>
    %115 = vector.multi_reduction <add>, %114, %cst_47 [1] : vector<16x80xf32> to vector<16xf32>
    %116 = vector.shape_cast %115 : vector<16xf32> to vector<16x1xf32>
    %cst_48 = arith.constant 1.000000e+00 : f32
    %117 = vector.broadcast %cst_48 : f32 to vector<16x1xf32>
    %118 = arith.divf %117, %116 : vector<16x1xf32>
    %119 = vector.broadcast %118 : vector<16x1xf32> to vector<16x80xf32>
    %120 = arith.mulf %114, %119 : vector<16x80xf32>
    %cst_49 = arith.constant dense<0.000000e+00> : vector<16x16xf32>
    %121 = tpu.matmul %120, %108, %cst_49 {dimension_numbers = #tpu.dot_dimension_numbers<[1], [0], [0], [1], [0, 0, 1, 1], [], []>} : vector<16x80xf32>, vector<80x16xf32>, vector<16x16xf32> -> vector<16x16xf32>
    %122 = vector.extract_strided_slice %73 {offsets = [0, 48], sizes = [16, 16], strides = [1, 1]} : vector<16x64xf32> to vector<16x16xf32>
    %123 = vector.extract_strided_slice %72 {offsets = [0, 48], sizes = [80, 16], strides = [1, 1]} : vector<80x128xf32> to vector<80x16xf32>
    %124 = vector.extract_strided_slice %72 {offsets = [0, 112], sizes = [80, 16], strides = [1, 1]} : vector<80x128xf32> to vector<80x16xf32>
    %cst_50 = arith.constant dense<0.000000e+00> : vector<16x80xf32>
    %125 = tpu.matmul %122, %123, %cst_50 {dimension_numbers = #tpu.dot_dimension_numbers<[1], [1], [0], [0], [0, 0, 1, 0], [], []>} : vector<16x16xf32>, vector<80x16xf32>, vector<16x80xf32> -> vector<16x80xf32>
    %cst_51 = arith.constant dense<0xFF800000> : vector<16xf32>
    %126 = vector.multi_reduction <maximumf>, %125, %cst_51 [1] : vector<16x80xf32> to vector<16xf32>
    %127 = vector.shape_cast %126 : vector<16xf32> to vector<16x1xf32>
    %128 = vector.broadcast %127 : vector<16x1xf32> to vector<16x80xf32>
    %129 = arith.subf %125, %128 : vector<16x80xf32>
    %130 = math.exp %129 : vector<16x80xf32>
    %cst_52 = arith.constant dense<0.000000e+00> : vector<16xf32>
    %131 = vector.multi_reduction <add>, %130, %cst_52 [1] : vector<16x80xf32> to vector<16xf32>
    %132 = vector.shape_cast %131 : vector<16xf32> to vector<16x1xf32>
    %cst_53 = arith.constant 1.000000e+00 : f32
    %133 = vector.broadcast %cst_53 : f32 to vector<16x1xf32>
    %134 = arith.divf %133, %132 : vector<16x1xf32>
    %135 = vector.broadcast %134 : vector<16x1xf32> to vector<16x80xf32>
    %136 = arith.mulf %130, %135 : vector<16x80xf32>
    %cst_54 = arith.constant dense<0.000000e+00> : vector<16x16xf32>
    %137 = tpu.matmul %136, %124, %cst_54 {dimension_numbers = #tpu.dot_dimension_numbers<[1], [0], [0], [1], [0, 0, 1, 1], [], []>} : vector<16x80xf32>, vector<80x16xf32>, vector<16x16xf32> -> vector<16x16xf32>
    %138 = tpu.concatenate %89, %105, %121, %137 in 1 : vector<16x16xf32>, vector<16x16xf32>, vector<16x16xf32>, vector<16x16xf32> -> vector<16x64xf32>
    %139 = vector.extract_strided_slice %56 {offsets = [64, 0], sizes = [64, 128], strides = [1, 1]} : vector<128x128xf32> to vector<64x128xf32>
    %140 = arith.mulf %139, %4 : vector<64x128xf32>
    %141 = vector.extract_strided_slice %59 {offsets = [64, 0], sizes = [64, 128], strides = [1, 1]} : vector<128x128xf32> to vector<64x128xf32>
    %142 = arith.mulf %141, %6 : vector<64x128xf32>
    %143 = arith.addf %140, %142 : vector<64x128xf32>
    %144 = vector.extract_strided_slice %62 {offsets = [16, 0], sizes = [16, 128], strides = [1, 1]} : vector<32x128xf32> to vector<16x128xf32>
    %145 = tpu.concatenate %143, %144 in 0 : vector<64x128xf32>, vector<16x128xf32> -> vector<80x128xf32>
    %146 = vector.extract_strided_slice %65 {offsets = [16, 0], sizes = [16, 64], strides = [1, 1]} : vector<32x64xf32> to vector<16x64xf32>
    %147 = vector.extract_strided_slice %146 {offsets = [0, 0], sizes = [16, 16], strides = [1, 1]} : vector<16x64xf32> to vector<16x16xf32>
    %148 = vector.extract_strided_slice %145 {offsets = [0, 0], sizes = [80, 16], strides = [1, 1]} : vector<80x128xf32> to vector<80x16xf32>
    %149 = vector.extract_strided_slice %145 {offsets = [0, 64], sizes = [80, 16], strides = [1, 1]} : vector<80x128xf32> to vector<80x16xf32>
    %cst_55 = arith.constant dense<0.000000e+00> : vector<16x80xf32>
    %150 = tpu.matmul %147, %148, %cst_55 {dimension_numbers = #tpu.dot_dimension_numbers<[1], [1], [0], [0], [0, 0, 1, 0], [], []>} : vector<16x16xf32>, vector<80x16xf32>, vector<16x80xf32> -> vector<16x80xf32>
    %cst_56 = arith.constant dense<0xFF800000> : vector<16xf32>
    %151 = vector.multi_reduction <maximumf>, %150, %cst_56 [1] : vector<16x80xf32> to vector<16xf32>
    %152 = vector.shape_cast %151 : vector<16xf32> to vector<16x1xf32>
    %153 = vector.broadcast %152 : vector<16x1xf32> to vector<16x80xf32>
    %154 = arith.subf %150, %153 : vector<16x80xf32>
    %155 = math.exp %154 : vector<16x80xf32>
    %cst_57 = arith.constant dense<0.000000e+00> : vector<16xf32>
    %156 = vector.multi_reduction <add>, %155, %cst_57 [1] : vector<16x80xf32> to vector<16xf32>
    %157 = vector.shape_cast %156 : vector<16xf32> to vector<16x1xf32>
    %cst_58 = arith.constant 1.000000e+00 : f32
    %158 = vector.broadcast %cst_58 : f32 to vector<16x1xf32>
    %159 = arith.divf %158, %157 : vector<16x1xf32>
    %160 = vector.broadcast %159 : vector<16x1xf32> to vector<16x80xf32>
    %161 = arith.mulf %155, %160 : vector<16x80xf32>
    %cst_59 = arith.constant dense<0.000000e+00> : vector<16x16xf32>
    %162 = tpu.matmul %161, %149, %cst_59 {dimension_numbers = #tpu.dot_dimension_numbers<[1], [0], [0], [1], [0, 0, 1, 1], [], []>} : vector<16x80xf32>, vector<80x16xf32>, vector<16x16xf32> -> vector<16x16xf32>
    %163 = vector.extract_strided_slice %146 {offsets = [0, 16], sizes = [16, 16], strides = [1, 1]} : vector<16x64xf32> to vector<16x16xf32>
    %164 = vector.extract_strided_slice %145 {offsets = [0, 16], sizes = [80, 16], strides = [1, 1]} : vector<80x128xf32> to vector<80x16xf32>
    %165 = vector.extract_strided_slice %145 {offsets = [0, 80], sizes = [80, 16], strides = [1, 1]} : vector<80x128xf32> to vector<80x16xf32>
    %cst_60 = arith.constant dense<0.000000e+00> : vector<16x80xf32>
    %166 = tpu.matmul %163, %164, %cst_60 {dimension_numbers = #tpu.dot_dimension_numbers<[1], [1], [0], [0], [0, 0, 1, 0], [], []>} : vector<16x16xf32>, vector<80x16xf32>, vector<16x80xf32> -> vector<16x80xf32>
    %cst_61 = arith.constant dense<0xFF800000> : vector<16xf32>
    %167 = vector.multi_reduction <maximumf>, %166, %cst_61 [1] : vector<16x80xf32> to vector<16xf32>
    %168 = vector.shape_cast %167 : vector<16xf32> to vector<16x1xf32>
    %169 = vector.broadcast %168 : vector<16x1xf32> to vector<16x80xf32>
    %170 = arith.subf %166, %169 : vector<16x80xf32>
    %171 = math.exp %170 : vector<16x80xf32>
    %cst_62 = arith.constant dense<0.000000e+00> : vector<16xf32>
    %172 = vector.multi_reduction <add>, %171, %cst_62 [1] : vector<16x80xf32> to vector<16xf32>
    %173 = vector.shape_cast %172 : vector<16xf32> to vector<16x1xf32>
    %cst_63 = arith.constant 1.000000e+00 : f32
    %174 = vector.broadcast %cst_63 : f32 to vector<16x1xf32>
    %175 = arith.divf %174, %173 : vector<16x1xf32>
    %176 = vector.broadcast %175 : vector<16x1xf32> to vector<16x80xf32>
    %177 = arith.mulf %171, %176 : vector<16x80xf32>
    %cst_64 = arith.constant dense<0.000000e+00> : vector<16x16xf32>
    %178 = tpu.matmul %177, %165, %cst_64 {dimension_numbers = #tpu.dot_dimension_numbers<[1], [0], [0], [1], [0, 0, 1, 1], [], []>} : vector<16x80xf32>, vector<80x16xf32>, vector<16x16xf32> -> vector<16x16xf32>
    %179 = vector.extract_strided_slice %146 {offsets = [0, 32], sizes = [16, 16], strides = [1, 1]} : vector<16x64xf32> to vector<16x16xf32>
    %180 = vector.extract_strided_slice %145 {offsets = [0, 32], sizes = [80, 16], strides = [1, 1]} : vector<80x128xf32> to vector<80x16xf32>
    %181 = vector.extract_strided_slice %145 {offsets = [0, 96], sizes = [80, 16], strides = [1, 1]} : vector<80x128xf32> to vector<80x16xf32>
    %cst_65 = arith.constant dense<0.000000e+00> : vector<16x80xf32>
    %182 = tpu.matmul %179, %180, %cst_65 {dimension_numbers = #tpu.dot_dimension_numbers<[1], [1], [0], [0], [0, 0, 1, 0], [], []>} : vector<16x16xf32>, vector<80x16xf32>, vector<16x80xf32> -> vector<16x80xf32>
    %cst_66 = arith.constant dense<0xFF800000> : vector<16xf32>
    %183 = vector.multi_reduction <maximumf>, %182, %cst_66 [1] : vector<16x80xf32> to vector<16xf32>
    %184 = vector.shape_cast %183 : vector<16xf32> to vector<16x1xf32>
    %185 = vector.broadcast %184 : vector<16x1xf32> to vector<16x80xf32>
    %186 = arith.subf %182, %185 : vector<16x80xf32>
    %187 = math.exp %186 : vector<16x80xf32>
    %cst_67 = arith.constant dense<0.000000e+00> : vector<16xf32>
    %188 = vector.multi_reduction <add>, %187, %cst_67 [1] : vector<16x80xf32> to vector<16xf32>
    %189 = vector.shape_cast %188 : vector<16xf32> to vector<16x1xf32>
    %cst_68 = arith.constant 1.000000e+00 : f32
    %190 = vector.broadcast %cst_68 : f32 to vector<16x1xf32>
    %191 = arith.divf %190, %189 : vector<16x1xf32>
    %192 = vector.broadcast %191 : vector<16x1xf32> to vector<16x80xf32>
    %193 = arith.mulf %187, %192 : vector<16x80xf32>
    %cst_69 = arith.constant dense<0.000000e+00> : vector<16x16xf32>
    %194 = tpu.matmul %193, %181, %cst_69 {dimension_numbers = #tpu.dot_dimension_numbers<[1], [0], [0], [1], [0, 0, 1, 1], [], []>} : vector<16x80xf32>, vector<80x16xf32>, vector<16x16xf32> -> vector<16x16xf32>
    %195 = vector.extract_strided_slice %146 {offsets = [0, 48], sizes = [16, 16], strides = [1, 1]} : vector<16x64xf32> to vector<16x16xf32>
    %196 = vector.extract_strided_slice %145 {offsets = [0, 48], sizes = [80, 16], strides = [1, 1]} : vector<80x128xf32> to vector<80x16xf32>
    %197 = vector.extract_strided_slice %145 {offsets = [0, 112], sizes = [80, 16], strides = [1, 1]} : vector<80x128xf32> to vector<80x16xf32>
    %cst_70 = arith.constant dense<0.000000e+00> : vector<16x80xf32>
    %198 = tpu.matmul %195, %196, %cst_70 {dimension_numbers = #tpu.dot_dimension_numbers<[1], [1], [0], [0], [0, 0, 1, 0], [], []>} : vector<16x16xf32>, vector<80x16xf32>, vector<16x80xf32> -> vector<16x80xf32>
    %cst_71 = arith.constant dense<0xFF800000> : vector<16xf32>
    %199 = vector.multi_reduction <maximumf>, %198, %cst_71 [1] : vector<16x80xf32> to vector<16xf32>
    %200 = vector.shape_cast %199 : vector<16xf32> to vector<16x1xf32>
    %201 = vector.broadcast %200 : vector<16x1xf32> to vector<16x80xf32>
    %202 = arith.subf %198, %201 : vector<16x80xf32>
    %203 = math.exp %202 : vector<16x80xf32>
    %cst_72 = arith.constant dense<0.000000e+00> : vector<16xf32>
    %204 = vector.multi_reduction <add>, %203, %cst_72 [1] : vector<16x80xf32> to vector<16xf32>
    %205 = vector.shape_cast %204 : vector<16xf32> to vector<16x1xf32>
    %cst_73 = arith.constant 1.000000e+00 : f32
    %206 = vector.broadcast %cst_73 : f32 to vector<16x1xf32>
    %207 = arith.divf %206, %205 : vector<16x1xf32>
    %208 = vector.broadcast %207 : vector<16x1xf32> to vector<16x80xf32>
    %209 = arith.mulf %203, %208 : vector<16x80xf32>
    %cst_74 = arith.constant dense<0.000000e+00> : vector<16x16xf32>
    %210 = tpu.matmul %209, %197, %cst_74 {dimension_numbers = #tpu.dot_dimension_numbers<[1], [0], [0], [1], [0, 0, 1, 1], [], []>} : vector<16x80xf32>, vector<80x16xf32>, vector<16x16xf32> -> vector<16x16xf32>
    %211 = tpu.concatenate %162, %178, %194, %210 in 1 : vector<16x16xf32>, vector<16x16xf32>, vector<16x16xf32>, vector<16x16xf32> -> vector<16x64xf32>
    %212 = tpu.concatenate %138, %211 in 0 : vector<16x64xf32>, vector<16x64xf32> -> vector<32x64xf32>
    %c0_75 = arith.constant 0 : index
    %c0_76 = arith.constant 0 : index
    %c0_77 = arith.constant 0 : index
    %213 = vector.load %arg8[%c0_75, %c0_76, %c0_77] : memref<2x64x32xf32, #tpu.memory_space<vmem>>, vector<1x64x32xf32>
    %214 = vector.shape_cast %213 : vector<1x64x32xf32> to vector<64x32xf32>
    %cst_78 = arith.constant dense<0.000000e+00> : vector<32x32xf32>
    %215 = tpu.matmul %212, %214, %cst_78 {dimension_numbers = #tpu.dot_dimension_numbers<[1], [0], [0], [1], [0, 0, 1, 1], [], []>} : vector<32x64xf32>, vector<64x32xf32>, vector<32x32xf32> -> vector<32x32xf32>
    %216 = arith.addf %2, %215 : vector<32x32xf32>
    %cst_79 = arith.constant dense<0.000000e+00> : vector<32xf32>
    %217 = vector.multi_reduction <add>, %216, %cst_79 [1] : vector<32x32xf32> to vector<32xf32>
    %218 = vector.shape_cast %217 : vector<32xf32> to vector<32x1xf32>
    %cst_80 = arith.constant 3.200000e+01 : f32
    %219 = vector.broadcast %cst_80 : f32 to vector<32x1xf32>
    %220 = arith.divf %218, %219 : vector<32x1xf32>
    %221 = vector.broadcast %220 : vector<32x1xf32> to vector<32x32xf32>
    %222 = arith.subf %216, %221 : vector<32x32xf32>
    %223 = arith.mulf %222, %222 : vector<32x32xf32>
    %cst_81 = arith.constant dense<0.000000e+00> : vector<32xf32>
    %224 = vector.multi_reduction <add>, %223, %cst_81 [1] : vector<32x32xf32> to vector<32xf32>
    %225 = vector.shape_cast %224 : vector<32xf32> to vector<32x1xf32>
    %cst_82 = arith.constant 3.200000e+01 : f32
    %226 = vector.broadcast %cst_82 : f32 to vector<32x1xf32>
    %227 = arith.divf %225, %226 : vector<32x1xf32>
    %cst_83 = arith.constant 9.99999974E-6 : f32
    %228 = vector.broadcast %cst_83 : f32 to vector<32x1xf32>
    %229 = arith.addf %227, %228 : vector<32x1xf32>
    %230 = math.rsqrt %229 : vector<32x1xf32>
    %231 = vector.broadcast %230 : vector<32x1xf32> to vector<32x32xf32>
    %232 = arith.mulf %222, %231 : vector<32x32xf32>
    %233 = vector.broadcast %28 : vector<1x32xf32> to vector<32x32xf32>
    %234 = arith.mulf %232, %233 : vector<32x32xf32>
    %235 = vector.broadcast %29 : vector<1x32xf32> to vector<32x32xf32>
    %236 = arith.addf %234, %235 : vector<32x32xf32>
    %c0_84 = arith.constant 0 : index
    %c0_85 = arith.constant 0 : index
    %c0_86 = arith.constant 0 : index
    %237 = vector.load %arg9[%c0_84, %c0_85, %c0_86] : memref<2x32x128xf32, #tpu.memory_space<vmem>>, vector<1x32x128xf32>
    %238 = vector.shape_cast %237 : vector<1x32x128xf32> to vector<32x128xf32>
    %cst_87 = arith.constant dense<0.000000e+00> : vector<32x128xf32>
    %239 = tpu.matmul %236, %238, %cst_87 {dimension_numbers = #tpu.dot_dimension_numbers<[1], [0], [0], [1], [0, 0, 1, 1], [], []>} : vector<32x32xf32>, vector<32x128xf32>, vector<32x128xf32> -> vector<32x128xf32>
    %cst_88 = arith.constant 5.000000e-01 : f32
    %240 = vector.broadcast %cst_88 : f32 to vector<32x128xf32>
    %241 = arith.mulf %240, %239 : vector<32x128xf32>
    %cst_89 = arith.constant 0.707106769 : f32
    %242 = vector.broadcast %cst_89 : f32 to vector<32x128xf32>
    %243 = arith.mulf %239, %242 : vector<32x128xf32>
    %cst_90 = arith.constant -4.000000e+00 : f32
    %cst_91 = arith.constant 4.000000e+00 : f32
    %244 = vector.broadcast %cst_90 : f32 to vector<32x128xf32>
    %245 = arith.maximumf %244, %243 : vector<32x128xf32>
    %246 = vector.broadcast %cst_91 : f32 to vector<32x128xf32>
    %247 = arith.minimumf %246, %245 : vector<32x128xf32>
    %248 = arith.mulf %247, %247 : vector<32x128xf32>
    %cst_92 = arith.constant 2.29050653E-4 : f32
    %249 = vector.broadcast %cst_92 : f32 to vector<32x128xf32>
    %250 = arith.mulf %249, %248 : vector<32x128xf32>
    %cst_93 = arith.constant 0.00340829091 : f32
    %251 = vector.broadcast %cst_93 : f32 to vector<32x128xf32>
    %252 = arith.addf %250, %251 : vector<32x128xf32>
    %253 = arith.mulf %252, %248 : vector<32x128xf32>
    %cst_94 = arith.constant 0.0509556942 : f32
    %254 = vector.broadcast %cst_94 : f32 to vector<32x128xf32>
    %255 = arith.addf %253, %254 : vector<32x128xf32>
    %256 = arith.mulf %255, %248 : vector<32x128xf32>
    %cst_95 = arith.constant 0.185208321 : f32
    %257 = vector.broadcast %cst_95 : f32 to vector<32x128xf32>
    %258 = arith.addf %256, %257 : vector<32x128xf32>
    %259 = arith.mulf %258, %248 : vector<32x128xf32>
    %cst_96 = arith.constant 1.12837911 : f32
    %260 = vector.broadcast %cst_96 : f32 to vector<32x128xf32>
    %261 = arith.addf %259, %260 : vector<32x128xf32>
    %cst_97 = arith.constant -1.17916031E-7 : f32
    %262 = vector.broadcast %cst_97 : f32 to vector<32x128xf32>
    %263 = arith.mulf %262, %248 : vector<32x128xf32>
    %cst_98 = arith.constant 2.35479656E-5 : f32
    %264 = vector.broadcast %cst_98 : f32 to vector<32x128xf32>
    %265 = arith.addf %263, %264 : vector<32x128xf32>
    %266 = arith.mulf %265, %248 : vector<32x128xf32>
    %cst_99 = arith.constant 0.00101796258 : f32
    %267 = vector.broadcast %cst_99 : f32 to vector<32x128xf32>
    %268 = arith.addf %266, %267 : vector<32x128xf32>
    %269 = arith.mulf %268, %248 : vector<32x128xf32>
    %cst_100 = arith.constant 0.0140704699 : f32
    %270 = vector.broadcast %cst_100 : f32 to vector<32x128xf32>
    %271 = arith.addf %269, %270 : vector<32x128xf32>
    %272 = arith.mulf %271, %248 : vector<32x128xf32>
    %cst_101 = arith.constant 0.110985048 : f32
    %273 = vector.broadcast %cst_101 : f32 to vector<32x128xf32>
    %274 = arith.addf %272, %273 : vector<32x128xf32>
    %275 = arith.mulf %274, %248 : vector<32x128xf32>
    %cst_102 = arith.constant 0.497469246 : f32
    %276 = vector.broadcast %cst_102 : f32 to vector<32x128xf32>
    %277 = arith.addf %275, %276 : vector<32x128xf32>
    %278 = arith.mulf %277, %248 : vector<32x128xf32>
    %cst_103 = arith.constant 1.000000e+00 : f32
    %279 = vector.broadcast %cst_103 : f32 to vector<32x128xf32>
    %280 = arith.addf %278, %279 : vector<32x128xf32>
    %281 = arith.mulf %247, %261 : vector<32x128xf32>
    %282 = arith.divf %281, %280 : vector<32x128xf32>
    %cst_104 = arith.constant 1.000000e+00 : f32
    %283 = vector.broadcast %cst_104 : f32 to vector<32x128xf32>
    %284 = arith.addf %283, %282 : vector<32x128xf32>
    %285 = arith.mulf %241, %284 : vector<32x128xf32>
    %c0_105 = arith.constant 0 : index
    %c0_106 = arith.constant 0 : index
    %c0_107 = arith.constant 0 : index
    %286 = vector.load %arg10[%c0_105, %c0_106, %c0_107] : memref<2x128x32xf32, #tpu.memory_space<vmem>>, vector<1x128x32xf32>
    %287 = vector.shape_cast %286 : vector<1x128x32xf32> to vector<128x32xf32>
    %cst_108 = arith.constant dense<0.000000e+00> : vector<32x32xf32>
    %288 = tpu.matmul %285, %287, %cst_108 {dimension_numbers = #tpu.dot_dimension_numbers<[1], [0], [0], [1], [0, 0, 1, 1], [], []>} : vector<32x128xf32>, vector<128x32xf32>, vector<32x32xf32> -> vector<32x32xf32>
    %289 = arith.addf %216, %288 : vector<32x32xf32>
    %290 = vector.extract_strided_slice %7 {offsets = [6, 0], sizes = [1, 32], strides = [1, 1]} : vector<14x32xf32> to vector<1x32xf32>
    %291 = vector.extract_strided_slice %7 {offsets = [7, 0], sizes = [1, 32], strides = [1, 1]} : vector<14x32xf32> to vector<1x32xf32>
    %292 = vector.extract_strided_slice %7 {offsets = [8, 0], sizes = [1, 32], strides = [1, 1]} : vector<14x32xf32> to vector<1x32xf32>
    %293 = vector.extract_strided_slice %7 {offsets = [9, 0], sizes = [1, 32], strides = [1, 1]} : vector<14x32xf32> to vector<1x32xf32>
    %294 = vector.extract_strided_slice %7 {offsets = [10, 0], sizes = [1, 32], strides = [1, 1]} : vector<14x32xf32> to vector<1x32xf32>
    %295 = vector.extract_strided_slice %7 {offsets = [11, 0], sizes = [1, 32], strides = [1, 1]} : vector<14x32xf32> to vector<1x32xf32>
    %296 = vector.broadcast %290 : vector<1x32xf32> to vector<128x32xf32>
    %297 = arith.mulf %23, %296 : vector<128x32xf32>
    %298 = vector.broadcast %291 : vector<1x32xf32> to vector<128x32xf32>
    %299 = arith.addf %297, %298 : vector<128x32xf32>
    %cst_109 = arith.constant dense<0.000000e+00> : vector<32xf32>
    %300 = vector.multi_reduction <add>, %289, %cst_109 [1] : vector<32x32xf32> to vector<32xf32>
    %301 = vector.shape_cast %300 : vector<32xf32> to vector<32x1xf32>
    %cst_110 = arith.constant 3.200000e+01 : f32
    %302 = vector.broadcast %cst_110 : f32 to vector<32x1xf32>
    %303 = arith.divf %301, %302 : vector<32x1xf32>
    %304 = vector.broadcast %303 : vector<32x1xf32> to vector<32x32xf32>
    %305 = arith.subf %289, %304 : vector<32x32xf32>
    %306 = arith.mulf %305, %305 : vector<32x32xf32>
    %cst_111 = arith.constant dense<0.000000e+00> : vector<32xf32>
    %307 = vector.multi_reduction <add>, %306, %cst_111 [1] : vector<32x32xf32> to vector<32xf32>
    %308 = vector.shape_cast %307 : vector<32xf32> to vector<32x1xf32>
    %cst_112 = arith.constant 3.200000e+01 : f32
    %309 = vector.broadcast %cst_112 : f32 to vector<32x1xf32>
    %310 = arith.divf %308, %309 : vector<32x1xf32>
    %cst_113 = arith.constant 9.99999974E-6 : f32
    %311 = vector.broadcast %cst_113 : f32 to vector<32x1xf32>
    %312 = arith.addf %310, %311 : vector<32x1xf32>
    %313 = math.rsqrt %312 : vector<32x1xf32>
    %314 = vector.broadcast %313 : vector<32x1xf32> to vector<32x32xf32>
    %315 = arith.mulf %305, %314 : vector<32x32xf32>
    %316 = vector.broadcast %292 : vector<1x32xf32> to vector<32x32xf32>
    %317 = arith.mulf %315, %316 : vector<32x32xf32>
    %318 = vector.broadcast %293 : vector<1x32xf32> to vector<32x32xf32>
    %319 = arith.addf %317, %318 : vector<32x32xf32>
    %c1_114 = arith.constant 1 : index
    %c0_115 = arith.constant 0 : index
    %c0_116 = arith.constant 0 : index
    %320 = vector.load %arg6[%c1_114, %c0_115, %c0_116] : memref<2x32x128xf32, #tpu.memory_space<vmem>>, vector<1x32x128xf32>
    %321 = vector.shape_cast %320 : vector<1x32x128xf32> to vector<32x128xf32>
    %cst_117 = arith.constant dense<0.000000e+00> : vector<128x128xf32>
    %322 = tpu.matmul %299, %321, %cst_117 {dimension_numbers = #tpu.dot_dimension_numbers<[1], [0], [0], [1], [0, 0, 1, 1], [], []>} : vector<128x32xf32>, vector<32x128xf32>, vector<128x128xf32> -> vector<128x128xf32>
    %c1_118 = arith.constant 1 : index
    %c0_119 = arith.constant 0 : index
    %c0_120 = arith.constant 0 : index
    %323 = vector.load %arg7[%c1_118, %c0_119, %c0_120] : memref<2x32x128xf32, #tpu.memory_space<vmem>>, vector<1x32x128xf32>
    %324 = vector.shape_cast %323 : vector<1x32x128xf32> to vector<32x128xf32>
    %cst_121 = arith.constant dense<0.000000e+00> : vector<128x128xf32>
    %325 = tpu.matmul %299, %324, %cst_121 {dimension_numbers = #tpu.dot_dimension_numbers<[1], [0], [0], [1], [0, 0, 1, 1], [], []>} : vector<128x32xf32>, vector<32x128xf32>, vector<128x128xf32> -> vector<128x128xf32>
    %c1_122 = arith.constant 1 : index
    %c0_123 = arith.constant 0 : index
    %c0_124 = arith.constant 0 : index
    %326 = vector.load %arg6[%c1_122, %c0_123, %c0_124] : memref<2x32x128xf32, #tpu.memory_space<vmem>>, vector<1x32x128xf32>
    %327 = vector.shape_cast %326 : vector<1x32x128xf32> to vector<32x128xf32>
    %cst_125 = arith.constant dense<0.000000e+00> : vector<32x128xf32>
    %328 = tpu.matmul %319, %327, %cst_125 {dimension_numbers = #tpu.dot_dimension_numbers<[1], [0], [0], [1], [0, 0, 1, 1], [], []>} : vector<32x32xf32>, vector<32x128xf32>, vector<32x128xf32> -> vector<32x128xf32>
    %c1_126 = arith.constant 1 : index
    %c0_127 = arith.constant 0 : index
    %c0_128 = arith.constant 0 : index
    %329 = vector.load %arg5[%c1_126, %c0_127, %c0_128] : memref<2x32x64xf32, #tpu.memory_space<vmem>>, vector<1x32x64xf32>
    %330 = vector.shape_cast %329 : vector<1x32x64xf32> to vector<32x64xf32>
    %cst_129 = arith.constant dense<0.000000e+00> : vector<32x64xf32>
    %331 = tpu.matmul %319, %330, %cst_129 {dimension_numbers = #tpu.dot_dimension_numbers<[1], [0], [0], [1], [0, 0, 1, 1], [], []>} : vector<32x32xf32>, vector<32x64xf32>, vector<32x64xf32> -> vector<32x64xf32>
    %332 = vector.extract_strided_slice %322 {offsets = [0, 0], sizes = [64, 128], strides = [1, 1]} : vector<128x128xf32> to vector<64x128xf32>
    %333 = arith.mulf %332, %4 : vector<64x128xf32>
    %334 = vector.extract_strided_slice %325 {offsets = [0, 0], sizes = [64, 128], strides = [1, 1]} : vector<128x128xf32> to vector<64x128xf32>
    %335 = arith.mulf %334, %6 : vector<64x128xf32>
    %336 = arith.addf %333, %335 : vector<64x128xf32>
    %337 = vector.extract_strided_slice %328 {offsets = [0, 0], sizes = [16, 128], strides = [1, 1]} : vector<32x128xf32> to vector<16x128xf32>
    %338 = tpu.concatenate %336, %337 in 0 : vector<64x128xf32>, vector<16x128xf32> -> vector<80x128xf32>
    %339 = vector.extract_strided_slice %331 {offsets = [0, 0], sizes = [16, 64], strides = [1, 1]} : vector<32x64xf32> to vector<16x64xf32>
    %340 = vector.extract_strided_slice %339 {offsets = [0, 0], sizes = [16, 16], strides = [1, 1]} : vector<16x64xf32> to vector<16x16xf32>
    %341 = vector.extract_strided_slice %338 {offsets = [0, 0], sizes = [80, 16], strides = [1, 1]} : vector<80x128xf32> to vector<80x16xf32>
    %342 = vector.extract_strided_slice %338 {offsets = [0, 64], sizes = [80, 16], strides = [1, 1]} : vector<80x128xf32> to vector<80x16xf32>
    %cst_130 = arith.constant dense<0.000000e+00> : vector<16x80xf32>
    %343 = tpu.matmul %340, %341, %cst_130 {dimension_numbers = #tpu.dot_dimension_numbers<[1], [1], [0], [0], [0, 0, 1, 0], [], []>} : vector<16x16xf32>, vector<80x16xf32>, vector<16x80xf32> -> vector<16x80xf32>
    %cst_131 = arith.constant dense<0xFF800000> : vector<16xf32>
    %344 = vector.multi_reduction <maximumf>, %343, %cst_131 [1] : vector<16x80xf32> to vector<16xf32>
    %345 = vector.shape_cast %344 : vector<16xf32> to vector<16x1xf32>
    %346 = vector.broadcast %345 : vector<16x1xf32> to vector<16x80xf32>
    %347 = arith.subf %343, %346 : vector<16x80xf32>
    %348 = math.exp %347 : vector<16x80xf32>
    %cst_132 = arith.constant dense<0.000000e+00> : vector<16xf32>
    %349 = vector.multi_reduction <add>, %348, %cst_132 [1] : vector<16x80xf32> to vector<16xf32>
    %350 = vector.shape_cast %349 : vector<16xf32> to vector<16x1xf32>
    %cst_133 = arith.constant 1.000000e+00 : f32
    %351 = vector.broadcast %cst_133 : f32 to vector<16x1xf32>
    %352 = arith.divf %351, %350 : vector<16x1xf32>
    %353 = vector.broadcast %352 : vector<16x1xf32> to vector<16x80xf32>
    %354 = arith.mulf %348, %353 : vector<16x80xf32>
    %cst_134 = arith.constant dense<0.000000e+00> : vector<16x16xf32>
    %355 = tpu.matmul %354, %342, %cst_134 {dimension_numbers = #tpu.dot_dimension_numbers<[1], [0], [0], [1], [0, 0, 1, 1], [], []>} : vector<16x80xf32>, vector<80x16xf32>, vector<16x16xf32> -> vector<16x16xf32>
    %356 = vector.extract_strided_slice %339 {offsets = [0, 16], sizes = [16, 16], strides = [1, 1]} : vector<16x64xf32> to vector<16x16xf32>
    %357 = vector.extract_strided_slice %338 {offsets = [0, 16], sizes = [80, 16], strides = [1, 1]} : vector<80x128xf32> to vector<80x16xf32>
    %358 = vector.extract_strided_slice %338 {offsets = [0, 80], sizes = [80, 16], strides = [1, 1]} : vector<80x128xf32> to vector<80x16xf32>
    %cst_135 = arith.constant dense<0.000000e+00> : vector<16x80xf32>
    %359 = tpu.matmul %356, %357, %cst_135 {dimension_numbers = #tpu.dot_dimension_numbers<[1], [1], [0], [0], [0, 0, 1, 0], [], []>} : vector<16x16xf32>, vector<80x16xf32>, vector<16x80xf32> -> vector<16x80xf32>
    %cst_136 = arith.constant dense<0xFF800000> : vector<16xf32>
    %360 = vector.multi_reduction <maximumf>, %359, %cst_136 [1] : vector<16x80xf32> to vector<16xf32>
    %361 = vector.shape_cast %360 : vector<16xf32> to vector<16x1xf32>
    %362 = vector.broadcast %361 : vector<16x1xf32> to vector<16x80xf32>
    %363 = arith.subf %359, %362 : vector<16x80xf32>
    %364 = math.exp %363 : vector<16x80xf32>
    %cst_137 = arith.constant dense<0.000000e+00> : vector<16xf32>
    %365 = vector.multi_reduction <add>, %364, %cst_137 [1] : vector<16x80xf32> to vector<16xf32>
    %366 = vector.shape_cast %365 : vector<16xf32> to vector<16x1xf32>
    %cst_138 = arith.constant 1.000000e+00 : f32
    %367 = vector.broadcast %cst_138 : f32 to vector<16x1xf32>
    %368 = arith.divf %367, %366 : vector<16x1xf32>
    %369 = vector.broadcast %368 : vector<16x1xf32> to vector<16x80xf32>
    %370 = arith.mulf %364, %369 : vector<16x80xf32>
    %cst_139 = arith.constant dense<0.000000e+00> : vector<16x16xf32>
    %371 = tpu.matmul %370, %358, %cst_139 {dimension_numbers = #tpu.dot_dimension_numbers<[1], [0], [0], [1], [0, 0, 1, 1], [], []>} : vector<16x80xf32>, vector<80x16xf32>, vector<16x16xf32> -> vector<16x16xf32>
    %372 = vector.extract_strided_slice %339 {offsets = [0, 32], sizes = [16, 16], strides = [1, 1]} : vector<16x64xf32> to vector<16x16xf32>
    %373 = vector.extract_strided_slice %338 {offsets = [0, 32], sizes = [80, 16], strides = [1, 1]} : vector<80x128xf32> to vector<80x16xf32>
    %374 = vector.extract_strided_slice %338 {offsets = [0, 96], sizes = [80, 16], strides = [1, 1]} : vector<80x128xf32> to vector<80x16xf32>
    %cst_140 = arith.constant dense<0.000000e+00> : vector<16x80xf32>
    %375 = tpu.matmul %372, %373, %cst_140 {dimension_numbers = #tpu.dot_dimension_numbers<[1], [1], [0], [0], [0, 0, 1, 0], [], []>} : vector<16x16xf32>, vector<80x16xf32>, vector<16x80xf32> -> vector<16x80xf32>
    %cst_141 = arith.constant dense<0xFF800000> : vector<16xf32>
    %376 = vector.multi_reduction <maximumf>, %375, %cst_141 [1] : vector<16x80xf32> to vector<16xf32>
    %377 = vector.shape_cast %376 : vector<16xf32> to vector<16x1xf32>
    %378 = vector.broadcast %377 : vector<16x1xf32> to vector<16x80xf32>
    %379 = arith.subf %375, %378 : vector<16x80xf32>
    %380 = math.exp %379 : vector<16x80xf32>
    %cst_142 = arith.constant dense<0.000000e+00> : vector<16xf32>
    %381 = vector.multi_reduction <add>, %380, %cst_142 [1] : vector<16x80xf32> to vector<16xf32>
    %382 = vector.shape_cast %381 : vector<16xf32> to vector<16x1xf32>
    %cst_143 = arith.constant 1.000000e+00 : f32
    %383 = vector.broadcast %cst_143 : f32 to vector<16x1xf32>
    %384 = arith.divf %383, %382 : vector<16x1xf32>
    %385 = vector.broadcast %384 : vector<16x1xf32> to vector<16x80xf32>
    %386 = arith.mulf %380, %385 : vector<16x80xf32>
    %cst_144 = arith.constant dense<0.000000e+00> : vector<16x16xf32>
    %387 = tpu.matmul %386, %374, %cst_144 {dimension_numbers = #tpu.dot_dimension_numbers<[1], [0], [0], [1], [0, 0, 1, 1], [], []>} : vector<16x80xf32>, vector<80x16xf32>, vector<16x16xf32> -> vector<16x16xf32>
    %388 = vector.extract_strided_slice %339 {offsets = [0, 48], sizes = [16, 16], strides = [1, 1]} : vector<16x64xf32> to vector<16x16xf32>
    %389 = vector.extract_strided_slice %338 {offsets = [0, 48], sizes = [80, 16], strides = [1, 1]} : vector<80x128xf32> to vector<80x16xf32>
    %390 = vector.extract_strided_slice %338 {offsets = [0, 112], sizes = [80, 16], strides = [1, 1]} : vector<80x128xf32> to vector<80x16xf32>
    %cst_145 = arith.constant dense<0.000000e+00> : vector<16x80xf32>
    %391 = tpu.matmul %388, %389, %cst_145 {dimension_numbers = #tpu.dot_dimension_numbers<[1], [1], [0], [0], [0, 0, 1, 0], [], []>} : vector<16x16xf32>, vector<80x16xf32>, vector<16x80xf32> -> vector<16x80xf32>
    %cst_146 = arith.constant dense<0xFF800000> : vector<16xf32>
    %392 = vector.multi_reduction <maximumf>, %391, %cst_146 [1] : vector<16x80xf32> to vector<16xf32>
    %393 = vector.shape_cast %392 : vector<16xf32> to vector<16x1xf32>
    %394 = vector.broadcast %393 : vector<16x1xf32> to vector<16x80xf32>
    %395 = arith.subf %391, %394 : vector<16x80xf32>
    %396 = math.exp %395 : vector<16x80xf32>
    %cst_147 = arith.constant dense<0.000000e+00> : vector<16xf32>
    %397 = vector.multi_reduction <add>, %396, %cst_147 [1] : vector<16x80xf32> to vector<16xf32>
    %398 = vector.shape_cast %397 : vector<16xf32> to vector<16x1xf32>
    %cst_148 = arith.constant 1.000000e+00 : f32
    %399 = vector.broadcast %cst_148 : f32 to vector<16x1xf32>
    %400 = arith.divf %399, %398 : vector<16x1xf32>
    %401 = vector.broadcast %400 : vector<16x1xf32> to vector<16x80xf32>
    %402 = arith.mulf %396, %401 : vector<16x80xf32>
    %cst_149 = arith.constant dense<0.000000e+00> : vector<16x16xf32>
    %403 = tpu.matmul %402, %390, %cst_149 {dimension_numbers = #tpu.dot_dimension_numbers<[1], [0], [0], [1], [0, 0, 1, 1], [], []>} : vector<16x80xf32>, vector<80x16xf32>, vector<16x16xf32> -> vector<16x16xf32>
    %404 = tpu.concatenate %355, %371, %387, %403 in 1 : vector<16x16xf32>, vector<16x16xf32>, vector<16x16xf32>, vector<16x16xf32> -> vector<16x64xf32>
    %405 = vector.extract_strided_slice %322 {offsets = [64, 0], sizes = [64, 128], strides = [1, 1]} : vector<128x128xf32> to vector<64x128xf32>
    %406 = arith.mulf %405, %4 : vector<64x128xf32>
    %407 = vector.extract_strided_slice %325 {offsets = [64, 0], sizes = [64, 128], strides = [1, 1]} : vector<128x128xf32> to vector<64x128xf32>
    %408 = arith.mulf %407, %6 : vector<64x128xf32>
    %409 = arith.addf %406, %408 : vector<64x128xf32>
    %410 = vector.extract_strided_slice %328 {offsets = [16, 0], sizes = [16, 128], strides = [1, 1]} : vector<32x128xf32> to vector<16x128xf32>
    %411 = tpu.concatenate %409, %410 in 0 : vector<64x128xf32>, vector<16x128xf32> -> vector<80x128xf32>
    %412 = vector.extract_strided_slice %331 {offsets = [16, 0], sizes = [16, 64], strides = [1, 1]} : vector<32x64xf32> to vector<16x64xf32>
    %413 = vector.extract_strided_slice %412 {offsets = [0, 0], sizes = [16, 16], strides = [1, 1]} : vector<16x64xf32> to vector<16x16xf32>
    %414 = vector.extract_strided_slice %411 {offsets = [0, 0], sizes = [80, 16], strides = [1, 1]} : vector<80x128xf32> to vector<80x16xf32>
    %415 = vector.extract_strided_slice %411 {offsets = [0, 64], sizes = [80, 16], strides = [1, 1]} : vector<80x128xf32> to vector<80x16xf32>
    %cst_150 = arith.constant dense<0.000000e+00> : vector<16x80xf32>
    %416 = tpu.matmul %413, %414, %cst_150 {dimension_numbers = #tpu.dot_dimension_numbers<[1], [1], [0], [0], [0, 0, 1, 0], [], []>} : vector<16x16xf32>, vector<80x16xf32>, vector<16x80xf32> -> vector<16x80xf32>
    %cst_151 = arith.constant dense<0xFF800000> : vector<16xf32>
    %417 = vector.multi_reduction <maximumf>, %416, %cst_151 [1] : vector<16x80xf32> to vector<16xf32>
    %418 = vector.shape_cast %417 : vector<16xf32> to vector<16x1xf32>
    %419 = vector.broadcast %418 : vector<16x1xf32> to vector<16x80xf32>
    %420 = arith.subf %416, %419 : vector<16x80xf32>
    %421 = math.exp %420 : vector<16x80xf32>
    %cst_152 = arith.constant dense<0.000000e+00> : vector<16xf32>
    %422 = vector.multi_reduction <add>, %421, %cst_152 [1] : vector<16x80xf32> to vector<16xf32>
    %423 = vector.shape_cast %422 : vector<16xf32> to vector<16x1xf32>
    %cst_153 = arith.constant 1.000000e+00 : f32
    %424 = vector.broadcast %cst_153 : f32 to vector<16x1xf32>
    %425 = arith.divf %424, %423 : vector<16x1xf32>
    %426 = vector.broadcast %425 : vector<16x1xf32> to vector<16x80xf32>
    %427 = arith.mulf %421, %426 : vector<16x80xf32>
    %cst_154 = arith.constant dense<0.000000e+00> : vector<16x16xf32>
    %428 = tpu.matmul %427, %415, %cst_154 {dimension_numbers = #tpu.dot_dimension_numbers<[1], [0], [0], [1], [0, 0, 1, 1], [], []>} : vector<16x80xf32>, vector<80x16xf32>, vector<16x16xf32> -> vector<16x16xf32>
    %429 = vector.extract_strided_slice %412 {offsets = [0, 16], sizes = [16, 16], strides = [1, 1]} : vector<16x64xf32> to vector<16x16xf32>
    %430 = vector.extract_strided_slice %411 {offsets = [0, 16], sizes = [80, 16], strides = [1, 1]} : vector<80x128xf32> to vector<80x16xf32>
    %431 = vector.extract_strided_slice %411 {offsets = [0, 80], sizes = [80, 16], strides = [1, 1]} : vector<80x128xf32> to vector<80x16xf32>
    %cst_155 = arith.constant dense<0.000000e+00> : vector<16x80xf32>
    %432 = tpu.matmul %429, %430, %cst_155 {dimension_numbers = #tpu.dot_dimension_numbers<[1], [1], [0], [0], [0, 0, 1, 0], [], []>} : vector<16x16xf32>, vector<80x16xf32>, vector<16x80xf32> -> vector<16x80xf32>
    %cst_156 = arith.constant dense<0xFF800000> : vector<16xf32>
    %433 = vector.multi_reduction <maximumf>, %432, %cst_156 [1] : vector<16x80xf32> to vector<16xf32>
    %434 = vector.shape_cast %433 : vector<16xf32> to vector<16x1xf32>
    %435 = vector.broadcast %434 : vector<16x1xf32> to vector<16x80xf32>
    %436 = arith.subf %432, %435 : vector<16x80xf32>
    %437 = math.exp %436 : vector<16x80xf32>
    %cst_157 = arith.constant dense<0.000000e+00> : vector<16xf32>
    %438 = vector.multi_reduction <add>, %437, %cst_157 [1] : vector<16x80xf32> to vector<16xf32>
    %439 = vector.shape_cast %438 : vector<16xf32> to vector<16x1xf32>
    %cst_158 = arith.constant 1.000000e+00 : f32
    %440 = vector.broadcast %cst_158 : f32 to vector<16x1xf32>
    %441 = arith.divf %440, %439 : vector<16x1xf32>
    %442 = vector.broadcast %441 : vector<16x1xf32> to vector<16x80xf32>
    %443 = arith.mulf %437, %442 : vector<16x80xf32>
    %cst_159 = arith.constant dense<0.000000e+00> : vector<16x16xf32>
    %444 = tpu.matmul %443, %431, %cst_159 {dimension_numbers = #tpu.dot_dimension_numbers<[1], [0], [0], [1], [0, 0, 1, 1], [], []>} : vector<16x80xf32>, vector<80x16xf32>, vector<16x16xf32> -> vector<16x16xf32>
    %445 = vector.extract_strided_slice %412 {offsets = [0, 32], sizes = [16, 16], strides = [1, 1]} : vector<16x64xf32> to vector<16x16xf32>
    %446 = vector.extract_strided_slice %411 {offsets = [0, 32], sizes = [80, 16], strides = [1, 1]} : vector<80x128xf32> to vector<80x16xf32>
    %447 = vector.extract_strided_slice %411 {offsets = [0, 96], sizes = [80, 16], strides = [1, 1]} : vector<80x128xf32> to vector<80x16xf32>
    %cst_160 = arith.constant dense<0.000000e+00> : vector<16x80xf32>
    %448 = tpu.matmul %445, %446, %cst_160 {dimension_numbers = #tpu.dot_dimension_numbers<[1], [1], [0], [0], [0, 0, 1, 0], [], []>} : vector<16x16xf32>, vector<80x16xf32>, vector<16x80xf32> -> vector<16x80xf32>
    %cst_161 = arith.constant dense<0xFF800000> : vector<16xf32>
    %449 = vector.multi_reduction <maximumf>, %448, %cst_161 [1] : vector<16x80xf32> to vector<16xf32>
    %450 = vector.shape_cast %449 : vector<16xf32> to vector<16x1xf32>
    %451 = vector.broadcast %450 : vector<16x1xf32> to vector<16x80xf32>
    %452 = arith.subf %448, %451 : vector<16x80xf32>
    %453 = math.exp %452 : vector<16x80xf32>
    %cst_162 = arith.constant dense<0.000000e+00> : vector<16xf32>
    %454 = vector.multi_reduction <add>, %453, %cst_162 [1] : vector<16x80xf32> to vector<16xf32>
    %455 = vector.shape_cast %454 : vector<16xf32> to vector<16x1xf32>
    %cst_163 = arith.constant 1.000000e+00 : f32
    %456 = vector.broadcast %cst_163 : f32 to vector<16x1xf32>
    %457 = arith.divf %456, %455 : vector<16x1xf32>
    %458 = vector.broadcast %457 : vector<16x1xf32> to vector<16x80xf32>
    %459 = arith.mulf %453, %458 : vector<16x80xf32>
    %cst_164 = arith.constant dense<0.000000e+00> : vector<16x16xf32>
    %460 = tpu.matmul %459, %447, %cst_164 {dimension_numbers = #tpu.dot_dimension_numbers<[1], [0], [0], [1], [0, 0, 1, 1], [], []>} : vector<16x80xf32>, vector<80x16xf32>, vector<16x16xf32> -> vector<16x16xf32>
    %461 = vector.extract_strided_slice %412 {offsets = [0, 48], sizes = [16, 16], strides = [1, 1]} : vector<16x64xf32> to vector<16x16xf32>
    %462 = vector.extract_strided_slice %411 {offsets = [0, 48], sizes = [80, 16], strides = [1, 1]} : vector<80x128xf32> to vector<80x16xf32>
    %463 = vector.extract_strided_slice %411 {offsets = [0, 112], sizes = [80, 16], strides = [1, 1]} : vector<80x128xf32> to vector<80x16xf32>
    %cst_165 = arith.constant dense<0.000000e+00> : vector<16x80xf32>
    %464 = tpu.matmul %461, %462, %cst_165 {dimension_numbers = #tpu.dot_dimension_numbers<[1], [1], [0], [0], [0, 0, 1, 0], [], []>} : vector<16x16xf32>, vector<80x16xf32>, vector<16x80xf32> -> vector<16x80xf32>
    %cst_166 = arith.constant dense<0xFF800000> : vector<16xf32>
    %465 = vector.multi_reduction <maximumf>, %464, %cst_166 [1] : vector<16x80xf32> to vector<16xf32>
    %466 = vector.shape_cast %465 : vector<16xf32> to vector<16x1xf32>
    %467 = vector.broadcast %466 : vector<16x1xf32> to vector<16x80xf32>
    %468 = arith.subf %464, %467 : vector<16x80xf32>
    %469 = math.exp %468 : vector<16x80xf32>
    %cst_167 = arith.constant dense<0.000000e+00> : vector<16xf32>
    %470 = vector.multi_reduction <add>, %469, %cst_167 [1] : vector<16x80xf32> to vector<16xf32>
    %471 = vector.shape_cast %470 : vector<16xf32> to vector<16x1xf32>
    %cst_168 = arith.constant 1.000000e+00 : f32
    %472 = vector.broadcast %cst_168 : f32 to vector<16x1xf32>
    %473 = arith.divf %472, %471 : vector<16x1xf32>
    %474 = vector.broadcast %473 : vector<16x1xf32> to vector<16x80xf32>
    %475 = arith.mulf %469, %474 : vector<16x80xf32>
    %cst_169 = arith.constant dense<0.000000e+00> : vector<16x16xf32>
    %476 = tpu.matmul %475, %463, %cst_169 {dimension_numbers = #tpu.dot_dimension_numbers<[1], [0], [0], [1], [0, 0, 1, 1], [], []>} : vector<16x80xf32>, vector<80x16xf32>, vector<16x16xf32> -> vector<16x16xf32>
    %477 = tpu.concatenate %428, %444, %460, %476 in 1 : vector<16x16xf32>, vector<16x16xf32>, vector<16x16xf32>, vector<16x16xf32> -> vector<16x64xf32>
    %478 = tpu.concatenate %404, %477 in 0 : vector<16x64xf32>, vector<16x64xf32> -> vector<32x64xf32>
    %c1_170 = arith.constant 1 : index
    %c0_171 = arith.constant 0 : index
    %c0_172 = arith.constant 0 : index
    %479 = vector.load %arg8[%c1_170, %c0_171, %c0_172] : memref<2x64x32xf32, #tpu.memory_space<vmem>>, vector<1x64x32xf32>
    %480 = vector.shape_cast %479 : vector<1x64x32xf32> to vector<64x32xf32>
    %cst_173 = arith.constant dense<0.000000e+00> : vector<32x32xf32>
    %481 = tpu.matmul %478, %480, %cst_173 {dimension_numbers = #tpu.dot_dimension_numbers<[1], [0], [0], [1], [0, 0, 1, 1], [], []>} : vector<32x64xf32>, vector<64x32xf32>, vector<32x32xf32> -> vector<32x32xf32>
    %482 = arith.addf %289, %481 : vector<32x32xf32>
    %cst_174 = arith.constant dense<0.000000e+00> : vector<32xf32>
    %483 = vector.multi_reduction <add>, %482, %cst_174 [1] : vector<32x32xf32> to vector<32xf32>
    %484 = vector.shape_cast %483 : vector<32xf32> to vector<32x1xf32>
    %cst_175 = arith.constant 3.200000e+01 : f32
    %485 = vector.broadcast %cst_175 : f32 to vector<32x1xf32>
    %486 = arith.divf %484, %485 : vector<32x1xf32>
    %487 = vector.broadcast %486 : vector<32x1xf32> to vector<32x32xf32>
    %488 = arith.subf %482, %487 : vector<32x32xf32>
    %489 = arith.mulf %488, %488 : vector<32x32xf32>
    %cst_176 = arith.constant dense<0.000000e+00> : vector<32xf32>
    %490 = vector.multi_reduction <add>, %489, %cst_176 [1] : vector<32x32xf32> to vector<32xf32>
    %491 = vector.shape_cast %490 : vector<32xf32> to vector<32x1xf32>
    %cst_177 = arith.constant 3.200000e+01 : f32
    %492 = vector.broadcast %cst_177 : f32 to vector<32x1xf32>
    %493 = arith.divf %491, %492 : vector<32x1xf32>
    %cst_178 = arith.constant 9.99999974E-6 : f32
    %494 = vector.broadcast %cst_178 : f32 to vector<32x1xf32>
    %495 = arith.addf %493, %494 : vector<32x1xf32>
    %496 = math.rsqrt %495 : vector<32x1xf32>
    %497 = vector.broadcast %496 : vector<32x1xf32> to vector<32x32xf32>
    %498 = arith.mulf %488, %497 : vector<32x32xf32>
    %499 = vector.broadcast %294 : vector<1x32xf32> to vector<32x32xf32>
    %500 = arith.mulf %498, %499 : vector<32x32xf32>
    %501 = vector.broadcast %295 : vector<1x32xf32> to vector<32x32xf32>
    %502 = arith.addf %500, %501 : vector<32x32xf32>
    %c1_179 = arith.constant 1 : index
    %c0_180 = arith.constant 0 : index
    %c0_181 = arith.constant 0 : index
    %503 = vector.load %arg9[%c1_179, %c0_180, %c0_181] : memref<2x32x128xf32, #tpu.memory_space<vmem>>, vector<1x32x128xf32>
    %504 = vector.shape_cast %503 : vector<1x32x128xf32> to vector<32x128xf32>
    %cst_182 = arith.constant dense<0.000000e+00> : vector<32x128xf32>
    %505 = tpu.matmul %502, %504, %cst_182 {dimension_numbers = #tpu.dot_dimension_numbers<[1], [0], [0], [1], [0, 0, 1, 1], [], []>} : vector<32x32xf32>, vector<32x128xf32>, vector<32x128xf32> -> vector<32x128xf32>
    %cst_183 = arith.constant 5.000000e-01 : f32
    %506 = vector.broadcast %cst_183 : f32 to vector<32x128xf32>
    %507 = arith.mulf %506, %505 : vector<32x128xf32>
    %cst_184 = arith.constant 0.707106769 : f32
    %508 = vector.broadcast %cst_184 : f32 to vector<32x128xf32>
    %509 = arith.mulf %505, %508 : vector<32x128xf32>
    %cst_185 = arith.constant -4.000000e+00 : f32
    %cst_186 = arith.constant 4.000000e+00 : f32
    %510 = vector.broadcast %cst_185 : f32 to vector<32x128xf32>
    %511 = arith.maximumf %510, %509 : vector<32x128xf32>
    %512 = vector.broadcast %cst_186 : f32 to vector<32x128xf32>
    %513 = arith.minimumf %512, %511 : vector<32x128xf32>
    %514 = arith.mulf %513, %513 : vector<32x128xf32>
    %cst_187 = arith.constant 2.29050653E-4 : f32
    %515 = vector.broadcast %cst_187 : f32 to vector<32x128xf32>
    %516 = arith.mulf %515, %514 : vector<32x128xf32>
    %cst_188 = arith.constant 0.00340829091 : f32
    %517 = vector.broadcast %cst_188 : f32 to vector<32x128xf32>
    %518 = arith.addf %516, %517 : vector<32x128xf32>
    %519 = arith.mulf %518, %514 : vector<32x128xf32>
    %cst_189 = arith.constant 0.0509556942 : f32
    %520 = vector.broadcast %cst_189 : f32 to vector<32x128xf32>
    %521 = arith.addf %519, %520 : vector<32x128xf32>
    %522 = arith.mulf %521, %514 : vector<32x128xf32>
    %cst_190 = arith.constant 0.185208321 : f32
    %523 = vector.broadcast %cst_190 : f32 to vector<32x128xf32>
    %524 = arith.addf %522, %523 : vector<32x128xf32>
    %525 = arith.mulf %524, %514 : vector<32x128xf32>
    %cst_191 = arith.constant 1.12837911 : f32
    %526 = vector.broadcast %cst_191 : f32 to vector<32x128xf32>
    %527 = arith.addf %525, %526 : vector<32x128xf32>
    %cst_192 = arith.constant -1.17916031E-7 : f32
    %528 = vector.broadcast %cst_192 : f32 to vector<32x128xf32>
    %529 = arith.mulf %528, %514 : vector<32x128xf32>
    %cst_193 = arith.constant 2.35479656E-5 : f32
    %530 = vector.broadcast %cst_193 : f32 to vector<32x128xf32>
    %531 = arith.addf %529, %530 : vector<32x128xf32>
    %532 = arith.mulf %531, %514 : vector<32x128xf32>
    %cst_194 = arith.constant 0.00101796258 : f32
    %533 = vector.broadcast %cst_194 : f32 to vector<32x128xf32>
    %534 = arith.addf %532, %533 : vector<32x128xf32>
    %535 = arith.mulf %534, %514 : vector<32x128xf32>
    %cst_195 = arith.constant 0.0140704699 : f32
    %536 = vector.broadcast %cst_195 : f32 to vector<32x128xf32>
    %537 = arith.addf %535, %536 : vector<32x128xf32>
    %538 = arith.mulf %537, %514 : vector<32x128xf32>
    %cst_196 = arith.constant 0.110985048 : f32
    %539 = vector.broadcast %cst_196 : f32 to vector<32x128xf32>
    %540 = arith.addf %538, %539 : vector<32x128xf32>
    %541 = arith.mulf %540, %514 : vector<32x128xf32>
    %cst_197 = arith.constant 0.497469246 : f32
    %542 = vector.broadcast %cst_197 : f32 to vector<32x128xf32>
    %543 = arith.addf %541, %542 : vector<32x128xf32>
    %544 = arith.mulf %543, %514 : vector<32x128xf32>
    %cst_198 = arith.constant 1.000000e+00 : f32
    %545 = vector.broadcast %cst_198 : f32 to vector<32x128xf32>
    %546 = arith.addf %544, %545 : vector<32x128xf32>
    %547 = arith.mulf %513, %527 : vector<32x128xf32>
    %548 = arith.divf %547, %546 : vector<32x128xf32>
    %cst_199 = arith.constant 1.000000e+00 : f32
    %549 = vector.broadcast %cst_199 : f32 to vector<32x128xf32>
    %550 = arith.addf %549, %548 : vector<32x128xf32>
    %551 = arith.mulf %507, %550 : vector<32x128xf32>
    %c1_200 = arith.constant 1 : index
    %c0_201 = arith.constant 0 : index
    %c0_202 = arith.constant 0 : index
    %552 = vector.load %arg10[%c1_200, %c0_201, %c0_202] : memref<2x128x32xf32, #tpu.memory_space<vmem>>, vector<1x128x32xf32>
    %553 = vector.shape_cast %552 : vector<1x128x32xf32> to vector<128x32xf32>
    %cst_203 = arith.constant dense<0.000000e+00> : vector<32x32xf32>
    %554 = tpu.matmul %551, %553, %cst_203 {dimension_numbers = #tpu.dot_dimension_numbers<[1], [0], [0], [1], [0, 0, 1, 1], [], []>} : vector<32x128xf32>, vector<128x32xf32>, vector<32x32xf32> -> vector<32x32xf32>
    %555 = arith.addf %482, %554 : vector<32x32xf32>
    %556 = vector.extract_strided_slice %7 {offsets = [12, 0], sizes = [1, 32], strides = [1, 1]} : vector<14x32xf32> to vector<1x32xf32>
    %557 = vector.extract_strided_slice %7 {offsets = [13, 0], sizes = [1, 32], strides = [1, 1]} : vector<14x32xf32> to vector<1x32xf32>
    %cst_204 = arith.constant dense<0.000000e+00> : vector<32xf32>
    %558 = vector.multi_reduction <add>, %555, %cst_204 [1] : vector<32x32xf32> to vector<32xf32>
    %559 = vector.shape_cast %558 : vector<32xf32> to vector<32x1xf32>
    %cst_205 = arith.constant 3.200000e+01 : f32
    %560 = vector.broadcast %cst_205 : f32 to vector<32x1xf32>
    %561 = arith.divf %559, %560 : vector<32x1xf32>
    %562 = vector.broadcast %561 : vector<32x1xf32> to vector<32x32xf32>
    %563 = arith.subf %555, %562 : vector<32x32xf32>
    %564 = arith.mulf %563, %563 : vector<32x32xf32>
    %cst_206 = arith.constant dense<0.000000e+00> : vector<32xf32>
    %565 = vector.multi_reduction <add>, %564, %cst_206 [1] : vector<32x32xf32> to vector<32xf32>
    %566 = vector.shape_cast %565 : vector<32xf32> to vector<32x1xf32>
    %cst_207 = arith.constant 3.200000e+01 : f32
    %567 = vector.broadcast %cst_207 : f32 to vector<32x1xf32>
    %568 = arith.divf %566, %567 : vector<32x1xf32>
    %cst_208 = arith.constant 9.99999974E-6 : f32
    %569 = vector.broadcast %cst_208 : f32 to vector<32x1xf32>
    %570 = arith.addf %568, %569 : vector<32x1xf32>
    %571 = math.rsqrt %570 : vector<32x1xf32>
    %572 = vector.broadcast %571 : vector<32x1xf32> to vector<32x32xf32>
    %573 = arith.mulf %563, %572 : vector<32x32xf32>
    %574 = vector.broadcast %556 : vector<1x32xf32> to vector<32x32xf32>
    %575 = arith.mulf %573, %574 : vector<32x32xf32>
    %576 = vector.broadcast %557 : vector<1x32xf32> to vector<32x32xf32>
    %577 = arith.addf %575, %576 : vector<32x32xf32>
    %c0_209 = arith.constant 0 : index
    %c0_210 = arith.constant 0 : index
    %578 = vector.load %arg11[%c0_209, %c0_210] : memref<32x32xf32, #tpu.memory_space<vmem>>, vector<32x32xf32>
    tpu.vector_store %arg11[%c0_209, %c0_210], %577 {strides = array<i32>} : memref<32x32xf32, #tpu.memory_space<vmem>>, vector<32x32xf32>,
    return
  }
  func.func @transform_0(%arg0: i32) -> (i32, i32) {
    %c0_i32 = arith.constant 0 : i32
    %c0_i32_0 = arith.constant 0 : i32
    %c0_i32_1 = arith.constant 0 : i32
    return %c0_i32, %c0_i32_0 : i32, i32
  }
  func.func @transform_1(%arg0: i32) -> (i32, i32) {
    %c0_i32 = arith.constant 0 : i32
    %c0_i32_0 = arith.constant 0 : i32
    %c0_i32_1 = arith.constant 0 : i32
    return %c0_i32, %c0_i32_0 : i32, i32
  }
  func.func @transform_2(%arg0: i32) -> (i32, i32, i32) {
    %c0_i32 = arith.constant 0 : i32
    %c0_i32_0 = arith.constant 0 : i32
    %c0_i32_1 = arith.constant 0 : i32
    %c0_i32_2 = arith.constant 0 : i32
    return %c0_i32, %c0_i32_0, %c0_i32_1 : i32, i32, i32
  }
  func.func @transform_3(%arg0: i32) -> (i32, i32) {
    %c0_i32 = arith.constant 0 : i32
    %c0_i32_0 = arith.constant 0 : i32
    %c0_i32_1 = arith.constant 0 : i32
    return %c0_i32, %c0_i32_0 : i32, i32
  }
  func.func @transform_4(%arg0: i32) -> (i32, i32, i32) {
    %c0_i32 = arith.constant 0 : i32
    %c0_i32_0 = arith.constant 0 : i32
    %c0_i32_1 = arith.constant 0 : i32
    %c0_i32_2 = arith.constant 0 : i32
    return %c0_i32, %c0_i32_0, %c0_i32_1 : i32, i32, i32
  }
  func.func @transform_5(%arg0: i32) -> (i32, i32, i32) {
    %c0_i32 = arith.constant 0 : i32
    %c0_i32_0 = arith.constant 0 : i32
    %c0_i32_1 = arith.constant 0 : i32
    %c0_i32_2 = arith.constant 0 : i32
    return %c0_i32, %c0_i32_0, %c0_i32_1 : i32, i32, i32
  }
  func.func @transform_6(%arg0: i32) -> (i32, i32, i32) {
    %c0_i32 = arith.constant 0 : i32
    %c0_i32_0 = arith.constant 0 : i32
    %c0_i32_1 = arith.constant 0 : i32
    %c0_i32_2 = arith.constant 0 : i32
    return %c0_i32, %c0_i32_0, %c0_i32_1 : i32, i32, i32
  }
  func.func @transform_7(%arg0: i32) -> (i32, i32, i32) {
    %c0_i32 = arith.constant 0 : i32
    %c0_i32_0 = arith.constant 0 : i32
    %c0_i32_1 = arith.constant 0 : i32
    %c0_i32_2 = arith.constant 0 : i32
    return %c0_i32, %c0_i32_0, %c0_i32_1 : i32, i32, i32
  }
  func.func @transform_8(%arg0: i32) -> (i32, i32, i32) {
    %c0_i32 = arith.constant 0 : i32
    %c0_i32_0 = arith.constant 0 : i32
    %c0_i32_1 = arith.constant 0 : i32
    %c0_i32_2 = arith.constant 0 : i32
    return %c0_i32, %c0_i32_0, %c0_i32_1 : i32, i32, i32
  }
  func.func @transform_9(%arg0: i32) -> (i32, i32, i32) {
    %c0_i32 = arith.constant 0 : i32
    %c0_i32_0 = arith.constant 0 : i32
    %c0_i32_1 = arith.constant 0 : i32
    %c0_i32_2 = arith.constant 0 : i32
    return %c0_i32, %c0_i32_0, %c0_i32_1 : i32, i32, i32
  }
  func.func @transform_10(%arg0: i32) -> (i32, i32) {
    %c0_i32 = arith.constant 0 : i32
    %c0_i32_0 = arith.constant 0 : i32
    %c0_i32_1 = arith.constant 0 : i32
    return %c0_i32, %c0_i32_0 : i32, i32
  }
}

</mosaic_0001>

<bundles_post_ra>
// kernel: perceiver_resampler.1
= control target key start
LH: loop header
LB: loop body
LE: loop exit
PB: predicated region body
PF: predicated region fallthrough
CT: control target
= control target key end

     0   :  { %vm73_vm0 = vcmask 261120   ;;  %s13173_s0 = inlined_call_operand.vmem [shape: f32[128,32], index: 0, kind: input, shape index: {}]   ;;  %s13174_s1 = inlined_call_operand.vmem [shape: f32[16,32], index: 1, kind: input, shape index: {}]   ;;  %s13175_s2 = inlined_call_operand.vmem [shape: f32[2,64,128], index: 2, kind: input, shape index: {}]   ;;  %s13176_s3 = inlined_call_operand.vmem [shape: f32[14,32], index: 3, kind: input, shape index: {}]   ;;  %s13177_s4 = inlined_call_operand.vmem [shape: f32[2,32,64], index: 4, kind: input, shape index: {}]   ;;  %s13178_s5 = inlined_call_operand.vmem [shape: f32[2,32,128], index: 5, kind: input, shape index: {}]   ;;  %s13179_s6 = inlined_call_operand.vmem [shape: f32[2,32,128], index: 6, kind: input, shape index: {}]   ;;  %s13180_s7 = inlined_call_operand.vmem [shape: f32[2,64,32], index: 7, kind: input, shape index: {}]   ;;  %s13181_s8 = inlined_call_operand.vmem [shape: f32[2,32,128], index: 8, kind: input, shape index: {}]   ;;  %s13182_s9 = inlined_call_operand.vmem [shape: f32[2,128,32], index: 9, kind: input, shape index: {}]   ;;  %s13183_s10 = inlined_call_operand.hbm [shape: f32[32,32], index: 10, kind: output, shape index: {}]  }
   0x1   :  { %v36_v0 = vld [vmem:[%s13173_s0] sm:$0xff]  ;;  %v38_v1 = vld [vmem:[%s13173_s0 + $0x10] sm:$0xff]  ;;  %v10963_v2 = vld [vmem:[%s13173_s0 + $0x8] sm:$0xff] }
   0x2   :  { %v74_v3 = vsel %vm73_vm0, %v36_v0, 0.0  ;;  %v80_v4 = vsel %vm73_vm0, %v38_v1, 0.0  ;;  %v10970_v5 = vld [vmem:[%s13173_s0 + $0x18] sm:$0xff]  ;;  %v77_v6 = vsel %vm73_vm0, %v10963_v2, 0.0  ;;  %v10979_v8 = vld [vmem:[%s13173_s0 + $0x20] sm:$0xff]  ;;  %v10984_v9 = vld [vmem:[%s13173_s0 + $0x28] sm:$0xff] }
   0x3   :  { %75 = vadd.xlane.f32.xlu0 %v74_v3  ;;  %81 = vadd.xlane.f32.xlu1 %v80_v4  ;;  %v83_v7 = vsel %vm73_vm0, %v10970_v5, 0.0 }
   0x7   :  { %78 = vadd.xlane.f32.xlu0 %v77_v6  ;;  %84 = vadd.xlane.f32.xlu1 %v83_v7 }
   0x8   :  { %15 = vsyncpa [#allocation3], 0  ;;  %v86_v10 = vsel %vm73_vm0, %v10979_v8, 0.0  ;;  %v89_v11 = vsel %vm73_vm0, %v10984_v9, 0.0  ;;  %v10993_v12 = vld [vmem:[%s13173_s0 + $0x30] sm:$0xff]  ;;  %v10998_v13 = vld [vmem:[%s13173_s0 + $0x38] sm:$0xff] }
   0x9   :  { %v92_v14 = vsel %vm73_vm0, %v10993_v12, 0.0  ;;  %v95_v15 = vsel %vm73_vm0, %v10998_v13, 0.0  ;;  %v11007_v16 = vld [vmem:[%s13173_s0 + $0x40] sm:$0xff]  ;;  %v11012_v17 = vld [vmem:[%s13173_s0 + $0x48] sm:$0xff]  ;;  %v11021_v20 = vld [vmem:[%s13173_s0 + $0x50] sm:$0xff]  ;;  %vm911_vm1 = vcmask 130048  }
   0xa   :  { %v98_v18 = vsel %vm73_vm0, %v11007_v16, 0.0  ;;  %v101_v19 = vsel %vm73_vm0, %v11012_v17, 0.0  ;;  %v11026_v21 = vld [vmem:[%s13173_s0 + $0x58] sm:$0xff]  ;;  %v104_v22 = vsel %vm73_vm0, %v11021_v20, 0.0  ;;  %v11035_v24 = vld [vmem:[%s13173_s0 + $0x60] sm:$0xff]  ;;  %v11040_v25 = vld [vmem:[%s13173_s0 + $0x68] sm:$0xff] }
   0xb   :  { %87 = vadd.xlane.f32.xlu0 %v86_v10  ;;  %90 = vadd.xlane.f32.xlu1 %v89_v11  ;;  %v107_v23 = vsel %vm73_vm0, %v11026_v21, 0.0  ;;  %v110_v26 = vsel %vm73_vm0, %v11035_v24, 0.0  ;;  %v113_v27 = vsel %vm73_vm0, %v11040_v25, 0.0  ;;  %v11049_v28 = vld [vmem:[%s13173_s0 + $0x70] sm:$0xff]  ;;  %v11054_v29 = vld [vmem:[%s13173_s0 + $0x78] sm:$0xff]  ;;  %v11063_v32 = vld [vmem:[%s13174_s1] sm:$0xff] }
   0xc   :  { %v116_v30 = vsel %vm73_vm0, %v11049_v28, 0.0  ;;  %v119_v31 = vsel %vm73_vm0, %v11054_v29, 0.0  ;;  %v11068_v33 = vld [vmem:[%s13174_s1 + $0x8] sm:$0xff]  ;;  %v323_v34 = vsel %vm73_vm0, %v11063_v32, 0.0  ;;  %vm11445_vm2 = vmpackc.low %vm911_vm1, %vm911_vm1  ;;  %vm1023_vm3 = vcmask 654336   ;;  %s10889_s24 = smov 64  }
   0xd   :  { %v326_v35 = vsel %vm73_vm0, %v11068_v33, 0.0  ;;  %s10890_s25 = smov 112   ;;  %s10891_s26 = smov 48   ;;  %vm3046_vm4 = vcmask 523264   ;;  %vm1961_vm5 = vcmask 392192  }
   0xe   :  { %s10892_s27 = smov 96   ;;  %s10893_s28 = smov 32  }
   0xf   :  { %93 = vadd.xlane.f32.xlu0 %v92_v14  ;;  %96 = vadd.xlane.f32.xlu1 %v95_v15  ;;  %s10894_s0 = smov 80   ;;  %s10895_s29 = smov 16  }
  0x13   :  { %99 = vadd.xlane.f32.xlu0 %v98_v18  ;;  %102 = vadd.xlane.f32.xlu1 %v101_v19 }
  0x17   :  { %105 = vadd.xlane.f32.xlu0 %v104_v22  ;;  %108 = vadd.xlane.f32.xlu1 %v107_v23 }
  0x1b   :  { %111 = vadd.xlane.f32.xlu0 %v110_v26  ;;  %114 = vadd.xlane.f32.xlu1 %v113_v27 }
  0x1f   :  { %117 = vadd.xlane.f32.xlu0 %v116_v30  ;;  %120 = vadd.xlane.f32.xlu1 %v119_v31 }
  0x23   :  { %324 = vadd.xlane.f32.xlu0 %v323_v34  ;;  %327 = vadd.xlane.f32.xlu1 %v326_v35 }
  0x90   :  { %v76_v36 = vpop.xlane.xlu0 %75  ;;  %v82_v37 = vpop.xlane.xlu1 %81 }
  0x91   :  { %v123_v38 = vmul.f32 0.03125, %v76_v36  ;;  %v125_v39 = vmul.f32 0.03125, %v82_v37 }
  0x93   :  { %v11074_v40 = vsub.f32 %v36_v0, %v123_v38  ;;  %v11076_v41 = vsub.f32 %v38_v1, %v125_v39 }
  0x94   :  { %v79_v42 = vpop.xlane.xlu0 %78  ;;  %v85_v43 = vpop.xlane.xlu1 %84 }
  0x95   :  { %v124_v44 = vmul.f32 0.03125, %v79_v42  ;;  %v126_v45 = vmul.f32 0.03125, %v85_v43  ;;  %v155_v46 = vmul.f32 %v11074_v40, %v11074_v40  ;;  %v157_v47 = vmul.f32 %v11076_v41, %v11076_v41 }
  0x97   :  { %v11083_v48 = vsub.f32 %v10963_v2, %v124_v44  ;;  %v11086_v49 = vsub.f32 %v10970_v5, %v126_v45  ;;  %v171_v50 = vsel %vm73_vm0, %v155_v46, 0.0  ;;  %v177_v53 = vsel %vm73_vm0, %v157_v47, 0.0 }
  0x98   :  { %172 = vadd.xlane.f32.xlu0 %v171_v50  ;;  %v88_v51 = vpop.xlane.xlu0 %87  ;;  %v91_v52 = vpop.xlane.xlu1 %90 }
  0x99   :  { %v127_v54 = vmul.f32 0.03125, %v88_v51  ;;  %v128_v55 = vmul.f32 0.03125, %v91_v52  ;;  %v156_v56 = vmul.f32 %v11083_v48, %v11083_v48  ;;  %v158_v57 = vmul.f32 %v11086_v49, %v11086_v49 }
  0x9b   :  { %v11095_v58 = vsub.f32 %v10979_v8, %v127_v54  ;;  %v11098_v59 = vsub.f32 %v10984_v9, %v128_v55  ;;  %v174_v60 = vsel %vm73_vm0, %v156_v56, 0.0  ;;  %v180_v63 = vsel %vm73_vm0, %v158_v57, 0.0 }
  0x9c   :  { %178 = vadd.xlane.f32.xlu0 %v177_v53  ;;  %175 = vadd.xlane.f32.xlu1 %v174_v60  ;;  %v94_v61 = vpop.xlane.xlu0 %93  ;;  %v97_v62 = vpop.xlane.xlu1 %96 }
  0x9d   :  { %v129_v0 = vmul.f32 0.03125, %v94_v61  ;;  %v130_v1 = vmul.f32 0.03125, %v97_v62  ;;  %v159_v2 = vmul.f32 %v11095_v58, %v11095_v58  ;;  %v160_v3 = vmul.f32 %v11098_v59, %v11098_v59 }
  0x9f   :  { %v11107_v4 = vsub.f32 %v10993_v12, %v129_v0  ;;  %v11110_v5 = vsub.f32 %v10998_v13, %v130_v1  ;;  %v183_v6 = vsel %vm73_vm0, %v159_v2, 0.0  ;;  %v186_v9 = vsel %vm73_vm0, %v160_v3, 0.0 }
  0xa0   :  { %181 = vadd.xlane.f32.xlu1 %v180_v63  ;;  %184 = vadd.xlane.f32.xlu0 %v183_v6  ;;  %v100_v7 = vpop.xlane.xlu0 %99  ;;  %v103_v8 = vpop.xlane.xlu1 %102  ;;  %v558_v6 = vld [vmem:[%s13179_s6] sm:$0xff] }
  0xa1   :  { %v131_v10 = vmul.f32 0.03125, %v100_v7  ;;  %v132_v11 = vmul.f32 0.03125, %v103_v8  ;;  %v161_v14 = vmul.f32 %v11107_v4, %v11107_v4  ;;  %v162_v12 = vmul.f32 %v11110_v5, %v11110_v5  ;;  %v559_v8 = vld [vmem:[%s13179_s6 + $0x8] sm:$0xff] }
  0xa3   :  { %v11119_v15 = vsub.f32 %v11007_v16, %v131_v10  ;;  %v11122_v13 = vsub.f32 %v11012_v17, %v132_v11  ;;  %v189_v18 = vsel %vm73_vm0, %v161_v14, 0.0  ;;  %v192_v23 = vsel %vm73_vm0, %v162_v12, 0.0  ;;  %v363_v14 = vld [vmem:[%s13178_s5 + $0x10] sm:$0xff]  ;;  %v364_v12 = vld [vmem:[%s13178_s5 + $0x18] sm:$0xff] }
  0xa4   :  { %187 = vadd.xlane.f32.xlu1 %v186_v9  ;;  %190 = vadd.xlane.f32.xlu0 %v189_v18  ;;  %v106_v19 = vpop.xlane.xlu0 %105  ;;  %v109_v22 = vpop.xlane.xlu1 %108  ;;  %v8955_v10 = vpack.c.bf16 %v559_v8, %v558_v6  ;;  %v560_v18 = vld [vmem:[%s13179_s6 + $0x10] sm:$0xff] }
  0xa5   :  { %v133_v26 = vmul.f32 0.03125, %v106_v19  ;;  %v134_v27 = vmul.f32 0.03125, %v109_v22  ;;  %v163_v30 = vmul.f32 %v11119_v15, %v11119_v15  ;;  %v164_v16 = vmul.f32 %v11122_v13, %v11122_v13  ;;  %v561_v22 = vld [vmem:[%s13179_s6 + $0x18] sm:$0xff] }
  0xa6   :  { %8956 = vmatprep.subr.bf16.mxu1 %v8955_v10  ;;  %v11205_v19 = vpack.c.bf16 %v364_v12, %v363_v14 }
  0xa7   :  { %v11131_v31 = vsub.f32 %v11021_v20, %v133_v26  ;;  %v11134_v17 = vsub.f32 %v11026_v21, %v134_v27  ;;  %v195_v34 = vsel %vm73_vm0, %v163_v30, 0.0  ;;  %v198_v37 = vsel %vm73_vm0, %v164_v16, 0.0  ;;  %8958 = vmatpush3.bf16.msra.mxu1 %v8955_v10 }
  0xa8   :  { %193 = vadd.xlane.f32.xlu1 %v192_v23  ;;  %196 = vadd.xlane.f32.xlu0 %v195_v34  ;;  %v112_v35 = vpop.xlane.xlu0 %111  ;;  %v115_v36 = vpop.xlane.xlu1 %114  ;;  %v8959_v23 = vpack.c.bf16 %v561_v22, %v560_v18  ;;  %v283_v30 = vlaneseq }
  0xa9   :  { %v135_v38 = vmul.f32 0.03125, %v112_v35  ;;  %v136_v39 = vmul.f32 0.03125, %v115_v36  ;;  %v165_v42 = vmul.f32 %v11131_v31, %v11131_v31  ;;  %v166_v20 = vmul.f32 %v11134_v17, %v11134_v17 }
  0xaa   :  { %8960 = vmatprep.subr.bf16.mxu1 %v8959_v23 }
  0xab   :  { %v11143_v43 = vsub.f32 %v11035_v24, %v135_v38  ;;  %v11146_v21 = vsub.f32 %v11040_v25, %v136_v39  ;;  %v201_v44 = vsel %vm73_vm0, %v165_v42, 0.0  ;;  %v204_v47 = vsel %vm73_vm0, %v166_v20, 0.0  ;;  %8962 = vmatpush3.bf16.msra.mxu1 %v8959_v23 }
  0xac   :  { %199 = vadd.xlane.f32.xlu1 %v198_v37  ;;  %202 = vadd.xlane.f32.xlu0 %v201_v44  ;;  %v118_v45 = vpop.xlane.xlu0 %117  ;;  %v121_v46 = vpop.xlane.xlu1 %120  ;;  %v11213_v38 = vshrl.u32 %v283_v30, 7 }
  0xad   :  { %v137_v50 = vmul.f32 0.03125, %v118_v45  ;;  %v138_v51 = vmul.f32 0.03125, %v121_v46  ;;  %v167_v52 = vmul.f32 %v11143_v43, %v11143_v43  ;;  %v168_v24 = vmul.f32 %v11146_v21, %v11146_v21 }
  0xae   :  { %13192 = vst [vmem:[#allocation5_spill] sm:$0xff] %v11213_v38 }
  0xaf   :  { %v11155_v53 = vsub.f32 %v11049_v28, %v137_v50  ;;  %v11158_v25 = vsub.f32 %v11054_v29, %v138_v51  ;;  %v207_v54 = vsel %vm73_vm0, %v167_v52, 0.0  ;;  %v210_v57 = vsel %vm73_vm0, %v168_v24, 0.0  ;;  %v11219_v52 = vld [vmem:[%s13176_s3] sm:$0xff] }
  0xb0   :  { %205 = vadd.xlane.f32.xlu1 %v204_v47  ;;  %208 = vadd.xlane.f32.xlu0 %v207_v54  ;;  %v325_v55 = vpop.xlane.xlu0 %324  ;;  %v328_v56 = vpop.xlane.xlu1 %327  ;;  %v13189_v47 = vsub.s32 0, %v11213_v38 }
  0xb1   :  { %v329_v60 = vmul.f32 0.03125, %v325_v55  ;;  %v330_v61 = vmul.f32 0.03125, %v328_v56  ;;  %v169_v62 = vmul.f32 %v11155_v53, %v11155_v53  ;;  %v170_v28 = vmul.f32 %v11158_v25, %v11158_v25 }
  0xb2   :  { %v13188_v55 = vsub.s32 1, %v11213_v38 }
  0xb3   :  { %v11167_v63 = vsub.f32 %v11063_v32, %v329_v60  ;;  %v11170_v29 = vsub.f32 %v11068_v33, %v330_v61  ;;  %v213_v0 = vsel %vm73_vm0, %v169_v62, 0.0  ;;  %v216_v1 = vsel %vm73_vm0, %v170_v28, 0.0  ;;  %v361_v32 = vld [vmem:[%s13178_s5] sm:$0xff]  ;;  %v362_v33 = vld [vmem:[%s13178_s5 + $0x8] sm:$0xff] }
  0xb4   :  { %211 = vadd.xlane.f32.xlu1 %v210_v57  ;;  %214 = vadd.xlane.f32.xlu0 %v213_v0  ;;  %v11187_v7 = vpack.c.bf16 %v362_v33, %v361_v32  ;;  %v11225_v60 = vrot.slane %v11219_v52, %v13189_v47 }
  0xb5   :  { %v333_v2 = vmul.f32 %v11167_v63, %v11167_v63  ;;  %v334_v3 = vmul.f32 %v11170_v29, %v11170_v29 }
  0xb6   :  { %8948 = vmatprep.subr.bf16.mxu0 %v11187_v7 }
  0xb7   :  { %v335_v9 = vsel %vm73_vm0, %v333_v2, 0.0  ;;  %v338_v11 = vsel %vm73_vm0, %v334_v3, 0.0  ;;  %8950 = vmatpush3.bf16.msra.mxu0 %v11187_v7  ;;  %v11233_v3 = vrot.slane %v11219_v52, %v13188_v55 }
  0xb8   :  { %217 = vadd.xlane.f32.xlu1 %v216_v1  ;;  %336 = vadd.xlane.f32.xlu0 %v335_v9 }
  0xb9   :  { %8952 = vmatprep.subr.bf16.mxu0 %v11205_v19 }
  0xbb   :  { %8954 = vmatpush3.bf16.msra.mxu0 %v11205_v19 }
  0xbc   :  { %339 = vadd.xlane.f32.xlu1 %v338_v11  ;;  %8964 = vmatprep.subr.bf16.mxu0 %v11187_v7 }
 0x125   :  { %v173_v26 = vpop.xlane.xlu0 %172 }
 0x126   :  { %v219_v27 = vmul.f32 0.03125, %v173_v26 }
 0x128   :  { %v235_v16 = vadd.f32 1e-05, %v219_v27 }
 0x129   :  { %v176_v34 = vpop.xlane.xlu1 %175  ;;  %v179_v35 = vpop.xlane.xlu0 %178 }
 0x12a   :  { %10633 = vrsqrt.f32 %v235_v16  ;;  %v220_v36 = vmul.f32 0.03125, %v176_v34  ;;  %v221_v37 = vmul.f32 0.03125, %v179_v35 }
 0x12c   :  { %v236_v39 = vadd.f32 1e-05, %v220_v36  ;;  %v237_v42 = vadd.f32 1e-05, %v221_v37 }
 0x12d   :  { %v182_v20 = vpop.xlane.xlu1 %181  ;;  %v185_v44 = vpop.xlane.xlu0 %184 }
 0x12e   :  { %10635 = vrsqrt.f32 %v236_v39  ;;  %v222_v45 = vmul.f32 0.03125, %v182_v20  ;;  %v223_v46 = vmul.f32 0.03125, %v185_v44 }
 0x12f   :  { %10637 = vrsqrt.f32 %v237_v42 }
 0x130   :  { %v238_v50 = vadd.f32 1e-05, %v222_v45  ;;  %v239_v51 = vadd.f32 1e-05, %v223_v46 }
 0x131   :  { %v188_v24 = vpop.xlane.xlu1 %187  ;;  %v191_v54 = vpop.xlane.xlu0 %190 }
 0x132   :  { %10639 = vrsqrt.f32 %v238_v50  ;;  %v224_v56 = vmul.f32 0.03125, %v188_v24  ;;  %v225_v57 = vmul.f32 0.03125, %v191_v54 }
 0x133   :  { %10641 = vrsqrt.f32 %v239_v51 }
 0x134   :  { %v10634_v61 = vpop.eup %10633  ;;  %v240_v62 = vadd.f32 1e-05, %v224_v56  ;;  %v241_v28 = vadd.f32 1e-05, %v225_v57 }
 0x135   :  { %v194_v0 = vpop.xlane.xlu1 %193  ;;  %v197_v1 = vpop.xlane.xlu0 %196  ;;  %v11228_v2 = vmul.f32 %v10634_v61, %v11074_v40 }
 0x136   :  { %10643 = vrsqrt.f32 %v240_v62  ;;  %v226_v32 = vmul.f32 0.03125, %v194_v0  ;;  %v227_v33 = vmul.f32 0.03125, %v197_v1  ;;  %v798_v1 = vld [vmem:[%s13177_s4] sm:$0xff] }
 0x137   :  { %10645 = vrsqrt.f32 %v241_v28  ;;  %v287_v6 = vmul.f32 %v11225_v60, %v11228_v2 }
 0x138   :  { %v10636_v8 = vpop.eup %10635  ;;  %v242_v9 = vadd.f32 1e-05, %v226_v32  ;;  %v243_v10 = vadd.f32 1e-05, %v227_v33  ;;  %v799_v32 = vld [vmem:[%s13177_s4 + $0x8] sm:$0xff] }
 0x139   :  { %v10638_v11 = vpop.eup %10637  ;;  %v200_v14 = vpop.xlane.xlu1 %199  ;;  %v307_v40 = vadd.f32 %v11233_v3, %v287_v6  ;;  %v11239_v18 = vmul.f32 %v10636_v8, %v11083_v48 }
 0x13a   :  { %v203_v12 = vpop.xlane.xlu0 %202  ;;  %10647 = vrsqrt.f32 %v242_v9  ;;  %v228_v22 = vmul.f32 0.03125, %v200_v14  ;;  %v11242_v26 = vmul.f32 %v10638_v11, %v11076_v41 }
 0x13b   :  { %v229_v23 = vmul.f32 0.03125, %v203_v12  ;;  %10649 = vrsqrt.f32 %v243_v10  ;;  %7887 = vmatprep.mubr.msk.f32.mxu0 %vm73_vm0, %v307_v40  ;;  %7919 = vmatprep.mubr.msk.f32.mxu1 %vm73_vm0, %v307_v40  ;;  %v288_v27 = vmul.f32 %v11225_v60, %v11239_v18  ;;  %v11294_v40 = vpack.c.bf16 %v799_v32, %v798_v1 }
 0x13c   :  { %v10640_v30 = vpop.eup %10639  ;;  %v244_v16 = vadd.f32 1e-05, %v228_v22  ;;  %v289_v48 = vmul.f32 %v11225_v60, %v11242_v26 }
 0x13d   :  { %v245_v34 = vadd.f32 1e-05, %v229_v23  ;;  %v10642_v35 = vpop.eup %10641  ;;  %v206_v36 = vpop.xlane.xlu1 %205  ;;  %v308_v41 = vadd.f32 %v11233_v3, %v288_v27  ;;  %v11252_v39 = vmul.f32 %v10640_v30, %v11086_v49 }
 0x13e   :  { %v209_v37 = vpop.xlane.xlu0 %208  ;;  %10651 = vrsqrt.f32 %v244_v16  ;;  %v230_v42 = vmul.f32 0.03125, %v206_v36  ;;  %v309_v44 = vadd.f32 %v11233_v3, %v289_v48  ;;  %v11260_v46 = vmul.f32 %v10642_v35, %v11095_v58 }
 0x13f   :  { %v231_v20 = vmul.f32 0.03125, %v209_v37  ;;  %10653 = vrsqrt.f32 %v245_v34  ;;  %7888 = vmatmul.mubr.msk.f32.vlgmr.msra.gmra.mrb[0].mxu0 %vm73_vm0, %v308_v41  ;;  %7920 = vmatmul.mubr.msk.f32.vlgmr.msra.gmra.mrb[0].mxu1 %vm73_vm0, %v308_v41  ;;  %v290_v45 = vmul.f32 %v11225_v60, %v11252_v39 }
 0x140   :  { %v10644_v50 = vpop.eup %10643  ;;  %v246_v51 = vadd.f32 1e-05, %v230_v42  ;;  %7890 = vmatprep.mubr.msk.f32.mxu0 %vm73_vm0, %v309_v44  ;;  %7922 = vmatprep.mubr.msk.f32.mxu1 %vm73_vm0, %v309_v44  ;;  %v291_v61 = vmul.f32 %v11225_v60, %v11260_v46 }
 0x141   :  { %v247_v49 = vadd.f32 1e-05, %v231_v20  ;;  %v10646_v24 = vpop.eup %10645  ;;  %v212_v54 = vpop.xlane.xlu1 %211  ;;  %v310_v57 = vadd.f32 %v11233_v3, %v290_v45  ;;  %v11268_v62 = vmul.f32 %v10644_v50, %v11098_v59  ;;  %8966 = vmatpush3.bf16.msra.mxu0 %v11187_v7 }
 0x142   :  { %v215_v56 = vpop.xlane.xlu0 %214  ;;  %10655 = vrsqrt.f32 %v246_v51  ;;  %v232_v58 = vmul.f32 0.03125, %v212_v54  ;;  %v11272_v0 = vmul.f32 %v10646_v24, %v11107_v4  ;;  %8968 = vmatprep.subr.bf16.mxu0 %v11205_v19  ;;  %v311_v59 = vadd.f32 %v11233_v3, %v291_v61 }
 0x143   :  { %v233_v28 = vmul.f32 0.03125, %v215_v56  ;;  %10657 = vrsqrt.f32 %v247_v49  ;;  %7891 = vmatmul.mubr.msk.f32.gmra.mrb[2].mxu0 %vm73_vm0, %v310_v57  ;;  %7923 = vmatmul.mubr.msk.f32.gmra.mrb[2].mxu1 %vm73_vm0, %v310_v57  ;;  %v292_v4 = vmul.f32 %v11225_v60, %v11268_v62  ;;  %v13187_v61 = vsub.s32 2, %v11213_v38 }
 0x144   :  { %v10648_v7 = vpop.eup %10647  ;;  %v248_v33 = vadd.f32 1e-05, %v232_v58  ;;  %v293_v8 = vmul.f32 %v11225_v60, %v11272_v0  ;;  %7893 = vmatprep.mubr.msk.f32.mxu0 %vm73_vm0, %v311_v59  ;;  %7925 = vmatprep.mubr.msk.f32.mxu1 %vm73_vm0, %v311_v59  ;;  %v13184_v59 = vsub.s32 3, %v11213_v38 }
 0x145   :  { %v249_v6 = vadd.f32 1e-05, %v233_v28  ;;  %v10650_v9 = vpop.eup %10649  ;;  %v218_v10 = vpop.xlane.xlu1 %217  ;;  %v312_v14 = vadd.f32 %v11233_v3, %v292_v4  ;;  %v11292_v12 = vmul.f32 %v10648_v7, %v11110_v5  ;;  %8970 = vmatpush3.bf16.msra.mxu0 %v11205_v19 }
 0x146   :  { %v337_v11 = vpop.xlane.xlu0 %336  ;;  %10659 = vrsqrt.f32 %v248_v33  ;;  %v234_v22 = vmul.f32 0.03125, %v218_v10  ;;  %v313_v27 = vadd.f32 %v11233_v3, %v293_v8  ;;  %v11303_v5 = vmul.f32 %v10650_v9, %v11119_v15  ;;  %8972 = vmatprep.subr.bf16.mxu0 %v11294_v40 }
 0x147   :  { %v341_v23 = vmul.f32 0.03125, %v337_v11  ;;  %10661 = vrsqrt.f32 %v249_v6  ;;  %7894 = vmatmul.mubr.msk.f32.gmra.mrb[4].mxu0 %vm73_vm0, %v312_v14  ;;  %7926 = vmatmul.mubr.msk.f32.gmra.mrb[4].mxu1 %vm73_vm0, %v312_v14  ;;  %v294_v30 = vmul.f32 %v11225_v60, %v11292_v12  ;;  %v358_v11 = vrot.slane %v11219_v52, %v13184_v59 }
 0x148   :  { %v10652_v16 = vpop.eup %10651  ;;  %v250_v34 = vadd.f32 1e-05, %v234_v22  ;;  %7896 = vmatprep.mubr.msk.f32.mxu0 %vm73_vm0, %v313_v27  ;;  %7928 = vmatprep.mubr.msk.f32.mxu1 %vm73_vm0, %v313_v27  ;;  %v295_v37 = vmul.f32 %v11225_v60, %v11303_v5 }
 0x149   :  { %v343_v48 = vadd.f32 1e-05, %v341_v23  ;;  %v10654_v35 = vpop.eup %10653  ;;  %v340_v19 = vpop.xlane.xlu1 %339  ;;  %v314_v36 = vadd.f32 %v11233_v3, %v294_v30  ;;  %v11311_v41 = vmul.f32 %v10652_v16, %v11122_v13  ;;  %v801_v30 = vld [vmem:[%s13177_s4 + $0x18] sm:$0xff] }
 0x14a   :  { %10663 = vrsqrt.f32 %v250_v34  ;;  %v342_v15 = vmul.f32 0.03125, %v340_v19  ;;  %v11315_v42 = vmul.f32 %v10654_v35, %v11131_v31  ;;  %v315_v20 = vadd.f32 %v11233_v3, %v295_v37  ;;  %v11410_v34 = vld [vmem:[%s13175_s2] sm:$0xff] }
 0x14b   :  { %10665 = vrsqrt.f32 %v343_v48  ;;  %7897 = vmatmul.mubr.msk.f32.gmra.mrb[6].mxu0 %vm73_vm0, %v314_v36  ;;  %7929 = vmatmul.mubr.msk.f32.gmra.mrb[6].mxu1 %vm73_vm0, %v314_v36  ;;  %v296_v44 = vmul.f32 %v11225_v60, %v11311_v41  ;;  %v11415_v48 = vld [vmem:[%s13175_s2 + $0x40] sm:$0xff] }
 0x14c   :  { %v10656_v45 = vpop.eup %10655  ;;  %v344_v13 = vadd.f32 1e-05, %v342_v15  ;;  %v297_v50 = vmul.f32 %v11225_v60, %v11315_v42  ;;  %7899 = vmatprep.mubr.msk.f32.mxu0 %vm73_vm0, %v315_v20  ;;  %7931 = vmatprep.mubr.msk.f32.mxu1 %vm73_vm0, %v315_v20 }
 0x14d   :  { %v10658_v51 = vpop.eup %10657  ;;  %v316_v31 = vadd.f32 %v11233_v3, %v296_v44  ;;  %v11328_v49 = vmul.f32 %v10656_v45, %v11134_v17 }
 0x14e   :  { %10667 = vrsqrt.f32 %v344_v13  ;;  %v317_v24 = vadd.f32 %v11233_v3, %v297_v50  ;;  %v11332_v54 = vmul.f32 %v10658_v51, %v11143_v43  ;;  %v11424_v13 = vld [vmem:[%s13175_s2 + $0x18] sm:$0xff] }
 0x14f   :  { %7900 = vmatmul.mubr.msk.f32.gmra.mrb[8].mxu0 %vm73_vm0, %v316_v31  ;;  %7932 = vmatmul.mubr.msk.f32.gmra.mrb[8].mxu1 %vm73_vm0, %v316_v31  ;;  %v298_v56 = vmul.f32 %v11225_v60, %v11328_v49  ;;  %v11429_v50 = vld [vmem:[%s13175_s2 + $0x58] sm:$0xff]  ;;  %v11434_v31 = vld [vmem:[%s13175_s2 + $0x10] sm:$0xff] }
 0x150   :  { %v10660_v57 = vpop.eup %10659  ;;  %7902 = vmatprep.mubr.msk.f32.mxu0 %vm73_vm0, %v317_v24  ;;  %7934 = vmatprep.mubr.msk.f32.mxu1 %vm73_vm0, %v317_v24  ;;  %v299_v17 = vmul.f32 %v11225_v60, %v11332_v54  ;;  %v11439_v24 = vld [vmem:[%s13175_s2 + $0x50] sm:$0xff] }
 0x151   :  { %v10662_v58 = vpop.eup %10661  ;;  %v318_v43 = vadd.f32 %v11233_v3, %v298_v56  ;;  %v11345_v28 = vmul.f32 %v10660_v57, %v11146_v21 }
 0x152   :  { %v319_v1 = vadd.f32 %v11233_v3, %v299_v17  ;;  %v11349_v32 = vmul.f32 %v10662_v58, %v11155_v53  ;;  %v352_v53 = vrot.slane %v11219_v52, %v13187_v61  ;;  %v800_v52 = vld [vmem:[%s13177_s4 + $0x10] sm:$0xff] }
 0x153   :  { %7903 = vmatmul.mubr.msk.f32.gmra.mrb[10].mxu0 %vm73_vm0, %v318_v43  ;;  %7935 = vmatmul.mubr.msk.f32.gmra.mrb[10].mxu1 %vm73_vm0, %v318_v43  ;;  %v300_v4 = vmul.f32 %v11225_v60, %v11345_v28 }
 0x154   :  { %v10664_v7 = vpop.eup %10663  ;;  %7905 = vmatprep.mubr.msk.f32.mxu0 %vm73_vm0, %v319_v1  ;;  %7937 = vmatprep.mubr.msk.f32.mxu1 %vm73_vm0, %v319_v1  ;;  %v301_v21 = vmul.f32 %v11225_v60, %v11349_v32 }
 0x155   :  { %v10666_v33 = vpop.eup %10665  ;;  %v320_v6 = vadd.f32 %v11233_v3, %v300_v4  ;;  %v11365_v8 = vmul.f32 %v10664_v7, %v11158_v25 }
 0x156   :  { %v321_v9 = vadd.f32 %v11233_v3, %v301_v21  ;;  %v347_v10 = vmul.f32 %v10666_v33, %v11167_v63  ;;  %v11454_v33 = vld [vmem:[%s13175_s2 + $0x28] sm:$0xff] }
 0x157   :  { %7906 = vmatmul.mubr.msk.f32.gmra.mrb[12].mxu0 %vm73_vm0, %v320_v6  ;;  %7938 = vmatmul.mubr.msk.f32.gmra.mrb[12].mxu1 %vm73_vm0, %v320_v6  ;;  %v302_v14 = vmul.f32 %v11225_v60, %v11365_v8  ;;  %v11459_v6 = vld [vmem:[%s13175_s2 + $0x68] sm:$0xff] }
 0x158   :  { %v10668_v22 = vpop.eup %10667  ;;  %7908 = vmatprep.mubr.msk.f32.mxu0 %vm73_vm0, %v321_v9  ;;  %7940 = vmatprep.mubr.msk.f32.mxu1 %vm73_vm0, %v321_v9  ;;  %v353_v25 = vmul.f32 %v352_v53, %v347_v10 }
 0x159   :  { %v348_v23 = vmul.f32 %v10668_v22, %v11170_v29  ;;  %v322_v63 = vadd.f32 %v11233_v3, %v302_v14  ;;  %v8975_v29 = vpack.c.bf16 %v801_v30, %v800_v52  ;;  %v11400_v3 = vld [vmem:[%s13175_s2 + $0x8] sm:$0xff]  ;;  %v11466_v14 = vld [vmem:[%s13175_s2 + $0x20] sm:$0xff] }
 0x15a   :  { %v359_v27 = vadd.f32 %v358_v11, %v353_v25  ;;  %v11471_v22 = vld [vmem:[%s13175_s2 + $0x60] sm:$0xff] }
 0x15b   :  { %7909 = vmatmul.mubr.msk.f32.gmra.mrb[14].mxu0 %vm73_vm0, %v322_v63  ;;  %7941 = vmatmul.mubr.msk.f32.gmra.mrb[14].mxu1 %vm73_vm0, %v322_v63  ;;  %v354_v60 = vmul.f32 %v352_v53, %v348_v23 }
 0x15c   :  { %7951 = vmatprep.mubr.msk.f32.mxu0 %vm73_vm0, %v359_v27 }
 0x15d   :  { %v360_v16 = vadd.f32 %v358_v11, %v354_v60 }
 0x15f   :  { %7952 = vmatmul.mubr.msk.f32.vlgmr.msra.gmra.mrb[16].mxu0 %vm73_vm0, %v360_v16 }
 0x160   :  { %7954 = vmatprep.mubr.msk.f32.mxu0 %vm73_vm0, %v359_v27  ;;  %8974 = vmatpush3.bf16.msra.mxu0 %v11294_v40  ;;  %v11405_v40 = vld [vmem:[%s13175_s2 + $0x48] sm:$0xff] }
 0x161   :  { %8976 = vmatprep.subr.bf16.mxu0 %v8975_v29 }
 0x163   :  { %7955 = vmatmul.mubr.msk.f32.gmra.mrb[18].mxu0 %vm73_vm0, %v360_v16 }
 0x164   :  { %8978 = vmatpush3.bf16.msra.mxu0 %v8975_v29  ;;  %7965 = vmatprep.mubr.msk.f32.mxu0 %vm73_vm0, %v359_v27 }
 0x167   :  { %7966 = vmatmul.mubr.msk.f32.vlgmr.msra.gmra.mrb[20].mxu0 %vm73_vm0, %v360_v16 }
 0x168   :  { %7968 = vmatprep.mubr.msk.f32.mxu0 %vm73_vm0, %v359_v27 }
 0x16b   :  { %7969 = vmatmul.mubr.msk.f32.gmra.mrb[22].mxu0 %vm73_vm0, %v360_v16 }
 0x212   :  { %v7889_v35 = vpop.f32.mrb[0].mxu0  ;;  %v7921_v19 = vpop.f32.mrb[0].mxu1 }
 0x213   :  { %v888_v36 = vmul.f32 %v7889_v35, %v11400_v3  ;;  %v896_v37 = vmul.f32 %v7921_v19, %v11405_v40  ;;  %v479_v15 = vpop.f32.mrb[1].mxu0  ;;  %v628_v20 = vpop.f32.mrb[1].mxu1  ;;  %v11484_v35 = vld [vmem:[%s13175_s2 + $0x38] sm:$0xff] }
 0x214   :  { %v887_v44 = vmul.f32 %v479_v15, %v11410_v34  ;;  %v895_v45 = vmul.f32 %v11415_v48, %v628_v20  ;;  %v11489_v19 = vld [vmem:[%s13175_s2 + $0x78] sm:$0xff]  ;;  %v60_v20 = vld [vmem:[%s13175_s2 + $0x30] sm:$0xff] }
 0x215   :  { %v904_v51 = vadd.f32 %v896_v37, %v888_v36 }
 0x216   :  { %v903_v56 = vadd.f32 %v895_v45, %v887_v44  ;;  %v7892_v57 = vpop.f32.mrb[2].mxu0  ;;  %v7924_v17 = vpop.f32.mrb[2].mxu1  ;;  %v6933_v44 = vld [vmem:[%s13175_s2 + $0x70] sm:$0xff] }
 0x217   :  { %v890_v58 = vmul.f32 %v7892_v57, %v11424_v13  ;;  %v898_v43 = vmul.f32 %v7924_v17, %v11429_v50  ;;  %v489_v1 = vpop.f32.mrb[3].mxu0  ;;  %v638_v4 = vpop.f32.mrb[3].mxu1 }
 0x218   :  { %v889_v21 = vmul.f32 %v489_v1, %v11434_v31  ;;  %v897_v53 = vmul.f32 %v11439_v24, %v638_v4  ;;  %v8979_v9 = vpack.c.bf16 %v904_v51, %v903_v56  ;;  %v11461_v10 = vpack.i.bf16 %v904_v51, %v903_v56 }
 0x219   :  { %v906_v11 = vadd.f32 %v898_v43, %v890_v58 }
 0x21a   :  { %v905_v25 = vadd.f32 %v897_v53, %v889_v21  ;;  %v7895_v23 = vpop.f32.mrb[4].mxu0  ;;  %v7927_v63 = vpop.f32.mrb[4].mxu1  ;;  %8981 = vmatprep.subr.msk.bf16.mxu0 %vm11445_vm2, %v8979_v9 }
 0x21b   :  { %v892_v27 = vmul.f32 %v7895_v23, %v11454_v33  ;;  %v900_v52 = vmul.f32 %v7927_v63, %v11459_v6  ;;  %v499_v30 = vpop.f32.mrb[5].mxu0  ;;  %v648_v60 = vpop.f32.mrb[5].mxu1  ;;  %8984 = vmatpush3.bf16.xpose.msk.msra.mxu0 %vm11445_vm2, %v8979_v9 }
 0x21c   :  { %v891_v16 = vmul.f32 %v499_v30, %v11466_v14  ;;  %v899_v29 = vmul.f32 %v11471_v22, %v648_v60  ;;  %v8985_v36 = vpack.c.bf16 %v906_v11, %v905_v25  ;;  %v11491_v37 = vpack.i.bf16 %v906_v11, %v905_v25 }
 0x21d   :  { %v908_v15 = vadd.f32 %v900_v52, %v892_v27 }
 0x21e   :  { %v907_v45 = vadd.f32 %v899_v29, %v891_v16  ;;  %v7898_v51 = vpop.f32.mrb[6].mxu0  ;;  %v7930_v56 = vpop.f32.mrb[6].mxu1  ;;  %8987 = vmatprep.subr.msk.bf16.mxu0 %vm11445_vm2, %v8985_v36 }
 0x21f   :  { %v894_v57 = vmul.f32 %v7898_v51, %v11484_v35  ;;  %v902_v17 = vmul.f32 %v7930_v56, %v11489_v19  ;;  %v509_v58 = vpop.f32.mrb[7].mxu0  ;;  %v658_v43 = vpop.f32.mrb[7].mxu1 }
 0x220   :  { %v893_v1 = vmul.f32 %v509_v58, %v60_v20  ;;  %v901_v4 = vmul.f32 %v6933_v44, %v658_v43  ;;  %v8991_v21 = vpack.c.bf16 %v908_v15, %v907_v45  ;;  %v11503_v53 = vpack.i.bf16 %v908_v15, %v907_v45 }
 0x221   :  { %v910_v9 = vadd.f32 %v902_v17, %v894_v57 }
 0x222   :  { %v909_v11 = vadd.f32 %v901_v4, %v893_v1  ;;  %v7901_v25 = vpop.f32.mrb[8].mxu0  ;;  %v7933_v23 = vpop.f32.mrb[8].mxu1 }
 0x223   :  { %v1965_v63 = vmul.f32 %v7901_v25, %v11400_v3  ;;  %v1973_v27 = vmul.f32 %v7933_v23, %v11405_v40  ;;  %v519_v52 = vpop.f32.mrb[9].mxu0  ;;  %v668_v30 = vpop.f32.mrb[9].mxu1  ;;  %8990 = vmatpush3.bf16.xpose.msk.msra.mxu0 %vm11445_vm2, %v8985_v36 }
 0x224   :  { %v1964_v60 = vmul.f32 %v519_v52, %v11410_v34  ;;  %v1972_v16 = vmul.f32 %v11415_v48, %v668_v30  ;;  %8993 = vmatprep.subr.msk.bf16.mxu0 %vm11445_vm2, %v8991_v21  ;;  %v8997_v29 = vpack.c.bf16 %v910_v9, %v909_v11  ;;  %v11513_v15 = vpack.i.bf16 %v910_v9, %v909_v11 }
 0x225   :  { %v1981_v45 = vadd.f32 %v1973_v27, %v1965_v63 }
 0x226   :  { %v1980_v51 = vadd.f32 %v1972_v16, %v1964_v60  ;;  %v7904_v3 = vpop.f32.mrb[10].mxu0  ;;  %v7936_v56 = vpop.f32.mrb[10].mxu1 }
 0x227   :  { %v1967_v40 = vmul.f32 %v7904_v3, %v11424_v13  ;;  %v1975_v57 = vmul.f32 %v7936_v56, %v11429_v50  ;;  %v529_v17 = vpop.f32.mrb[11].mxu0  ;;  %v678_v36 = vpop.f32.mrb[11].mxu1 }
 0x228   :  { %v1966_v34 = vmul.f32 %v529_v17, %v11434_v31  ;;  %v1974_v48 = vmul.f32 %v11439_v24, %v678_v36  ;;  %v11519_v58 = vpack.c.bf16 %v1981_v45, %v1980_v51  ;;  %v11521_v43 = vpack.i.bf16 %v1981_v45, %v1980_v51 }
 0x229   :  { %v1983_v1 = vadd.f32 %v1975_v57, %v1967_v40 }
 0x22a   :  { %v1982_v4 = vadd.f32 %v1974_v48, %v1966_v34  ;;  %v7907_v9 = vpop.f32.mrb[12].mxu0  ;;  %v7939_v11 = vpop.f32.mrb[12].mxu1 }
 0x22b   :  { %v1969_v25 = vmul.f32 %v7907_v9, %v11454_v33  ;;  %v1977_v13 = vmul.f32 %v7939_v11, %v11459_v6  ;;  %v539_v23 = vpop.f32.mrb[13].mxu0  ;;  %v688_v50 = vpop.f32.mrb[13].mxu1  ;;  %8996 = vmatpush3.bf16.xpose.msk.msra.mxu0 %vm11445_vm2, %v8991_v21 }
 0x22c   :  { %v1968_v31 = vmul.f32 %v539_v23, %v11466_v14  ;;  %v1976_v24 = vmul.f32 %v11471_v22, %v688_v50  ;;  %8999 = vmatprep.subr.msk.bf16.mxu0 %vm11445_vm2, %v8997_v29  ;;  %v11531_v63 = vpack.c.bf16 %v1983_v1, %v1982_v4  ;;  %v11533_v27 = vpack.i.bf16 %v1983_v1, %v1982_v4 }
 0x22d   :  { %v1985_v52 = vadd.f32 %v1977_v13, %v1969_v25 }
 0x22e   :  { %v1984_v33 = vadd.f32 %v1976_v24, %v1968_v31  ;;  %v7910_v30 = vpop.f32.mrb[14].mxu0  ;;  %v7942_v6 = vpop.f32.mrb[14].mxu1 }
 0x22f   :  { %v1971_v60 = vmul.f32 %v7910_v30, %v11484_v35  ;;  %v1979_v16 = vmul.f32 %v7942_v6, %v11489_v19  ;;  %v549_v21 = vpop.f32.mrb[15].mxu0  ;;  %v698_v45 = vpop.f32.mrb[15].mxu1 }
 0x230   :  { %v1970_v14 = vmul.f32 %v549_v21, %v60_v20  ;;  %v1978_v51 = vmul.f32 %v6933_v44, %v698_v45  ;;  %v11537_v22 = vpack.c.bf16 %v1985_v52, %v1984_v33  ;;  %v11539_v3 = vpack.i.bf16 %v1985_v52, %v1984_v33 }
 0x231   :  { %v1987_v56 = vadd.f32 %v1979_v16, %v1971_v60 }
 0x232   :  { %v1986_v40 = vadd.f32 %v1978_v51, %v1970_v14  ;;  %v7953_v57 = vpop.f32.mrb[16].mxu0 }
 0x233   :  { %v779_v17 = vpop.f32.mrb[17].mxu0  ;;  %9002 = vmatpush3.bf16.xpose.msk.msra.mxu0 %vm11445_vm2, %v8997_v29 }
 0x234   :  { %v9003_v36 = vpack.c.bf16 %v7953_v57, %v779_v17  ;;  %v11543_v34 = vpack.i.bf16 %v7953_v57, %v779_v17  ;;  %v11547_v19 = vpack.c.bf16 %v1987_v56, %v1986_v40  ;;  %v11549_v20 = vpack.i.bf16 %v1987_v56, %v1986_v40 }
 0x236   :  { %v7956_v35 = vpop.f32.mrb[18].mxu0  ;;  %9005 = vmatprep.subr.msk.bf16.mxu0 %vm11445_vm2, %v9003_v36 }
 0x237   :  { %v789_v44 = vpop.f32.mrb[19].mxu0 }
 0x238   :  { %v11551_v48 = vpack.c.bf16 %v7956_v35, %v789_v44  ;;  %v11553_v1 = vpack.i.bf16 %v7956_v35, %v789_v44 }
 0x23a   :  { %v11555_v4 = vpop.f32.mrb[20].mxu0 }
 0x23b   :  { %v11557_v9 = vpop.f32.mrb[21].mxu0  ;;  %9008 = vmatpush3.bf16.xpose.msk.msra.mxu0 %vm11445_vm2, %v9003_v36 }
 0x23c   :  { %7991 = vmatprep.mubr.msk.f32.mxu0 %vm911_vm1, %v11557_v9 }
 0x23e   :  { %v11563_v29 = vpop.f32.mrb[22].mxu0 }
 0x23f   :  { %v11565_v11 = vpop.f32.mrb[23].mxu0 }
 0x242   :  { %7992 = vmatmul.mubr.msk.f32.vlgmr.msra.gmra.mrb[24].mxu0 %vm911_vm1, %v11555_v4 }
 0x315   :  { %v7993_v25 = vpop.f32.mrb[24].mxu0 }
 0x316   :  { %v1014_v13 = vpop.f32.mrb[25].mxu0  ;;  %v1027_v23 = vsel %vm1023_vm3, %v7993_v25, -inf }
 0x317   :  { %1028 = vmax.xlane.f32.xlu1 %v1027_v23  ;;  %v1024_v50 = vsel %vm1023_vm3, %v1014_v13, -inf }
 0x318   :  { %1025 = vmax.xlane.f32.xlu0 %v1024_v50 }
 0x328   :  { %9934 = vrot.lane.b32.xlu1 %v11461_v10, %s10889_s24 }
 0x32c   :  { %9944 = vrot.lane.b32.xlu1 %v11503_v53, %s10889_s24 }
 0x330   :  { %9949 = vrot.lane.b32.xlu1 %v11513_v15, %s10889_s24 }
 0x334   :  { %9954 = vrot.lane.b32.xlu1 %v11543_v34, %s10889_s24 }
 0x338   :  { %9959 = vrot.lane.b32.xlu1 %v11461_v10, %s10890_s25 }
 0x33c   :  { %9969 = vrot.lane.b32.xlu1 %v11503_v53, %s10890_s25 }
 0x340   :  { %9979 = vrot.lane.b32.xlu1 %v11543_v34, %s10890_s25 }
 0x344   :  { %1161 = vrot.lane.b32.xlu1 %v11555_v4, %s10890_s25 }
 0x3a4   :  { %v1029_v31 = vpop.xlane.xlu1 %1028 }
 0x3a5   :  { %v1031_v24 = vsub.f32 %v7993_v25, %v1029_v31  ;;  %v1026_v52 = vpop.xlane.xlu0 %1025 }
 0x3a6   :  { %v1030_v33 = vsub.f32 %v1014_v13, %v1026_v52 }
 0x3a7   :  { %v1034_v30 = vmul.f32 1.442695, %v1031_v24 }
 0x3a8   :  { %v1032_v6 = vmul.f32 1.442695, %v1030_v33  ;;  %v9935_v60 = vpop.permute.xlu1 %9934 }
 0x3a9   :  { %10669 = vpow2.f32 %v1034_v30  ;;  %v9937_v16 = vunpack.i.h.bf16 %v9935_v60  ;;  %v9936_v21 = vunpack.i.l.bf16 %v9935_v60 }
 0x3aa   :  { %10671 = vpow2.f32 %v1032_v6 }
 0x3ab   :  { %v9009_v45 = vpack.c.bf16 %v9937_v16, %v9936_v21 }
 0x3ac   :  { %v9945_v57 = vpop.permute.xlu1 %9944 }
 0x3ad   :  { %9010 = vmatprep.subr.bf16.mxu1 %v9009_v45  ;;  %v9947_v25 = vunpack.i.h.bf16 %v9945_v57  ;;  %v9946_v13 = vunpack.i.l.bf16 %v9945_v57 }
 0x3ae   :  { %9012 = vmatpush3.bf16.msra.mxu1 %v9009_v45 }
 0x3af   :  { %v9017_v30 = vpack.c.bf16 %v9947_v25, %v9946_v13 }
 0x3b0   :  { %v9950_v35 = vpop.permute.xlu1 %9949 }
 0x3b1   :  { %v9952_v52 = vunpack.i.h.bf16 %v9950_v35  ;;  %v9951_v33 = vunpack.i.l.bf16 %v9950_v35 }
 0x3b3   :  { %v10670_v14 = vpop.eup %10669 }
 0x3b4   :  { %v1039_v51 = vsel %vm1023_vm3, %v10670_v14, 0.0  ;;  %v10672_v56 = vpop.eup %10671  ;;  %v9955_v24 = vpop.permute.xlu1 %9954 }
 0x3b5   :  { %1040 = vadd.xlane.f32.xlu0 %v1039_v51  ;;  %v1036_v40 = vsel %vm1023_vm3, %v10672_v56, 0.0  ;;  %v9957_v16 = vunpack.i.h.bf16 %v9955_v24  ;;  %v9956_v21 = vunpack.i.l.bf16 %v9955_v24  ;;  %v9021_v51 = vpack.c.bf16 %v9952_v52, %v9951_v33 }
 0x3b9   :  { %1037 = vadd.xlane.f32.xlu0 %v1036_v40  ;;  %v9960_v40 = vpop.permute.xlu1 %9959 }
 0x3ba   :  { %v9962_v57 = vunpack.i.h.bf16 %v9960_v40 }
 0x3bd   :  { %v9970_v24 = vpop.permute.xlu1 %9969 }
 0x3be   :  { %v9972_v52 = vunpack.i.h.bf16 %v9970_v24 }
 0x3cf   :  { %9939 = vrot.lane.b32.xlu0 %v11491_v37, %s10889_s24 }
 0x3d3   :  { %9964 = vrot.lane.b32.xlu0 %v11491_v37, %s10890_s25 }
 0x3d7   :  { %9974 = vrot.lane.b32.xlu0 %v11513_v15, %s10890_s25 }
 0x3db   :  { %1159 = vrot.lane.b32.xlu0 %v11557_v9, %s10890_s25 }
 0x442   :  { %v1041_v17 = vpop.xlane.xlu0 %1040 }
 0x446   :  { %v1038_v36 = vpop.xlane.xlu0 %1037 }
 0x447   :  { %10673 = vrcp.f32 %v1038_v36  ;;  %v9961_v36 = vunpack.i.l.bf16 %v9960_v40 }
 0x448   :  { %10675 = vrcp.f32 %v1041_v17 }
 0x449   :  { %v9029_v25 = vpack.c.bf16 %v9962_v57, %v9961_v36 }
 0x44a   :  { %v9940_v44 = vpop.permute.xlu0 %9939 }
 0x44b   :  { %v9942_v23 = vunpack.i.h.bf16 %v9940_v44  ;;  %v9941_v50 = vunpack.i.l.bf16 %v9940_v44  ;;  %v9025_v44 = vpack.c.bf16 %v9957_v16, %v9956_v21  ;;  %v9980_v16 = vpop.permute.xlu1 %9979 }
 0x44c   :  { %v9982_v21 = vunpack.i.h.bf16 %v9980_v16 }
 0x44d   :  { %v9013_v31 = vpack.c.bf16 %v9942_v23, %v9941_v50 }
 0x44e   :  { %v9965_v45 = vpop.permute.xlu0 %9964 }
 0x44f   :  { %9014 = vmatprep.subr.bf16.mxu1 %v9013_v31  ;;  %v9967_v23 = vunpack.i.h.bf16 %v9965_v45  ;;  %v9966_v50 = vunpack.i.l.bf16 %v9965_v45  ;;  %v9981_v45 = vunpack.i.l.bf16 %v9980_v16  ;;  %v1162_v40 = vpop.permute.xlu1 %1161 }
 0x450   :  { %9016 = vmatpush3.bf16.msra.mxu1 %v9013_v31 }
 0x451   :  { %v10674_v6 = vpop.eup %10673  ;;  %9018 = vmatprep.subr.bf16.mxu1 %v9017_v30  ;;  %v9035_v31 = vpack.c.bf16 %v9967_v23, %v9966_v50 }
 0x452   :  { %v1046_v60 = vmul.f32 %v10674_v6, %v10672_v56  ;;  %v9975_v35 = vpop.permute.xlu0 %9974  ;;  %v10676_v17 = vpop.eup %10675 }
 0x453   :  { %v1047_v13 = vmul.f32 %v10676_v17, %v10670_v14  ;;  %v9971_v14 = vunpack.i.l.bf16 %v9970_v24  ;;  %v9976_v6 = vunpack.i.l.bf16 %v9975_v35 }
 0x454   :  { %9020 = vmatpush3.bf16.msra.mxu1 %v9017_v30  ;;  %8014 = vmatprep.mubr.msk.f32.mxu1 %vm1023_vm3, %v1046_v60  ;;  %v9977_v30 = vunpack.i.h.bf16 %v9975_v35 }
 0x455   :  { %9022 = vmatprep.subr.bf16.mxu1 %v9021_v51  ;;  %v9041_v33 = vpack.c.bf16 %v9972_v52, %v9971_v14 }
 0x456   :  { %v1160_v56 = vpop.permute.xlu0 %1159  ;;  %v9047_v60 = vpack.c.bf16 %v9977_v30, %v9976_v6 }
 0x458   :  { %9024 = vmatpush3.bf16.msra.mxu1 %v9021_v51  ;;  %v9053_v51 = vpack.c.bf16 %v9982_v21, %v9981_v45 }
 0x459   :  { %9026 = vmatprep.subr.bf16.mxu1 %v9025_v44 }
 0x45c   :  { %9028 = vmatpush3.bf16.msra.mxu1 %v9025_v44 }
 0x45d   :  { %9031 = vmatprep.subr.msk.bf16.mxu1 %vm11445_vm2, %v9029_v25 }
 0x45f   :  { %8015 = vmatmul.mubr.msk.f32.vlgmr.msra.gmra.mrb[16].mxu1 %vm1023_vm3, %v1047_v13 }
 0x460   :  { %8037 = vmatprep.mubr.msk.f32.mxu1 %vm911_vm1, %v1160_v56 }
 0x465   :  { %9034 = vmatpush3.bf16.xpose.msk.msra.mxu1 %vm11445_vm2, %v9029_v25 }
 0x466   :  { %9037 = vmatprep.subr.msk.bf16.mxu1 %vm11445_vm2, %v9035_v31 }
 0x46d   :  { %9040 = vmatpush3.bf16.xpose.msk.msra.mxu1 %vm11445_vm2, %v9035_v31 }
 0x46e   :  { %9043 = vmatprep.subr.msk.bf16.mxu1 %vm11445_vm2, %v9041_v33 }
 0x475   :  { %9046 = vmatpush3.bf16.xpose.msk.msra.mxu1 %vm11445_vm2, %v9041_v33 }
 0x476   :  { %9049 = vmatprep.subr.msk.bf16.mxu1 %vm11445_vm2, %v9047_v60 }
 0x47d   :  { %9052 = vmatpush3.bf16.xpose.msk.msra.mxu1 %vm11445_vm2, %v9047_v60 }
 0x47e   :  { %9055 = vmatprep.subr.msk.bf16.mxu1 %vm11445_vm2, %v9053_v51 }
 0x485   :  { %9058 = vmatpush3.bf16.xpose.msk.msra.mxu1 %vm11445_vm2, %v9053_v51 }
 0x48c   :  { %8038 = vmatmul.mubr.msk.f32.vlgmr.msra.gmra.mrb[18].mxu1 %vm911_vm1, %v1162_v40 }
 0x532   :  { %v11621_v57 = vpop.f32.mrb[16].mxu1 }
 0x533   :  { %v11623_v36 = vpop.f32.mrb[17].mxu1 }
 0x55f   :  { %v8039_v44 = vpop.f32.mrb[18].mxu1 }
 0x560   :  { %v1273_v35 = vpop.f32.mrb[19].mxu1  ;;  %v1285_v17 = vsel %vm1023_vm3, %v8039_v44, -inf }
 0x561   :  { %1286 = vmax.xlane.f32.xlu1 %v1285_v17  ;;  %v1282_v25 = vsel %vm1023_vm3, %v1273_v35, -inf }
 0x562   :  { %1283 = vmax.xlane.f32.xlu0 %v1282_v25 }
 0x572   :  { %9989 = vrot.lane.b32.xlu1 %v11491_v37, %s10891_s26 }
 0x576   :  { %9999 = vrot.lane.b32.xlu1 %v11513_v15, %s10891_s26 }
 0x578   :  { %9984 = vrot.lane.b32.xlu0 %v11461_v10, %s10891_s26 }
 0x57c   :  { %9994 = vrot.lane.b32.xlu0 %v11503_v53, %s10891_s26 }
 0x5ee   :  { %v1287_v13 = vpop.xlane.xlu1 %1286 }
 0x5ef   :  { %v1289_v56 = vsub.f32 %v8039_v44, %v1287_v13  ;;  %v1284_v23 = vpop.xlane.xlu0 %1283 }
 0x5f0   :  { %v1288_v50 = vsub.f32 %v1273_v35, %v1284_v23 }
 0x5f1   :  { %v1292_v31 = vmul.f32 1.442695, %v1289_v56 }
 0x5f2   :  { %v1290_v24 = vmul.f32 1.442695, %v1288_v50  ;;  %v9990_v52 = vpop.permute.xlu1 %9989 }
 0x5f3   :  { %10677 = vpow2.f32 %v1292_v31  ;;  %v9992_v14 = vunpack.i.h.bf16 %v9990_v52  ;;  %v9985_v33 = vpop.permute.xlu0 %9984  ;;  %v9991_v30 = vunpack.i.l.bf16 %v9990_v52 }
 0x5f4   :  { %10679 = vpow2.f32 %v1290_v24  ;;  %v9987_v6 = vunpack.i.h.bf16 %v9985_v33  ;;  %v9986_v60 = vunpack.i.l.bf16 %v9985_v33 }
 0x5f5   :  { %v9063_v40 = vpack.c.bf16 %v9992_v14, %v9991_v30 }
 0x5f6   :  { %v9059_v16 = vpack.c.bf16 %v9987_v6, %v9986_v60  ;;  %v10000_v17 = vpop.permute.xlu1 %9999 }
 0x5f7   :  { %v9995_v21 = vpop.permute.xlu0 %9994  ;;  %v10002_v44 = vunpack.i.h.bf16 %v10000_v17  ;;  %v10001_v35 = vunpack.i.l.bf16 %v10000_v17 }
 0x5f8   :  { %v9997_v45 = vunpack.i.h.bf16 %v9995_v21  ;;  %v9996_v51 = vunpack.i.l.bf16 %v9995_v21  ;;  %9060 = vmatprep.subr.bf16.mxu0 %v9059_v16 }
 0x5f9   :  { %9062 = vmatpush3.bf16.msra.mxu0 %v9059_v16  ;;  %v9071_v31 = vpack.c.bf16 %v10002_v44, %v10001_v35 }
 0x5fa   :  { %9064 = vmatprep.subr.bf16.mxu0 %v9063_v40  ;;  %v9067_v25 = vpack.c.bf16 %v9997_v45, %v9996_v51 }
 0x5fd   :  { %v10678_v13 = vpop.eup %10677  ;;  %9066 = vmatpush3.bf16.msra.mxu0 %v9063_v40 }
 0x5fe   :  { %v10680_v56 = vpop.eup %10679  ;;  %9068 = vmatprep.subr.bf16.mxu0 %v9067_v25  ;;  %v1297_v23 = vsel %vm1023_vm3, %v10678_v13, 0.0 }
 0x5ff   :  { %1298 = vadd.xlane.f32.xlu1 %v1297_v23  ;;  %v1294_v50 = vsel %vm1023_vm3, %v10680_v56, 0.0 }
 0x600   :  { %1295 = vadd.xlane.f32.xlu0 %v1294_v50 }
 0x601   :  { %9070 = vmatpush3.bf16.msra.mxu0 %v9067_v25 }
 0x602   :  { %9072 = vmatprep.subr.bf16.mxu0 %v9071_v31 }
 0x605   :  { %9074 = vmatpush3.bf16.msra.mxu0 %v9071_v31 }
 0x610   :  { %10009 = vrot.lane.b32.xlu1 %v11461_v10, %s10892_s27 }
 0x614   :  { %10019 = vrot.lane.b32.xlu1 %v11503_v53, %s10892_s27 }
 0x616   :  { %10004 = vrot.lane.b32.xlu0 %v11543_v34, %s10891_s26 }
 0x618   :  { %10029 = vrot.lane.b32.xlu1 %v11543_v34, %s10892_s27 }
 0x61a   :  { %10014 = vrot.lane.b32.xlu0 %v11491_v37, %s10892_s27 }
 0x61c   :  { %1419 = vrot.lane.b32.xlu1 %v11555_v4, %s10892_s27 }
 0x61e   :  { %10024 = vrot.lane.b32.xlu0 %v11513_v15, %s10892_s27 }
 0x622   :  { %1417 = vrot.lane.b32.xlu0 %v11557_v9, %s10892_s27 }
 0x68c   :  { %v1299_v24 = vpop.xlane.xlu1 %1298 }
 0x68d   :  { %10681 = vrcp.f32 %v1299_v24  ;;  %v1296_v52 = vpop.xlane.xlu0 %1295 }
 0x68e   :  { %10683 = vrcp.f32 %v1296_v52 }
 0x690   :  { %v10010_v14 = vpop.permute.xlu1 %10009 }
 0x691   :  { %v10005_v33 = vpop.permute.xlu0 %10004  ;;  %v10012_v30 = vunpack.i.h.bf16 %v10010_v14  ;;  %v10011_v6 = vunpack.i.l.bf16 %v10010_v14 }
 0x692   :  { %v10007_v60 = vunpack.i.h.bf16 %v10005_v33  ;;  %v10006_v16 = vunpack.i.l.bf16 %v10005_v33 }
 0x693   :  { %v9079_v51 = vpack.c.bf16 %v10012_v30, %v10011_v6 }
 0x694   :  { %v9075_v21 = vpack.c.bf16 %v10007_v60, %v10006_v16  ;;  %v10020_v52 = vpop.permute.xlu1 %10019 }
 0x695   :  { %v10015_v45 = vpop.permute.xlu0 %10014  ;;  %v10022_v14 = vunpack.i.h.bf16 %v10020_v52 }
 0x696   :  { %9076 = vmatprep.subr.bf16.mxu0 %v9075_v21  ;;  %v10017_v23 = vunpack.i.h.bf16 %v10015_v45  ;;  %v10016_v50 = vunpack.i.l.bf16 %v10015_v45 }
 0x697   :  { %v10682_v40 = vpop.eup %10681  ;;  %9078 = vmatpush3.bf16.msra.mxu0 %v9075_v21 }
 0x698   :  { %v10684_v17 = vpop.eup %10683  ;;  %9081 = vmatprep.subr.msk.bf16.mxu0 %vm11445_vm2, %v9079_v51  ;;  %v1305_v25 = vmul.f32 %v10682_v40, %v10678_v13  ;;  %v9085_v24 = vpack.c.bf16 %v10017_v23, %v10016_v50  ;;  %v10030_v60 = vpop.permute.xlu1 %10029 }
 0x699   :  { %v10025_v44 = vpop.permute.xlu0 %10024  ;;  %v1304_v35 = vmul.f32 %v10684_v17, %v10680_v56  ;;  %v10021_v56 = vunpack.i.l.bf16 %v10020_v52  ;;  %v10032_v16 = vunpack.i.h.bf16 %v10030_v60  ;;  %v10031_v21 = vunpack.i.l.bf16 %v10030_v60 }
 0x69a   :  { %v10027_v33 = vunpack.i.h.bf16 %v10025_v44  ;;  %v10026_v30 = vunpack.i.l.bf16 %v10025_v44 }
 0x69b   :  { %8060 = vmatprep.mubr.msk.f32.mxu0 %vm1023_vm3, %v1304_v35  ;;  %v9091_v13 = vpack.c.bf16 %v10022_v14, %v10021_v56  ;;  %v9103_v45 = vpack.c.bf16 %v10032_v16, %v10031_v21 }
 0x69c   :  { %8061 = vmatmul.mubr.msk.f32.vlgmr.msra.gmra.mrb[26].mxu0 %vm1023_vm3, %v1305_v25  ;;  %v9097_v6 = vpack.c.bf16 %v10027_v33, %v10026_v30 }
 0x69d   :  { %v1418_v31 = vpop.permute.xlu0 %1417 }
 0x69e   :  { %8083 = vmatprep.mubr.msk.f32.mxu0 %vm911_vm1, %v1418_v31 }
 0x6a0   :  { %9084 = vmatpush3.bf16.xpose.msk.msra.mxu0 %vm11445_vm2, %v9079_v51  ;;  %v1420_v51 = vpop.permute.xlu1 %1419 }
 0x6a1   :  { %9087 = vmatprep.subr.msk.bf16.mxu0 %vm11445_vm2, %v9085_v24 }
 0x6a8   :  { %9090 = vmatpush3.bf16.xpose.msk.msra.mxu0 %vm11445_vm2, %v9085_v24 }
 0x6a9   :  { %9093 = vmatprep.subr.msk.bf16.mxu0 %vm11445_vm2, %v9091_v13 }
 0x6b0   :  { %9096 = vmatpush3.bf16.xpose.msk.msra.mxu0 %vm11445_vm2, %v9091_v13 }
 0x6b1   :  { %9099 = vmatprep.subr.msk.bf16.mxu0 %vm11445_vm2, %v9097_v6 }
 0x6b8   :  { %9102 = vmatpush3.bf16.xpose.msk.msra.mxu0 %vm11445_vm2, %v9097_v6 }
 0x6b9   :  { %9105 = vmatprep.subr.msk.bf16.mxu0 %vm11445_vm2, %v9103_v45 }
 0x6c0   :  { %9108 = vmatpush3.bf16.xpose.msk.msra.mxu0 %vm11445_vm2, %v9103_v45 }
 0x6c7   :  { %8084 = vmatmul.mubr.msk.f32.vlgmr.msra.gmra.mrb[28].mxu0 %vm911_vm1, %v1420_v51 }
 0x76f   :  { %v11677_v40 = vpop.f32.mrb[26].mxu0 }
 0x770   :  { %v11679_v17 = vpop.f32.mrb[27].mxu0 }
 0x79a   :  { %v8085_v44 = vpop.f32.mrb[28].mxu0 }
 0x79b   :  { %v1531_v35 = vpop.f32.mrb[29].mxu0  ;;  %v1543_v25 = vsel %vm1023_vm3, %v8085_v44, -inf }
 0x79c   :  { %1544 = vmax.xlane.f32.xlu1 %v1543_v25  ;;  %v1540_v23 = vsel %vm1023_vm3, %v1531_v35, -inf }
 0x79d   :  { %1541 = vmax.xlane.f32.xlu0 %v1540_v23 }
 0x7ad   :  { %10039 = vrot.lane.b32.xlu1 %v11491_v37, %s10893_s28 }
 0x7b1   :  { %10049 = vrot.lane.b32.xlu1 %v11513_v15, %s10893_s28 }
 0x7b3   :  { %10034 = vrot.lane.b32.xlu0 %v11461_v10, %s10893_s28 }
 0x7b7   :  { %10044 = vrot.lane.b32.xlu0 %v11503_v53, %s10893_s28 }
 0x829   :  { %v1545_v50 = vpop.xlane.xlu1 %1544 }
 0x82a   :  { %v1547_v31 = vsub.f32 %v8085_v44, %v1545_v50  ;;  %v1542_v24 = vpop.xlane.xlu0 %1541 }
 0x82b   :  { %v1546_v52 = vsub.f32 %v1531_v35, %v1542_v24 }
 0x82c   :  { %v1550_v14 = vmul.f32 1.442695, %v1547_v31 }
 0x82d   :  { %v1548_v56 = vmul.f32 1.442695, %v1546_v52  ;;  %v10040_v13 = vpop.permute.xlu1 %10039 }
 0x82e   :  { %10685 = vpow2.f32 %v1550_v14  ;;  %v10042_v33 = vunpack.i.h.bf16 %v10040_v13  ;;  %v10035_v30 = vpop.permute.xlu0 %10034  ;;  %v10041_v6 = vunpack.i.l.bf16 %v10040_v13 }
 0x82f   :  { %10687 = vpow2.f32 %v1548_v56  ;;  %v10037_v60 = vunpack.i.h.bf16 %v10035_v30  ;;  %v10036_v16 = vunpack.i.l.bf16 %v10035_v30 }
 0x830   :  { %v9113_v23 = vpack.c.bf16 %v10042_v33, %v10041_v6 }
 0x831   :  { %v9109_v21 = vpack.c.bf16 %v10037_v60, %v10036_v16  ;;  %v10050_v59 = vpop.permute.xlu1 %10049 }
 0x832   :  { %v10045_v45 = vpop.permute.xlu0 %10044  ;;  %v10052_v44 = vunpack.i.h.bf16 %v10050_v59  ;;  %v10051_v35 = vunpack.i.l.bf16 %v10050_v59 }
 0x833   :  { %v10047_v51 = vunpack.i.h.bf16 %v10045_v45  ;;  %v10046_v25 = vunpack.i.l.bf16 %v10045_v45  ;;  %9110 = vmatprep.subr.bf16.mxu1 %v9109_v21 }
 0x834   :  { %9112 = vmatpush3.bf16.msra.mxu1 %v9109_v21  ;;  %v9121_v56 = vpack.c.bf16 %v10052_v44, %v10051_v35 }
 0x835   :  { %9114 = vmatprep.subr.bf16.mxu1 %v9113_v23  ;;  %v9117_v50 = vpack.c.bf16 %v10047_v51, %v10046_v25 }
 0x838   :  { %v10686_v31 = vpop.eup %10685  ;;  %9116 = vmatpush3.bf16.msra.mxu1 %v9113_v23 }
 0x839   :  { %v10688_v24 = vpop.eup %10687  ;;  %9118 = vmatprep.subr.bf16.mxu1 %v9117_v50  ;;  %v1555_v52 = vsel %vm1023_vm3, %v10686_v31, 0.0 }
 0x83a   :  { %1556 = vadd.xlane.f32.xlu1 %v1555_v52  ;;  %v1552_v14 = vsel %vm1023_vm3, %v10688_v24, 0.0 }
 0x83b   :  { %1553 = vadd.xlane.f32.xlu0 %v1552_v14 }
 0x83c   :  { %9120 = vmatpush3.bf16.msra.mxu1 %v9117_v50 }
 0x83d   :  { %9122 = vmatprep.subr.bf16.mxu1 %v9121_v56 }
 0x840   :  { %9124 = vmatpush3.bf16.msra.mxu1 %v9121_v56 }
 0x84b   :  { %10059 = vrot.lane.b32.xlu1 %v11461_v10, %s10894_s0 }
 0x84f   :  { %10069 = vrot.lane.b32.xlu1 %v11503_v53, %s10894_s0 }
 0x851   :  { %10054 = vrot.lane.b32.xlu0 %v11543_v34, %s10893_s28 }
 0x853   :  { %10079 = vrot.lane.b32.xlu1 %v11543_v34, %s10894_s0 }
 0x855   :  { %10064 = vrot.lane.b32.xlu0 %v11491_v37, %s10894_s0 }
 0x857   :  { %1677 = vrot.lane.b32.xlu1 %v11555_v4, %s10894_s0 }
 0x859   :  { %10074 = vrot.lane.b32.xlu0 %v11513_v15, %s10894_s0 }
 0x85d   :  { %1675 = vrot.lane.b32.xlu0 %v11557_v9, %s10894_s0 }
 0x8c7   :  { %v1557_v59 = vpop.xlane.xlu1 %1556 }
 0x8c8   :  { %10689 = vrcp.f32 %v1557_v59  ;;  %v1554_v13 = vpop.xlane.xlu0 %1553 }
 0x8c9   :  { %10691 = vrcp.f32 %v1554_v13 }
 0x8cb   :  { %v10060_v33 = vpop.permute.xlu1 %10059 }
 0x8cc   :  { %v10055_v30 = vpop.permute.xlu0 %10054  ;;  %v10062_v6 = vunpack.i.h.bf16 %v10060_v33  ;;  %v10061_v60 = vunpack.i.l.bf16 %v10060_v33 }
 0x8cd   :  { %v10057_v16 = vunpack.i.h.bf16 %v10055_v30  ;;  %v10056_v21 = vunpack.i.l.bf16 %v10055_v30 }
 0x8ce   :  { %v9129_v25 = vpack.c.bf16 %v10062_v6, %v10061_v60 }
 0x8cf   :  { %v9125_v45 = vpack.c.bf16 %v10057_v16, %v10056_v21  ;;  %v10070_v59 = vpop.permute.xlu1 %10069 }
 0x8d0   :  { %v10065_v51 = vpop.permute.xlu0 %10064  ;;  %v10072_v13 = vunpack.i.h.bf16 %v10070_v59 }
 0x8d1   :  { %9126 = vmatprep.subr.bf16.mxu1 %v9125_v45  ;;  %v10067_v50 = vunpack.i.h.bf16 %v10065_v51  ;;  %v10066_v52 = vunpack.i.l.bf16 %v10065_v51 }
 0x8d2   :  { %v10690_v4 = vpop.eup %10689  ;;  %9128 = vmatpush3.bf16.msra.mxu1 %v9125_v45 }
 0x8d3   :  { %v10692_v23 = vpop.eup %10691  ;;  %9131 = vmatprep.subr.msk.bf16.mxu1 %vm11445_vm2, %v9129_v25  ;;  %v1563_v35 = vmul.f32 %v10690_v4, %v10686_v31  ;;  %v9135_v56 = vpack.c.bf16 %v10067_v50, %v10066_v52  ;;  %v10080_v60 = vpop.permute.xlu1 %10079 }
 0x8d4   :  { %v10075_v9 = vpop.permute.xlu0 %10074  ;;  %v1562_v44 = vmul.f32 %v10692_v23, %v10688_v24  ;;  %v10071_v24 = vunpack.i.l.bf16 %v10070_v59  ;;  %v10082_v16 = vunpack.i.h.bf16 %v10080_v60  ;;  %v10081_v21 = vunpack.i.l.bf16 %v10080_v60 }
 0x8d5   :  { %v10077_v33 = vunpack.i.h.bf16 %v10075_v9  ;;  %v10076_v30 = vunpack.i.l.bf16 %v10075_v9 }
 0x8d6   :  { %8106 = vmatprep.mubr.msk.f32.mxu1 %vm1023_vm3, %v1562_v44  ;;  %v9141_v31 = vpack.c.bf16 %v10072_v13, %v10071_v24  ;;  %v9153_v45 = vpack.c.bf16 %v10082_v16, %v10081_v21 }
 0x8d7   :  { %8107 = vmatmul.mubr.msk.f32.vlgmr.msra.gmra.mrb[20].mxu1 %vm1023_vm3, %v1563_v35  ;;  %v9147_v6 = vpack.c.bf16 %v10077_v33, %v10076_v30  ;;  %v1678_v51 = vpop.permute.xlu1 %1677 }
 0x8d8   :  { %v1676_v14 = vpop.permute.xlu0 %1675 }
 0x8d9   :  { %8129 = vmatprep.mubr.msk.f32.mxu1 %vm911_vm1, %v1676_v14 }
 0x8db   :  { %9134 = vmatpush3.bf16.xpose.msk.msra.mxu1 %vm11445_vm2, %v9129_v25 }
 0x8dc   :  { %9137 = vmatprep.subr.msk.bf16.mxu1 %vm11445_vm2, %v9135_v56 }
 0x8e3   :  { %9140 = vmatpush3.bf16.xpose.msk.msra.mxu1 %vm11445_vm2, %v9135_v56 }
 0x8e4   :  { %9143 = vmatprep.subr.msk.bf16.mxu1 %vm11445_vm2, %v9141_v31 }
 0x8eb   :  { %9146 = vmatpush3.bf16.xpose.msk.msra.mxu1 %vm11445_vm2, %v9141_v31 }
 0x8ec   :  { %9149 = vmatprep.subr.msk.bf16.mxu1 %vm11445_vm2, %v9147_v6 }
 0x8f3   :  { %9152 = vmatpush3.bf16.xpose.msk.msra.mxu1 %vm11445_vm2, %v9147_v6 }
 0x8f4   :  { %9155 = vmatprep.subr.msk.bf16.mxu1 %vm11445_vm2, %v9153_v45 }
 0x8fb   :  { %9158 = vmatpush3.bf16.xpose.msk.msra.mxu1 %vm11445_vm2, %v9153_v45 }
 0x902   :  { %8130 = vmatmul.mubr.msk.f32.vlgmr.msra.gmra.mrb[22].mxu1 %vm911_vm1, %v1678_v51 }
 0x9aa   :  { %v11733_v25 = vpop.f32.mrb[20].mxu1 }
 0x9ab   :  { %v11735_v4 = vpop.f32.mrb[21].mxu1 }
 0x9d5   :  { %v8131_v23 = vpop.f32.mrb[22].mxu1 }
 0x9d6   :  { %v1789_v9 = vpop.f32.mrb[23].mxu1  ;;  %v1801_v44 = vsel %vm1023_vm3, %v8131_v23, -inf }
 0x9d7   :  { %1802 = vmax.xlane.f32.xlu1 %v1801_v44  ;;  %v1798_v35 = vsel %vm1023_vm3, %v1789_v9, -inf }
 0x9d8   :  { %1799 = vmax.xlane.f32.xlu0 %v1798_v35 }
 0x9e8   :  { %10089 = vrot.lane.b32.xlu1 %v11491_v37, %s10895_s29 }
 0x9ee   :  { %10084 = vrot.lane.b32.xlu0 %v11461_v10, %s10895_s29 }
 0x9f2   :  { %10094 = vrot.lane.b32.xlu0 %v11503_v53, %s10895_s29 }
 0xa64   :  { %v1803_v50 = vpop.xlane.xlu1 %1802 }
 0xa65   :  { %v1805_v52 = vsub.f32 %v8131_v23, %v1803_v50  ;;  %v1800_v14 = vpop.xlane.xlu0 %1799 }
 0xa66   :  { %v1804_v56 = vsub.f32 %v1789_v9, %v1800_v14 }
 0xa67   :  { %v1808_v59 = vmul.f32 1.442695, %v1805_v52 }
 0xa68   :  { %v1806_v13 = vmul.f32 1.442695, %v1804_v56  ;;  %v10090_v24 = vpop.permute.xlu1 %10089 }
 0xa69   :  { %10693 = vpow2.f32 %v1808_v59  ;;  %v10092_v31 = vunpack.i.h.bf16 %v10090_v24  ;;  %v10085_v33 = vpop.permute.xlu0 %10084  ;;  %v10091_v30 = vunpack.i.l.bf16 %v10090_v24 }
 0xa6a   :  { %10695 = vpow2.f32 %v1806_v13  ;;  %v10087_v6 = vunpack.i.h.bf16 %v10085_v33  ;;  %v10086_v37 = vunpack.i.l.bf16 %v10085_v33 }
 0xa6b   :  { %v9163_v53 = vpack.c.bf16 %v10092_v31, %v10091_v30 }
 0xa6c   :  { %v9159_v60 = vpack.c.bf16 %v10087_v6, %v10086_v37 }
 0xa6d   :  { %v10095_v16 = vpop.permute.xlu0 %10094 }
 0xa6e   :  { %v10097_v10 = vunpack.i.h.bf16 %v10095_v16  ;;  %v10096_v21 = vunpack.i.l.bf16 %v10095_v16  ;;  %9160 = vmatprep.subr.bf16.mxu0 %v9159_v60 }
 0xa6f   :  { %9162 = vmatpush3.bf16.msra.mxu0 %v9159_v60 }
 0xa70   :  { %9164 = vmatprep.subr.bf16.mxu0 %v9163_v53  ;;  %v9167_v45 = vpack.c.bf16 %v10097_v10, %v10096_v21 }
 0xa73   :  { %v10694_v51 = vpop.eup %10693  ;;  %9166 = vmatpush3.bf16.msra.mxu0 %v9163_v53 }
 0xa74   :  { %v10696_v23 = vpop.eup %10695  ;;  %9168 = vmatprep.subr.bf16.mxu0 %v9167_v45  ;;  %v1813_v9 = vsel %vm1023_vm3, %v10694_v51, 0.0 }
 0xa75   :  { %1814 = vadd.xlane.f32.xlu1 %v1813_v9  ;;  %v1810_v44 = vsel %vm1023_vm3, %v10696_v23, 0.0 }
 0xa76   :  { %1811 = vadd.xlane.f32.xlu0 %v1810_v44 }
 0xa77   :  { %9170 = vmatpush3.bf16.msra.mxu0 %v9167_v45 }
 0xa86   :  { %10099 = vrot.lane.b32.xlu1 %v11513_v15, %s10895_s29 }
 0xa8c   :  { %10104 = vrot.lane.b32.xlu0 %v11543_v34, %s10895_s29 }
 0xb02   :  { %v1815_v35 = vpop.xlane.xlu1 %1814 }
 0xb03   :  { %10697 = vrcp.f32 %v1815_v35  ;;  %v1812_v50 = vpop.xlane.xlu0 %1811 }
 0xb04   :  { %10699 = vrcp.f32 %v1812_v50 }
 0xb06   :  { %v10100_v52 = vpop.permute.xlu1 %10099 }
 0xb07   :  { %v10102_v14 = vunpack.i.h.bf16 %v10100_v52  ;;  %v10101_v56 = vunpack.i.l.bf16 %v10100_v52  ;;  %v10105_v59 = vpop.permute.xlu0 %10104 }
 0xb08   :  { %v10107_v13 = vunpack.i.h.bf16 %v10105_v59  ;;  %v10106_v24 = vunpack.i.l.bf16 %v10105_v59 }
 0xb09   :  { %v9171_v31 = vpack.c.bf16 %v10102_v14, %v10101_v56 }
 0xb0a   :  { %v9175_v33 = vpack.c.bf16 %v10107_v13, %v10106_v24 }
 0xb0b   :  { %9172 = vmatprep.subr.bf16.mxu0 %v9171_v31 }
 0xb0c   :  { %9174 = vmatpush3.bf16.msra.mxu0 %v9171_v31 }
 0xb0d   :  { %v10698_v30 = vpop.eup %10697  ;;  %9176 = vmatprep.subr.bf16.mxu0 %v9175_v33 }
 0xb0e   :  { %v10700_v15 = vpop.eup %10699  ;;  %v1821_v34 = vmul.f32 %v10698_v30, %v10694_v51 }
 0xb0f   :  { %v1820_v6 = vmul.f32 %v10700_v15, %v10696_v23 }
 0xb10   :  { %9178 = vmatpush3.bf16.msra.mxu0 %v9175_v33 }
 0xb11   :  { %8152 = vmatprep.mubr.msk.f32.mxu0 %vm1023_vm3, %v1820_v6  ;;  %9181 = vmatprep.subr.msk.bf16.mxu0 %vm11445_vm2, %v11519_v58 }
 0xb13   :  { %8153 = vmatmul.mubr.msk.f32.vlgmr.msra.gmra.mrb[30].mxu0 %vm1023_vm3, %v1821_v34 }
 0xb14   :  { %8175 = vmatprep.mubr.msk.f32.mxu0 %vm911_vm1, %v11565_v11 }
 0xb19   :  { %9184 = vmatpush3.bf16.xpose.msk.msra.mxu0 %vm11445_vm2, %v11519_v58 }
 0xb1a   :  { %9187 = vmatprep.subr.msk.bf16.mxu0 %vm11445_vm2, %v11531_v63 }
 0xb21   :  { %9190 = vmatpush3.bf16.xpose.msk.msra.mxu0 %vm11445_vm2, %v11531_v63 }
 0xb22   :  { %9193 = vmatprep.subr.msk.bf16.mxu0 %vm11445_vm2, %v11537_v22 }
 0xb29   :  { %9196 = vmatpush3.bf16.xpose.msk.msra.mxu0 %vm11445_vm2, %v11537_v22 }
 0xb2a   :  { %9199 = vmatprep.subr.msk.bf16.mxu0 %vm11445_vm2, %v11547_v19 }
 0xb31   :  { %9202 = vmatpush3.bf16.xpose.msk.msra.mxu0 %vm11445_vm2, %v11547_v19 }
 0xb32   :  { %9205 = vmatprep.subr.msk.bf16.mxu0 %vm11445_vm2, %v11551_v48 }
 0xb39   :  { %9208 = vmatpush3.bf16.xpose.msk.msra.mxu0 %vm11445_vm2, %v11551_v48 }
 0xb40   :  { %8176 = vmatmul.mubr.msk.f32.vlgmr.msra.gmra.mrb[32].mxu0 %vm911_vm1, %v11563_v29 }
 0xbe6   :  { %v11787_v58 = vpop.f32.mrb[30].mxu0 }
 0xbe7   :  { %v11789_v63 = vpop.f32.mrb[31].mxu0 }
 0xc13   :  { %v8177_v22 = vpop.f32.mrb[32].mxu0 }
 0xc14   :  { %v2090_v37 = vpop.f32.mrb[33].mxu0  ;;  %v2102_v60 = vsel %vm1023_vm3, %v8177_v22, -inf }
 0xc15   :  { %2103 = vmax.xlane.f32.xlu0 %v2102_v60  ;;  %v2099_v19 = vsel %vm1023_vm3, %v2090_v37, -inf }
 0xc16   :  { %2100 = vmax.xlane.f32.xlu1 %v2099_v19 }
 0xc27   :  { %10114 = vrot.lane.b32.xlu1 %v11533_v27, %s10889_s24 }
 0xc2b   :  { %10109 = vrot.lane.b32.xlu0 %v11521_v43, %s10889_s24  ;;  %10119 = vrot.lane.b32.xlu1 %v11539_v3, %s10889_s24 }
 0xc2f   :  { %10124 = vrot.lane.b32.xlu0 %v11549_v20, %s10889_s24  ;;  %10129 = vrot.lane.b32.xlu1 %v11553_v1, %s10889_s24 }
 0xca2   :  { %v2104_v48 = vpop.xlane.xlu0 %2103 }
 0xca3   :  { %v2106_v16 = vsub.f32 %v8177_v22, %v2104_v48  ;;  %v2101_v10 = vpop.xlane.xlu1 %2100 }
 0xca4   :  { %v2105_v21 = vsub.f32 %v2090_v37, %v2101_v10 }
 0xca5   :  { %v2109_v53 = vmul.f32 1.442695, %v2106_v16 }
 0xca6   :  { %v2107_v45 = vmul.f32 1.442695, %v2105_v21  ;;  %v10110_v51 = vpop.permute.xlu0 %10109 }
 0xca7   :  { %10701 = vpow2.f32 %v2109_v53  ;;  %v10112_v23 = vunpack.i.h.bf16 %v10110_v51  ;;  %v10111_v9 = vunpack.i.l.bf16 %v10110_v51  ;;  %v10115_v44 = vpop.permute.xlu1 %10114 }
 0xca8   :  { %10703 = vpow2.f32 %v2107_v45  ;;  %v10117_v35 = vunpack.i.h.bf16 %v10115_v44  ;;  %v10116_v50 = vunpack.i.l.bf16 %v10115_v44 }
 0xca9   :  { %v9209_v52 = vpack.c.bf16 %v10112_v23, %v10111_v9 }
 0xcaa   :  { %v9213_v14 = vpack.c.bf16 %v10117_v35, %v10116_v50  ;;  %v10125_v59 = vpop.permute.xlu0 %10124 }
 0xcab   :  { %9210 = vmatprep.subr.bf16.mxu1 %v9209_v52  ;;  %v10120_v56 = vpop.permute.xlu1 %10119  ;;  %v10127_v33 = vunpack.i.h.bf16 %v10125_v59  ;;  %v10126_v30 = vunpack.i.l.bf16 %v10125_v59 }
 0xcac   :  { %v10122_v13 = vunpack.i.h.bf16 %v10120_v56  ;;  %v10121_v24 = vunpack.i.l.bf16 %v10120_v56  ;;  %9212 = vmatpush3.bf16.msra.mxu1 %v9209_v52 }
 0xcad   :  { %9214 = vmatprep.subr.bf16.mxu1 %v9213_v14  ;;  %v9221_v48 = vpack.c.bf16 %v10127_v33, %v10126_v30 }
 0xcae   :  { %v9217_v31 = vpack.c.bf16 %v10122_v13, %v10121_v24 }
 0xcaf   :  { %v10130_v15 = vpop.permute.xlu1 %10129 }
 0xcb0   :  { %9216 = vmatpush3.bf16.msra.mxu1 %v9213_v14  ;;  %v10132_v37 = vunpack.i.h.bf16 %v10130_v15  ;;  %v10131_v60 = vunpack.i.l.bf16 %v10130_v15 }
 0xcb1   :  { %v10702_v6 = vpop.eup %10701  ;;  %9218 = vmatprep.subr.bf16.mxu1 %v9217_v31 }
 0xcb2   :  { %v10704_v34 = vpop.eup %10703  ;;  %v2114_v22 = vsel %vm1023_vm3, %v10702_v6, 0.0  ;;  %v9225_v16 = vpack.c.bf16 %v10132_v37, %v10131_v60 }
 0xcb3   :  { %2115 = vadd.xlane.f32.xlu1 %v2114_v22  ;;  %v2111_v19 = vsel %vm1023_vm3, %v10704_v34, 0.0 }
 0xcb4   :  { %2112 = vadd.xlane.f32.xlu0 %v2111_v19  ;;  %9220 = vmatpush3.bf16.msra.mxu1 %v9217_v31 }
 0xcb5   :  { %9222 = vmatprep.subr.bf16.mxu1 %v9221_v48 }
 0xcb8   :  { %9224 = vmatpush3.bf16.msra.mxu1 %v9221_v48 }
 0xcb9   :  { %9226 = vmatprep.subr.bf16.mxu1 %v9225_v16 }
 0xcbc   :  { %9228 = vmatpush3.bf16.msra.mxu1 %v9225_v16 }
 0xcc4   :  { %10139 = vrot.lane.b32.xlu1 %v11533_v27, %s10890_s25 }
 0xcc8   :  { %10149 = vrot.lane.b32.xlu1 %v11549_v20, %s10890_s25 }
 0xcca   :  { %10134 = vrot.lane.b32.xlu0 %v11521_v43, %s10890_s25 }
 0xccc   :  { %2234 = vrot.lane.b32.xlu1 %v11565_v11, %s10890_s25 }
 0xcce   :  { %10144 = vrot.lane.b32.xlu0 %v11539_v3, %s10890_s25 }
 0xcd2   :  { %10154 = vrot.lane.b32.xlu0 %v11553_v1, %s10890_s25 }
 0xcd6   :  { %2236 = vrot.lane.b32.xlu0 %v11563_v29, %s10890_s25 }
 0xd40   :  { %v2116_v10 = vpop.xlane.xlu1 %2115 }
 0xd41   :  { %10705 = vrcp.f32 %v2116_v10  ;;  %v2113_v21 = vpop.xlane.xlu0 %2112 }
 0xd42   :  { %10707 = vrcp.f32 %v2113_v21 }
 0xd44   :  { %v10140_v53 = vpop.permute.xlu1 %10139 }
 0xd45   :  { %v10135_v45 = vpop.permute.xlu0 %10134  ;;  %v10142_v52 = vunpack.i.h.bf16 %v10140_v53  ;;  %v10141_v14 = vunpack.i.l.bf16 %v10140_v53 }
 0xd46   :  { %v10137_v51 = vunpack.i.h.bf16 %v10135_v45  ;;  %v10136_v23 = vunpack.i.l.bf16 %v10135_v45 }
 0xd47   :  { %v9235_v13 = vpack.c.bf16 %v10142_v52, %v10141_v14 }
 0xd48   :  { %v9229_v9 = vpack.c.bf16 %v10137_v51, %v10136_v23  ;;  %v10150_v44 = vpop.permute.xlu1 %10149 }
 0xd49   :  { %v10145_v31 = vpop.permute.xlu0 %10144 }
 0xd4a   :  { %9231 = vmatprep.subr.msk.bf16.mxu1 %vm11445_vm2, %v9229_v9  ;;  %v10147_v33 = vunpack.i.h.bf16 %v10145_v31  ;;  %v10146_v30 = vunpack.i.l.bf16 %v10145_v31 }
 0xd4b   :  { %v10706_v35 = vpop.eup %10705 }
 0xd4c   :  { %v10708_v50 = vpop.eup %10707  ;;  %v2122_v59 = vmul.f32 %v10706_v35, %v10702_v6  ;;  %v2235_v24 = vpop.permute.xlu1 %2234  ;;  %v9241_v15 = vpack.c.bf16 %v10147_v33, %v10146_v30  ;;  %v10152_v6 = vunpack.i.h.bf16 %v10150_v44 }
 0xd4d   :  { %v2121_v56 = vmul.f32 %v10708_v50, %v10704_v34  ;;  %v10151_v34 = vunpack.i.l.bf16 %v10150_v44  ;;  %v10155_v37 = vpop.permute.xlu0 %10154 }
 0xd4e   :  { %v10157_v60 = vunpack.i.h.bf16 %v10155_v37  ;;  %v10156_v19 = vunpack.i.l.bf16 %v10155_v37 }
 0xd4f   :  { %8198 = vmatprep.mubr.msk.f32.mxu1 %vm1023_vm3, %v2121_v56  ;;  %v9247_v22 = vpack.c.bf16 %v10152_v6, %v10151_v34 }
 0xd50   :  { %8199 = vmatmul.mubr.msk.f32.vlgmr.msra.gmra.mrb[24].mxu1 %vm1023_vm3, %v2122_v59  ;;  %v9253_v48 = vpack.c.bf16 %v10157_v60, %v10156_v19 }
 0xd51   :  { %9234 = vmatpush3.bf16.xpose.msk.msra.mxu1 %vm11445_vm2, %v9229_v9  ;;  %8221 = vmatprep.mubr.msk.f32.mxu1 %vm911_vm1, %v2235_v24  ;;  %v2237_v16 = vpop.permute.xlu0 %2236 }
 0xd52   :  { %9237 = vmatprep.subr.msk.bf16.mxu1 %vm11445_vm2, %v9235_v13 }
 0xd59   :  { %9240 = vmatpush3.bf16.xpose.msk.msra.mxu1 %vm11445_vm2, %v9235_v13 }
 0xd5a   :  { %9243 = vmatprep.subr.msk.bf16.mxu1 %vm11445_vm2, %v9241_v15 }
 0xd61   :  { %9246 = vmatpush3.bf16.xpose.msk.msra.mxu1 %vm11445_vm2, %v9241_v15 }
 0xd62   :  { %9249 = vmatprep.subr.msk.bf16.mxu1 %vm11445_vm2, %v9247_v22 }
 0xd69   :  { %9252 = vmatpush3.bf16.xpose.msk.msra.mxu1 %vm11445_vm2, %v9247_v22 }
 0xd6a   :  { %9255 = vmatprep.subr.msk.bf16.mxu1 %vm11445_vm2, %v9253_v48 }
 0xd71   :  { %9258 = vmatpush3.bf16.xpose.msk.msra.mxu1 %vm11445_vm2, %v9253_v48 }
 0xd78   :  { %8222 = vmatmul.mubr.msk.f32.vlgmr.msra.gmra.mrb[26].mxu1 %vm911_vm1, %v2237_v16 }
 0xe23   :  { %v11843_v10 = vpop.f32.mrb[24].mxu1 }
 0xe24   :  { %v11845_v21 = vpop.f32.mrb[25].mxu1 }
 0xe4b   :  { %v8223_v53 = vpop.f32.mrb[26].mxu1 }
 0xe4c   :  { %v2348_v45 = vpop.f32.mrb[27].mxu1  ;;  %v2360_v51 = vsel %vm1023_vm3, %v8223_v53, -inf }
 0xe4d   :  { %2361 = vmax.xlane.f32.xlu0 %v2360_v51  ;;  %v2357_v23 = vsel %vm1023_vm3, %v2348_v45, -inf }
 0xe4e   :  { %2358 = vmax.xlane.f32.xlu1 %v2357_v23 }
 0xe5f   :  { %10164 = vrot.lane.b32.xlu1 %v11533_v27, %s10891_s26 }
 0xe63   :  { %10159 = vrot.lane.b32.xlu0 %v11521_v43, %s10891_s26  ;;  %10169 = vrot.lane.b32.xlu1 %v11539_v3, %s10891_s26 }
 0xe67   :  { %10174 = vrot.lane.b32.xlu0 %v11549_v20, %s10891_s26  ;;  %10179 = vrot.lane.b32.xlu1 %v11553_v1, %s10891_s26 }
 0xeda   :  { %v2362_v9 = vpop.xlane.xlu0 %2361 }
 0xedb   :  { %v2364_v44 = vsub.f32 %v8223_v53, %v2362_v9  ;;  %v2359_v35 = vpop.xlane.xlu1 %2358 }
 0xedc   :  { %v2363_v50 = vsub.f32 %v2348_v45, %v2359_v35 }
 0xedd   :  { %v2367_v52 = vmul.f32 1.442695, %v2364_v44 }
 0xede   :  { %v2365_v14 = vmul.f32 1.442695, %v2363_v50  ;;  %v10160_v56 = vpop.permute.xlu0 %10159 }
 0xedf   :  { %10709 = vpow2.f32 %v2367_v52  ;;  %v10162_v59 = vunpack.i.h.bf16 %v10160_v56  ;;  %v10161_v13 = vunpack.i.l.bf16 %v10160_v56  ;;  %v10165_v24 = vpop.permute.xlu1 %10164 }
 0xee0   :  { %10711 = vpow2.f32 %v2365_v14  ;;  %v10167_v31 = vunpack.i.h.bf16 %v10165_v24  ;;  %v10166_v33 = vunpack.i.l.bf16 %v10165_v24 }
 0xee1   :  { %v9259_v30 = vpack.c.bf16 %v10162_v59, %v10161_v13 }
 0xee2   :  { %v9263_v15 = vpack.c.bf16 %v10167_v31, %v10166_v33  ;;  %v10175_v34 = vpop.permute.xlu0 %10174 }
 0xee3   :  { %9260 = vmatprep.subr.bf16.mxu0 %v9259_v30  ;;  %v10170_v6 = vpop.permute.xlu1 %10169  ;;  %v10177_v19 = vunpack.i.h.bf16 %v10175_v34  ;;  %v10176_v48 = vunpack.i.l.bf16 %v10175_v34 }
 0xee4   :  { %v10172_v22 = vunpack.i.h.bf16 %v10170_v6  ;;  %v10171_v37 = vunpack.i.l.bf16 %v10170_v6  ;;  %9262 = vmatpush3.bf16.msra.mxu0 %v9259_v30 }
 0xee5   :  { %9264 = vmatprep.subr.bf16.mxu0 %v9263_v15  ;;  %v9271_v35 = vpack.c.bf16 %v10177_v19, %v10176_v48 }
 0xee6   :  { %v9267_v60 = vpack.c.bf16 %v10172_v22, %v10171_v37 }
 0xee7   :  { %v10180_v16 = vpop.permute.xlu1 %10179 }
 0xee8   :  { %9266 = vmatpush3.bf16.msra.mxu0 %v9263_v15  ;;  %v10182_v23 = vunpack.i.h.bf16 %v10180_v16  ;;  %v10181_v9 = vunpack.i.l.bf16 %v10180_v16 }
 0xee9   :  { %v10710_v53 = vpop.eup %10709  ;;  %9268 = vmatprep.subr.bf16.mxu0 %v9267_v60 }
 0xeea   :  { %v10712_v45 = vpop.eup %10711  ;;  %v2372_v51 = vsel %vm1023_vm3, %v10710_v53, 0.0  ;;  %v9275_v50 = vpack.c.bf16 %v10182_v23, %v10181_v9 }
 0xeeb   :  { %2373 = vadd.xlane.f32.xlu1 %v2372_v51  ;;  %v2369_v44 = vsel %vm1023_vm3, %v10712_v45, 0.0 }
 0xeec   :  { %2370 = vadd.xlane.f32.xlu0 %v2369_v44  ;;  %9270 = vmatpush3.bf16.msra.mxu0 %v9267_v60 }
 0xeed   :  { %9272 = vmatprep.subr.bf16.mxu0 %v9271_v35 }
 0xef0   :  { %9274 = vmatpush3.bf16.msra.mxu0 %v9271_v35 }
 0xef1   :  { %9276 = vmatprep.subr.bf16.mxu0 %v9275_v50 }
 0xef4   :  { %9278 = vmatpush3.bf16.msra.mxu0 %v9275_v50 }
 0xefc   :  { %10189 = vrot.lane.b32.xlu1 %v11533_v27, %s10892_s27 }
 0xf00   :  { %10199 = vrot.lane.b32.xlu1 %v11549_v20, %s10892_s27 }
 0xf02   :  { %10184 = vrot.lane.b32.xlu0 %v11521_v43, %s10892_s27 }
 0xf04   :  { %2492 = vrot.lane.b32.xlu1 %v11565_v11, %s10892_s27 }
 0xf06   :  { %10194 = vrot.lane.b32.xlu0 %v11539_v3, %s10892_s27 }
 0xf0a   :  { %10204 = vrot.lane.b32.xlu0 %v11553_v1, %s10892_s27 }
 0xf0e   :  { %2494 = vrot.lane.b32.xlu0 %v11563_v29, %s10892_s27 }
 0xf78   :  { %v2374_v52 = vpop.xlane.xlu1 %2373 }
 0xf79   :  { %10713 = vrcp.f32 %v2374_v52  ;;  %v2371_v14 = vpop.xlane.xlu0 %2370 }
 0xf7a   :  { %10715 = vrcp.f32 %v2371_v14 }
 0xf7c   :  { %v10190_v56 = vpop.permute.xlu1 %10189 }
 0xf7d   :  { %v10185_v59 = vpop.permute.xlu0 %10184  ;;  %v10192_v6 = vunpack.i.h.bf16 %v10190_v56  ;;  %v10191_v34 = vunpack.i.l.bf16 %v10190_v56 }
 0xf7e   :  { %v10187_v13 = vunpack.i.h.bf16 %v10185_v59  ;;  %v10186_v24 = vunpack.i.l.bf16 %v10185_v59 }
 0xf7f   :  { %v9285_v60 = vpack.c.bf16 %v10192_v6, %v10191_v34 }
 0xf80   :  { %v9279_v31 = vpack.c.bf16 %v10187_v13, %v10186_v24  ;;  %v10200_v33 = vpop.permute.xlu1 %10199 }
 0xf81   :  { %v10195_v48 = vpop.permute.xlu0 %10194 }
 0xf82   :  { %9281 = vmatprep.subr.msk.bf16.mxu0 %vm11445_vm2, %v9279_v31  ;;  %v10197_v16 = vunpack.i.h.bf16 %v10195_v48  ;;  %v10196_v51 = vunpack.i.l.bf16 %v10195_v48 }
 0xf83   :  { %v10714_v30 = vpop.eup %10713 }
 0xf84   :  { %v10716_v15 = vpop.eup %10715  ;;  %v2380_v37 = vmul.f32 %v10714_v30, %v10710_v53  ;;  %v2493_v19 = vpop.permute.xlu1 %2492  ;;  %v9291_v23 = vpack.c.bf16 %v10197_v16, %v10196_v51  ;;  %v10202_v53 = vunpack.i.h.bf16 %v10200_v33 }
 0xf85   :  { %v2379_v22 = vmul.f32 %v10716_v15, %v10712_v45  ;;  %v10201_v45 = vunpack.i.l.bf16 %v10200_v33  ;;  %v10205_v44 = vpop.permute.xlu0 %10204 }
 0xf86   :  { %v10207_v35 = vunpack.i.h.bf16 %v10205_v44  ;;  %v10206_v50 = vunpack.i.l.bf16 %v10205_v44 }
 0xf87   :  { %8244 = vmatprep.mubr.msk.f32.mxu0 %vm1023_vm3, %v2379_v22  ;;  %v9297_v9 = vpack.c.bf16 %v10202_v53, %v10201_v45 }
 0xf88   :  { %8245 = vmatmul.mubr.msk.f32.vlgmr.msra.gmra.mrb[34].mxu0 %vm1023_vm3, %v2380_v37  ;;  %v9303_v52 = vpack.c.bf16 %v10207_v35, %v10206_v50 }
 0xf89   :  { %9284 = vmatpush3.bf16.xpose.msk.msra.mxu0 %vm11445_vm2, %v9279_v31  ;;  %8267 = vmatprep.mubr.msk.f32.mxu0 %vm911_vm1, %v2493_v19  ;;  %v2495_v14 = vpop.permute.xlu0 %2494 }
 0xf8a   :  { %9287 = vmatprep.subr.msk.bf16.mxu0 %vm11445_vm2, %v9285_v60 }
 0xf91   :  { %9290 = vmatpush3.bf16.xpose.msk.msra.mxu0 %vm11445_vm2, %v9285_v60 }
 0xf92   :  { %9293 = vmatprep.subr.msk.bf16.mxu0 %vm11445_vm2, %v9291_v23 }
 0xf99   :  { %9296 = vmatpush3.bf16.xpose.msk.msra.mxu0 %vm11445_vm2, %v9291_v23 }
 0xf9a   :  { %9299 = vmatprep.subr.msk.bf16.mxu0 %vm11445_vm2, %v9297_v9 }
 0xfa1   :  { %9302 = vmatpush3.bf16.xpose.msk.msra.mxu0 %vm11445_vm2, %v9297_v9 }
 0xfa2   :  { %9305 = vmatprep.subr.msk.bf16.mxu0 %vm11445_vm2, %v9303_v52 }
 0xfa9   :  { %9308 = vmatpush3.bf16.xpose.msk.msra.mxu0 %vm11445_vm2, %v9303_v52 }
 0xfb0   :  { %8268 = vmatmul.mubr.msk.f32.vlgmr.msra.gmra.mrb[36].mxu0 %vm911_vm1, %v2495_v14 }
0x105b   :  { %v11899_v56 = vpop.f32.mrb[34].mxu0 }
0x105c   :  { %v11901_v59 = vpop.f32.mrb[35].mxu0 }
0x1083   :  { %v8269_v13 = vpop.f32.mrb[36].mxu0 }
0x1084   :  { %v2606_v24 = vpop.f32.mrb[37].mxu0  ;;  %v2618_v31 = vsel %vm1023_vm3, %v8269_v13, -inf }
0x1085   :  { %2619 = vmax.xlane.f32.xlu0 %v2618_v31  ;;  %v2615_v33 = vsel %vm1023_vm3, %v2606_v24, -inf }
0x1086   :  { %2616 = vmax.xlane.f32.xlu1 %v2615_v33 }
0x1097   :  { %10214 = vrot.lane.b32.xlu1 %v11533_v27, %s10893_s28 }
0x109b   :  { %10209 = vrot.lane.b32.xlu0 %v11521_v43, %s10893_s28  ;;  %10219 = vrot.lane.b32.xlu1 %v11539_v3, %s10893_s28 }
0x109f   :  { %10224 = vrot.lane.b32.xlu0 %v11549_v20, %s10893_s28  ;;  %10229 = vrot.lane.b32.xlu1 %v11553_v1, %s10893_s28 }
0x1112   :  { %v2620_v30 = vpop.xlane.xlu0 %2619 }
0x1113   :  { %v2622_v15 = vsub.f32 %v8269_v13, %v2620_v30  ;;  %v2617_v6 = vpop.xlane.xlu1 %2616 }
0x1114   :  { %v2621_v34 = vsub.f32 %v2606_v24, %v2617_v6 }
0x1115   :  { %v2625_v22 = vmul.f32 1.442695, %v2622_v15 }
0x1116   :  { %v2623_v37 = vmul.f32 1.442695, %v2621_v34  ;;  %v10210_v60 = vpop.permute.xlu0 %10209 }
0x1117   :  { %10717 = vpow2.f32 %v2625_v22  ;;  %v10212_v19 = vunpack.i.h.bf16 %v10210_v60  ;;  %v10211_v48 = vunpack.i.l.bf16 %v10210_v60  ;;  %v10215_v16 = vpop.permute.xlu1 %10214 }
0x1118   :  { %10719 = vpow2.f32 %v2623_v37  ;;  %v10217_v51 = vunpack.i.h.bf16 %v10215_v16  ;;  %v10216_v23 = vunpack.i.l.bf16 %v10215_v16 }
0x1119   :  { %v9309_v53 = vpack.c.bf16 %v10212_v19, %v10211_v48 }
0x111a   :  { %v9313_v45 = vpack.c.bf16 %v10217_v51, %v10216_v23  ;;  %v10225_v44 = vpop.permute.xlu0 %10224 }
0x111b   :  { %9310 = vmatprep.subr.bf16.mxu1 %v9309_v53  ;;  %v10220_v9 = vpop.permute.xlu1 %10219  ;;  %v10227_v14 = vunpack.i.h.bf16 %v10225_v44  ;;  %v10226_v13 = vunpack.i.l.bf16 %v10225_v44 }
0x111c   :  { %v10222_v35 = vunpack.i.h.bf16 %v10220_v9  ;;  %v10221_v50 = vunpack.i.l.bf16 %v10220_v9  ;;  %9312 = vmatpush3.bf16.msra.mxu1 %v9309_v53 }
0x111d   :  { %9314 = vmatprep.subr.bf16.mxu1 %v9313_v45  ;;  %v9321_v22 = vpack.c.bf16 %v10227_v14, %v10226_v13 }
0x111e   :  { %v9317_v52 = vpack.c.bf16 %v10222_v35, %v10221_v50 }
0x111f   :  { %v10230_v24 = vpop.permute.xlu1 %10229 }
0x1120   :  { %9316 = vmatpush3.bf16.msra.mxu1 %v9313_v45  ;;  %v10232_v15 = vunpack.i.h.bf16 %v10230_v24  ;;  %v10231_v6 = vunpack.i.l.bf16 %v10230_v24 }
0x1121   :  { %v10718_v31 = vpop.eup %10717  ;;  %9318 = vmatprep.subr.bf16.mxu1 %v9317_v52 }
0x1122   :  { %v10720_v33 = vpop.eup %10719  ;;  %v2630_v30 = vsel %vm1023_vm3, %v10718_v31, 0.0  ;;  %v9325_v37 = vpack.c.bf16 %v10232_v15, %v10231_v6 }
0x1123   :  { %2631 = vadd.xlane.f32.xlu1 %v2630_v30  ;;  %v2627_v34 = vsel %vm1023_vm3, %v10720_v33, 0.0 }
0x1124   :  { %2628 = vadd.xlane.f32.xlu0 %v2627_v34  ;;  %9320 = vmatpush3.bf16.msra.mxu1 %v9317_v52 }
0x1125   :  { %9322 = vmatprep.subr.bf16.mxu1 %v9321_v22 }
0x1128   :  { %9324 = vmatpush3.bf16.msra.mxu1 %v9321_v22 }
0x1129   :  { %9326 = vmatprep.subr.bf16.mxu1 %v9325_v37 }
0x112c   :  { %9328 = vmatpush3.bf16.msra.mxu1 %v9325_v37 }
0x1134   :  { %10239 = vrot.lane.b32.xlu1 %v11533_v27, %s10894_s0 }
0x1138   :  { %10249 = vrot.lane.b32.xlu1 %v11549_v20, %s10894_s0 }
0x113a   :  { %10234 = vrot.lane.b32.xlu0 %v11521_v43, %s10894_s0 }
0x113c   :  { %2750 = vrot.lane.b32.xlu1 %v11565_v11, %s10894_s0 }
0x113e   :  { %10244 = vrot.lane.b32.xlu0 %v11539_v3, %s10894_s0 }
0x1142   :  { %10254 = vrot.lane.b32.xlu0 %v11553_v1, %s10894_s0 }
0x1146   :  { %2752 = vrot.lane.b32.xlu0 %v11563_v29, %s10894_s0 }
0x11b0   :  { %v2632_v60 = vpop.xlane.xlu1 %2631 }
0x11b1   :  { %10721 = vrcp.f32 %v2632_v60  ;;  %v2629_v19 = vpop.xlane.xlu0 %2628 }
0x11b2   :  { %10723 = vrcp.f32 %v2629_v19 }
0x11b4   :  { %v10240_v48 = vpop.permute.xlu1 %10239 }
0x11b5   :  { %v10235_v16 = vpop.permute.xlu0 %10234  ;;  %v10242_v44 = vunpack.i.h.bf16 %v10240_v48  ;;  %v10241_v35 = vunpack.i.l.bf16 %v10240_v48 }
0x11b6   :  { %v10237_v51 = vunpack.i.h.bf16 %v10235_v16  ;;  %v10236_v23 = vunpack.i.l.bf16 %v10235_v16 }
0x11b7   :  { %v9335_v29 = vpack.c.bf16 %v10242_v44, %v10241_v35 }
0x11b8   :  { %v9329_v53 = vpack.c.bf16 %v10237_v51, %v10236_v23  ;;  %v10250_v45 = vpop.permute.xlu1 %10249 }
0x11b9   :  { %v10245_v13 = vpop.permute.xlu0 %10244 }
0x11ba   :  { %9331 = vmatprep.subr.msk.bf16.mxu1 %vm11445_vm2, %v9329_v53  ;;  %v10247_v24 = vunpack.i.h.bf16 %v10245_v13  ;;  %v10246_v30 = vunpack.i.l.bf16 %v10245_v13 }
0x11bb   :  { %v10722_v11 = vpop.eup %10721 }
0x11bc   :  { %v10724_v9 = vpop.eup %10723  ;;  %v2638_v52 = vmul.f32 %v10722_v11, %v10718_v31  ;;  %v2751_v14 = vpop.permute.xlu1 %2750  ;;  %v9341_v15 = vpack.c.bf16 %v10247_v24, %v10246_v30  ;;  %v10252_v31 = vunpack.i.h.bf16 %v10250_v45 }
0x11bd   :  { %v2637_v50 = vmul.f32 %v10724_v9, %v10720_v33  ;;  %v10251_v33 = vunpack.i.l.bf16 %v10250_v45  ;;  %v10255_v34 = vpop.permute.xlu0 %10254 }
0x11be   :  { %v10257_v22 = vunpack.i.h.bf16 %v10255_v34  ;;  %v10256_v37 = vunpack.i.l.bf16 %v10255_v34 }
0x11bf   :  { %8290 = vmatprep.mubr.msk.f32.mxu1 %vm1023_vm3, %v2637_v50  ;;  %v9347_v6 = vpack.c.bf16 %v10252_v31, %v10251_v33 }
0x11c0   :  { %8291 = vmatmul.mubr.msk.f32.vlgmr.msra.gmra.mrb[28].mxu1 %vm1023_vm3, %v2638_v52  ;;  %v9353_v60 = vpack.c.bf16 %v10257_v22, %v10256_v37 }
0x11c1   :  { %9334 = vmatpush3.bf16.xpose.msk.msra.mxu1 %vm11445_vm2, %v9329_v53  ;;  %8313 = vmatprep.mubr.msk.f32.mxu1 %vm911_vm1, %v2751_v14  ;;  %v2753_v19 = vpop.permute.xlu0 %2752 }
0x11c2   :  { %9337 = vmatprep.subr.msk.bf16.mxu1 %vm11445_vm2, %v9335_v29 }
0x11c9   :  { %9340 = vmatpush3.bf16.xpose.msk.msra.mxu1 %vm11445_vm2, %v9335_v29 }
0x11ca   :  { %9343 = vmatprep.subr.msk.bf16.mxu1 %vm11445_vm2, %v9341_v15 }
0x11d1   :  { %9346 = vmatpush3.bf16.xpose.msk.msra.mxu1 %vm11445_vm2, %v9341_v15 }
0x11d2   :  { %9349 = vmatprep.subr.msk.bf16.mxu1 %vm11445_vm2, %v9347_v6 }
0x11d9   :  { %9352 = vmatpush3.bf16.xpose.msk.msra.mxu1 %vm11445_vm2, %v9347_v6 }
0x11da   :  { %9355 = vmatprep.subr.msk.bf16.mxu1 %vm11445_vm2, %v9353_v60 }
0x11e1   :  { %9358 = vmatpush3.bf16.xpose.msk.msra.mxu1 %vm11445_vm2, %v9353_v60 }
0x11e8   :  { %8314 = vmatmul.mubr.msk.f32.vlgmr.msra.gmra.mrb[30].mxu1 %vm911_vm1, %v2753_v19 }
0x1293   :  { %v8292_v48 = vpop.f32.mrb[28].mxu1 }
0x1294   :  { %v2741_v16 = vpop.f32.mrb[29].mxu1 }
0x12bb   :  { %v8315_v51 = vpop.f32.mrb[30].mxu1 }
0x12bc   :  { %v2864_v23 = vpop.f32.mrb[31].mxu1  ;;  %v2876_v53 = vsel %vm1023_vm3, %v8315_v51, -inf }
0x12bd   :  { %2877 = vmax.xlane.f32.xlu0 %v2876_v53  ;;  %v2873_v45 = vsel %vm1023_vm3, %v2864_v23, -inf }
0x12be   :  { %2874 = vmax.xlane.f32.xlu1 %v2873_v45 }
0x12cf   :  { %10259 = vrot.lane.b32.xlu1 %v11521_v43, %s10895_s29 }
0x12d3   :  { %10269 = vrot.lane.b32.xlu1 %v11539_v3, %s10895_s29 }
0x12d7   :  { %10274 = vrot.lane.b32.xlu1 %v11549_v20, %s10895_s29 }
0x12db   :  { %10279 = vrot.lane.b32.xlu1 %v11553_v1, %s10895_s29 }
0x12df   :  { %1937 = vrot.lane.b32.xlu1 %v11677_v40, %s10895_s29 }
0x12e3   :  { %1945 = vrot.lane.b32.xlu1 %v11733_v25, %s10893_s28 }
0x12e7   :  { %1953 = vrot.lane.b32.xlu1 %v11787_v58, %s10891_s26 }
0x12eb   :  { %3012 = vrot.lane.b32.xlu1 %v11899_v56, %s10895_s29 }
0x12ef   :  { %3020 = vrot.lane.b32.xlu1 %v8292_v48, %s10893_s28 }
0x134a   :  { %v2878_v43 = vpop.xlane.xlu0 %2877 }
0x134b   :  { %v2880_v3 = vsub.f32 %v8315_v51, %v2878_v43  ;;  %v2875_v20 = vpop.xlane.xlu1 %2874  ;;  %v3038_v51 = vld [vmem:[%s13180_s7] sm:$0xff] }
0x134c   :  { %v2879_v11 = vsub.f32 %v2864_v23, %v2875_v20  ;;  %v3039_v23 = vld [vmem:[%s13180_s7 + $0x8] sm:$0xff]  ;;  %v3041_v20 = vld [vmem:[%s13180_s7 + $0x18] sm:$0xff] }
0x134d   :  { %v2883_v9 = vmul.f32 1.442695, %v2880_v3  ;;  %v9379_v45 = vpack.c.bf16 %v3039_v23, %v3038_v51  ;;  %v3040_v3 = vld [vmem:[%s13180_s7 + $0x10] sm:$0xff]  ;;  %v3544_v23 = vsub.s32 6, %v11213_v38 }
0x134e   :  { %v2881_v1 = vmul.f32 1.442695, %v2879_v11 }
0x134f   :  { %10725 = vpow2.f32 %v2883_v9  ;;  %v10260_v44 = vpop.permute.xlu1 %10259 }
0x1350   :  { %v10262_v40 = vunpack.i.h.bf16 %v10260_v44  ;;  %v10261_v35 = vunpack.i.l.bf16 %v10260_v44  ;;  %10727 = vpow2.f32 %v2881_v1  ;;  %v9383_v44 = vpack.c.bf16 %v3041_v20, %v3040_v3 }
0x1351   :  { %v3564_v3 = vsub.s32 7, %v11213_v38 }
0x1352   :  { %v9359_v25 = vpack.c.bf16 %v10262_v40, %v10261_v35  ;;  %v3042_v35 = vld [vmem:[%s13180_s7 + $0x20] sm:$0xff] }
0x1353   :  { %v10270_v14 = vpop.permute.xlu1 %10269 }
0x1354   :  { %9360 = vmatprep.subr.bf16.mxu0 %v9359_v25  ;;  %v10272_v30 = vunpack.i.h.bf16 %v10270_v14  ;;  %v10271_v15 = vunpack.i.l.bf16 %v10270_v14 }
0x1355   :  { %9362 = vmatpush3.bf16.msra.mxu0 %v9359_v25  ;;  %v3043_v25 = vld [vmem:[%s13180_s7 + $0x28] sm:$0xff] }
0x1357   :  { %v10275_v24 = vpop.permute.xlu1 %10274 }
0x1358   :  { %v10276_v6 = vunpack.i.l.bf16 %v10275_v24 }
0x1359   :  { %v10726_v58 = vpop.eup %10725 }
0x135a   :  { %v2888_v50 = vsel %vm1023_vm3, %v10726_v58, 0.0  ;;  %v10728_v56 = vpop.eup %10727 }
0x135b   :  { %2889 = vadd.xlane.f32.xlu0 %v2888_v50  ;;  %v2885_v52 = vsel %vm1023_vm3, %v10728_v56, 0.0  ;;  %v10280_v34 = vpop.permute.xlu1 %10279 }
0x135c   :  { %v10282_v60 = vunpack.i.h.bf16 %v10280_v34  ;;  %v10281_v19 = vunpack.i.l.bf16 %v10280_v34 }
0x135e   :  { %v9375_v53 = vpack.c.bf16 %v10282_v60, %v10281_v19  ;;  %v12048_v60 = vld [vmem:[%s13174_s1 + $0x8] sm:$0xff] }
0x135f   :  { %2886 = vadd.xlane.f32.xlu0 %v2885_v52  ;;  %v1938_v50 = vpop.permute.xlu1 %1937  ;;  %v3045_v52 = vld [vmem:[%s13180_s7 + $0x38] sm:$0xff] }
0x1375   :  { %10264 = vrot.lane.b32.xlu0 %v11533_v27, %s10895_s29 }
0x1379   :  { %1935 = vrot.lane.b32.xlu0 %v11679_v17, %s10895_s29 }
0x137d   :  { %1943 = vrot.lane.b32.xlu0 %v11735_v4, %s10893_s28  ;;  %v10277_v4 = vunpack.i.h.bf16 %v10275_v24  ;;  %v1958_v24 = vsel %vm911_vm1, %v11621_v57, %v1938_v50  ;;  %v7101_v57 = vld [vmem:[%s13178_s5 + $0x30] sm:$0xff] }
0x137f   :  { %v9371_v48 = vpack.c.bf16 %v10277_v4, %v10276_v6 }
0x1381   :  { %1951 = vrot.lane.b32.xlu0 %v11789_v63, %s10891_s26  ;;  %v9367_v63 = vpack.c.bf16 %v10272_v30, %v10271_v15  ;;  %v7099_v15 = vld [vmem:[%s13178_s5 + $0x20] sm:$0xff] }
0x1385   :  { %3010 = vrot.lane.b32.xlu0 %v11901_v59, %s10895_s29 }
0x1389   :  { %3018 = vrot.lane.b32.xlu0 %v2741_v16, %s10893_s28 }
0x13e8   :  { %v2890_v29 = vpop.xlane.xlu0 %2889 }
0x13ec   :  { %v2887_v13 = vpop.xlane.xlu0 %2886 }
0x13ed   :  { %10729 = vrcp.f32 %v2887_v13 }
0x13ee   :  { %10731 = vrcp.f32 %v2890_v29  ;;  %v1946_v29 = vpop.permute.xlu1 %1945 }
0x13f0   :  { %v10265_v27 = vpop.permute.xlu0 %10264 }
0x13f1   :  { %v10267_v17 = vunpack.i.h.bf16 %v10265_v27  ;;  %v10266_v31 = vunpack.i.l.bf16 %v10265_v27  ;;  %v1960_v27 = vsel %vm73_vm0, %v1958_v24, %v1946_v29 }
0x13f2   :  { %v1954_v13 = vpop.permute.xlu1 %1953 }
0x13f3   :  { %v9363_v33 = vpack.c.bf16 %v10267_v17, %v10266_v31  ;;  %v1963_v30 = vsel %vm1961_vm5, %v1960_v27, %v1954_v13  ;;  %v7100_v17 = vld [vmem:[%s13178_s5 + $0x28] sm:$0xff] }
0x13f4   :  { %v1936_v59 = vpop.permute.xlu0 %1935  ;;  %v9435_v31 = vpack.c.bf16 %v7100_v17, %v7099_v15 }
0x13f5   :  { %9364 = vmatprep.subr.bf16.mxu0 %v9363_v33  ;;  %v1957_v9 = vsel %vm911_vm1, %v11623_v36, %v1936_v59  ;;  %v9387_v36 = vpack.c.bf16 %v3043_v25, %v3042_v35 }
0x13f6   :  { %9366 = vmatpush3.bf16.msra.mxu0 %v9363_v33  ;;  %v7102_v33 = vld [vmem:[%s13178_s5 + $0x38] sm:$0xff]  ;;  %v3013_v51 = vpop.permute.xlu1 %3012 }
0x13f7   :  { %v10730_v22 = vpop.eup %10729  ;;  %9368 = vmatprep.subr.bf16.mxu0 %v9367_v63  ;;  %v9439_v4 = vpack.c.bf16 %v7102_v33, %v7101_v57  ;;  %v3033_v35 = vsel %vm911_vm1, %v11843_v10, %v3013_v51 }
0x13f8   :  { %v2895_v37 = vmul.f32 %v10730_v22, %v10728_v56  ;;  %v1944_v16 = vpop.permute.xlu0 %1943  ;;  %v10732_v43 = vpop.eup %10731  ;;  %v12040_v22 = vld [vmem:[%s13174_s1] sm:$0xff] }
0x13f9   :  { %v2896_v1 = vmul.f32 %v10732_v43, %v10726_v58  ;;  %v1959_v40 = vsel %vm73_vm0, %v1957_v9, %v1944_v16  ;;  %v3044_v58 = vld [vmem:[%s13180_s7 + $0x30] sm:$0xff] }
0x13fa   :  { %9370 = vmatpush3.bf16.msra.mxu0 %v9367_v63  ;;  %8336 = vmatprep.mubr.msk.f32.mxu0 %vm1023_vm3, %v2895_v37  ;;  %v9391_v14 = vpack.c.bf16 %v3045_v52, %v3044_v58  ;;  %v3021_v20 = vpop.permute.xlu1 %3020 }
0x13fb   :  { %9372 = vmatprep.subr.bf16.mxu0 %v9371_v48 }
0x13fc   :  { %v1952_v11 = vpop.permute.xlu0 %1951 }
0x13fd   :  { %v1962_v56 = vsel %vm1961_vm5, %v1959_v40, %v1952_v11 }
0x13fe   :  { %9374 = vmatpush3.bf16.msra.mxu0 %v9371_v48 }
0x13ff   :  { %9376 = vmatprep.subr.bf16.mxu0 %v9375_v53 }
0x1402   :  { %9378 = vmatpush3.bf16.msra.mxu0 %v9375_v53  ;;  %v3011_v53 = vpop.permute.xlu0 %3010 }
0x1403   :  { %9380 = vmatprep.subr.bf16.mxu0 %v9379_v45 }
0x1405   :  { %8337 = vmatmul.mubr.msk.f32.vlgmr.msra.gmra.mrb[38].mxu0 %vm1023_vm3, %v2896_v1 }
0x1406   :  { %9382 = vmatpush3.bf16.msra.mxu0 %v9379_v45  ;;  %8355 = vmatprep.mubr.msk.f32.mxu0 %vm3046_vm4, %v1962_v56  ;;  %v12061_v45 = vld [vmem:[%s13176_s3] sm:$0xff]  ;;  %v3019_v11 = vpop.permute.xlu0 %3018 }
0x1407   :  { %9384 = vmatprep.subr.bf16.mxu0 %v9383_v44  ;;  %v3545_v43 = vrot.slane %v12061_v45, %v3544_v23  ;;  %v3565_v1 = vrot.slane %v12061_v45, %v3564_v3 }
0x1409   :  { %v3546_v9 = vmul.f32 %v3545_v43, %v11228_v2  ;;  %v3547_v56 = vmul.f32 %v3545_v43, %v11239_v18  ;;  %v3549_v18 = vmul.f32 %v3545_v43, %v11252_v39  ;;  %v3551_v13 = vmul.f32 %v3545_v43, %v11268_v62 }
0x140a   :  { %9386 = vmatpush3.bf16.msra.mxu0 %v9383_v44  ;;  %v3032_v44 = vsel %vm911_vm1, %v11845_v21, %v3011_v53  ;;  %v3548_v21 = vmul.f32 %v3545_v43, %v11242_v26  ;;  %v3552_v39 = vmul.f32 %v3545_v43, %v11272_v0  ;;  %v3553_v27 = vmul.f32 %v3545_v43, %v11292_v12 }
0x140b   :  { %9388 = vmatprep.subr.bf16.mxu0 %v9387_v36  ;;  %v3034_v25 = vsel %vm73_vm0, %v3032_v44, %v3019_v11  ;;  %v12077_v52 = vadd.f32 %v3565_v1, %v3546_v9  ;;  %v12083_v10 = vadd.f32 %v3565_v1, %v3547_v56  ;;  %v12093_v26 = vadd.f32 %v3565_v1, %v3549_v18 }
0x140c   :  { %v12086_v29 = vadd.f32 %v3565_v1, %v3548_v21  ;;  %v3554_v62 = vmul.f32 %v3545_v43, %v11303_v5  ;;  %v12113_v0 = vadd.f32 %v3565_v1, %v3553_v27  ;;  %v3555_v15 = vmul.f32 %v3545_v43, %v11311_v41  ;;  %v3217_v27 = vld [vmem:[%s13181_s8 + $0x8] sm:$0xff] }
0x140d   :  { %v3557_v5 = vmul.f32 %v3545_v43, %v11328_v49  ;;  %v3558_v33 = vmul.f32 %v3545_v43, %v11332_v54  ;;  %v3561_v54 = vmul.f32 %v3545_v43, %v11365_v8 }
0x140e   :  { %9390 = vmatpush3.bf16.msra.mxu0 %v9387_v36  ;;  %v3035_v36 = vsel %vm73_vm0, %v3033_v35, %v3021_v20  ;;  %v12116_v17 = vadd.f32 %v3565_v1, %v3554_v62  ;;  %v12123_v12 = vadd.f32 %v3565_v1, %v3555_v15  ;;  %v3218_v62 = vld [vmem:[%s13181_s8 + $0x10] sm:$0xff] }
0x140f   :  { %9392 = vmatprep.subr.bf16.mxu0 %v9391_v14  ;;  %v12133_v41 = vadd.f32 %v3565_v1, %v3557_v5  ;;  %v3219_v5 = vld [vmem:[%s13181_s8 + $0x18] sm:$0xff] }
0x1412   :  { %9394 = vmatpush3.bf16.msra.mxu0 %v9391_v14  ;;  %v3550_v14 = vmul.f32 %v3545_v43, %v11260_v46  ;;  %v12103_v46 = vadd.f32 %v3565_v1, %v3551_v13 }
0x1413   :  { %9436 = vmatprep.subr.bf16.mxu0 %v9435_v31 }
0x1414   :  { %v12096_v24 = vadd.f32 %v3565_v1, %v3550_v14 }
0x1415   :  { %8356 = vmatmul.mubr.msk.f32.vlgmr.msra.gmra.mrb[40].mxu0 %vm3046_vm4, %v1963_v30  ;;  %v12106_v30 = vadd.f32 %v3565_v1, %v3552_v39  ;;  %v3216_v39 = vld [vmem:[%s13181_s8] sm:$0xff] }
0x1416   :  { %9438 = vmatpush3.bf16.msra.mxu0 %v9435_v31 }
0x1417   :  { %9440 = vmatprep.subr.bf16.mxu0 %v9439_v4 }
0x141a   :  { %9442 = vmatpush3.bf16.msra.mxu0 %v9439_v4 }
0x141b   :  { %9452 = vmatprep.subr.bf16.mxu0 %v9435_v31 }
0x14d8   :  { %v8338_v6 = vpop.f32.mrb[38].mxu0 }
0x14d9   :  { %3028 = vrot.lane.b32.xlu1 %v8338_v6, %s10891_s26  ;;  %v2999_v63 = vpop.f32.mrb[39].mxu0  ;;  %v3560_v6 = vmul.f32 %v3545_v43, %v11349_v32 }
0x14da   :  { %3026 = vrot.lane.b32.xlu0 %v2999_v63, %s10891_s26 }
0x14db   :  { %v12146_v63 = vadd.f32 %v3565_v1, %v3560_v6 }
0x14e8   :  { %v8357_v34 = vpop.f32.mrb[40].mxu0 }
0x14e9   :  { %v3125_v59 = vpop.f32.mrb[41].mxu0  ;;  %v12051_v19 = vadd.f32 %v12048_v60, %v8357_v34 }
0x14ea   :  { %v12043_v37 = vadd.f32 %v12040_v22, %v3125_v59 }
0x14eb   :  { %v3151_v16 = vsel %vm73_vm0, %v12051_v19, 0.0 }
0x14ec   :  { %v3148_v48 = vsel %vm73_vm0, %v12043_v37, 0.0 }
0x14f9   :  { %3149 = vadd.xlane.f32.xlu0 %v3148_v48 }
0x14fd   :  { %3152 = vadd.xlane.f32.xlu1 %v3151_v16 }
0x154b   :  { %v3029_v40 = vpop.permute.xlu1 %3028 }
0x154c   :  { %v3027_v50 = vpop.permute.xlu0 %3026  ;;  %v3037_v2 = vsel %vm1961_vm5, %v3035_v36, %v3029_v40 }
0x154d   :  { %v3036_v58 = vsel %vm1961_vm5, %v3034_v25, %v3027_v50 }
0x154e   :  { %8358 = vmatprep.mubr.msk.f32.mxu0 %vm3046_vm4, %v3036_v58 }
0x154f   :  { %8359 = vmatmul.mubr.msk.f32.gmra.mrb[42].mxu0 %vm3046_vm4, %v3037_v2 }
0x1550   :  { %8421 = vmatprep.mubr.msk.f32.mxu0 %vm73_vm0, %v12077_v52 }
0x1553   :  { %8422 = vmatmul.mubr.msk.f32.vlgmr.msra.gmra.mrb[44].mxu0 %vm73_vm0, %v12083_v10 }
0x1554   :  { %8424 = vmatprep.mubr.msk.f32.mxu0 %vm73_vm0, %v12086_v29  ;;  %9454 = vmatpush3.bf16.msra.mxu0 %v9435_v31  ;;  %v3556_v31 = vmul.f32 %v3545_v43, %v11315_v42  ;;  %v3559_v42 = vmul.f32 %v3545_v43, %v11345_v28  ;;  %v12152_v28 = vadd.f32 %v3565_v1, %v3561_v54 }
0x1555   :  { %9456 = vmatprep.subr.bf16.mxu0 %v9439_v4 }
0x1556   :  { %v12126_v57 = vadd.f32 %v3565_v1, %v3556_v31  ;;  %v12143_v49 = vadd.f32 %v3565_v1, %v3559_v42  ;;  %v9395_v31 = vpack.c.bf16 %v3217_v27, %v3216_v39  ;;  %v9399_v42 = vpack.c.bf16 %v3219_v5, %v3218_v62 }
0x1557   :  { %8425 = vmatmul.mubr.msk.f32.gmra.mrb[46].mxu0 %vm73_vm0, %v12093_v26  ;;  %v13186_v62 = vsub.s32 4, %v11213_v38 }
0x1558   :  { %8427 = vmatprep.mubr.msk.f32.mxu0 %vm73_vm0, %v12096_v24  ;;  %9458 = vmatpush3.bf16.msra.mxu0 %v9439_v4  ;;  %v12136_v4 = vadd.f32 %v3565_v1, %v3558_v33 }
0x1559   :  { %9396 = vmatprep.subr.bf16.mxu1 %v9395_v31 }
0x155a   :  { %9398 = vmatpush3.bf16.msra.mxu1 %v9395_v31 }
0x155b   :  { %8428 = vmatmul.mubr.msk.f32.gmra.mrb[48].mxu0 %vm73_vm0, %v12103_v46  ;;  %9400 = vmatprep.subr.bf16.mxu1 %v9399_v42 }
0x155c   :  { %8430 = vmatprep.mubr.msk.f32.mxu0 %vm73_vm0, %v12106_v30 }
0x155e   :  { %9402 = vmatpush3.bf16.msra.mxu1 %v9399_v42  ;;  %v12235_v42 = vrot.slane %v12061_v45, %v13186_v62 }
0x155f   :  { %8431 = vmatmul.mubr.msk.f32.gmra.mrb[50].mxu0 %vm73_vm0, %v12113_v0 }
0x1560   :  { %8433 = vmatprep.mubr.msk.f32.mxu0 %vm73_vm0, %v12116_v17 }
0x1563   :  { %8434 = vmatmul.mubr.msk.f32.gmra.mrb[52].mxu0 %vm73_vm0, %v12123_v12 }
0x1564   :  { %8436 = vmatprep.mubr.msk.f32.mxu0 %vm73_vm0, %v12126_v57 }
0x1567   :  { %8437 = vmatmul.mubr.msk.f32.gmra.mrb[54].mxu0 %vm73_vm0, %v12133_v41 }
0x1568   :  { %8439 = vmatprep.mubr.msk.f32.mxu0 %vm73_vm0, %v12136_v4 }
0x156b   :  { %8440 = vmatmul.mubr.msk.f32.gmra.mrb[56].mxu0 %vm73_vm0, %v12143_v49 }
0x156c   :  { %8442 = vmatprep.mubr.msk.f32.mxu0 %vm73_vm0, %v12146_v63 }
0x156f   :  { %8443 = vmatmul.mubr.msk.f32.gmra.mrb[58].mxu0 %vm73_vm0, %v12152_v28 }
0x1586   :  { %v3150_v16 = vpop.xlane.xlu0 %3149 }
0x1587   :  { %v3160_v51 = vmul.f32 0.03125, %v3150_v16 }
0x1589   :  { %v3164_v3 = vsub.f32 %v12043_v37, %v3160_v51 }
0x158a   :  { %v3153_v32 = vpop.xlane.xlu1 %3152 }
0x158b   :  { %v3161_v34 = vmul.f32 0.03125, %v3153_v32 }
0x158d   :  { %v12157_v59 = vsub.f32 %v12051_v19, %v3161_v34 }
0x158f   :  { %v3169_v8 = vmul.f32 %v12157_v59, %v12157_v59 }
0x1591   :  { %v3175_v48 = vsel %vm73_vm0, %v3169_v8, 0.0 }
0x1592   :  { %3176 = vadd.xlane.f32.xlu1 %v3175_v48 }
0x161f   :  { %v3177_v6 = vpop.xlane.xlu1 %3176 }
0x1620   :  { %v3185_v54 = vmul.f32 0.03125, %v3177_v6  ;;  %v13185_v6 = vsub.s32 5, %v11213_v38 }
0x1622   :  { %v8360_v23 = vpop.f32.mrb[42].mxu0  ;;  %v3189_v48 = vadd.f32 1e-05, %v3185_v54 }
0x1623   :  { %v3135_v53 = vpop.f32.mrb[43].mxu0  ;;  %v12167_v20 = vadd.f32 %v12048_v60, %v8360_v23 }
0x1624   :  { %v12163_v43 = vadd.f32 %v12040_v22, %v3135_v53  ;;  %v3168_v22 = vmul.f32 %v3164_v3, %v3164_v3  ;;  %10733 = vrsqrt.f32 %v3189_v48 }
0x1625   :  { %v3157_v40 = vsel %vm73_vm0, %v12167_v20, 0.0 }
0x1626   :  { %v12169_v11 = vpop.f32.mrb[44].mxu0  ;;  %v3154_v9 = vsel %vm73_vm0, %v12163_v43, 0.0  ;;  %v3172_v60 = vsel %vm73_vm0, %v3168_v22, 0.0 }
0x1627   :  { %v12173_v1 = vpop.f32.mrb[45].mxu0  ;;  %3155 = vadd.xlane.f32.xlu0 %v3154_v9 }
0x162a   :  { %v12175_v44 = vpop.f32.mrb[46].mxu0 }
0x162b   :  { %v12179_v35 = vpop.f32.mrb[47].mxu0  ;;  %3158 = vadd.xlane.f32.xlu0 %v3157_v40 }
0x162e   :  { %v12181_v25 = vpop.f32.mrb[48].mxu0  ;;  %v10734_v31 = vpop.eup %10733 }
0x162f   :  { %v12184_v50 = vpop.f32.mrb[49].mxu0  ;;  %3173 = vadd.xlane.f32.xlu0 %v3172_v60  ;;  %v3197_v5 = vmul.f32 %v10734_v31, %v12157_v59  ;;  %v3443_v31 = vld [vmem:[%s13182_s9 + $0x30] sm:$0xff] }
0x1631   :  { %v3205_v48 = vmul.f32 %v12235_v42, %v3197_v5  ;;  %v3444_v5 = vld [vmem:[%s13182_s9 + $0x38] sm:$0xff] }
0x1632   :  { %v12186_v56 = vpop.f32.mrb[50].mxu0 }
0x1633   :  { %v12188_v36 = vpop.f32.mrb[51].mxu0 }
0x1636   :  { %v12190_v58 = vpop.f32.mrb[52].mxu0 }
0x1637   :  { %v12192_v2 = vpop.f32.mrb[53].mxu0 }
0x163a   :  { %v12194_v21 = vpop.f32.mrb[54].mxu0 }
0x163b   :  { %v12196_v18 = vpop.f32.mrb[55].mxu0 }
0x163e   :  { %v12198_v14 = vpop.f32.mrb[56].mxu0 }
0x163f   :  { %v12200_v13 = vpop.f32.mrb[57].mxu0 }
0x1640   :  { %13195 = vst [vmem:[#allocation6_spill] sm:$0xff] %v12200_v13 }
0x1642   :  { %v12211_v15 = vpop.f32.mrb[58].mxu0 }
0x1643   :  { %13196 = vst [vmem:[#allocation7_spill] sm:$0xff] %v12211_v15  ;;  %v12216_v33 = vpop.f32.mrb[59].mxu0 }
0x1644   :  { %13197 = vst [vmem:[#allocation8_spill] sm:$0xff] %v12216_v33 }
0x16b4   :  { %v3156_v32 = vpop.xlane.xlu0 %3155 }
0x16b5   :  { %v3162_v34 = vmul.f32 0.03125, %v3156_v32 }
0x16b7   :  { %v12219_v8 = vsub.f32 %v12163_v43, %v3162_v34  ;;  %v12241_v34 = vrot.slane %v12061_v45, %v13185_v6  ;;  %v3438_v45 = vld [vmem:[%s13182_s9 + $0x8] sm:$0xff] }
0x16b8   :  { %v3159_v16 = vpop.xlane.xlu0 %3158 }
0x16b9   :  { %v3163_v51 = vmul.f32 0.03125, %v3159_v16  ;;  %v3170_v23 = vmul.f32 %v12219_v8, %v12219_v8 }
0x16bb   :  { %v12224_v53 = vsub.f32 %v12167_v20, %v3163_v51  ;;  %v3178_v9 = vsel %vm73_vm0, %v3170_v23, 0.0  ;;  %v3213_v51 = vadd.f32 %v12241_v34, %v3205_v48  ;;  %v3446_v48 = vld [vmem:[%s13182_s9 + $0x48] sm:$0xff] }
0x16bc   :  { %3179 = vadd.xlane.f32.xlu0 %v3178_v9  ;;  %v3174_v40 = vpop.xlane.xlu0 %3173  ;;  %v3439_v9 = vld [vmem:[%s13182_s9 + $0x10] sm:$0xff] }
0x16bd   :  { %v3184_v22 = vmul.f32 0.03125, %v3174_v40  ;;  %v3171_v60 = vmul.f32 %v12224_v53, %v12224_v53  ;;  %v3440_v40 = vld [vmem:[%s13182_s9 + $0x18] sm:$0xff] }
0x16bf   :  { %v3188_v39 = vadd.f32 1e-05, %v3184_v22  ;;  %v3181_v27 = vsel %vm73_vm0, %v3171_v60, 0.0  ;;  %v9407_v22 = vpack.c.bf16 %v3440_v40, %v3439_v9  ;;  %v3441_v60 = vld [vmem:[%s13182_s9 + $0x20] sm:$0xff] }
0x16c0   :  { %3182 = vadd.xlane.f32.xlu1 %v3181_v27 }
0x16c1   :  { %10735 = vrsqrt.f32 %v3188_v39  ;;  %v3442_v39 = vld [vmem:[%s13182_s9 + $0x28] sm:$0xff] }
0x16c2   :  { %v9411_v27 = vpack.c.bf16 %v3442_v39, %v3441_v60  ;;  %v3449_v60 = vld [vmem:[%s13182_s9 + $0x60] sm:$0xff]  ;;  %v3450_v39 = vld [vmem:[%s13182_s9 + $0x68] sm:$0xff] }
0x16cb   :  { %v10736_v54 = vpop.eup %10735 }
0x16cc   :  { %v3196_v32 = vmul.f32 %v10736_v54, %v3164_v3  ;;  %v3437_v3 = vld [vmem:[%s13182_s9] sm:$0xff]  ;;  %v9415_v54 = vpack.c.bf16 %v3444_v5, %v3443_v31  ;;  %v9427_v31 = vpack.c.bf16 %v3450_v39, %v3449_v60  ;;  %v3451_v5 = vld [vmem:[%s13182_s9 + $0x70] sm:$0xff] }
0x16cd   :  { %v9403_v23 = vpack.c.bf16 %v3438_v45, %v3437_v3  ;;  %v3447_v3 = vld [vmem:[%s13182_s9 + $0x50] sm:$0xff]  ;;  %v3448_v45 = vld [vmem:[%s13182_s9 + $0x58] sm:$0xff] }
0x16ce   :  { %v3204_v16 = vmul.f32 %v12235_v42, %v3196_v32  ;;  %v3445_v32 = vld [vmem:[%s13182_s9 + $0x40] sm:$0xff]  ;;  %v9423_v9 = vpack.c.bf16 %v3448_v45, %v3447_v3 }
0x16cf   :  { %9404 = vmatprep.subr.bf16.mxu1 %v9403_v23 }
0x16d0   :  { %v3212_v59 = vadd.f32 %v12241_v34, %v3204_v16  ;;  %v9419_v16 = vpack.c.bf16 %v3446_v48, %v3445_v32 }
0x16d2   :  { %8369 = vmatprep.mubr.msk.f32.mxu1 %vm73_vm0, %v3212_v59 }
0x16d3   :  { %8370 = vmatmul.mubr.msk.f32.vlgmr.msra.gmra.mrb[32].mxu1 %vm73_vm0, %v3213_v51 }
0x16d4   :  { %9406 = vmatpush3.bf16.msra.mxu1 %v9403_v23 }
0x16d5   :  { %9408 = vmatprep.subr.bf16.mxu1 %v9407_v22 }
0x16d8   :  { %9410 = vmatpush3.bf16.msra.mxu1 %v9407_v22 }
0x16d9   :  { %9412 = vmatprep.subr.bf16.mxu1 %v9411_v27 }
0x16dc   :  { %9414 = vmatpush3.bf16.msra.mxu1 %v9411_v27 }
0x16dd   :  { %9416 = vmatprep.subr.bf16.mxu1 %v9415_v54 }
0x16e0   :  { %9418 = vmatpush3.bf16.msra.mxu1 %v9415_v54  ;;  %v3452_v54 = vld [vmem:[%s13182_s9 + $0x78] sm:$0xff] }
0x16e1   :  { %9420 = vmatprep.subr.bf16.mxu1 %v9419_v16  ;;  %v9431_v32 = vpack.c.bf16 %v3452_v54, %v3451_v5 }
0x16e4   :  { %9422 = vmatpush3.bf16.msra.mxu1 %v9419_v16 }
0x16e5   :  { %9424 = vmatprep.subr.bf16.mxu1 %v9423_v9 }
0x16e8   :  { %9426 = vmatpush3.bf16.msra.mxu1 %v9423_v9 }
0x16e9   :  { %9428 = vmatprep.subr.bf16.mxu1 %v9427_v31 }
0x16ec   :  { %9430 = vmatpush3.bf16.msra.mxu1 %v9427_v31 }
0x16ed   :  { %9432 = vmatprep.subr.bf16.mxu1 %v9431_v32 }
0x16f0   :  { %9434 = vmatpush3.bf16.msra.mxu1 %v9431_v32 }
0x1749   :  { %v3180_v59 = vpop.xlane.xlu0 %3179 }
0x174a   :  { %v3186_v51 = vmul.f32 0.03125, %v3180_v59 }
0x174c   :  { %v3190_v23 = vadd.f32 1e-05, %v3186_v51 }
0x174d   :  { %v3183_v40 = vpop.xlane.xlu1 %3182 }
0x174e   :  { %10737 = vrsqrt.f32 %v3190_v23  ;;  %v3187_v22 = vmul.f32 0.03125, %v3183_v40 }
0x1750   :  { %v3191_v27 = vadd.f32 1e-05, %v3187_v22 }
0x1752   :  { %10739 = vrsqrt.f32 %v3191_v27 }
0x1758   :  { %v10738_v48 = vpop.eup %10737 }
0x1759   :  { %v3198_v16 = vmul.f32 %v10738_v48, %v12219_v8 }
0x175b   :  { %v3206_v59 = vmul.f32 %v12235_v42, %v3198_v16 }
0x175c   :  { %v10740_v51 = vpop.eup %10739 }
0x175d   :  { %v3214_v3 = vadd.f32 %v12241_v34, %v3206_v59  ;;  %v3199_v45 = vmul.f32 %v10740_v51, %v12224_v53 }
0x175f   :  { %8372 = vmatprep.mubr.msk.f32.mxu1 %vm73_vm0, %v3214_v3  ;;  %v3207_v23 = vmul.f32 %v12235_v42, %v3199_v45 }
0x1761   :  { %v3215_v9 = vadd.f32 %v12241_v34, %v3207_v23 }
0x1763   :  { %8373 = vmatmul.mubr.msk.f32.gmra.mrb[34].mxu1 %vm73_vm0, %v3215_v9 }
0x17a6   :  { %v8371_v40 = vpop.f32.mrb[32].mxu1 }
0x17a7   :  { %v3322_v22 = vmul.f32 0.70710677, %v8371_v40  ;;  %v3298_v60 = vpop.f32.mrb[33].mxu1 }
0x17a8   :  { %v3321_v39 = vmul.f32 0.70710677, %v3298_v60 }
0x17a9   :  { %v7096_v8 = vclamps-f32 %v3322_v22, 4.0 }
0x17aa   :  { %v7095_v27 = vclamps-f32 %v3321_v39, 4.0 }
0x17ab   :  { %v3334_v31 = vmul.f32 %v7096_v8, %v7096_v8 }
0x17ac   :  { %v3333_v5 = vmul.f32 %v7095_v27, %v7095_v27 }
0x17ad   :  { %v3370_v54 = vmul.f32 -1.1791603e-07, %v3334_v31  ;;  %v3338_v32 = vmul.f32 0.00022905065, %v3334_v31 }
0x17ae   :  { %v3369_v48 = vmul.f32 -1.1791603e-07, %v3333_v5  ;;  %v3337_v16 = vmul.f32 0.00022905065, %v3333_v5 }
0x17af   :  { %v3374_v53 = vadd.f32 2.3547966e-05, %v3370_v54  ;;  %v3342_v42 = vadd.f32 0.003408291, %v3338_v32 }
0x17b0   :  { %v3373_v59 = vadd.f32 2.3547966e-05, %v3369_v48  ;;  %v3341_v45 = vadd.f32 0.003408291, %v3337_v16 }
0x17b1   :  { %v3378_v51 = vmul.f32 %v3374_v53, %v3334_v31  ;;  %v3346_v6 = vmul.f32 %v3342_v42, %v3334_v31 }
0x17b2   :  { %v3377_v3 = vmul.f32 %v3373_v59, %v3333_v5  ;;  %v3345_v22 = vmul.f32 %v3341_v45, %v3333_v5 }
0x17b3   :  { %v3382_v34 = vadd.f32 0.0010179626, %v3378_v51  ;;  %v3350_v47 = vadd.f32 0.050955694, %v3346_v6 }
0x17b4   :  { %v3381_v23 = vadd.f32 0.0010179626, %v3377_v3  ;;  %v3349_v15 = vadd.f32 0.050955694, %v3345_v22 }
0x17b5   :  { %v3386_v9 = vmul.f32 %v3382_v34, %v3334_v31  ;;  %v3354_v48 = vmul.f32 %v3350_v47, %v3334_v31 }
0x17b6   :  { %v3385_v62 = vmul.f32 %v3381_v23, %v3333_v5  ;;  %v3353_v59 = vmul.f32 %v3349_v15, %v3333_v5 }
0x17b7   :  { %v3390_v61 = vadd.f32 0.01407047, %v3386_v9  ;;  %v3358_v3 = vadd.f32 0.18520832, %v3354_v48  ;;  %v3318_v48 = vmul.f32 0.5, %v8371_v40  ;;  %v7122_v40 = vld [vmem:[%s13179_s6 + $0x38] sm:$0xff] }
0x17b8   :  { %v3389_v39 = vadd.f32 0.01407047, %v3385_v62  ;;  %v3357_v23 = vadd.f32 0.18520832, %v3353_v59 }
0x17b9   :  { %v3394_v55 = vmul.f32 %v3390_v61, %v3334_v31  ;;  %v3362_v62 = vmul.f32 %v3358_v3, %v3334_v31 }
0x17ba   :  { %v3393_v38 = vmul.f32 %v3389_v39, %v3333_v5  ;;  %v3361_v61 = vmul.f32 %v3357_v23, %v3333_v5  ;;  %v3317_v39 = vmul.f32 0.5, %v3298_v60  ;;  %v7121_v60 = vld [vmem:[%s13179_s6 + $0x30] sm:$0xff] }
0x17bb   :  { %v3398_v33 = vadd.f32 0.11098505, %v3394_v55  ;;  %v3366_v6 = vadd.f32 1.1283791, %v3362_v62 }
0x17bc   :  { %v3397_v54 = vadd.f32 0.11098505, %v3393_v38  ;;  %v3365_v55 = vadd.f32 1.1283791, %v3361_v61 }
0x17bd   :  { %v3402_v13 = vmul.f32 %v3398_v33, %v3334_v31  ;;  %v3418_v45 = vmul.f32 %v7096_v8, %v3366_v6  ;;  %v7120_v8 = vld [vmem:[%s13179_s6 + $0x28] sm:$0xff] }
0x17be   :  { %v3401_v53 = vmul.f32 %v3397_v54, %v3333_v5  ;;  %v3417_v33 = vmul.f32 %v7095_v27, %v3365_v55 }
0x17bf   :  { %v3406_v32 = vadd.f32 0.49746925, %v3402_v13 }
0x17c0   :  { %v3405_v51 = vadd.f32 0.49746925, %v3401_v53 }
0x17c1   :  { %v3410_v16 = vmul.f32 %v3406_v32, %v3334_v31  ;;  %v7119_v31 = vld [vmem:[%s13179_s6 + $0x20] sm:$0xff] }
0x17c2   :  { %v3409_v34 = vmul.f32 %v3405_v51, %v3333_v5  ;;  %v9443_v27 = vpack.c.bf16 %v7120_v8, %v7119_v31  ;;  %v9447_v5 = vpack.c.bf16 %v7122_v40, %v7121_v60 }
0x17c3   :  { %v3414_v42 = vadd.f32 1.0, %v3410_v16 }
0x17c4   :  { %v3413_v9 = vadd.f32 1.0, %v3409_v34  ;;  %9444 = vmatprep.subr.bf16.mxu1 %v9443_v27 }
0x17c5   :  { %10741 = vrcp.f32 %v3414_v42 }
0x17c6   :  { %10743 = vrcp.f32 %v3413_v9 }
0x17cf   :  { %v10742_v38 = vpop.eup %10741 }
0x17d0   :  { %v10744_v47 = vpop.eup %10743  ;;  %v3424_v22 = vmul.f32 %v10742_v38, %v3418_v45 }
0x17d1   :  { %v3422_v13 = vmul.f32 %v10744_v47, %v3417_v33 }
0x17d2   :  { %v3430_v15 = vadd.f32 1.0, %v3424_v22 }
0x17d3   :  { %v3429_v54 = vadd.f32 1.0, %v3422_v13 }
0x17d4   :  { %v3434_v32 = vmul.f32 %v3430_v15, %v3318_v48 }
0x17d5   :  { %v3433_v53 = vmul.f32 %v3429_v54, %v3317_v39 }
0x17d7   :  { %8407 = vmatprep.mubr.f32.mxu1 %v3433_v53 }
0x17d8   :  { %8408 = vmatmul.mubr.f32.vlgmr.msra.gmra.mrb[36].mxu1 %v3434_v32 }
0x17d9   :  { %9446 = vmatpush3.bf16.msra.mxu1 %v9443_v27 }
0x17da   :  { %9448 = vmatprep.subr.bf16.mxu1 %v9447_v5 }
0x17dd   :  { %9450 = vmatpush3.bf16.msra.mxu1 %v9447_v5 }
0x1836   :  { %v8374_v59 = vpop.f32.mrb[34].mxu1 }
0x1837   :  { %v3324_v51 = vmul.f32 0.70710677, %v8374_v59  ;;  %v3308_v16 = vpop.f32.mrb[35].mxu1 }
0x1838   :  { %v3323_v3 = vmul.f32 0.70710677, %v3308_v16 }
0x1839   :  { %v7098_v34 = vclamps-f32 %v3324_v51, 4.0 }
0x183a   :  { %v7097_v42 = vclamps-f32 %v3323_v3, 4.0 }
0x183b   :  { %v3336_v23 = vmul.f32 %v7098_v34, %v7098_v34 }
0x183c   :  { %v3335_v9 = vmul.f32 %v7097_v42, %v7097_v42 }
0x183d   :  { %v3372_v62 = vmul.f32 -1.1791603e-07, %v3336_v23  ;;  %v3340_v61 = vmul.f32 0.00022905065, %v3336_v23 }
0x183e   :  { %v3371_v6 = vmul.f32 -1.1791603e-07, %v3335_v9  ;;  %v3339_v45 = vmul.f32 0.00022905065, %v3335_v9 }
0x183f   :  { %v3376_v55 = vadd.f32 2.3547966e-05, %v3372_v62  ;;  %v3344_v47 = vadd.f32 0.003408291, %v3340_v61 }
0x1840   :  { %v3375_v38 = vadd.f32 2.3547966e-05, %v3371_v6  ;;  %v3343_v15 = vadd.f32 0.003408291, %v3339_v45 }
0x1841   :  { %v3380_v33 = vmul.f32 %v3376_v55, %v3336_v23  ;;  %v3348_v48 = vmul.f32 %v3344_v47, %v3336_v23 }
0x1842   :  { %v3379_v22 = vmul.f32 %v3375_v38, %v3335_v9  ;;  %v3347_v31 = vmul.f32 %v3343_v15, %v3335_v9 }
0x1843   :  { %v3384_v13 = vadd.f32 0.0010179626, %v3380_v33  ;;  %v3352_v60 = vadd.f32 0.050955694, %v3348_v48 }
0x1844   :  { %v3383_v39 = vadd.f32 0.0010179626, %v3379_v22  ;;  %v3351_v51 = vadd.f32 0.050955694, %v3347_v31 }
0x1845   :  { %v3388_v54 = vmul.f32 %v3384_v13, %v3336_v23  ;;  %v3356_v6 = vmul.f32 %v3352_v60, %v3336_v23 }
0x1846   :  { %v3387_v53 = vmul.f32 %v3383_v39, %v3335_v9  ;;  %v3355_v38 = vmul.f32 %v3351_v51, %v3335_v9 }
0x1847   :  { %v3392_v32 = vadd.f32 0.01407047, %v3388_v54  ;;  %v3360_v22 = vadd.f32 0.18520832, %v3356_v6  ;;  %v3320_v6 = vmul.f32 0.5, %v8374_v59 }
0x1848   :  { %v3391_v8 = vadd.f32 0.01407047, %v3387_v53  ;;  %v3359_v39 = vadd.f32 0.18520832, %v3355_v38 }
0x1849   :  { %v3396_v27 = vmul.f32 %v3392_v32, %v3336_v23  ;;  %v3364_v15 = vmul.f32 %v3360_v22, %v3336_v23 }
0x184a   :  { %v3395_v40 = vmul.f32 %v3391_v8, %v3335_v9  ;;  %v3363_v48 = vmul.f32 %v3359_v39, %v3335_v9 }
0x184b   :  { %v3400_v5 = vadd.f32 0.11098505, %v3396_v27  ;;  %v3368_v53 = vadd.f32 1.1283791, %v3364_v15  ;;  %v10853_v15 = vld [vmem:[%s13175_s2 + $0x10] sm:$0xff] }
0x184c   :  { %v3399_v3 = vadd.f32 0.11098505, %v3395_v40  ;;  %v3367_v32 = vadd.f32 1.1283791, %v3363_v48  ;;  %v4187_v48 = vmul.f32 %v10853_v15, %v12179_v35 }
0x184d   :  { %v3404_v62 = vmul.f32 %v3400_v5, %v3336_v23  ;;  %v3420_v31 = vmul.f32 %v7098_v34, %v3368_v53  ;;  %v10854_v53 = vld [vmem:[%s13175_s2 + $0x58] sm:$0xff] }
0x184e   :  { %v3403_v55 = vmul.f32 %v3399_v3, %v3335_v9  ;;  %v3419_v27 = vmul.f32 %v7097_v42, %v3367_v32  ;;  %v3319_v3 = vmul.f32 0.5, %v3308_v16  ;;  %v12385_v16 = vld [vmem:[%s13175_s2 + $0x48] sm:$0xff] }
0x184f   :  { %v3408_v61 = vadd.f32 0.49746925, %v3404_v62 }
0x1850   :  { %v3407_v33 = vadd.f32 0.49746925, %v3403_v55 }
0x1851   :  { %v3412_v45 = vmul.f32 %v3408_v61, %v3336_v23  ;;  %v10850_v23 = vld [vmem:[%s13175_s2] sm:$0xff] }
0x1852   :  { %v3411_v13 = vmul.f32 %v3407_v33, %v3335_v9  ;;  %v4185_v9 = vmul.f32 %v10850_v23, %v12173_v1  ;;  %v10852_v1 = vld [vmem:[%s13175_s2 + $0x18] sm:$0xff] }
0x1853   :  { %v3416_v47 = vadd.f32 1.0, %v3412_v45 }
0x1854   :  { %v3415_v54 = vadd.f32 1.0, %v3411_v13 }
0x1855   :  { %10745 = vrcp.f32 %v3416_v47 }
0x1856   :  { %10747 = vrcp.f32 %v3415_v54  ;;  %v4188_v54 = vmul.f32 %v10852_v1, %v12175_v44 }
0x185f   :  { %v10746_v8 = vpop.eup %10745 }
0x1860   :  { %v10748_v60 = vpop.eup %10747  ;;  %v3428_v40 = vmul.f32 %v10746_v8, %v3420_v31 }
0x1861   :  { %v3426_v5 = vmul.f32 %v10748_v60, %v3419_v27  ;;  %v10855_v27 = vld [vmem:[%s13175_s2 + $0x50] sm:$0xff] }
0x1862   :  { %v3432_v51 = vadd.f32 1.0, %v3428_v40 }
0x1863   :  { %v3431_v62 = vadd.f32 1.0, %v3426_v5 }
0x1864   :  { %v3436_v61 = vmul.f32 %v3432_v51, %v3320_v6  ;;  %v10857_v6 = vld [vmem:[%s13175_s2 + $0x20] sm:$0xff] }
0x1865   :  { %v3435_v55 = vmul.f32 %v3431_v62, %v3319_v3  ;;  %v10856_v3 = vld [vmem:[%s13175_s2 + $0x28] sm:$0xff] }
0x1866   :  { %v4190_v62 = vmul.f32 %v10856_v3, %v12181_v25 }
0x1867   :  { %8410 = vmatprep.mubr.f32.mxu1 %v3435_v55  ;;  %v4189_v55 = vmul.f32 %v10857_v6, %v12184_v50 }
0x1868   :  { %8411 = vmatmul.mubr.f32.gmra.mrb[38].mxu1 %v3436_v61  ;;  %v10858_v61 = vld [vmem:[%s13175_s2 + $0x68] sm:$0xff] }
0x1869   :  { %8453 = vmatprep.mubr.msk.f32.mxu1 %vm73_vm0, %v12077_v52 }
0x186c   :  { %8454 = vmatmul.mubr.msk.f32.vlgmr.msra.gmra.mrb[40].mxu1 %vm73_vm0, %v12083_v10 }
0x186d   :  { %8456 = vmatprep.mubr.msk.f32.mxu1 %vm73_vm0, %v12086_v29 }
0x1870   :  { %8457 = vmatmul.mubr.msk.f32.gmra.mrb[42].mxu1 %vm73_vm0, %v12093_v26 }
0x1871   :  { %8459 = vmatprep.mubr.msk.f32.mxu1 %vm73_vm0, %v12096_v24 }
0x1874   :  { %8460 = vmatmul.mubr.msk.f32.gmra.mrb[44].mxu1 %vm73_vm0, %v12103_v46 }
0x1875   :  { %8462 = vmatprep.mubr.msk.f32.mxu1 %vm73_vm0, %v12106_v30 }
0x1878   :  { %8463 = vmatmul.mubr.msk.f32.gmra.mrb[46].mxu1 %vm73_vm0, %v12113_v0 }
0x1879   :  { %8465 = vmatprep.mubr.msk.f32.mxu1 %vm73_vm0, %v12116_v17 }
0x187c   :  { %8466 = vmatmul.mubr.msk.f32.gmra.mrb[48].mxu1 %vm73_vm0, %v12123_v12 }
0x187d   :  { %8468 = vmatprep.mubr.msk.f32.mxu1 %vm73_vm0, %v12126_v57 }
0x1880   :  { %8469 = vmatmul.mubr.msk.f32.gmra.mrb[50].mxu1 %vm73_vm0, %v12133_v41 }
0x1881   :  { %8471 = vmatprep.mubr.msk.f32.mxu1 %vm73_vm0, %v12136_v4 }
0x1884   :  { %8472 = vmatmul.mubr.msk.f32.gmra.mrb[52].mxu1 %vm73_vm0, %v12143_v49 }
0x1885   :  { %8474 = vmatprep.mubr.msk.f32.mxu1 %vm73_vm0, %v12146_v63 }
0x1888   :  { %8475 = vmatmul.mubr.msk.f32.gmra.mrb[54].mxu1 %vm73_vm0, %v12152_v28 }
0x18ab   :  { %v8409_v52 = vpop.f32.mrb[36].mxu1 }
0x18ac   :  { %v12350_v10 = vadd.f32 %v8409_v52, %v12051_v19  ;;  %v3519_v29 = vpop.f32.mrb[37].mxu1 }
0x18ad   :  { %v12353_v26 = vadd.f32 %v3519_v29, %v12043_v37 }
0x18ae   :  { %v3585_v24 = vsel %vm73_vm0, %v12350_v10, 0.0 }
0x18af   :  { %3586 = vadd.xlane.f32.xlu1 %v3585_v24  ;;  %v3582_v46 = vsel %vm73_vm0, %v12353_v26, 0.0  ;;  %v10859_v24 = vld [vmem:[%s13175_s2 + $0x60] sm:$0xff] }
0x18b0   :  { %3583 = vadd.xlane.f32.xlu0 %v3582_v46 }
0x193b   :  { %v8412_v30 = vpop.f32.mrb[38].mxu1 }
0x193c   :  { %v12360_v0 = vadd.f32 %v8412_v30, %v12167_v20  ;;  %v3587_v17 = vpop.xlane.xlu1 %3586  ;;  %v3529_v12 = vpop.f32.mrb[39].mxu1  ;;  %v12375_v20 = vld [vmem:[%s13175_s2 + $0x8] sm:$0xff] }
0x193d   :  { %v3595_v19 = vmul.f32 0.03125, %v3587_v17  ;;  %v12363_v57 = vadd.f32 %v3529_v12, %v12163_v43  ;;  %v3584_v37 = vpop.xlane.xlu0 %3583  ;;  %v4186_v43 = vmul.f32 %v12375_v20, %v12169_v11  ;;  %v10851_v11 = vld [vmem:[%s13175_s2 + $0x40] sm:$0xff] }
0x193e   :  { %v3594_v41 = vmul.f32 0.03125, %v3584_v37  ;;  %v3591_v4 = vsel %vm73_vm0, %v12360_v0, 0.0 }
0x193f   :  { %v12368_v49 = vsub.f32 %v12350_v10, %v3595_v19  ;;  %3592 = vadd.xlane.f32.xlu1 %v3591_v4  ;;  %v8455_v63 = vpop.f32.mrb[40].mxu1  ;;  %v3588_v28 = vsel %vm73_vm0, %v12363_v57, 0.0  ;;  %v10860_v19 = vld [vmem:[%s13175_s2 + $0x38] sm:$0xff] }
0x1940   :  { %v12380_v59 = vsub.f32 %v12353_v26, %v3594_v41  ;;  %v4194_v34 = vmul.f32 %v12385_v16, %v8455_v63  ;;  %v3919_v42 = vpop.f32.mrb[41].mxu1  ;;  %3589 = vadd.xlane.f32.xlu0 %v3588_v28  ;;  %v4192_v37 = vmul.f32 %v10860_v19, %v12186_v56  ;;  %v10861_v41 = vld [vmem:[%s13175_s2 + $0x30] sm:$0xff]  ;;  %v10862_v63 = vld [vmem:[%s13175_s2 + $0x78] sm:$0xff] }
0x1941   :  { %v4193_v38 = vmul.f32 %v10851_v11, %v3919_v42  ;;  %v3603_v33 = vmul.f32 %v12368_v49, %v12368_v49  ;;  %v4191_v4 = vmul.f32 %v10861_v41, %v12188_v36  ;;  %v5260_v36 = vmul.f32 %v12375_v20, %v12190_v58 }
0x1942   :  { %v4202_v45 = vadd.f32 %v4194_v34, %v4186_v43  ;;  %v3602_v22 = vmul.f32 %v12380_v59, %v12380_v59  ;;  %v10863_v34 = vld [vmem:[%s13175_s2 + $0x70] sm:$0xff]  ;;  %v5262_v58 = vmul.f32 %v10852_v1, %v12194_v21 }
0x1943   :  { %v4201_v13 = vadd.f32 %v4193_v38, %v4185_v9  ;;  %v8458_v47 = vpop.f32.mrb[42].mxu1  ;;  %v3609_v39 = vsel %vm73_vm0, %v3603_v33, 0.0 }
0x1944   :  { %v4196_v32 = vmul.f32 %v10854_v53, %v8458_v47  ;;  %3610 = vadd.xlane.f32.xlu1 %v3609_v39  ;;  %v3929_v31 = vpop.f32.mrb[43].mxu1  ;;  %v3606_v8 = vsel %vm73_vm0, %v3602_v22, 0.0  ;;  %v5259_v22 = vmul.f32 %v10850_v23, %v12192_v2  ;;  %v5261_v2 = vmul.f32 %v10853_v15, %v12196_v18 }
0x1945   :  { %v4195_v44 = vmul.f32 %v10855_v27, %v3929_v31  ;;  %3607 = vadd.xlane.f32.xlu0 %v3606_v8  ;;  %v9467_v60 = vpack.c.bf16 %v4202_v45, %v4201_v13  ;;  %v12415_v40 = vpack.i.bf16 %v4202_v45, %v4201_v13 }
0x1946   :  { %v4204_v5 = vadd.f32 %v4196_v32, %v4188_v54 }
0x1947   :  { %v4203_v35 = vadd.f32 %v4195_v44, %v4187_v48  ;;  %v8461_v51 = vpop.f32.mrb[44].mxu1  ;;  %9469 = vmatprep.subr.msk.bf16.mxu1 %vm11445_vm2, %v9467_v60 }
0x1948   :  { %v4198_v52 = vmul.f32 %v10858_v61, %v8461_v51  ;;  %v3939_v29 = vpop.f32.mrb[45].mxu1  ;;  %9472 = vmatpush3.bf16.xpose.msk.msra.mxu1 %vm11445_vm2, %v9467_v60  ;;  %v5264_v51 = vmul.f32 %v10856_v3, %v12198_v14  ;;  %v13200_v3 = vld [vmem:[#allocation8_spill] sm:$0xff] }
0x1949   :  { %v4197_v25 = vmul.f32 %v10859_v24, %v3939_v29  ;;  %v9473_v46 = vpack.c.bf16 %v4204_v5, %v4203_v35  ;;  %v12435_v30 = vpack.i.bf16 %v4204_v5, %v4203_v35 }
0x194a   :  { %v4206_v17 = vadd.f32 %v4198_v52, %v4190_v62  ;;  %v13198_v62 = vld [vmem:[#allocation6_spill] sm:$0xff] }
0x194b   :  { %v4205_v12 = vadd.f32 %v4197_v25, %v4189_v55  ;;  %v8464_v50 = vpop.f32.mrb[46].mxu1  ;;  %9475 = vmatprep.subr.msk.bf16.mxu1 %vm11445_vm2, %v9473_v46  ;;  %v5263_v55 = vmul.f32 %v10857_v6, %v13198_v62  ;;  %v13199_v25 = vld [vmem:[#allocation7_spill] sm:$0xff]  ;;  %v5265_v6 = vmul.f32 %v10861_v41, %v13200_v3 }
0x194c   :  { %v4200_v28 = vmul.f32 %v10862_v63, %v8464_v50  ;;  %v3949_v43 = vpop.f32.mrb[47].mxu1  ;;  %v5266_v14 = vmul.f32 %v10860_v19, %v13199_v25 }
0x194d   :  { %v4199_v42 = vmul.f32 %v10863_v34, %v3949_v43  ;;  %v9479_v9 = vpack.c.bf16 %v4206_v17, %v4205_v12  ;;  %v12453_v38 = vpack.i.bf16 %v4206_v17, %v4205_v12 }
0x194e   :  { %v4208_v56 = vadd.f32 %v4200_v28, %v4192_v37 }
0x194f   :  { %v4207_v33 = vadd.f32 %v4199_v42, %v4191_v4  ;;  %v8467_v45 = vpop.f32.mrb[48].mxu1 }
0x1950   :  { %v5268_v13 = vmul.f32 %v12385_v16, %v8467_v45  ;;  %v3959_v47 = vpop.f32.mrb[49].mxu1  ;;  %9478 = vmatpush3.bf16.xpose.msk.msra.mxu1 %vm11445_vm2, %v9473_v46 }
0x1951   :  { %v5267_v39 = vmul.f32 %v10851_v11, %v3959_v47  ;;  %9481 = vmatprep.subr.msk.bf16.mxu1 %vm11445_vm2, %v9479_v9  ;;  %v9485_v54 = vpack.c.bf16 %v4208_v56, %v4207_v33  ;;  %v12463_v48 = vpack.i.bf16 %v4208_v56, %v4207_v33 }
0x1952   :  { %v5276_v32 = vadd.f32 %v5268_v13, %v5260_v36 }
0x1953   :  { %v5275_v31 = vadd.f32 %v5267_v39, %v5259_v22  ;;  %v8470_v8 = vpop.f32.mrb[50].mxu1 }
0x1954   :  { %v5270_v20 = vmul.f32 %v10854_v53, %v8470_v8  ;;  %v3969_v16 = vpop.f32.mrb[51].mxu1 }
0x1955   :  { %v5269_v23 = vmul.f32 %v10855_v27, %v3969_v16  ;;  %v12467_v44 = vpack.c.bf16 %v5276_v32, %v5275_v31  ;;  %v12469_v60 = vpack.i.bf16 %v5276_v32, %v5275_v31  ;;  %v72_v32 = vld [vmem:[%s13176_s3 + $0x8] sm:$0x3f]  ;;  %v13201_v31 = vld [vmem:[#allocation5_spill] sm:$0xff] }
0x1956   :  { %v5278_v11 = vadd.f32 %v5270_v20, %v5262_v58  ;;  %v13202_v8 = vsub.s32 0, %v13201_v31 }
0x1957   :  { %v5277_v5 = vadd.f32 %v5269_v23, %v5261_v2  ;;  %v8473_v35 = vpop.f32.mrb[52].mxu1 }
0x1958   :  { %v5272_v52 = vmul.f32 %v10858_v61, %v8473_v35  ;;  %v3979_v29 = vpop.f32.mrb[53].mxu1  ;;  %9484 = vmatpush3.bf16.xpose.msk.msra.mxu1 %vm11445_vm2, %v9479_v9  ;;  %v3637_v58 = vrot.slane %v72_v32, %v13202_v8 }
0x1959   :  { %v5271_v21 = vmul.f32 %v10859_v24, %v3979_v29  ;;  %9487 = vmatprep.subr.msk.bf16.mxu1 %vm11445_vm2, %v9485_v54  ;;  %v12477_v18 = vpack.c.bf16 %v5278_v11, %v5277_v5  ;;  %v12479_v1 = vpack.i.bf16 %v5278_v11, %v5277_v5  ;;  %v13203_v11 = vsub.s32 1, %v13201_v31  ;;  %v7144_v29 = vld [vmem:[%s13177_s4 + $0x28] sm:$0xff] }
0x195a   :  { %v5280_v15 = vadd.f32 %v5272_v52, %v5264_v51  ;;  %v7143_v52 = vld [vmem:[%s13177_s4 + $0x20] sm:$0xff] }
0x195b   :  { %v5279_v53 = vadd.f32 %v5271_v21, %v5263_v55  ;;  %v8476_v27 = vpop.f32.mrb[54].mxu1  ;;  %v3645_v5 = vrot.slane %v72_v32, %v13203_v11  ;;  %v7146_v21 = vld [vmem:[%s13177_s4 + $0x38] sm:$0xff] }
0x195c   :  { %v5274_v61 = vmul.f32 %v10862_v63, %v8476_v27  ;;  %v3989_v46 = vpop.f32.mrb[55].mxu1 }
0x195d   :  { %v5273_v17 = vmul.f32 %v10863_v34, %v3989_v46  ;;  %v12483_v12 = vpack.c.bf16 %v5280_v15, %v5279_v53  ;;  %v12485_v24 = vpack.i.bf16 %v5280_v15, %v5279_v53 }
0x195e   :  { %v5282_v50 = vadd.f32 %v5274_v61, %v5266_v14 }
0x195f   :  { %v5281_v37 = vadd.f32 %v5273_v17, %v5265_v6 }
0x1960   :  { %9490 = vmatpush3.bf16.xpose.msk.msra.mxu1 %vm11445_vm2, %v9485_v54 }
0x1961   :  { %v12489_v4 = vpack.c.bf16 %v5282_v50, %v5281_v37  ;;  %v12491_v28 = vpack.i.bf16 %v5282_v50, %v5281_v37 }
0x19cc   :  { %v3593_v43 = vpop.xlane.xlu1 %3592 }
0x19cd   :  { %v3597_v19 = vmul.f32 0.03125, %v3593_v43  ;;  %v3590_v42 = vpop.xlane.xlu0 %3589 }
0x19ce   :  { %v3596_v41 = vmul.f32 0.03125, %v3590_v42 }
0x19cf   :  { %v3601_v63 = vsub.f32 %v12360_v0, %v3597_v19 }
0x19d0   :  { %v3600_v34 = vsub.f32 %v12363_v57, %v3596_v41 }
0x19d1   :  { %v3611_v9 = vpop.xlane.xlu1 %3610  ;;  %v3605_v56 = vmul.f32 %v3601_v63, %v3601_v63 }
0x19d2   :  { %v3619_v33 = vmul.f32 0.03125, %v3611_v9  ;;  %v3608_v45 = vpop.xlane.xlu0 %3607  ;;  %v3604_v36 = vmul.f32 %v3600_v34, %v3600_v34 }
0x19d3   :  { %v3618_v22 = vmul.f32 0.03125, %v3608_v45  ;;  %v3615_v13 = vsel %vm73_vm0, %v3605_v56, 0.0 }
0x19d4   :  { %v3623_v47 = vadd.f32 1e-05, %v3619_v33  ;;  %3616 = vadd.xlane.f32.xlu1 %v3615_v13  ;;  %v3612_v39 = vsel %vm73_vm0, %v3604_v36, 0.0 }
0x19d5   :  { %v3622_v54 = vadd.f32 1e-05, %v3618_v22  ;;  %3613 = vadd.xlane.f32.xlu0 %v3612_v39 }
0x19d6   :  { %10749 = vrsqrt.f32 %v3623_v47 }
0x19d7   :  { %10751 = vrsqrt.f32 %v3622_v54 }
0x19e0   :  { %v10750_v2 = vpop.eup %10749 }
0x19e1   :  { %v10752_v20 = vpop.eup %10751  ;;  %v3631_v16 = vmul.f32 %v10750_v2, %v12368_v49  ;;  %v9459_v49 = vpack.c.bf16 %v7144_v29, %v7143_v52 }
0x19e2   :  { %v3630_v23 = vmul.f32 %v10752_v20, %v12380_v59  ;;  %v7145_v59 = vld [vmem:[%s13177_s4 + $0x30] sm:$0xff] }
0x19e3   :  { %v3639_v35 = vmul.f32 %v3637_v58, %v3631_v16  ;;  %9460 = vmatprep.subr.bf16.mxu0 %v9459_v49  ;;  %v9463_v15 = vpack.c.bf16 %v7146_v21, %v7145_v59 }
0x19e4   :  { %v3638_v51 = vmul.f32 %v3637_v58, %v3630_v23 }
0x19e5   :  { %v3647_v55 = vadd.f32 %v3645_v5, %v3639_v35 }
0x19e6   :  { %v3646_v62 = vadd.f32 %v3645_v5, %v3638_v51 }
0x19e8   :  { %8485 = vmatprep.mubr.msk.f32.mxu0 %vm73_vm0, %v3646_v62 }
0x19e9   :  { %8486 = vmatmul.mubr.msk.f32.vlgmr.msra.gmra.mrb[60].mxu0 %vm73_vm0, %v3647_v55 }
0x19ea   :  { %9462 = vmatpush3.bf16.msra.mxu0 %v9459_v49 }
0x19eb   :  { %9464 = vmatprep.subr.bf16.mxu0 %v9463_v15 }
0x19ee   :  { %9466 = vmatpush3.bf16.msra.mxu0 %v9463_v15 }
0x1a61   :  { %v3617_v53 = vpop.xlane.xlu1 %3616 }
0x1a62   :  { %v3621_v27 = vmul.f32 0.03125, %v3617_v53  ;;  %v3614_v25 = vpop.xlane.xlu0 %3613 }
0x1a63   :  { %v3620_v14 = vmul.f32 0.03125, %v3614_v25 }
0x1a64   :  { %v3625_v3 = vadd.f32 1e-05, %v3621_v27 }
0x1a65   :  { %v3624_v6 = vadd.f32 1e-05, %v3620_v14 }
0x1a66   :  { %10753 = vrsqrt.f32 %v3625_v3 }
0x1a67   :  { %10755 = vrsqrt.f32 %v3624_v6 }
0x1a70   :  { %v10754_v61 = vpop.eup %10753 }
0x1a71   :  { %v10756_v46 = vpop.eup %10755  ;;  %v3633_v17 = vmul.f32 %v10754_v61, %v3601_v63 }
0x1a72   :  { %v3632_v50 = vmul.f32 %v10756_v46, %v3600_v34 }
0x1a73   :  { %v3641_v37 = vmul.f32 %v3637_v58, %v3633_v17 }
0x1a74   :  { %v3640_v43 = vmul.f32 %v3637_v58, %v3632_v50 }
0x1a75   :  { %v3649_v42 = vadd.f32 %v3645_v5, %v3641_v37 }
0x1a76   :  { %v3648_v19 = vadd.f32 %v3645_v5, %v3640_v43 }
0x1a78   :  { %8488 = vmatprep.mubr.msk.f32.mxu0 %vm73_vm0, %v3648_v19 }
0x1a79   :  { %8489 = vmatmul.mubr.msk.f32.gmra.mrb[62].mxu0 %vm73_vm0, %v3649_v42 }
0x1a7a   :  { %8499 = vmatprep.mubr.msk.f32.mxu0 %vm73_vm0, %v3646_v62 }
0x1a7d   :  { %8500 = vmatmul.mubr.msk.f32.vlgmr.msra.gmra.mrb[64].mxu0 %vm73_vm0, %v3647_v55 }
0x1a7e   :  { %8502 = vmatprep.mubr.msk.f32.mxu0 %vm73_vm0, %v3648_v19 }
0x1a81   :  { %8503 = vmatmul.mubr.msk.f32.gmra.mrb[66].mxu0 %vm73_vm0, %v3649_v42 }
0x1abc   :  { %v8487_v41 = vpop.f32.mrb[60].mxu0 }
0x1abd   :  { %v4076_v9 = vpop.f32.mrb[61].mxu0 }
0x1abe   :  { %v9491_v63 = vpack.c.bf16 %v8487_v41, %v4076_v9  ;;  %v12526_v34 = vpack.i.bf16 %v8487_v41, %v4076_v9 }
0x1ac0   :  { %9493 = vmatprep.subr.msk.bf16.mxu1 %vm11445_vm2, %v9491_v63 }
0x1ac1   :  { %9496 = vmatpush3.bf16.xpose.msk.msra.mxu1 %vm11445_vm2, %v9491_v63 }
0x1b4c   :  { %v8490_v56 = vpop.f32.mrb[62].mxu0 }
0x1b4d   :  { %v4086_v33 = vpop.f32.mrb[63].mxu0 }
0x1b4e   :  { %v12532_v45 = vpack.c.bf16 %v8490_v56, %v4086_v33  ;;  %v12534_v36 = vpack.i.bf16 %v8490_v56, %v4086_v33 }
0x1b50   :  { %v12536_v22 = vpop.f32.mrb[64].mxu0 }
0x1b51   :  { %v12538_v13 = vpop.f32.mrb[65].mxu0 }
0x1b52   :  { %8525 = vmatprep.mubr.msk.f32.mxu1 %vm911_vm1, %v12538_v13 }
0x1b53   :  { %8526 = vmatmul.mubr.msk.f32.vlgmr.msra.gmra.mrb[56].mxu1 %vm911_vm1, %v12536_v22 }
0x1b54   :  { %v12544_v47 = vpop.f32.mrb[66].mxu0 }
0x1b55   :  { %v12546_v39 = vpop.f32.mrb[67].mxu0 }
0x1c26   :  { %v8527_v54 = vpop.f32.mrb[56].mxu1 }
0x1c27   :  { %v4311_v32 = vpop.f32.mrb[57].mxu1  ;;  %v4323_v8 = vsel %vm1023_vm3, %v8527_v54, -inf }
0x1c28   :  { %4324 = vmax.xlane.f32.xlu1 %v4323_v8  ;;  %v4320_v58 = vsel %vm1023_vm3, %v4311_v32, -inf }
0x1c29   :  { %4321 = vmax.xlane.f32.xlu0 %v4320_v58 }
0x1c39   :  { %10284 = vrot.lane.b32.xlu1 %v12415_v40, %s10889_s24 }
0x1c3d   :  { %10294 = vrot.lane.b32.xlu1 %v12453_v38, %s10889_s24 }
0x1c41   :  { %10299 = vrot.lane.b32.xlu1 %v12463_v48, %s10889_s24 }
0x1c45   :  { %10304 = vrot.lane.b32.xlu1 %v12526_v34, %s10889_s24 }
0x1c49   :  { %10309 = vrot.lane.b32.xlu1 %v12415_v40, %s10890_s25 }
0x1c4d   :  { %10319 = vrot.lane.b32.xlu1 %v12453_v38, %s10890_s25 }
0x1c51   :  { %10329 = vrot.lane.b32.xlu1 %v12526_v34, %s10890_s25 }
0x1c55   :  { %4457 = vrot.lane.b32.xlu1 %v12536_v22, %s10890_s25 }
0x1cb5   :  { %v4325_v2 = vpop.xlane.xlu1 %4324 }
0x1cb6   :  { %v4327_v20 = vsub.f32 %v8527_v54, %v4325_v2  ;;  %v4322_v16 = vpop.xlane.xlu0 %4321 }
0x1cb7   :  { %v4326_v23 = vsub.f32 %v4311_v32, %v4322_v16 }
0x1cb8   :  { %v4330_v11 = vmul.f32 1.442695, %v4327_v20 }
0x1cb9   :  { %v4328_v5 = vmul.f32 1.442695, %v4326_v23  ;;  %v10285_v35 = vpop.permute.xlu1 %10284 }
0x1cba   :  { %10757 = vpow2.f32 %v4330_v11  ;;  %v10287_v51 = vunpack.i.h.bf16 %v10285_v35  ;;  %v10286_v62 = vunpack.i.l.bf16 %v10285_v35 }
0x1cbb   :  { %10759 = vpow2.f32 %v4328_v5 }
0x1cbc   :  { %v9497_v55 = vpack.c.bf16 %v10287_v51, %v10286_v62 }
0x1cbd   :  { %v10295_v21 = vpop.permute.xlu1 %10294 }
0x1cbe   :  { %9498 = vmatprep.subr.bf16.mxu0 %v9497_v55  ;;  %v10297_v14 = vunpack.i.h.bf16 %v10295_v21  ;;  %v10296_v3 = vunpack.i.l.bf16 %v10295_v21 }
0x1cbf   :  { %9500 = vmatpush3.bf16.msra.mxu0 %v9497_v55 }
0x1cc0   :  { %v9505_v43 = vpack.c.bf16 %v10297_v14, %v10296_v3 }
0x1cc1   :  { %v10300_v27 = vpop.permute.xlu1 %10299 }
0x1cc2   :  { %v10302_v50 = vunpack.i.h.bf16 %v10300_v27  ;;  %v10301_v37 = vunpack.i.l.bf16 %v10300_v27 }
0x1cc4   :  { %v10758_v52 = vpop.eup %10757  ;;  %v9509_v56 = vpack.c.bf16 %v10302_v50, %v10301_v37 }
0x1cc5   :  { %v4335_v29 = vsel %vm1023_vm3, %v10758_v52, 0.0  ;;  %v10760_v49 = vpop.eup %10759  ;;  %v10305_v17 = vpop.permute.xlu1 %10304 }
0x1cc6   :  { %4336 = vadd.xlane.f32.xlu0 %v4335_v29  ;;  %v4332_v59 = vsel %vm1023_vm3, %v10760_v49, 0.0  ;;  %v10307_v41 = vunpack.i.h.bf16 %v10305_v17  ;;  %v10306_v9 = vunpack.i.l.bf16 %v10305_v17 }
0x1cc8   :  { %v9513_v8 = vpack.c.bf16 %v10307_v41, %v10306_v9 }
0x1cc9   :  { %v10310_v33 = vpop.permute.xlu1 %10309 }
0x1cca   :  { %4333 = vadd.xlane.f32.xlu0 %v4332_v59  ;;  %v10312_v54 = vunpack.i.h.bf16 %v10310_v33  ;;  %v10311_v32 = vunpack.i.l.bf16 %v10310_v33 }
0x1ccc   :  { %v9517_v20 = vpack.c.bf16 %v10312_v54, %v10311_v32 }
0x1ccd   :  { %v10320_v51 = vpop.permute.xlu1 %10319 }
0x1cce   :  { %v10322_v62 = vunpack.i.h.bf16 %v10320_v51  ;;  %v10321_v55 = vunpack.i.l.bf16 %v10320_v51 }
0x1cd1   :  { %v10330_v21 = vpop.permute.xlu1 %10329 }
0x1ce0   :  { %10289 = vrot.lane.b32.xlu0 %v12435_v30, %s10889_s24 }
0x1ce4   :  { %10314 = vrot.lane.b32.xlu0 %v12435_v30, %s10890_s25 }
0x1ce8   :  { %10324 = vrot.lane.b32.xlu0 %v12463_v48, %s10890_s25 }
0x1cec   :  { %4455 = vrot.lane.b32.xlu0 %v12538_v13, %s10890_s25 }
0x1d53   :  { %v4337_v15 = vpop.xlane.xlu0 %4336 }
0x1d57   :  { %v4334_v53 = vpop.xlane.xlu0 %4333 }
0x1d58   :  { %10761 = vrcp.f32 %v4334_v53  ;;  %v10331_v53 = vunpack.i.l.bf16 %v10330_v21 }
0x1d59   :  { %10763 = vrcp.f32 %v4337_v15  ;;  %v10332_v15 = vunpack.i.h.bf16 %v10330_v21 }
0x1d5b   :  { %v10290_v25 = vpop.permute.xlu0 %10289  ;;  %v9541_v27 = vpack.c.bf16 %v10332_v15, %v10331_v53 }
0x1d5c   :  { %v10292_v6 = vunpack.i.h.bf16 %v10290_v25  ;;  %v10291_v61 = vunpack.i.l.bf16 %v10290_v25  ;;  %v4458_v25 = vpop.permute.xlu1 %4457 }
0x1d5e   :  { %v9501_v46 = vpack.c.bf16 %v10292_v6, %v10291_v61 }
0x1d5f   :  { %v10315_v63 = vpop.permute.xlu0 %10314 }
0x1d60   :  { %9502 = vmatprep.subr.bf16.mxu0 %v9501_v46  ;;  %v10317_v11 = vunpack.i.h.bf16 %v10315_v63  ;;  %v10316_v5 = vunpack.i.l.bf16 %v10315_v63 }
0x1d61   :  { %9504 = vmatpush3.bf16.msra.mxu0 %v9501_v46 }
0x1d62   :  { %v10762_v19 = vpop.eup %10761  ;;  %9506 = vmatprep.subr.bf16.mxu0 %v9505_v43  ;;  %v9523_v35 = vpack.c.bf16 %v10317_v11, %v10316_v5 }
0x1d63   :  { %v4342_v42 = vmul.f32 %v10762_v19, %v10760_v49  ;;  %v10325_v58 = vpop.permute.xlu0 %10324  ;;  %v10764_v2 = vpop.eup %10763 }
0x1d64   :  { %v4343_v16 = vmul.f32 %v10764_v2, %v10758_v52  ;;  %v9529_v52 = vpack.c.bf16 %v10322_v62, %v10321_v55  ;;  %v10327_v29 = vunpack.i.h.bf16 %v10325_v58  ;;  %v10326_v49 = vunpack.i.l.bf16 %v10325_v58 }
0x1d65   :  { %9508 = vmatpush3.bf16.msra.mxu0 %v9505_v43  ;;  %8548 = vmatprep.mubr.msk.f32.mxu0 %vm1023_vm3, %v4342_v42 }
0x1d66   :  { %9510 = vmatprep.subr.bf16.mxu0 %v9509_v56  ;;  %v9535_v59 = vpack.c.bf16 %v10327_v29, %v10326_v49 }
0x1d67   :  { %v4456_v23 = vpop.permute.xlu0 %4455 }
0x1d69   :  { %9512 = vmatpush3.bf16.msra.mxu0 %v9509_v56 }
0x1d6a   :  { %9514 = vmatprep.subr.bf16.mxu0 %v9513_v8 }
0x1d6d   :  { %9516 = vmatpush3.bf16.msra.mxu0 %v9513_v8 }
0x1d6e   :  { %9519 = vmatprep.subr.msk.bf16.mxu0 %vm11445_vm2, %v9517_v20 }
0x1d70   :  { %8549 = vmatmul.mubr.msk.f32.vlgmr.msra.gmra.mrb[68].mxu0 %vm1023_vm3, %v4343_v16 }
0x1d71   :  { %8571 = vmatprep.mubr.msk.f32.mxu0 %vm911_vm1, %v4456_v23 }
0x1d76   :  { %9522 = vmatpush3.bf16.xpose.msk.msra.mxu0 %vm11445_vm2, %v9517_v20 }
0x1d77   :  { %9525 = vmatprep.subr.msk.bf16.mxu0 %vm11445_vm2, %v9523_v35 }
0x1d7e   :  { %9528 = vmatpush3.bf16.xpose.msk.msra.mxu0 %vm11445_vm2, %v9523_v35 }
0x1d7f   :  { %9531 = vmatprep.subr.msk.bf16.mxu0 %vm11445_vm2, %v9529_v52 }
0x1d86   :  { %9534 = vmatpush3.bf16.xpose.msk.msra.mxu0 %vm11445_vm2, %v9529_v52 }
0x1d87   :  { %9537 = vmatprep.subr.msk.bf16.mxu0 %vm11445_vm2, %v9535_v59 }
0x1d8e   :  { %9540 = vmatpush3.bf16.xpose.msk.msra.mxu0 %vm11445_vm2, %v9535_v59 }
0x1d8f   :  { %9543 = vmatprep.subr.msk.bf16.mxu0 %vm11445_vm2, %v9541_v27 }
0x1d96   :  { %9546 = vmatpush3.bf16.xpose.msk.msra.mxu0 %vm11445_vm2, %v9541_v27 }
0x1d9d   :  { %8572 = vmatmul.mubr.msk.f32.vlgmr.msra.gmra.mrb[70].mxu0 %vm911_vm1, %v4458_v25 }
0x1e43   :  { %v12600_v14 = vpop.f32.mrb[68].mxu0 }
0x1e44   :  { %v12602_v3 = vpop.f32.mrb[69].mxu0 }
0x1e70   :  { %v8573_v6 = vpop.f32.mrb[70].mxu0 }
0x1e71   :  { %v4569_v61 = vpop.f32.mrb[71].mxu0  ;;  %v4581_v46 = vsel %vm1023_vm3, %v8573_v6, -inf }
0x1e72   :  { %4582 = vmax.xlane.f32.xlu1 %v4581_v46  ;;  %v4578_v17 = vsel %vm1023_vm3, %v4569_v61, -inf }
0x1e73   :  { %4579 = vmax.xlane.f32.xlu0 %v4578_v17 }
0x1e83   :  { %10339 = vrot.lane.b32.xlu1 %v12435_v30, %s10891_s26 }
0x1e87   :  { %10349 = vrot.lane.b32.xlu1 %v12463_v48, %s10891_s26 }
0x1e89   :  { %10334 = vrot.lane.b32.xlu0 %v12415_v40, %s10891_s26 }
0x1e8d   :  { %10344 = vrot.lane.b32.xlu0 %v12453_v38, %s10891_s26 }
0x1eff   :  { %v4583_v50 = vpop.xlane.xlu1 %4582 }
0x1f00   :  { %v4585_v37 = vsub.f32 %v8573_v6, %v4583_v50  ;;  %v4580_v43 = vpop.xlane.xlu0 %4579 }
0x1f01   :  { %v4584_v19 = vsub.f32 %v4569_v61, %v4580_v43 }
0x1f02   :  { %v4588_v42 = vmul.f32 1.442695, %v4585_v37 }
0x1f03   :  { %v4586_v41 = vmul.f32 1.442695, %v4584_v19  ;;  %v10340_v9 = vpop.permute.xlu1 %10339 }
0x1f04   :  { %10765 = vpow2.f32 %v4588_v42  ;;  %v10342_v63 = vunpack.i.h.bf16 %v10340_v9  ;;  %v10335_v56 = vpop.permute.xlu0 %10334  ;;  %v10341_v33 = vunpack.i.l.bf16 %v10340_v9 }
0x1f05   :  { %10767 = vpow2.f32 %v4586_v41  ;;  %v10337_v54 = vunpack.i.h.bf16 %v10335_v56  ;;  %v10336_v32 = vunpack.i.l.bf16 %v10335_v56 }
0x1f06   :  { %v9551_v16 = vpack.c.bf16 %v10342_v63, %v10341_v33 }
0x1f07   :  { %v9547_v8 = vpack.c.bf16 %v10337_v54, %v10336_v32  ;;  %v10350_v23 = vpop.permute.xlu1 %10349 }
0x1f08   :  { %v10345_v58 = vpop.permute.xlu0 %10344  ;;  %v10352_v11 = vunpack.i.h.bf16 %v10350_v23  ;;  %v10351_v5 = vunpack.i.l.bf16 %v10350_v23 }
0x1f09   :  { %v10347_v2 = vunpack.i.h.bf16 %v10345_v58  ;;  %v10346_v20 = vunpack.i.l.bf16 %v10345_v58  ;;  %9548 = vmatprep.subr.bf16.mxu1 %v9547_v8 }
0x1f0a   :  { %9550 = vmatpush3.bf16.msra.mxu1 %v9547_v8  ;;  %v9559_v29 = vpack.c.bf16 %v10352_v11, %v10351_v5 }
0x1f0b   :  { %9552 = vmatprep.subr.bf16.mxu1 %v9551_v16  ;;  %v9555_v35 = vpack.c.bf16 %v10347_v2, %v10346_v20 }
0x1f0e   :  { %v10766_v51 = vpop.eup %10765  ;;  %9554 = vmatpush3.bf16.msra.mxu1 %v9551_v16 }
0x1f0f   :  { %v10768_v62 = vpop.eup %10767  ;;  %9556 = vmatprep.subr.bf16.mxu1 %v9555_v35  ;;  %v4593_v55 = vsel %vm1023_vm3, %v10766_v51, 0.0 }
0x1f10   :  { %4594 = vadd.xlane.f32.xlu1 %v4593_v55  ;;  %v4590_v52 = vsel %vm1023_vm3, %v10768_v62, 0.0 }
0x1f11   :  { %4591 = vadd.xlane.f32.xlu0 %v4590_v52 }
0x1f12   :  { %9558 = vmatpush3.bf16.msra.mxu1 %v9555_v35 }
0x1f13   :  { %9560 = vmatprep.subr.bf16.mxu1 %v9559_v29 }
0x1f16   :  { %9562 = vmatpush3.bf16.msra.mxu1 %v9559_v29 }
0x1f21   :  { %10359 = vrot.lane.b32.xlu1 %v12415_v40, %s10892_s27 }
0x1f25   :  { %10369 = vrot.lane.b32.xlu1 %v12453_v38, %s10892_s27 }
0x1f27   :  { %10354 = vrot.lane.b32.xlu0 %v12526_v34, %s10891_s26 }
0x1f29   :  { %10379 = vrot.lane.b32.xlu1 %v12526_v34, %s10892_s27 }
0x1f2b   :  { %10364 = vrot.lane.b32.xlu0 %v12435_v30, %s10892_s27 }
0x1f2d   :  { %4715 = vrot.lane.b32.xlu1 %v12536_v22, %s10892_s27 }
0x1f2f   :  { %10374 = vrot.lane.b32.xlu0 %v12463_v48, %s10892_s27 }
0x1f33   :  { %4713 = vrot.lane.b32.xlu0 %v12538_v13, %s10892_s27 }
0x1f9d   :  { %v4595_v49 = vpop.xlane.xlu1 %4594 }
0x1f9e   :  { %10769 = vrcp.f32 %v4595_v49  ;;  %v4592_v59 = vpop.xlane.xlu0 %4591 }
0x1f9f   :  { %10771 = vrcp.f32 %v4592_v59 }
0x1fa1   :  { %v10360_v21 = vpop.permute.xlu1 %10359 }
0x1fa2   :  { %v10355_v15 = vpop.permute.xlu0 %10354  ;;  %v10362_v53 = vunpack.i.h.bf16 %v10360_v21  ;;  %v10361_v27 = vunpack.i.l.bf16 %v10360_v21 }
0x1fa3   :  { %v10357_v25 = vunpack.i.h.bf16 %v10355_v15  ;;  %v10356_v6 = vunpack.i.l.bf16 %v10355_v15 }
0x1fa4   :  { %v9567_v17 = vpack.c.bf16 %v10362_v53, %v10361_v27 }
0x1fa5   :  { %v9563_v61 = vpack.c.bf16 %v10357_v25, %v10356_v6  ;;  %v10370_v33 = vpop.permute.xlu1 %10369 }
0x1fa6   :  { %v10365_v46 = vpop.permute.xlu0 %10364  ;;  %v10372_v54 = vunpack.i.h.bf16 %v10370_v33  ;;  %v10371_v32 = vunpack.i.l.bf16 %v10370_v33 }
0x1fa7   :  { %9564 = vmatprep.subr.bf16.mxu1 %v9563_v61  ;;  %v10367_v41 = vunpack.i.h.bf16 %v10365_v46  ;;  %v10366_v9 = vunpack.i.l.bf16 %v10365_v46 }
0x1fa8   :  { %v10770_v50 = vpop.eup %10769  ;;  %9566 = vmatpush3.bf16.msra.mxu1 %v9563_v61  ;;  %v9579_v8 = vpack.c.bf16 %v10372_v54, %v10371_v32 }
0x1fa9   :  { %v10772_v37 = vpop.eup %10771  ;;  %9569 = vmatprep.subr.msk.bf16.mxu1 %vm11445_vm2, %v9567_v17  ;;  %v4601_v42 = vmul.f32 %v10770_v50, %v10766_v51  ;;  %v9573_v56 = vpack.c.bf16 %v10367_v41, %v10366_v9  ;;  %v10380_v16 = vpop.permute.xlu1 %10379 }
0x1faa   :  { %v10375_v43 = vpop.permute.xlu0 %10374  ;;  %v4600_v19 = vmul.f32 %v10772_v37, %v10768_v62  ;;  %v10382_v23 = vunpack.i.h.bf16 %v10380_v16  ;;  %v10381_v11 = vunpack.i.l.bf16 %v10380_v16 }
0x1fab   :  { %v10377_v58 = vunpack.i.h.bf16 %v10375_v43  ;;  %v10376_v2 = vunpack.i.l.bf16 %v10375_v43 }
0x1fac   :  { %8594 = vmatprep.mubr.msk.f32.mxu1 %vm1023_vm3, %v4600_v19  ;;  %v9591_v5 = vpack.c.bf16 %v10382_v23, %v10381_v11 }
0x1fad   :  { %8595 = vmatmul.mubr.msk.f32.vlgmr.msra.gmra.mrb[58].mxu1 %vm1023_vm3, %v4601_v42  ;;  %v9585_v20 = vpack.c.bf16 %v10377_v58, %v10376_v2  ;;  %v4716_v35 = vpop.permute.xlu1 %4715 }
0x1fae   :  { %v4714_v63 = vpop.permute.xlu0 %4713 }
0x1faf   :  { %8617 = vmatprep.mubr.msk.f32.mxu1 %vm911_vm1, %v4714_v63 }
0x1fb1   :  { %9572 = vmatpush3.bf16.xpose.msk.msra.mxu1 %vm11445_vm2, %v9567_v17 }
0x1fb2   :  { %9575 = vmatprep.subr.msk.bf16.mxu1 %vm11445_vm2, %v9573_v56 }
0x1fb9   :  { %9578 = vmatpush3.bf16.xpose.msk.msra.mxu1 %vm11445_vm2, %v9573_v56 }
0x1fba   :  { %9581 = vmatprep.subr.msk.bf16.mxu1 %vm11445_vm2, %v9579_v8 }
0x1fc1   :  { %9584 = vmatpush3.bf16.xpose.msk.msra.mxu1 %vm11445_vm2, %v9579_v8 }
0x1fc2   :  { %9587 = vmatprep.subr.msk.bf16.mxu1 %vm11445_vm2, %v9585_v20 }
0x1fc9   :  { %9590 = vmatpush3.bf16.xpose.msk.msra.mxu1 %vm11445_vm2, %v9585_v20 }
0x1fca   :  { %9593 = vmatprep.subr.msk.bf16.mxu1 %vm11445_vm2, %v9591_v5 }
0x1fd1   :  { %9596 = vmatpush3.bf16.xpose.msk.msra.mxu1 %vm11445_vm2, %v9591_v5 }
0x1fd8   :  { %8618 = vmatmul.mubr.msk.f32.vlgmr.msra.gmra.mrb[60].mxu1 %vm911_vm1, %v4716_v35 }
0x2080   :  { %v12656_v51 = vpop.f32.mrb[58].mxu1 }
0x2081   :  { %v12658_v62 = vpop.f32.mrb[59].mxu1 }
0x20ab   :  { %v8619_v55 = vpop.f32.mrb[60].mxu1 }
0x20ac   :  { %v4827_v52 = vpop.f32.mrb[61].mxu1  ;;  %v4839_v29 = vsel %vm1023_vm3, %v8619_v55, -inf }
0x20ad   :  { %4840 = vmax.xlane.f32.xlu1 %v4839_v29  ;;  %v4836_v49 = vsel %vm1023_vm3, %v4827_v52, -inf }
0x20ae   :  { %4837 = vmax.xlane.f32.xlu0 %v4836_v49 }
0x20be   :  { %10389 = vrot.lane.b32.xlu1 %v12435_v30, %s10893_s28 }
0x20c2   :  { %10399 = vrot.lane.b32.xlu1 %v12463_v48, %s10893_s28 }
0x20c4   :  { %10384 = vrot.lane.b32.xlu0 %v12415_v40, %s10893_s28 }
0x20c8   :  { %10394 = vrot.lane.b32.xlu0 %v12453_v38, %s10893_s28 }
0x213a   :  { %v4841_v59 = vpop.xlane.xlu1 %4840 }
0x213b   :  { %v4843_v21 = vsub.f32 %v8619_v55, %v4841_v59  ;;  %v4838_v15 = vpop.xlane.xlu0 %4837 }
0x213c   :  { %v4842_v53 = vsub.f32 %v4827_v52, %v4838_v15 }
0x213d   :  { %v4846_v27 = vmul.f32 1.442695, %v4843_v21 }
0x213e   :  { %v4844_v25 = vmul.f32 1.442695, %v4842_v53  ;;  %v10390_v6 = vpop.permute.xlu1 %10389 }
0x213f   :  { %10773 = vpow2.f32 %v4846_v27  ;;  %v10392_v61 = vunpack.i.h.bf16 %v10390_v6  ;;  %v10385_v46 = vpop.permute.xlu0 %10384  ;;  %v10391_v17 = vunpack.i.l.bf16 %v10390_v6 }
0x2140   :  { %10775 = vpow2.f32 %v4844_v25  ;;  %v10387_v50 = vunpack.i.h.bf16 %v10385_v46  ;;  %v10386_v37 = vunpack.i.l.bf16 %v10385_v46 }
0x2141   :  { %v9601_v9 = vpack.c.bf16 %v10392_v61, %v10391_v17 }
0x2142   :  { %v9597_v43 = vpack.c.bf16 %v10387_v50, %v10386_v37  ;;  %v10400_v63 = vpop.permute.xlu1 %10399 }
0x2143   :  { %v10395_v19 = vpop.permute.xlu0 %10394  ;;  %v10402_v56 = vunpack.i.h.bf16 %v10400_v63  ;;  %v10401_v33 = vunpack.i.l.bf16 %v10400_v63 }
0x2144   :  { %v10397_v42 = vunpack.i.h.bf16 %v10395_v19  ;;  %v10396_v41 = vunpack.i.l.bf16 %v10395_v19  ;;  %9598 = vmatprep.subr.bf16.mxu0 %v9597_v43 }
0x2145   :  { %9600 = vmatpush3.bf16.msra.mxu0 %v9597_v43  ;;  %v9609_v20 = vpack.c.bf16 %v10402_v56, %v10401_v33 }
0x2146   :  { %9602 = vmatprep.subr.bf16.mxu0 %v9601_v9  ;;  %v9605_v54 = vpack.c.bf16 %v10397_v42, %v10396_v41 }
0x2149   :  { %v10774_v32 = vpop.eup %10773  ;;  %9604 = vmatpush3.bf16.msra.mxu0 %v9601_v9 }
0x214a   :  { %v10776_v8 = vpop.eup %10775  ;;  %9606 = vmatprep.subr.bf16.mxu0 %v9605_v54  ;;  %v4851_v58 = vsel %vm1023_vm3, %v10774_v32, 0.0 }
0x214b   :  { %4852 = vadd.xlane.f32.xlu1 %v4851_v58  ;;  %v4848_v2 = vsel %vm1023_vm3, %v10776_v8, 0.0 }
0x214c   :  { %4849 = vadd.xlane.f32.xlu0 %v4848_v2 }
0x214d   :  { %9608 = vmatpush3.bf16.msra.mxu0 %v9605_v54 }
0x214e   :  { %9610 = vmatprep.subr.bf16.mxu0 %v9609_v20 }
0x2151   :  { %9612 = vmatpush3.bf16.msra.mxu0 %v9609_v20 }
0x215c   :  { %10409 = vrot.lane.b32.xlu1 %v12415_v40, %s10894_s0 }
0x2160   :  { %10419 = vrot.lane.b32.xlu1 %v12453_v38, %s10894_s0 }
0x2162   :  { %10404 = vrot.lane.b32.xlu0 %v12526_v34, %s10893_s28 }
0x2164   :  { %10429 = vrot.lane.b32.xlu1 %v12526_v34, %s10894_s0 }
0x2166   :  { %10414 = vrot.lane.b32.xlu0 %v12435_v30, %s10894_s0 }
0x2168   :  { %4973 = vrot.lane.b32.xlu1 %v12536_v22, %s10894_s0 }
0x216a   :  { %10424 = vrot.lane.b32.xlu0 %v12463_v48, %s10894_s0 }
0x216e   :  { %4971 = vrot.lane.b32.xlu0 %v12538_v13, %s10894_s0 }
0x21d8   :  { %v4853_v16 = vpop.xlane.xlu1 %4852 }
0x21d9   :  { %10777 = vrcp.f32 %v4853_v16  ;;  %v4850_v23 = vpop.xlane.xlu0 %4849 }
0x21da   :  { %10779 = vrcp.f32 %v4850_v23 }
0x21dc   :  { %v10410_v11 = vpop.permute.xlu1 %10409 }
0x21dd   :  { %v10405_v5 = vpop.permute.xlu0 %10404  ;;  %v10412_v35 = vunpack.i.h.bf16 %v10410_v11  ;;  %v10411_v55 = vunpack.i.l.bf16 %v10410_v11 }
0x21de   :  { %v10407_v52 = vunpack.i.h.bf16 %v10405_v5  ;;  %v10406_v29 = vunpack.i.l.bf16 %v10405_v5 }
0x21df   :  { %v9617_v21 = vpack.c.bf16 %v10412_v35, %v10411_v55 }
0x21e0   :  { %v9613_v49 = vpack.c.bf16 %v10407_v52, %v10406_v29  ;;  %v10420_v17 = vpop.permute.xlu1 %10419 }
0x21e1   :  { %v10415_v59 = vpop.permute.xlu0 %10414  ;;  %v10422_v50 = vunpack.i.h.bf16 %v10420_v17  ;;  %v10421_v37 = vunpack.i.l.bf16 %v10420_v17 }
0x21e2   :  { %9614 = vmatprep.subr.bf16.mxu0 %v9613_v49  ;;  %v10417_v25 = vunpack.i.h.bf16 %v10415_v59  ;;  %v10416_v6 = vunpack.i.l.bf16 %v10415_v59 }
0x21e3   :  { %v10778_v22 = vpop.eup %10777  ;;  %9616 = vmatpush3.bf16.msra.mxu0 %v9613_v49  ;;  %v9629_v43 = vpack.c.bf16 %v10422_v50, %v10421_v37 }
0x21e4   :  { %v10780_v15 = vpop.eup %10779  ;;  %9619 = vmatprep.subr.msk.bf16.mxu0 %vm11445_vm2, %v9617_v21  ;;  %v4859_v27 = vmul.f32 %v10778_v22, %v10774_v32  ;;  %v9623_v46 = vpack.c.bf16 %v10417_v25, %v10416_v6  ;;  %v10430_v9 = vpop.permute.xlu1 %10429 }
0x21e5   :  { %v10425_v13 = vpop.permute.xlu0 %10424  ;;  %v4858_v53 = vmul.f32 %v10780_v15, %v10776_v8  ;;  %v10432_v63 = vunpack.i.h.bf16 %v10430_v9  ;;  %v10431_v56 = vunpack.i.l.bf16 %v10430_v9 }
0x21e6   :  { %v10427_v19 = vunpack.i.h.bf16 %v10425_v13  ;;  %v10426_v42 = vunpack.i.l.bf16 %v10425_v13 }
0x21e7   :  { %8640 = vmatprep.mubr.msk.f32.mxu0 %vm1023_vm3, %v4858_v53  ;;  %v9641_v33 = vpack.c.bf16 %v10432_v63, %v10431_v56 }
0x21e8   :  { %8641 = vmatmul.mubr.msk.f32.vlgmr.msra.gmra.mrb[72].mxu0 %vm1023_vm3, %v4859_v27  ;;  %v9635_v41 = vpack.c.bf16 %v10427_v19, %v10426_v42  ;;  %v4974_v54 = vpop.permute.xlu1 %4973 }
0x21e9   :  { %v4972_v61 = vpop.permute.xlu0 %4971 }
0x21ea   :  { %8663 = vmatprep.mubr.msk.f32.mxu0 %vm911_vm1, %v4972_v61 }
0x21ec   :  { %9622 = vmatpush3.bf16.xpose.msk.msra.mxu0 %vm11445_vm2, %v9617_v21 }
0x21ed   :  { %9625 = vmatprep.subr.msk.bf16.mxu0 %vm11445_vm2, %v9623_v46 }
0x21f4   :  { %9628 = vmatpush3.bf16.xpose.msk.msra.mxu0 %vm11445_vm2, %v9623_v46 }
0x21f5   :  { %9631 = vmatprep.subr.msk.bf16.mxu0 %vm11445_vm2, %v9629_v43 }
0x21fc   :  { %9634 = vmatpush3.bf16.xpose.msk.msra.mxu0 %vm11445_vm2, %v9629_v43 }
0x21fd   :  { %9637 = vmatprep.subr.msk.bf16.mxu0 %vm11445_vm2, %v9635_v41 }
0x2204   :  { %9640 = vmatpush3.bf16.xpose.msk.msra.mxu0 %vm11445_vm2, %v9635_v41 }
0x2205   :  { %9643 = vmatprep.subr.msk.bf16.mxu0 %vm11445_vm2, %v9641_v33 }
0x220c   :  { %9646 = vmatpush3.bf16.xpose.msk.msra.mxu0 %vm11445_vm2, %v9641_v33 }
0x2213   :  { %8664 = vmatmul.mubr.msk.f32.vlgmr.msra.gmra.mrb[74].mxu0 %vm911_vm1, %v4974_v54 }
0x22bb   :  { %v12712_v32 = vpop.f32.mrb[72].mxu0 }
0x22bc   :  { %v12714_v8 = vpop.f32.mrb[73].mxu0 }
0x22e6   :  { %v8665_v58 = vpop.f32.mrb[74].mxu0 }
0x22e7   :  { %v5085_v2 = vpop.f32.mrb[75].mxu0  ;;  %v5097_v20 = vsel %vm1023_vm3, %v8665_v58, -inf }
0x22e8   :  { %5098 = vmax.xlane.f32.xlu1 %v5097_v20  ;;  %v5094_v16 = vsel %vm1023_vm3, %v5085_v2, -inf }
0x22e9   :  { %5095 = vmax.xlane.f32.xlu0 %v5094_v16 }
0x22f9   :  { %10439 = vrot.lane.b32.xlu1 %v12435_v30, %s10895_s29 }
0x22ff   :  { %10434 = vrot.lane.b32.xlu0 %v12415_v40, %s10895_s29 }
0x2303   :  { %10444 = vrot.lane.b32.xlu0 %v12453_v38, %s10895_s29 }
0x2375   :  { %v5099_v23 = vpop.xlane.xlu1 %5098 }
0x2376   :  { %v5101_v11 = vsub.f32 %v8665_v58, %v5099_v23  ;;  %v5096_v5 = vpop.xlane.xlu0 %5095 }
0x2377   :  { %v5100_v35 = vsub.f32 %v5085_v2, %v5096_v5 }
0x2378   :  { %v5104_v55 = vmul.f32 1.442695, %v5101_v11 }
0x2379   :  { %v5102_v52 = vmul.f32 1.442695, %v5100_v35  ;;  %v10440_v29 = vpop.permute.xlu1 %10439 }
0x237a   :  { %10781 = vpow2.f32 %v5104_v55  ;;  %v10442_v49 = vunpack.i.h.bf16 %v10440_v29  ;;  %v10435_v59 = vpop.permute.xlu0 %10434  ;;  %v10441_v21 = vunpack.i.l.bf16 %v10440_v29 }
0x237b   :  { %10783 = vpow2.f32 %v5102_v52  ;;  %v10437_v22 = vunpack.i.h.bf16 %v10435_v59  ;;  %v10436_v30 = vunpack.i.l.bf16 %v10435_v59 }
0x237c   :  { %v9651_v40 = vpack.c.bf16 %v10442_v49, %v10441_v21 }
0x237d   :  { %v9647_v15 = vpack.c.bf16 %v10437_v22, %v10436_v30 }
0x237e   :  { %v10445_v13 = vpop.permute.xlu0 %10444 }
0x237f   :  { %v10447_v53 = vunpack.i.h.bf16 %v10445_v13  ;;  %v10446_v27 = vunpack.i.l.bf16 %v10445_v13  ;;  %9648 = vmatprep.subr.bf16.mxu1 %v9647_v15 }
0x2380   :  { %9650 = vmatpush3.bf16.msra.mxu1 %v9647_v15 }
0x2381   :  { %9652 = vmatprep.subr.bf16.mxu1 %v9651_v40  ;;  %v9655_v38 = vpack.c.bf16 %v10447_v53, %v10446_v27 }
0x2384   :  { %v10782_v25 = vpop.eup %10781  ;;  %9654 = vmatpush3.bf16.msra.mxu1 %v9651_v40 }
0x2385   :  { %v10784_v6 = vpop.eup %10783  ;;  %9656 = vmatprep.subr.bf16.mxu1 %v9655_v38  ;;  %v5109_v61 = vsel %vm1023_vm3, %v10782_v25, 0.0 }
0x2386   :  { %5110 = vadd.xlane.f32.xlu1 %v5109_v61  ;;  %v5106_v46 = vsel %vm1023_vm3, %v10784_v6, 0.0 }
0x2387   :  { %5107 = vadd.xlane.f32.xlu0 %v5106_v46 }
0x2388   :  { %9658 = vmatpush3.bf16.msra.mxu1 %v9655_v38 }
0x2397   :  { %10449 = vrot.lane.b32.xlu1 %v12463_v48, %s10895_s29 }
0x239d   :  { %10454 = vrot.lane.b32.xlu0 %v12526_v34, %s10895_s29 }
0x2413   :  { %v5111_v17 = vpop.xlane.xlu1 %5110 }
0x2414   :  { %10785 = vrcp.f32 %v5111_v17  ;;  %v5108_v50 = vpop.xlane.xlu0 %5107 }
0x2415   :  { %10787 = vrcp.f32 %v5108_v50 }
0x2417   :  { %v10450_v37 = vpop.permute.xlu1 %10449 }
0x2418   :  { %v10452_v43 = vunpack.i.h.bf16 %v10450_v37  ;;  %v10451_v19 = vunpack.i.l.bf16 %v10450_v37  ;;  %v10455_v42 = vpop.permute.xlu0 %10454 }
0x2419   :  { %v10457_v41 = vunpack.i.h.bf16 %v10455_v42  ;;  %v10456_v9 = vunpack.i.l.bf16 %v10455_v42 }
0x241a   :  { %v9659_v63 = vpack.c.bf16 %v10452_v43, %v10451_v19 }
0x241b   :  { %v9663_v56 = vpack.c.bf16 %v10457_v41, %v10456_v9 }
0x241c   :  { %9660 = vmatprep.subr.bf16.mxu1 %v9659_v63 }
0x241d   :  { %9662 = vmatpush3.bf16.msra.mxu1 %v9659_v63 }
0x241e   :  { %v10786_v33 = vpop.eup %10785  ;;  %9664 = vmatprep.subr.bf16.mxu1 %v9663_v56 }
0x241f   :  { %v10788_v48 = vpop.eup %10787  ;;  %v5117_v34 = vmul.f32 %v10786_v33, %v10782_v25 }
0x2420   :  { %v5116_v54 = vmul.f32 %v10788_v48, %v10784_v6 }
0x2421   :  { %9666 = vmatpush3.bf16.msra.mxu1 %v9663_v56 }
0x2422   :  { %8686 = vmatprep.mubr.msk.f32.mxu1 %vm1023_vm3, %v5116_v54  ;;  %9669 = vmatprep.subr.msk.bf16.mxu1 %vm11445_vm2, %v12467_v44 }
0x2424   :  { %8687 = vmatmul.mubr.msk.f32.vlgmr.msra.gmra.mrb[62].mxu1 %vm1023_vm3, %v5117_v34 }
0x2425   :  { %8709 = vmatprep.mubr.msk.f32.mxu1 %vm911_vm1, %v12546_v39 }
0x242a   :  { %9672 = vmatpush3.bf16.xpose.msk.msra.mxu1 %vm11445_vm2, %v12467_v44 }
0x242b   :  { %9675 = vmatprep.subr.msk.bf16.mxu1 %vm11445_vm2, %v12477_v18 }
0x2432   :  { %9678 = vmatpush3.bf16.xpose.msk.msra.mxu1 %vm11445_vm2, %v12477_v18 }
0x2433   :  { %9681 = vmatprep.subr.msk.bf16.mxu1 %vm11445_vm2, %v12483_v12 }
0x243a   :  { %9684 = vmatpush3.bf16.xpose.msk.msra.mxu1 %vm11445_vm2, %v12483_v12 }
0x243b   :  { %9687 = vmatprep.subr.msk.bf16.mxu1 %vm11445_vm2, %v12489_v4 }
0x2442   :  { %9690 = vmatpush3.bf16.xpose.msk.msra.mxu1 %vm11445_vm2, %v12489_v4 }
0x2443   :  { %9693 = vmatprep.subr.msk.bf16.mxu1 %vm11445_vm2, %v12532_v45 }
0x244a   :  { %9696 = vmatpush3.bf16.xpose.msk.msra.mxu1 %vm11445_vm2, %v12532_v45 }
0x2451   :  { %8710 = vmatmul.mubr.msk.f32.vlgmr.msra.gmra.mrb[64].mxu1 %vm911_vm1, %v12544_v47 }
0x24f7   :  { %v12766_v44 = vpop.f32.mrb[62].mxu1 }
0x24f8   :  { %v12768_v18 = vpop.f32.mrb[63].mxu1 }
0x2524   :  { %v8711_v12 = vpop.f32.mrb[64].mxu1 }
0x2525   :  { %v5385_v58 = vpop.f32.mrb[65].mxu1  ;;  %v5397_v2 = vsel %vm1023_vm3, %v8711_v12, -inf }
0x2526   :  { %5398 = vmax.xlane.f32.xlu0 %v5397_v2  ;;  %v5394_v4 = vsel %vm1023_vm3, %v5385_v58, -inf }
0x2527   :  { %5395 = vmax.xlane.f32.xlu1 %v5394_v4 }
0x2538   :  { %10464 = vrot.lane.b32.xlu1 %v12479_v1, %s10889_s24 }
0x253c   :  { %10459 = vrot.lane.b32.xlu0 %v12469_v60, %s10889_s24  ;;  %10469 = vrot.lane.b32.xlu1 %v12485_v24, %s10889_s24 }
0x2540   :  { %10474 = vrot.lane.b32.xlu0 %v12491_v28, %s10889_s24  ;;  %10479 = vrot.lane.b32.xlu1 %v12534_v36, %s10889_s24 }
0x25b3   :  { %v5399_v45 = vpop.xlane.xlu0 %5398 }
0x25b4   :  { %v5401_v20 = vsub.f32 %v8711_v12, %v5399_v45  ;;  %v5396_v16 = vpop.xlane.xlu1 %5395 }
0x25b5   :  { %v5400_v23 = vsub.f32 %v5385_v58, %v5396_v16 }
0x25b6   :  { %v5404_v11 = vmul.f32 1.442695, %v5401_v20 }
0x25b7   :  { %v5402_v5 = vmul.f32 1.442695, %v5400_v23  ;;  %v10460_v35 = vpop.permute.xlu0 %10459 }
0x25b8   :  { %10789 = vpow2.f32 %v5404_v11  ;;  %v10462_v55 = vunpack.i.h.bf16 %v10460_v35  ;;  %v10461_v52 = vunpack.i.l.bf16 %v10460_v35  ;;  %v10465_v29 = vpop.permute.xlu1 %10464 }
0x25b9   :  { %10791 = vpow2.f32 %v5402_v5  ;;  %v10467_v49 = vunpack.i.h.bf16 %v10465_v29  ;;  %v10466_v59 = vunpack.i.l.bf16 %v10465_v29 }
0x25ba   :  { %v9697_v21 = vpack.c.bf16 %v10462_v55, %v10461_v52 }
0x25bb   :  { %v9701_v22 = vpack.c.bf16 %v10467_v49, %v10466_v59  ;;  %v10475_v15 = vpop.permute.xlu0 %10474 }
0x25bc   :  { %9698 = vmatprep.subr.bf16.mxu0 %v9697_v21  ;;  %v10470_v30 = vpop.permute.xlu1 %10469  ;;  %v10477_v27 = vunpack.i.h.bf16 %v10475_v15  ;;  %v10476_v38 = vunpack.i.l.bf16 %v10475_v15 }
0x25bd   :  { %v10472_v13 = vunpack.i.h.bf16 %v10470_v30  ;;  %v10471_v40 = vunpack.i.l.bf16 %v10470_v30  ;;  %9700 = vmatpush3.bf16.msra.mxu0 %v9697_v21 }
0x25be   :  { %9702 = vmatprep.subr.bf16.mxu0 %v9701_v22  ;;  %v9709_v17 = vpack.c.bf16 %v10477_v27, %v10476_v38 }
0x25bf   :  { %v9705_v53 = vpack.c.bf16 %v10472_v13, %v10471_v40 }
0x25c0   :  { %v10480_v25 = vpop.permute.xlu1 %10479 }
0x25c1   :  { %9704 = vmatpush3.bf16.msra.mxu0 %v9701_v22  ;;  %v10482_v50 = vunpack.i.h.bf16 %v10480_v25  ;;  %v10481_v37 = vunpack.i.l.bf16 %v10480_v25 }
0x25c2   :  { %v10790_v6 = vpop.eup %10789  ;;  %9706 = vmatprep.subr.bf16.mxu0 %v9705_v53 }
0x25c3   :  { %v10792_v61 = vpop.eup %10791  ;;  %v5409_v46 = vsel %vm1023_vm3, %v10790_v6, 0.0  ;;  %v9713_v19 = vpack.c.bf16 %v10482_v50, %v10481_v37 }
0x25c4   :  { %5410 = vadd.xlane.f32.xlu1 %v5409_v46  ;;  %v5406_v43 = vsel %vm1023_vm3, %v10792_v61, 0.0 }
0x25c5   :  { %5407 = vadd.xlane.f32.xlu0 %v5406_v43  ;;  %9708 = vmatpush3.bf16.msra.mxu0 %v9705_v53 }
0x25c6   :  { %9710 = vmatprep.subr.bf16.mxu0 %v9709_v17 }
0x25c9   :  { %9712 = vmatpush3.bf16.msra.mxu0 %v9709_v17 }
0x25ca   :  { %9714 = vmatprep.subr.bf16.mxu0 %v9713_v19 }
0x25cd   :  { %9716 = vmatpush3.bf16.msra.mxu0 %v9713_v19 }
0x25d5   :  { %10489 = vrot.lane.b32.xlu1 %v12479_v1, %s10890_s25 }
0x25d9   :  { %10499 = vrot.lane.b32.xlu1 %v12491_v28, %s10890_s25 }
0x25db   :  { %10484 = vrot.lane.b32.xlu0 %v12469_v60, %s10890_s25 }
0x25dd   :  { %5529 = vrot.lane.b32.xlu1 %v12546_v39, %s10890_s25 }
0x25df   :  { %10494 = vrot.lane.b32.xlu0 %v12485_v24, %s10890_s25 }
0x25e3   :  { %10504 = vrot.lane.b32.xlu0 %v12534_v36, %s10890_s25 }
0x25e7   :  { %5531 = vrot.lane.b32.xlu0 %v12544_v47, %s10890_s25 }
0x2651   :  { %v5411_v42 = vpop.xlane.xlu1 %5410 }
0x2652   :  { %10793 = vrcp.f32 %v5411_v42  ;;  %v5408_v41 = vpop.xlane.xlu0 %5407 }
0x2653   :  { %10795 = vrcp.f32 %v5408_v41 }
0x2655   :  { %v10490_v9 = vpop.permute.xlu1 %10489 }
0x2656   :  { %v10485_v63 = vpop.permute.xlu0 %10484  ;;  %v10492_v58 = vunpack.i.h.bf16 %v10490_v9  ;;  %v10491_v2 = vunpack.i.l.bf16 %v10490_v9 }
0x2657   :  { %v10487_v56 = vunpack.i.h.bf16 %v10485_v63  ;;  %v10486_v33 = vunpack.i.l.bf16 %v10485_v63 }
0x2658   :  { %v9723_v20 = vpack.c.bf16 %v10492_v58, %v10491_v2 }
0x2659   :  { %v9717_v48 = vpack.c.bf16 %v10487_v56, %v10486_v33  ;;  %v10500_v54 = vpop.permute.xlu1 %10499 }
0x265a   :  { %v10495_v23 = vpop.permute.xlu0 %10494  ;;  %v10502_v55 = vunpack.i.h.bf16 %v10500_v54  ;;  %v10501_v52 = vunpack.i.l.bf16 %v10500_v54 }
0x265b   :  { %9719 = vmatprep.subr.msk.bf16.mxu0 %vm11445_vm2, %v9717_v48  ;;  %v10497_v11 = vunpack.i.h.bf16 %v10495_v23  ;;  %v10496_v5 = vunpack.i.l.bf16 %v10495_v23 }
0x265c   :  { %v10794_v34 = vpop.eup %10793  ;;  %v9735_v29 = vpack.c.bf16 %v10502_v55, %v10501_v52 }
0x265d   :  { %v10796_v12 = vpop.eup %10795  ;;  %v5417_v45 = vmul.f32 %v10794_v34, %v10790_v6  ;;  %v5530_v16 = vpop.permute.xlu1 %5529  ;;  %v9729_v35 = vpack.c.bf16 %v10497_v11, %v10496_v5 }
0x265e   :  { %v5416_v4 = vmul.f32 %v10796_v12, %v10792_v61  ;;  %v10505_v49 = vpop.permute.xlu0 %10504 }
0x265f   :  { %v10507_v59 = vunpack.i.h.bf16 %v10505_v49  ;;  %v10506_v21 = vunpack.i.l.bf16 %v10505_v49 }
0x2660   :  { %8732 = vmatprep.mubr.msk.f32.mxu0 %vm1023_vm3, %v5416_v4 }
0x2661   :  { %8733 = vmatmul.mubr.msk.f32.vlgmr.msra.gmra.mrb[76].mxu0 %vm1023_vm3, %v5417_v45  ;;  %v9741_v22 = vpack.c.bf16 %v10507_v59, %v10506_v21 }
0x2662   :  { %9722 = vmatpush3.bf16.xpose.msk.msra.mxu0 %vm11445_vm2, %v9717_v48  ;;  %8755 = vmatprep.mubr.msk.f32.mxu0 %vm911_vm1, %v5530_v16  ;;  %v5532_v30 = vpop.permute.xlu0 %5531 }
0x2663   :  { %9725 = vmatprep.subr.msk.bf16.mxu0 %vm11445_vm2, %v9723_v20 }
0x266a   :  { %9728 = vmatpush3.bf16.xpose.msk.msra.mxu0 %vm11445_vm2, %v9723_v20 }
0x266b   :  { %9731 = vmatprep.subr.msk.bf16.mxu0 %vm11445_vm2, %v9729_v35 }
0x2672   :  { %9734 = vmatpush3.bf16.xpose.msk.msra.mxu0 %vm11445_vm2, %v9729_v35 }
0x2673   :  { %9737 = vmatprep.subr.msk.bf16.mxu0 %vm11445_vm2, %v9735_v29 }
0x267a   :  { %9740 = vmatpush3.bf16.xpose.msk.msra.mxu0 %vm11445_vm2, %v9735_v29 }
0x267b   :  { %9743 = vmatprep.subr.msk.bf16.mxu0 %vm11445_vm2, %v9741_v22 }
0x2682   :  { %9746 = vmatpush3.bf16.xpose.msk.msra.mxu0 %vm11445_vm2, %v9741_v22 }
0x2689   :  { %8756 = vmatmul.mubr.msk.f32.vlgmr.msra.gmra.mrb[78].mxu0 %vm911_vm1, %v5532_v30 }
0x2734   :  { %v12822_v15 = vpop.f32.mrb[76].mxu0 }
0x2735   :  { %v12824_v13 = vpop.f32.mrb[77].mxu0 }
0x275c   :  { %v8757_v40 = vpop.f32.mrb[78].mxu0 }
0x275d   :  { %v5643_v53 = vpop.f32.mrb[79].mxu0  ;;  %v5655_v27 = vsel %vm1023_vm3, %v8757_v40, -inf }
0x275e   :  { %5656 = vmax.xlane.f32.xlu0 %v5655_v27  ;;  %v5652_v38 = vsel %vm1023_vm3, %v5643_v53, -inf }
0x275f   :  { %5653 = vmax.xlane.f32.xlu1 %v5652_v38 }
0x2770   :  { %10514 = vrot.lane.b32.xlu1 %v12479_v1, %s10891_s26 }
0x2774   :  { %10509 = vrot.lane.b32.xlu0 %v12469_v60, %s10891_s26  ;;  %10519 = vrot.lane.b32.xlu1 %v12485_v24, %s10891_s26 }
0x2778   :  { %10524 = vrot.lane.b32.xlu0 %v12491_v28, %s10891_s26  ;;  %10529 = vrot.lane.b32.xlu1 %v12534_v36, %s10891_s26 }
0x27eb   :  { %v5657_v25 = vpop.xlane.xlu0 %5656 }
0x27ec   :  { %v5659_v6 = vsub.f32 %v8757_v40, %v5657_v25  ;;  %v5654_v61 = vpop.xlane.xlu1 %5653 }
0x27ed   :  { %v5658_v46 = vsub.f32 %v5643_v53, %v5654_v61 }
0x27ee   :  { %v5662_v17 = vmul.f32 1.442695, %v5659_v6 }
0x27ef   :  { %v5660_v50 = vmul.f32 1.442695, %v5658_v46  ;;  %v10510_v37 = vpop.permute.xlu0 %10509 }
0x27f0   :  { %10797 = vpow2.f32 %v5662_v17  ;;  %v10512_v43 = vunpack.i.h.bf16 %v10510_v37  ;;  %v10511_v19 = vunpack.i.l.bf16 %v10510_v37  ;;  %v10515_v42 = vpop.permute.xlu1 %10514 }
0x27f1   :  { %10799 = vpow2.f32 %v5660_v50  ;;  %v10517_v41 = vunpack.i.h.bf16 %v10515_v42  ;;  %v10516_v9 = vunpack.i.l.bf16 %v10515_v42 }
0x27f2   :  { %v9747_v63 = vpack.c.bf16 %v10512_v43, %v10511_v19 }
0x27f3   :  { %v9751_v56 = vpack.c.bf16 %v10517_v41, %v10516_v9  ;;  %v10525_v48 = vpop.permute.xlu0 %10524 }
0x27f4   :  { %9748 = vmatprep.subr.bf16.mxu1 %v9747_v63  ;;  %v10520_v33 = vpop.permute.xlu1 %10519  ;;  %v10527_v58 = vunpack.i.h.bf16 %v10525_v48  ;;  %v10526_v2 = vunpack.i.l.bf16 %v10525_v48 }
0x27f5   :  { %v10522_v54 = vunpack.i.h.bf16 %v10520_v33  ;;  %v10521_v34 = vunpack.i.l.bf16 %v10520_v33  ;;  %9750 = vmatpush3.bf16.msra.mxu1 %v9747_v63 }
0x27f6   :  { %9752 = vmatprep.subr.bf16.mxu1 %v9751_v56  ;;  %v9759_v23 = vpack.c.bf16 %v10527_v58, %v10526_v2 }
0x27f7   :  { %v9755_v12 = vpack.c.bf16 %v10522_v54, %v10521_v34 }
0x27f8   :  { %v10530_v4 = vpop.permute.xlu1 %10529 }
0x27f9   :  { %9754 = vmatpush3.bf16.msra.mxu1 %v9751_v56  ;;  %v10532_v11 = vunpack.i.h.bf16 %v10530_v4  ;;  %v10531_v5 = vunpack.i.l.bf16 %v10530_v4 }
0x27fa   :  { %v10798_v45 = vpop.eup %10797  ;;  %9756 = vmatprep.subr.bf16.mxu1 %v9755_v12 }
0x27fb   :  { %v10800_v20 = vpop.eup %10799  ;;  %v5667_v16 = vsel %vm1023_vm3, %v10798_v45, 0.0  ;;  %v9763_v55 = vpack.c.bf16 %v10532_v11, %v10531_v5 }
0x27fc   :  { %5668 = vadd.xlane.f32.xlu1 %v5667_v16  ;;  %v5664_v35 = vsel %vm1023_vm3, %v10800_v20, 0.0 }
0x27fd   :  { %5665 = vadd.xlane.f32.xlu0 %v5664_v35  ;;  %9758 = vmatpush3.bf16.msra.mxu1 %v9755_v12 }
0x27fe   :  { %9760 = vmatprep.subr.bf16.mxu1 %v9759_v23 }
0x2801   :  { %9762 = vmatpush3.bf16.msra.mxu1 %v9759_v23 }
0x2802   :  { %9764 = vmatprep.subr.bf16.mxu1 %v9763_v55 }
0x2805   :  { %9766 = vmatpush3.bf16.msra.mxu1 %v9763_v55 }
0x280d   :  { %10539 = vrot.lane.b32.xlu1 %v12479_v1, %s10892_s27 }
0x2811   :  { %10549 = vrot.lane.b32.xlu1 %v12491_v28, %s10892_s27 }
0x2813   :  { %10534 = vrot.lane.b32.xlu0 %v12469_v60, %s10892_s27 }
0x2815   :  { %5787 = vrot.lane.b32.xlu1 %v12546_v39, %s10892_s27 }
0x2817   :  { %10544 = vrot.lane.b32.xlu0 %v12485_v24, %s10892_s27 }
0x281b   :  { %10554 = vrot.lane.b32.xlu0 %v12534_v36, %s10892_s27 }
0x281f   :  { %5789 = vrot.lane.b32.xlu0 %v12544_v47, %s10892_s27 }
0x2889   :  { %v5669_v52 = vpop.xlane.xlu1 %5668 }
0x288a   :  { %10801 = vrcp.f32 %v5669_v52  ;;  %v5666_v29 = vpop.xlane.xlu0 %5665 }
0x288b   :  { %10803 = vrcp.f32 %v5666_v29 }
0x288d   :  { %v10540_v49 = vpop.permute.xlu1 %10539 }
0x288e   :  { %v10535_v59 = vpop.permute.xlu0 %10534  ;;  %v10542_v38 = vunpack.i.h.bf16 %v10540_v49  ;;  %v10541_v25 = vunpack.i.l.bf16 %v10540_v49 }
0x288f   :  { %v10537_v21 = vunpack.i.h.bf16 %v10535_v59  ;;  %v10536_v22 = vunpack.i.l.bf16 %v10535_v59 }
0x2890   :  { %v9773_v46 = vpack.c.bf16 %v10542_v38, %v10541_v25 }
0x2891   :  { %v9767_v30 = vpack.c.bf16 %v10537_v21, %v10536_v22  ;;  %v10550_v40 = vpop.permute.xlu1 %10549 }
0x2892   :  { %v10545_v50 = vpop.permute.xlu0 %10544  ;;  %v10552_v42 = vunpack.i.h.bf16 %v10550_v40  ;;  %v10551_v41 = vunpack.i.l.bf16 %v10550_v40 }
0x2893   :  { %9769 = vmatprep.subr.msk.bf16.mxu1 %vm11445_vm2, %v9767_v30  ;;  %v10547_v37 = vunpack.i.h.bf16 %v10545_v50  ;;  %v10546_v43 = vunpack.i.l.bf16 %v10545_v50 }
0x2894   :  { %v10802_v53 = vpop.eup %10801  ;;  %v9785_v9 = vpack.c.bf16 %v10552_v42, %v10551_v41 }
0x2895   :  { %v10804_v27 = vpop.eup %10803  ;;  %v5675_v61 = vmul.f32 %v10802_v53, %v10798_v45  ;;  %v5788_v17 = vpop.permute.xlu1 %5787  ;;  %v9779_v19 = vpack.c.bf16 %v10547_v37, %v10546_v43 }
0x2896   :  { %v5674_v6 = vmul.f32 %v10804_v27, %v10800_v20  ;;  %v10555_v63 = vpop.permute.xlu0 %10554 }
0x2897   :  { %v10557_v56 = vunpack.i.h.bf16 %v10555_v63  ;;  %v10556_v33 = vunpack.i.l.bf16 %v10555_v63 }
0x2898   :  { %8778 = vmatprep.mubr.msk.f32.mxu1 %vm1023_vm3, %v5674_v6 }
0x2899   :  { %8779 = vmatmul.mubr.msk.f32.vlgmr.msra.gmra.mrb[66].mxu1 %vm1023_vm3, %v5675_v61  ;;  %v9791_v48 = vpack.c.bf16 %v10557_v56, %v10556_v33 }
0x289a   :  { %9772 = vmatpush3.bf16.xpose.msk.msra.mxu1 %vm11445_vm2, %v9767_v30  ;;  %8801 = vmatprep.mubr.msk.f32.mxu1 %vm911_vm1, %v5788_v17  ;;  %v5790_v54 = vpop.permute.xlu0 %5789 }
0x289b   :  { %9775 = vmatprep.subr.msk.bf16.mxu1 %vm11445_vm2, %v9773_v46 }
0x28a2   :  { %9778 = vmatpush3.bf16.xpose.msk.msra.mxu1 %vm11445_vm2, %v9773_v46 }
0x28a3   :  { %9781 = vmatprep.subr.msk.bf16.mxu1 %vm11445_vm2, %v9779_v19 }
0x28aa   :  { %9784 = vmatpush3.bf16.xpose.msk.msra.mxu1 %vm11445_vm2, %v9779_v19 }
0x28ab   :  { %9787 = vmatprep.subr.msk.bf16.mxu1 %vm11445_vm2, %v9785_v9 }
0x28b2   :  { %9790 = vmatpush3.bf16.xpose.msk.msra.mxu1 %vm11445_vm2, %v9785_v9 }
0x28b3   :  { %9793 = vmatprep.subr.msk.bf16.mxu1 %vm11445_vm2, %v9791_v48 }
0x28ba   :  { %9796 = vmatpush3.bf16.xpose.msk.msra.mxu1 %vm11445_vm2, %v9791_v48 }
0x28c1   :  { %8802 = vmatmul.mubr.msk.f32.vlgmr.msra.gmra.mrb[68].mxu1 %vm911_vm1, %v5790_v54 }
0x296c   :  { %v12878_v34 = vpop.f32.mrb[66].mxu1 }
0x296d   :  { %v12880_v12 = vpop.f32.mrb[67].mxu1 }
0x2994   :  { %v8803_v58 = vpop.f32.mrb[68].mxu1 }
0x2995   :  { %v5901_v2 = vpop.f32.mrb[69].mxu1  ;;  %v5913_v4 = vsel %vm1023_vm3, %v8803_v58, -inf }
0x2996   :  { %5914 = vmax.xlane.f32.xlu0 %v5913_v4  ;;  %v5910_v45 = vsel %vm1023_vm3, %v5901_v2, -inf }
0x2997   :  { %5911 = vmax.xlane.f32.xlu1 %v5910_v45 }
0x29a8   :  { %10564 = vrot.lane.b32.xlu1 %v12479_v1, %s10893_s28 }
0x29ac   :  { %10559 = vrot.lane.b32.xlu0 %v12469_v60, %s10893_s28  ;;  %10569 = vrot.lane.b32.xlu1 %v12485_v24, %s10893_s28 }
0x29b0   :  { %10574 = vrot.lane.b32.xlu0 %v12491_v28, %s10893_s28  ;;  %10579 = vrot.lane.b32.xlu1 %v12534_v36, %s10893_s28 }
0x2a23   :  { %v5915_v20 = vpop.xlane.xlu0 %5914 }
0x2a24   :  { %v5917_v16 = vsub.f32 %v8803_v58, %v5915_v20  ;;  %v5912_v23 = vpop.xlane.xlu1 %5911 }
0x2a25   :  { %v5916_v11 = vsub.f32 %v5901_v2, %v5912_v23 }
0x2a26   :  { %v5920_v5 = vmul.f32 1.442695, %v5917_v16 }
0x2a27   :  { %v5918_v35 = vmul.f32 1.442695, %v5916_v11  ;;  %v10560_v55 = vpop.permute.xlu0 %10559 }
0x2a28   :  { %10805 = vpow2.f32 %v5920_v5  ;;  %v10562_v52 = vunpack.i.h.bf16 %v10560_v55  ;;  %v10561_v29 = vunpack.i.l.bf16 %v10560_v55  ;;  %v10565_v49 = vpop.permute.xlu1 %10564 }
0x2a29   :  { %10807 = vpow2.f32 %v5918_v35  ;;  %v10567_v59 = vunpack.i.h.bf16 %v10565_v49  ;;  %v10566_v21 = vunpack.i.l.bf16 %v10565_v49 }
0x2a2a   :  { %v9797_v22 = vpack.c.bf16 %v10562_v52, %v10561_v29 }
0x2a2b   :  { %v9801_v30 = vpack.c.bf16 %v10567_v59, %v10566_v21  ;;  %v10575_v53 = vpop.permute.xlu0 %10574 }
0x2a2c   :  { %9798 = vmatprep.subr.bf16.mxu0 %v9797_v22  ;;  %v10570_v40 = vpop.permute.xlu1 %10569  ;;  %v10577_v6 = vunpack.i.h.bf16 %v10575_v53  ;;  %v10576_v61 = vunpack.i.l.bf16 %v10575_v53 }
0x2a2d   :  { %v10572_v27 = vunpack.i.h.bf16 %v10570_v40  ;;  %v10571_v38 = vunpack.i.l.bf16 %v10570_v40  ;;  %9800 = vmatpush3.bf16.msra.mxu0 %v9797_v22 }
0x2a2e   :  { %9802 = vmatprep.subr.bf16.mxu0 %v9801_v30  ;;  %v9809_v43 = vpack.c.bf16 %v10577_v6, %v10576_v61 }
0x2a2f   :  { %v9805_v25 = vpack.c.bf16 %v10572_v27, %v10571_v38 }
0x2a30   :  { %v10580_v46 = vpop.permute.xlu1 %10579 }
0x2a31   :  { %9804 = vmatpush3.bf16.msra.mxu0 %v9801_v30  ;;  %v10582_v19 = vunpack.i.h.bf16 %v10580_v46  ;;  %v10581_v42 = vunpack.i.l.bf16 %v10580_v46 }
0x2a32   :  { %v10806_v17 = vpop.eup %10805  ;;  %9806 = vmatprep.subr.bf16.mxu0 %v9805_v25 }
0x2a33   :  { %v10808_v50 = vpop.eup %10807  ;;  %v5925_v37 = vsel %vm1023_vm3, %v10806_v17, 0.0  ;;  %v9813_v9 = vpack.c.bf16 %v10582_v19, %v10581_v42 }
0x2a34   :  { %5926 = vadd.xlane.f32.xlu1 %v5925_v37  ;;  %v5922_v41 = vsel %vm1023_vm3, %v10808_v50, 0.0 }
0x2a35   :  { %5923 = vadd.xlane.f32.xlu0 %v5922_v41  ;;  %9808 = vmatpush3.bf16.msra.mxu0 %v9805_v25 }
0x2a36   :  { %9810 = vmatprep.subr.bf16.mxu0 %v9809_v43 }
0x2a39   :  { %9812 = vmatpush3.bf16.msra.mxu0 %v9809_v43 }
0x2a3a   :  { %9814 = vmatprep.subr.bf16.mxu0 %v9813_v9 }
0x2a3d   :  { %9816 = vmatpush3.bf16.msra.mxu0 %v9813_v9 }
0x2a45   :  { %10589 = vrot.lane.b32.xlu1 %v12479_v1, %s10894_s0 }
0x2a49   :  { %10599 = vrot.lane.b32.xlu1 %v12491_v28, %s10894_s0 }
0x2a4b   :  { %10584 = vrot.lane.b32.xlu0 %v12469_v60, %s10894_s0 }
0x2a4d   :  { %6045 = vrot.lane.b32.xlu1 %v12546_v39, %s10894_s0 }
0x2a4f   :  { %10594 = vrot.lane.b32.xlu0 %v12485_v24, %s10894_s0 }
0x2a53   :  { %10604 = vrot.lane.b32.xlu0 %v12534_v36, %s10894_s0 }
0x2a57   :  { %6047 = vrot.lane.b32.xlu0 %v12544_v47, %s10894_s0 }
0x2ac1   :  { %v5927_v63 = vpop.xlane.xlu1 %5926 }
0x2ac2   :  { %10809 = vrcp.f32 %v5927_v63  ;;  %v5924_v56 = vpop.xlane.xlu0 %5923 }
0x2ac3   :  { %10811 = vrcp.f32 %v5924_v56 }
0x2ac5   :  { %v10590_v33 = vpop.permute.xlu1 %10589 }
0x2ac6   :  { %v10585_v48 = vpop.permute.xlu0 %10584  ;;  %v10592_v20 = vunpack.i.h.bf16 %v10590_v33  ;;  %v10591_v16 = vunpack.i.l.bf16 %v10590_v33 }
0x2ac7   :  { %v10587_v54 = vunpack.i.h.bf16 %v10585_v48  ;;  %v10586_v58 = vunpack.i.l.bf16 %v10585_v48 }
0x2ac8   :  { %v9823_v47 = vpack.c.bf16 %v10592_v20, %v10591_v16 }
0x2ac9   :  { %v9817_v2 = vpack.c.bf16 %v10587_v54, %v10586_v58  ;;  %v10600_v4 = vpop.permute.xlu1 %10599 }
0x2aca   :  { %v10595_v35 = vpop.permute.xlu0 %10594  ;;  %v10602_v49 = vunpack.i.h.bf16 %v10600_v4  ;;  %v10601_v59 = vunpack.i.l.bf16 %v10600_v4 }
0x2acb   :  { %9819 = vmatprep.subr.msk.bf16.mxu0 %vm11445_vm2, %v9817_v2  ;;  %v10597_v55 = vunpack.i.h.bf16 %v10595_v35  ;;  %v10596_v52 = vunpack.i.l.bf16 %v10595_v35 }
0x2acc   :  { %v10810_v39 = vpop.eup %10809  ;;  %v9835_v21 = vpack.c.bf16 %v10602_v49, %v10601_v59  ;;  %v7266_v49 = vld [vmem:[%s13180_s7 + $0x58] sm:$0xff] }
0x2acd   :  { %v10812_v45 = vpop.eup %10811  ;;  %v5933_v11 = vmul.f32 %v10810_v39, %v10806_v17  ;;  %v6046_v5 = vpop.permute.xlu1 %6045  ;;  %v9829_v29 = vpack.c.bf16 %v10597_v55, %v10596_v52 }
0x2ace   :  { %v5932_v23 = vmul.f32 %v10812_v45, %v10808_v50  ;;  %v10605_v22 = vpop.permute.xlu0 %10604 }
0x2acf   :  { %v10607_v30 = vunpack.i.h.bf16 %v10605_v22  ;;  %v10606_v40 = vunpack.i.l.bf16 %v10605_v22 }
0x2ad0   :  { %8824 = vmatprep.mubr.msk.f32.mxu0 %vm1023_vm3, %v5932_v23 }
0x2ad1   :  { %8825 = vmatmul.mubr.msk.f32.vlgmr.msra.gmra.mrb[80].mxu0 %vm1023_vm3, %v5933_v11  ;;  %v9841_v53 = vpack.c.bf16 %v10607_v30, %v10606_v40 }
0x2ad2   :  { %9822 = vmatpush3.bf16.xpose.msk.msra.mxu0 %vm11445_vm2, %v9817_v2  ;;  %8847 = vmatprep.mubr.msk.f32.mxu0 %vm911_vm1, %v6046_v5  ;;  %v6048_v27 = vpop.permute.xlu0 %6047  ;;  %v7264_v5 = vld [vmem:[%s13180_s7 + $0x48] sm:$0xff] }
0x2ad3   :  { %9825 = vmatprep.subr.msk.bf16.mxu0 %vm11445_vm2, %v9823_v47 }
0x2ada   :  { %9828 = vmatpush3.bf16.xpose.msk.msra.mxu0 %vm11445_vm2, %v9823_v47  ;;  %v7263_v47 = vld [vmem:[%s13180_s7 + $0x40] sm:$0xff] }
0x2adb   :  { %9831 = vmatprep.subr.msk.bf16.mxu0 %vm11445_vm2, %v9829_v29  ;;  %v9867_v55 = vpack.c.bf16 %v7264_v5, %v7263_v47  ;;  %v7277_v47 = vld [vmem:[%s13181_s8 + $0x30] sm:$0xff] }
0x2ae2   :  { %9834 = vmatpush3.bf16.xpose.msk.msra.mxu0 %vm11445_vm2, %v9829_v29  ;;  %v7265_v29 = vld [vmem:[%s13180_s7 + $0x50] sm:$0xff] }
0x2ae3   :  { %9837 = vmatprep.subr.msk.bf16.mxu0 %vm11445_vm2, %v9835_v21  ;;  %v9871_v30 = vpack.c.bf16 %v7266_v49, %v7265_v29 }
0x2aea   :  { %9840 = vmatpush3.bf16.xpose.msk.msra.mxu0 %vm11445_vm2, %v9835_v21 }
0x2aeb   :  { %9843 = vmatprep.subr.msk.bf16.mxu0 %vm11445_vm2, %v9841_v53 }
0x2af2   :  { %9846 = vmatpush3.bf16.xpose.msk.msra.mxu0 %vm11445_vm2, %v9841_v53  ;;  %v7267_v53 = vld [vmem:[%s13180_s7 + $0x60] sm:$0xff] }
0x2af9   :  { %8848 = vmatmul.mubr.msk.f32.vlgmr.msra.gmra.mrb[82].mxu0 %vm911_vm1, %v6048_v27  ;;  %v7268_v27 = vld [vmem:[%s13180_s7 + $0x68] sm:$0xff] }
0x2ba4   :  { %v8826_v38 = vpop.f32.mrb[80].mxu0 }
0x2ba5   :  { %v6036_v25 = vpop.f32.mrb[81].mxu0 }
0x2bcc   :  { %v8849_v6 = vpop.f32.mrb[82].mxu0 }
0x2bcd   :  { %v6159_v61 = vpop.f32.mrb[83].mxu0  ;;  %v6171_v46 = vsel %vm1023_vm3, %v8849_v6, -inf }
0x2bce   :  { %6172 = vmax.xlane.f32.xlu0 %v6171_v46  ;;  %v6168_v17 = vsel %vm1023_vm3, %v6159_v61, -inf }
0x2bcf   :  { %6169 = vmax.xlane.f32.xlu1 %v6168_v17 }
0x2be0   :  { %10609 = vrot.lane.b32.xlu1 %v12469_v60, %s10895_s29 }
0x2be4   :  { %10619 = vrot.lane.b32.xlu1 %v12485_v24, %s10895_s29 }
0x2be8   :  { %10624 = vrot.lane.b32.xlu1 %v12491_v28, %s10895_s29 }
0x2bec   :  { %10629 = vrot.lane.b32.xlu1 %v12534_v36, %s10895_s29 }
0x2bf0   :  { %5233 = vrot.lane.b32.xlu1 %v12656_v51, %s10895_s29 }
0x2bf4   :  { %5241 = vrot.lane.b32.xlu1 %v12712_v32, %s10893_s28 }
0x2bf8   :  { %5249 = vrot.lane.b32.xlu1 %v12766_v44, %s10891_s26 }
0x2bfc   :  { %6307 = vrot.lane.b32.xlu1 %v12878_v34, %s10895_s29 }
0x2c00   :  { %6315 = vrot.lane.b32.xlu1 %v8826_v38, %s10893_s28 }
0x2c5b   :  { %v6173_v7 = vpop.xlane.xlu0 %6172 }
0x2c5c   :  { %v6175_v60 = vsub.f32 %v8849_v6, %v6173_v7  ;;  %v6170_v24 = vpop.xlane.xlu1 %6169  ;;  %v7269_v6 = vld [vmem:[%s13180_s7 + $0x70] sm:$0xff] }
0x2c5d   :  { %v6174_v28 = vsub.f32 %v6159_v61, %v6170_v24  ;;  %v7270_v61 = vld [vmem:[%s13180_s7 + $0x78] sm:$0xff] }
0x2c5e   :  { %v6178_v50 = vmul.f32 1.442695, %v6175_v60  ;;  %v9879_v17 = vpack.c.bf16 %v7270_v61, %v7269_v6 }
0x2c5f   :  { %v6176_v36 = vmul.f32 1.442695, %v6174_v28 }
0x2c60   :  { %10813 = vpow2.f32 %v6178_v50  ;;  %v10610_v37 = vpop.permute.xlu1 %10609 }
0x2c61   :  { %v10612_v51 = vunpack.i.h.bf16 %v10610_v37  ;;  %v10611_v43 = vunpack.i.l.bf16 %v10610_v37  ;;  %10815 = vpow2.f32 %v6176_v36 }
0x2c63   :  { %v9847_v32 = vpack.c.bf16 %v10612_v51, %v10611_v43 }
0x2c64   :  { %v10620_v9 = vpop.permute.xlu1 %10619 }
0x2c65   :  { %9848 = vmatprep.subr.bf16.mxu1 %v9847_v32  ;;  %v10622_v33 = vunpack.i.h.bf16 %v10620_v9  ;;  %v10621_v48 = vunpack.i.l.bf16 %v10620_v9 }
0x2c66   :  { %9850 = vmatpush3.bf16.msra.mxu1 %v9847_v32 }
0x2c68   :  { %v10625_v56 = vpop.permute.xlu1 %10624 }
0x2c69   :  { %v10627_v2 = vunpack.i.h.bf16 %v10625_v56  ;;  %v10626_v4 = vunpack.i.l.bf16 %v10625_v56 }
0x2c6a   :  { %v10814_v44 = vpop.eup %10813 }
0x2c6b   :  { %v6183_v19 = vsel %vm1023_vm3, %v10814_v44, 0.0  ;;  %v10816_v34 = vpop.eup %10815  ;;  %v9859_v20 = vpack.c.bf16 %v10627_v2, %v10626_v4 }
0x2c6c   :  { %6184 = vadd.xlane.f32.xlu0 %v6183_v19  ;;  %v6180_v42 = vsel %vm1023_vm3, %v10816_v34, 0.0 }
0x2c70   :  { %6181 = vadd.xlane.f32.xlu0 %v6180_v42 }
0x2c86   :  { %10614 = vrot.lane.b32.xlu0 %v12479_v1, %s10895_s29 }
0x2c8a   :  { %5231 = vrot.lane.b32.xlu0 %v12658_v62, %s10895_s29 }
0x2c8e   :  { %5239 = vrot.lane.b32.xlu0 %v12714_v8, %s10893_s28  ;;  %v9855_v8 = vpack.c.bf16 %v10622_v33, %v10621_v48 }
0x2c92   :  { %5247 = vrot.lane.b32.xlu0 %v12768_v18, %s10891_s26  ;;  %v10630_v18 = vpop.permute.xlu1 %10629 }
0x2c93   :  { %v10632_v16 = vunpack.i.h.bf16 %v10630_v18  ;;  %v10631_v23 = vunpack.i.l.bf16 %v10630_v18 }
0x2c95   :  { %v9863_v35 = vpack.c.bf16 %v10632_v16, %v10631_v23 }
0x2c96   :  { %6305 = vrot.lane.b32.xlu0 %v12880_v12, %s10895_s29  ;;  %v5234_v38 = vpop.permute.xlu1 %5233 }
0x2c97   :  { %v5254_v60 = vsel %vm911_vm1, %v12600_v14, %v5234_v38 }
0x2c9a   :  { %6313 = vrot.lane.b32.xlu0 %v6036_v25, %s10893_s28  ;;  %v5242_v46 = vpop.permute.xlu1 %5241 }
0x2c9b   :  { %v5256_v24 = vsel %vm73_vm0, %v5254_v60, %v5242_v46  ;;  %v13204_v60 = vsub.s32 2, %v13201_v31 }
0x2c9e   :  { %v5250_v7 = vpop.permute.xlu1 %5249 }
0x2c9f   :  { %v5258_v28 = vsel %vm1961_vm5, %v5256_v24, %v5250_v7  ;;  %v13065_v7 = vld [vmem:[%s13176_s3 + $0x8] sm:$0x3f] }
0x2ca0   :  { %v13070_v24 = vrot.slane %v13065_v7, %v13204_v60 }
0x2ca2   :  { %v6308_v19 = vpop.permute.xlu1 %6307 }
0x2ca6   :  { %v6316_v42 = vpop.permute.xlu1 %6315 }
0x2cf9   :  { %v6185_v41 = vpop.xlane.xlu0 %6184 }
0x2cfd   :  { %v6182_v63 = vpop.xlane.xlu0 %6181 }
0x2cfe   :  { %10817 = vrcp.f32 %v6182_v63 }
0x2cff   :  { %10819 = vrcp.f32 %v6185_v41 }
0x2d01   :  { %v10615_v1 = vpop.permute.xlu0 %10614 }
0x2d02   :  { %v10617_v62 = vunpack.i.h.bf16 %v10615_v1  ;;  %v10616_v54 = vunpack.i.l.bf16 %v10615_v1 }
0x2d04   :  { %v9851_v58 = vpack.c.bf16 %v10617_v62, %v10616_v54 }
0x2d05   :  { %v5232_v12 = vpop.permute.xlu0 %5231 }
0x2d06   :  { %9852 = vmatprep.subr.bf16.mxu1 %v9851_v58  ;;  %v5253_v22 = vsel %vm911_vm1, %v12602_v3, %v5232_v12  ;;  %v9875_v3 = vpack.c.bf16 %v7268_v27, %v7267_v53 }
0x2d07   :  { %9854 = vmatpush3.bf16.msra.mxu1 %v9851_v58 }
0x2d08   :  { %v10818_v39 = vpop.eup %10817  ;;  %9856 = vmatprep.subr.bf16.mxu1 %v9855_v8 }
0x2d09   :  { %v6190_v45 = vmul.f32 %v10818_v39, %v10816_v34  ;;  %v5240_v11 = vpop.permute.xlu0 %5239  ;;  %v10820_v52 = vpop.eup %10819 }
0x2d0a   :  { %v6191_v21 = vmul.f32 %v10820_v52, %v10814_v44  ;;  %v5255_v40 = vsel %vm73_vm0, %v5253_v22, %v5240_v11 }
0x2d0b   :  { %9858 = vmatpush3.bf16.msra.mxu1 %v9855_v8  ;;  %8870 = vmatprep.mubr.msk.f32.mxu1 %vm1023_vm3, %v6190_v45 }
0x2d0c   :  { %9860 = vmatprep.subr.bf16.mxu1 %v9859_v20 }
0x2d0d   :  { %v5248_v59 = vpop.permute.xlu0 %5247 }
0x2d0e   :  { %v5257_v25 = vsel %vm1961_vm5, %v5255_v40, %v5248_v59 }
0x2d0f   :  { %9862 = vmatpush3.bf16.msra.mxu1 %v9859_v20 }
0x2d10   :  { %9864 = vmatprep.subr.bf16.mxu1 %v9863_v35 }
0x2d11   :  { %v6306_v34 = vpop.permute.xlu0 %6305 }
0x2d12   :  { %v6327_v9 = vsel %vm911_vm1, %v12824_v13, %v6306_v34 }
0x2d13   :  { %9866 = vmatpush3.bf16.msra.mxu1 %v9863_v35  ;;  %v7278_v35 = vld [vmem:[%s13181_s8 + $0x38] sm:$0xff] }
0x2d14   :  { %9868 = vmatprep.subr.bf16.mxu1 %v9867_v55 }
0x2d15   :  { %v6314_v41 = vpop.permute.xlu0 %6313 }
0x2d16   :  { %8871 = vmatmul.mubr.msk.f32.vlgmr.msra.gmra.mrb[70].mxu1 %vm1023_vm3, %v6191_v21  ;;  %v6329_v63 = vsel %vm73_vm0, %v6327_v9, %v6314_v41  ;;  %v7288_v41 = vld [vmem:[%s13182_s9 + $0x88] sm:$0xff] }
0x2d17   :  { %9870 = vmatpush3.bf16.msra.mxu1 %v9867_v55  ;;  %8889 = vmatprep.mubr.msk.f32.mxu1 %vm3046_vm4, %v5257_v25  ;;  %v9887_v55 = vpack.c.bf16 %v7278_v35, %v7277_v47  ;;  %v7302_v35 = vld [vmem:[%s13182_s9 + $0xf8] sm:$0xff] }
0x2d18   :  { %9872 = vmatprep.subr.bf16.mxu1 %v9871_v30 }
0x2d1b   :  { %9874 = vmatpush3.bf16.msra.mxu1 %v9871_v30 }
0x2d1c   :  { %9876 = vmatprep.subr.bf16.mxu1 %v9875_v3 }
0x2d1f   :  { %9878 = vmatpush3.bf16.msra.mxu1 %v9875_v3 }
0x2d20   :  { %9880 = vmatprep.subr.bf16.mxu1 %v9879_v17 }
0x2d23   :  { %9882 = vmatpush3.bf16.msra.mxu1 %v9879_v17 }
0x2d26   :  { %8890 = vmatmul.mubr.msk.f32.vlgmr.msra.gmra.mrb[72].mxu1 %vm3046_vm4, %v5258_v28 }
0x2de9   :  { %v8872_v50 = vpop.f32.mrb[70].mxu1 }
0x2dea   :  { %6323 = vrot.lane.b32.xlu1 %v8872_v50, %s10891_s26  ;;  %v6294_v36 = vpop.f32.mrb[71].mxu1 }
0x2deb   :  { %6321 = vrot.lane.b32.xlu0 %v6294_v36, %s10891_s26 }
0x2df9   :  { %v8891_v37 = vpop.f32.mrb[72].mxu1 }
0x2dfa   :  { %v6420_v51 = vpop.f32.mrb[73].mxu1  ;;  %v13008_v14 = vadd.f32 %v8891_v37, %v12350_v10  ;;  %v6328_v10 = vsel %vm911_vm1, %v12822_v15, %v6308_v19  ;;  %v13205_v37 = vsub.s32 3, %v13201_v31 }
0x2dfb   :  { %v13005_v43 = vadd.f32 %v6420_v51, %v12353_v26  ;;  %v6330_v1 = vsel %vm73_vm0, %v6328_v10, %v6316_v42  ;;  %v7287_v42 = vld [vmem:[%s13182_s9 + $0x80] sm:$0xff]  ;;  %v7290_v10 = vld [vmem:[%s13182_s9 + $0x98] sm:$0xff] }
0x2dfc   :  { %v6446_v44 = vsel %vm73_vm0, %v13008_v14, 0.0  ;;  %v13075_v51 = vrot.slane %v13065_v7, %v13205_v37  ;;  %v9891_v9 = vpack.c.bf16 %v7288_v41, %v7287_v42 }
0x2dfd   :  { %v6443_v32 = vsel %vm73_vm0, %v13005_v43, 0.0 }
0x2dfe   :  { %9892 = vmatprep.subr.bf16.mxu1 %v9891_v9 }
0x2dff   :  { %9894 = vmatpush3.bf16.msra.mxu1 %v9891_v9 }
0x2e0a   :  { %6444 = vadd.xlane.f32.xlu0 %v6443_v32 }
0x2e0e   :  { %6447 = vadd.xlane.f32.xlu1 %v6446_v44 }
0x2e5c   :  { %v6324_v26 = vpop.permute.xlu1 %6323 }
0x2e5d   :  { %v6322_v56 = vpop.permute.xlu0 %6321  ;;  %v6332_v48 = vsel %vm1961_vm5, %v6330_v1, %v6324_v26  ;;  %v7289_v26 = vld [vmem:[%s13182_s9 + $0x90] sm:$0xff]  ;;  %v7292_v1 = vld [vmem:[%s13182_s9 + $0xa8] sm:$0xff] }
0x2e5e   :  { %v6331_v33 = vsel %vm1961_vm5, %v6329_v63, %v6322_v56  ;;  %v9895_v63 = vpack.c.bf16 %v7290_v10, %v7289_v26  ;;  %v7291_v56 = vld [vmem:[%s13182_s9 + $0xa0] sm:$0xff] }
0x2e5f   :  { %8892 = vmatprep.mubr.msk.f32.mxu1 %vm3046_vm4, %v6331_v33  ;;  %v9899_v33 = vpack.c.bf16 %v7292_v1, %v7291_v56 }
0x2e60   :  { %8893 = vmatmul.mubr.msk.f32.gmra.mrb[74].mxu1 %vm3046_vm4, %v6332_v48  ;;  %9896 = vmatprep.subr.bf16.mxu1 %v9895_v63  ;;  %v7293_v48 = vld [vmem:[%s13182_s9 + $0xb0] sm:$0xff] }
0x2e61   :  { %9898 = vmatpush3.bf16.msra.mxu1 %v9895_v63 }
0x2e62   :  { %9900 = vmatprep.subr.bf16.mxu1 %v9899_v33 }
0x2e65   :  { %9902 = vmatpush3.bf16.msra.mxu1 %v9899_v33 }
0x2e97   :  { %v6445_v8 = vpop.xlane.xlu0 %6444 }
0x2e98   :  { %v6455_v2 = vmul.f32 0.03125, %v6445_v8 }
0x2e9a   :  { %v6459_v39 = vsub.f32 %v13005_v43, %v6455_v2  ;;  %v7297_v2 = vld [vmem:[%s13182_s9 + $0xd0] sm:$0xff] }
0x2e9b   :  { %v6448_v62 = vpop.xlane.xlu1 %6447 }
0x2e9c   :  { %v6456_v54 = vmul.f32 0.03125, %v6448_v62  ;;  %v6463_v23 = vmul.f32 %v6459_v39, %v6459_v39  ;;  %v7294_v62 = vld [vmem:[%s13182_s9 + $0xb8] sm:$0xff] }
0x2e9e   :  { %v6460_v13 = vsub.f32 %v13008_v14, %v6456_v54  ;;  %v6467_v11 = vsel %vm73_vm0, %v6463_v23, 0.0  ;;  %v9903_v54 = vpack.c.bf16 %v7294_v62, %v7293_v48  ;;  %v7299_v23 = vld [vmem:[%s13182_s9 + $0xe0] sm:$0xff] }
0x2ea0   :  { %v6464_v58 = vmul.f32 %v6460_v13, %v6460_v13  ;;  %9904 = vmatprep.subr.bf16.mxu1 %v9903_v54 }
0x2ea1   :  { %9906 = vmatpush3.bf16.msra.mxu1 %v9903_v54 }
0x2ea2   :  { %v6470_v15 = vsel %vm73_vm0, %v6464_v58, 0.0  ;;  %v7296_v58 = vld [vmem:[%s13182_s9 + $0xc8] sm:$0xff] }
0x2ea3   :  { %6471 = vadd.xlane.f32.xlu1 %v6470_v15 }
0x2f30   :  { %v6472_v52 = vpop.xlane.xlu1 %6471 }
0x2f31   :  { %v6480_v29 = vmul.f32 0.03125, %v6472_v52 }
0x2f33   :  { %v8894_v4 = vpop.f32.mrb[74].mxu1  ;;  %v6484_v22 = vadd.f32 1e-05, %v6480_v29 }
0x2f34   :  { %v6430_v18 = vpop.f32.mrb[75].mxu1  ;;  %v13031_v45 = vadd.f32 %v8894_v4, %v12360_v0  ;;  %v7276_v0 = vld [vmem:[%s13181_s8 + $0x28] sm:$0xff]  ;;  %v7298_v4 = vld [vmem:[%s13182_s9 + $0xd8] sm:$0xff] }
0x2f35   :  { %v13027_v12 = vadd.f32 %v6430_v18, %v12363_v57  ;;  %v7275_v57 = vld [vmem:[%s13181_s8 + $0x20] sm:$0xff]  ;;  %10821 = vrsqrt.f32 %v6484_v22 }
0x2f36   :  { %v6452_v16 = vsel %vm73_vm0, %v13031_v45, 0.0  ;;  %v9883_v5 = vpack.c.bf16 %v7276_v0, %v7275_v57 }
0x2f37   :  { %v6449_v20 = vsel %vm73_vm0, %v13027_v12, 0.0 }
0x2f38   :  { %6450 = vadd.xlane.f32.xlu0 %v6449_v20  ;;  %9884 = vmatprep.subr.bf16.mxu0 %v9883_v5 }
0x2f39   :  { %9886 = vmatpush3.bf16.msra.mxu0 %v9883_v5  ;;  %v7301_v5 = vld [vmem:[%s13182_s9 + $0xf0] sm:$0xff] }
0x2f3a   :  { %9888 = vmatprep.subr.bf16.mxu0 %v9887_v55 }
0x2f3c   :  { %6453 = vadd.xlane.f32.xlu0 %v6452_v16 }
0x2f3d   :  { %9890 = vmatpush3.bf16.msra.mxu0 %v9887_v55  ;;  %v9919_v55 = vpack.c.bf16 %v7302_v35, %v7301_v5 }
0x2f3f   :  { %v10822_v17 = vpop.eup %10821 }
0x2f40   :  { %6468 = vadd.xlane.f32.xlu0 %v6467_v11  ;;  %v6492_v28 = vmul.f32 %v10822_v17, %v6460_v13  ;;  %v7295_v13 = vld [vmem:[%s13182_s9 + $0xc0] sm:$0xff]  ;;  %v7300_v11 = vld [vmem:[%s13182_s9 + $0xe8] sm:$0xff]  ;;  %s10896_s9 = smov [#allocation2]  }
0x2f41   :  { %v9907_v15 = vpack.c.bf16 %v7296_v58, %v7295_v13  ;;  %v9915_v0 = vpack.c.bf16 %v7300_v11, %v7299_v23  ;;  %s6916_s4 = sshll.u32 %s10896_s9, 4  ;;  %s6917_s4 = int_to_ptr.vmem [resolvable:$true] %s6916_s4 }
0x2f42   :  { %v6500_v32 = vmul.f32 %v13070_v24, %v6492_v28  ;;  %s10865_s24 = scalar_lea.vmem %s6917_s4, 512  ;;  %p10870_p1 = scmp.lt.s32.totalorder %s6917_s4, %s6917_s4 }
0x2f43   :  { %9908 = vmatprep.subr.bf16.mxu1 %v9907_v15  ;;  %p10866_p0 = scmp.ne.s32.totalorder %s6917_s4, %s10865_s24  ;;  %p10871_p2 = scmp.lt.s32.totalorder %s10865_s24, %s10865_s24 }
0x2f44   :  { %v6508_v34 = vadd.f32 %v13075_v51, %v6500_v32  ;;  %9910 = vmatpush3.bf16.msra.mxu1 %v9907_v15 }
0x2f45   :  { %p10872_p3 = por %p10871_p2, %p10870_p1 }
0x2f47   :  { %p10873_p4 = pnand %p10872_p3, %p10866_p0 }
0x2fc5   :  { %v6451_v49 = vpop.xlane.xlu0 %6450 }
0x2fc6   :  { %v6457_v59 = vmul.f32 0.03125, %v6451_v49 }
0x2fc8   :  { %v13051_v21 = vsub.f32 %v13027_v12, %v6457_v59 }
0x2fc9   :  { %v6454_v30 = vpop.xlane.xlu0 %6453 }
0x2fca   :  { %v6458_v40 = vmul.f32 0.03125, %v6454_v30  ;;  %v6465_v53 = vmul.f32 %v13051_v21, %v13051_v21 }
0x2fcc   :  { %v13056_v27 = vsub.f32 %v13031_v45, %v6458_v40  ;;  %v6473_v38 = vsel %vm73_vm0, %v6465_v53, 0.0 }
0x2fcd   :  { %6474 = vadd.xlane.f32.xlu0 %v6473_v38  ;;  %v6469_v25 = vpop.xlane.xlu0 %6468 }
0x2fce   :  { %v6479_v3 = vmul.f32 0.03125, %v6469_v25  ;;  %v6466_v6 = vmul.f32 %v13056_v27, %v13056_v27 }
0x2fd0   :  { %v6483_v61 = vadd.f32 1e-05, %v6479_v3  ;;  %v6476_v46 = vsel %vm73_vm0, %v6466_v6, 0.0 }
0x2fd1   :  { %6477 = vadd.xlane.f32.xlu1 %v6476_v46 }
0x2fd2   :  { %10823 = vrsqrt.f32 %v6483_v61 }
0x2fdc   :  { %v10824_v50 = vpop.eup %10823 }
0x2fdd   :  { %v6491_v36 = vmul.f32 %v10824_v50, %v6459_v39  ;;  %v9911_v39 = vpack.c.bf16 %v7298_v4, %v7297_v2 }
0x2fdf   :  { %v6499_v44 = vmul.f32 %v13070_v24, %v6491_v36  ;;  %9912 = vmatprep.subr.bf16.mxu1 %v9911_v39 }
0x2fe0   :  { %9914 = vmatpush3.bf16.msra.mxu1 %v9911_v39 }
0x2fe1   :  { %v6507_v19 = vadd.f32 %v13075_v51, %v6499_v44  ;;  %9916 = vmatprep.subr.bf16.mxu1 %v9915_v0 }
0x2fe3   :  { %8903 = vmatprep.mubr.msk.f32.mxu0 %vm73_vm0, %v6507_v19 }
0x2fe4   :  { %8904 = vmatmul.mubr.msk.f32.vlgmr.msra.gmra.mrb[84].mxu0 %vm73_vm0, %v6508_v34  ;;  %9918 = vmatpush3.bf16.msra.mxu1 %v9915_v0 }
0x2fe5   :  { %9920 = vmatprep.subr.bf16.mxu1 %v9919_v55 }
0x2fe8   :  { %9922 = vmatpush3.bf16.msra.mxu1 %v9919_v55 }
0x305a   :  { %v6475_v8 = vpop.xlane.xlu0 %6474 }
0x305b   :  { %v6481_v18 = vmul.f32 0.03125, %v6475_v8 }
0x305d   :  { %v6485_v20 = vadd.f32 1e-05, %v6481_v18 }
0x305e   :  { %v6478_v16 = vpop.xlane.xlu1 %6477 }
0x305f   :  { %10825 = vrsqrt.f32 %v6485_v20  ;;  %v6482_v57 = vmul.f32 0.03125, %v6478_v16 }
0x3061   :  { %v6486_v47 = vadd.f32 1e-05, %v6482_v57 }
0x3063   :  { %10827 = vrsqrt.f32 %v6486_v47 }
0x3069   :  { %v10826_v52 = vpop.eup %10825 }
0x306a   :  { %v6493_v29 = vmul.f32 %v10826_v52, %v13051_v21 }
0x306c   :  { %v6501_v49 = vmul.f32 %v13070_v24, %v6493_v29 }
0x306d   :  { %v10828_v59 = vpop.eup %10827 }
0x306e   :  { %v6509_v22 = vadd.f32 %v13075_v51, %v6501_v49  ;;  %v6494_v30 = vmul.f32 %v10828_v59, %v13056_v27 }
0x3070   :  { %8906 = vmatprep.mubr.msk.f32.mxu0 %vm73_vm0, %v6509_v22  ;;  %v6502_v40 = vmul.f32 %v13070_v24, %v6494_v30 }
0x3072   :  { %v6510_v53 = vadd.f32 %v13075_v51, %v6502_v40 }
0x3074   :  { %8907 = vmatmul.mubr.msk.f32.gmra.mrb[86].mxu0 %vm73_vm0, %v6510_v53 }
0x30b7   :  { %v8905_v38 = vpop.f32.mrb[84].mxu0 }
0x30b8   :  { %v6618_v25 = vmul.f32 0.70710677, %v8905_v38  ;;  %v6594_v3 = vpop.f32.mrb[85].mxu0  ;;  %v6614_v53 = vmul.f32 0.5, %v8905_v38 }
0x30b9   :  { %v6617_v6 = vmul.f32 0.70710677, %v6594_v3  ;;  %v6613_v30 = vmul.f32 0.5, %v6594_v3 }
0x30ba   :  { %v7284_v21 = vclamps-f32 %v6618_v25, 4.0 }
0x30bb   :  { %v7283_v61 = vclamps-f32 %v6617_v6, 4.0 }
0x30bc   :  { %v6630_v46 = vmul.f32 %v7284_v21, %v7284_v21 }
0x30bd   :  { %v6629_v17 = vmul.f32 %v7283_v61, %v7283_v61 }
0x30be   :  { %v6666_v60 = vmul.f32 -1.1791603e-07, %v6630_v46  ;;  %v6634_v28 = vmul.f32 0.00022905065, %v6630_v46 }
0x30bf   :  { %v6665_v50 = vmul.f32 -1.1791603e-07, %v6629_v17  ;;  %v6633_v36 = vmul.f32 0.00022905065, %v6629_v17 }
0x30c0   :  { %v6670_v27 = vadd.f32 2.3547966e-05, %v6666_v60  ;;  %v6638_v24 = vadd.f32 0.003408291, %v6634_v28 }
0x30c1   :  { %v6669_v37 = vadd.f32 2.3547966e-05, %v6665_v50  ;;  %v6637_v19 = vadd.f32 0.003408291, %v6633_v36 }
0x30c2   :  { %v6674_v32 = vmul.f32 %v6670_v27, %v6630_v46  ;;  %v6642_v41 = vmul.f32 %v6638_v24, %v6630_v46 }
0x30c3   :  { %v6673_v44 = vmul.f32 %v6669_v37, %v6629_v17  ;;  %v6641_v10 = vmul.f32 %v6637_v19, %v6629_v17 }
0x30c4   :  { %v6678_v51 = vadd.f32 0.0010179626, %v6674_v32  ;;  %v6646_v1 = vadd.f32 0.050955694, %v6642_v41 }
0x30c5   :  { %v6677_v34 = vadd.f32 0.0010179626, %v6673_v44  ;;  %v6645_v62 = vadd.f32 0.050955694, %v6641_v10 }
0x30c6   :  { %v6682_v42 = vmul.f32 %v6678_v51, %v6630_v46  ;;  %v6650_v58 = vmul.f32 %v6646_v1, %v6630_v46 }
0x30c7   :  { %v6681_v9 = vmul.f32 %v6677_v34, %v6629_v17  ;;  %v6649_v2 = vmul.f32 %v6645_v62, %v6629_v17 }
0x30c8   :  { %v6686_v26 = vadd.f32 0.01407047, %v6682_v42  ;;  %v6654_v39 = vadd.f32 0.18520832, %v6650_v58 }
0x30c9   :  { %v6685_v63 = vadd.f32 0.01407047, %v6681_v9  ;;  %v6653_v23 = vadd.f32 0.18520832, %v6649_v2 }
0x30ca   :  { %v6690_v56 = vmul.f32 %v6686_v26, %v6630_v46  ;;  %v6658_v57 = vmul.f32 %v6654_v39, %v6630_v46 }
0x30cb   :  { %v6689_v33 = vmul.f32 %v6685_v63, %v6629_v17  ;;  %v6657_v0 = vmul.f32 %v6653_v23, %v6629_v17 }
0x30cc   :  { %v6694_v48 = vadd.f32 0.11098505, %v6690_v56  ;;  %v6662_v47 = vadd.f32 1.1283791, %v6658_v57 }
0x30cd   :  { %v6693_v54 = vadd.f32 0.11098505, %v6689_v33  ;;  %v6661_v5 = vadd.f32 1.1283791, %v6657_v0 }
0x30ce   :  { %v6698_v13 = vmul.f32 %v6694_v48, %v6630_v46  ;;  %v6714_v35 = vmul.f32 %v7284_v21, %v6662_v47 }
0x30cf   :  { %v6697_v15 = vmul.f32 %v6693_v54, %v6629_v17  ;;  %v6713_v52 = vmul.f32 %v7283_v61, %v6661_v5 }
0x30d0   :  { %v6702_v8 = vadd.f32 0.49746925, %v6698_v13 }
0x30d1   :  { %v6701_v4 = vadd.f32 0.49746925, %v6697_v15 }
0x30d2   :  { %v6706_v18 = vmul.f32 %v6702_v8, %v6630_v46 }
0x30d3   :  { %v6705_v20 = vmul.f32 %v6701_v4, %v6629_v17 }
0x30d4   :  { %v6710_v16 = vadd.f32 1.0, %v6706_v18 }
0x30d5   :  { %v6709_v11 = vadd.f32 1.0, %v6705_v20 }
0x30d6   :  { %10829 = vrcp.f32 %v6710_v16 }
0x30d7   :  { %10831 = vrcp.f32 %v6709_v11 }
0x30e0   :  { %v10830_v55 = vpop.eup %10829 }
0x30e1   :  { %v10832_v29 = vpop.eup %10831  ;;  %v6720_v49 = vmul.f32 %v10830_v55, %v6714_v35 }
0x30e2   :  { %v6718_v59 = vmul.f32 %v10832_v29, %v6713_v52 }
0x30e3   :  { %v6726_v22 = vadd.f32 1.0, %v6720_v49 }
0x30e4   :  { %v6725_v40 = vadd.f32 1.0, %v6718_v59 }
0x30e5   :  { %v6730_v6 = vmul.f32 %v6726_v22, %v6614_v53 }
0x30e6   :  { %v6729_v25 = vmul.f32 %v6725_v40, %v6613_v30 }
0x30e8   :  { %8941 = vmatprep.mubr.f32.mxu1 %v6729_v25 }
0x30e9   :  { %8942 = vmatmul.mubr.f32.vlgmr.msra.gmra.mrb[76].mxu1 %v6730_v6 }
0x3147   :  { %v8908_v60 = vpop.f32.mrb[86].mxu0 }
0x3148   :  { %v6620_v46 = vmul.f32 0.70710677, %v8908_v60  ;;  %v6604_v28 = vpop.f32.mrb[87].mxu0  ;;  %v6616_v6 = vmul.f32 0.5, %v8908_v60 }
0x3149   :  { %v6619_v17 = vmul.f32 0.70710677, %v6604_v28  ;;  %v6615_v53 = vmul.f32 0.5, %v6604_v28 }
0x314a   :  { %v7286_v50 = vclamps-f32 %v6620_v46, 4.0 }
0x314b   :  { %v7285_v27 = vclamps-f32 %v6619_v17, 4.0 }
0x314c   :  { %v6632_v21 = vmul.f32 %v7286_v50, %v7286_v50 }
0x314d   :  { %v6631_v36 = vmul.f32 %v7285_v27, %v7285_v27 }
0x314e   :  { %v6668_v61 = vmul.f32 -1.1791603e-07, %v6632_v21  ;;  %v6636_v37 = vmul.f32 0.00022905065, %v6632_v21 }
0x314f   :  { %v6667_v32 = vmul.f32 -1.1791603e-07, %v6631_v36  ;;  %v6635_v44 = vmul.f32 0.00022905065, %v6631_v36 }
0x3150   :  { %v6672_v24 = vadd.f32 2.3547966e-05, %v6668_v61  ;;  %v6640_v38 = vadd.f32 0.003408291, %v6636_v37 }
0x3151   :  { %v6671_v3 = vadd.f32 2.3547966e-05, %v6667_v32  ;;  %v6639_v42 = vadd.f32 0.003408291, %v6635_v44 }
0x3152   :  { %v6676_v51 = vmul.f32 %v6672_v24, %v6632_v21  ;;  %v6644_v26 = vmul.f32 %v6640_v38, %v6632_v21 }
0x3153   :  { %v6675_v19 = vmul.f32 %v6671_v3, %v6631_v36  ;;  %v6643_v56 = vmul.f32 %v6639_v42, %v6631_v36 }
0x3154   :  { %v6680_v34 = vadd.f32 0.0010179626, %v6676_v51  ;;  %v6648_v48 = vadd.f32 0.050955694, %v6644_v26 }
0x3155   :  { %v6679_v41 = vadd.f32 0.0010179626, %v6675_v19  ;;  %v6647_v13 = vadd.f32 0.050955694, %v6643_v56 }
0x3156   :  { %v6684_v9 = vmul.f32 %v6680_v34, %v6632_v21  ;;  %v6652_v8 = vmul.f32 %v6648_v48, %v6632_v21 }
0x3157   :  { %v6683_v10 = vmul.f32 %v6679_v41, %v6631_v36  ;;  %v6651_v18 = vmul.f32 %v6647_v13, %v6631_v36 }
0x3158   :  { %v6688_v63 = vadd.f32 0.01407047, %v6684_v9  ;;  %v6656_v16 = vadd.f32 0.18520832, %v6652_v8 }
0x3159   :  { %v6687_v1 = vadd.f32 0.01407047, %v6683_v10  ;;  %v6655_v57 = vadd.f32 0.18520832, %v6651_v18  ;;  %v13206_v18 = vsub.s32 4, %v13201_v31 }
0x315a   :  { %v6692_v33 = vmul.f32 %v6688_v63, %v6632_v21  ;;  %v6660_v47 = vmul.f32 %v6656_v16, %v6632_v21 }
0x315b   :  { %v6691_v62 = vmul.f32 %v6687_v1, %v6631_v36  ;;  %v6659_v5 = vmul.f32 %v6655_v57, %v6631_v36 }
0x315c   :  { %v6696_v54 = vadd.f32 0.11098505, %v6692_v33  ;;  %v6664_v35 = vadd.f32 1.1283791, %v6660_v47 }
0x315d   :  { %v6695_v58 = vadd.f32 0.11098505, %v6691_v62  ;;  %v6663_v55 = vadd.f32 1.1283791, %v6659_v5 }
0x315e   :  { %v6700_v15 = vmul.f32 %v6696_v54, %v6632_v21  ;;  %v6716_v52 = vmul.f32 %v7286_v50, %v6664_v35 }
0x315f   :  { %v6699_v2 = vmul.f32 %v6695_v58, %v6631_v36  ;;  %v6715_v49 = vmul.f32 %v7285_v27, %v6663_v55 }
0x3160   :  { %v6704_v4 = vadd.f32 0.49746925, %v6700_v15 }
0x3161   :  { %v6703_v39 = vadd.f32 0.49746925, %v6699_v2 }
0x3162   :  { %v6708_v20 = vmul.f32 %v6704_v4, %v6632_v21 }
0x3163   :  { %v6707_v23 = vmul.f32 %v6703_v39, %v6631_v36  ;;  %v6894_v39 = vrot.slane %v13065_v7, %v13206_v18 }
0x3164   :  { %v6712_v11 = vadd.f32 1.0, %v6708_v20 }
0x3165   :  { %v6711_v0 = vadd.f32 1.0, %v6707_v23  ;;  %v13207_v23 = vsub.s32 5, %v13201_v31 }
0x3166   :  { %10833 = vrcp.f32 %v6712_v11 }
0x3167   :  { %10835 = vrcp.f32 %v6711_v0  ;;  %v6902_v11 = vrot.slane %v13065_v7, %v13207_v23 }
0x3170   :  { %v10834_v29 = vpop.eup %10833 }
0x3171   :  { %v10836_v59 = vpop.eup %10835  ;;  %v6724_v22 = vmul.f32 %v10834_v29, %v6716_v52 }
0x3172   :  { %v6722_v30 = vmul.f32 %v10836_v59, %v6715_v49 }
0x3173   :  { %v6728_v40 = vadd.f32 1.0, %v6724_v22 }
0x3174   :  { %v6727_v25 = vadd.f32 1.0, %v6722_v30 }
0x3175   :  { %v6732_v17 = vmul.f32 %v6728_v40, %v6616_v6 }
0x3176   :  { %v6731_v46 = vmul.f32 %v6727_v25, %v6615_v53 }
0x3178   :  { %8944 = vmatprep.mubr.f32.mxu1 %v6731_v46 }
0x3179   :  { %8945 = vmatmul.mubr.f32.gmra.mrb[78].mxu1 %v6732_v17 }
0x31bc   :  { %v8943_v61 = vpop.f32.mrb[76].mxu1 }
0x31bd   :  { %v6836_v21 = vadd.f32 %v8943_v61, %v13008_v14  ;;  %v6816_v36 = vpop.f32.mrb[77].mxu1 }
0x31be   :  { %v6835_v37 = vadd.f32 %v6816_v36, %v13005_v43 }
0x31bf   :  { %v6842_v50 = vsel %vm73_vm0, %v6836_v21, 0.0 }
0x31c0   :  { %6843 = vadd.xlane.f32.xlu1 %v6842_v50  ;;  %v6839_v27 = vsel %vm73_vm0, %v6835_v37, 0.0 }
0x31c1   :  { %6840 = vadd.xlane.f32.xlu0 %v6839_v27 }
0x324c   :  { %v8946_v32 = vpop.f32.mrb[78].mxu1 }
0x324d   :  { %v6838_v28 = vadd.f32 %v8946_v32, %v13031_v45  ;;  %v6844_v60 = vpop.xlane.xlu1 %6843  ;;  %v6826_v24 = vpop.f32.mrb[79].mxu1 }
0x324e   :  { %v6852_v44 = vmul.f32 0.03125, %v6844_v60  ;;  %v6837_v3 = vadd.f32 %v6826_v24, %v13027_v12  ;;  %v6841_v51 = vpop.xlane.xlu0 %6840 }
0x324f   :  { %v6851_v38 = vmul.f32 0.03125, %v6841_v51  ;;  %v6848_v14 = vsel %vm73_vm0, %v6838_v28, 0.0 }
0x3250   :  { %v6856_v19 = vsub.f32 %v6836_v21, %v6852_v44  ;;  %6849 = vadd.xlane.f32.xlu1 %v6848_v14  ;;  %v6845_v43 = vsel %vm73_vm0, %v6837_v3, 0.0 }
0x3251   :  { %v6855_v34 = vsub.f32 %v6835_v37, %v6851_v38  ;;  %6846 = vadd.xlane.f32.xlu0 %v6845_v43 }
0x3252   :  { %v6860_v42 = vmul.f32 %v6856_v19, %v6856_v19 }
0x3253   :  { %v6859_v41 = vmul.f32 %v6855_v34, %v6855_v34 }
0x3254   :  { %v6866_v9 = vsel %vm73_vm0, %v6860_v42, 0.0 }
0x3255   :  { %6867 = vadd.xlane.f32.xlu1 %v6866_v9  ;;  %v6863_v45 = vsel %vm73_vm0, %v6859_v41, 0.0 }
0x3256   :  { %6864 = vadd.xlane.f32.xlu0 %v6863_v45 }
0x32dd   :  { %v6850_v26 = vpop.xlane.xlu1 %6849 }
0x32de   :  { %v6854_v12 = vmul.f32 0.03125, %v6850_v26  ;;  %v6847_v10 = vpop.xlane.xlu0 %6846 }
0x32df   :  { %v6853_v63 = vmul.f32 0.03125, %v6847_v10 }
0x32e0   :  { %v6858_v56 = vsub.f32 %v6838_v28, %v6854_v12 }
0x32e1   :  { %v6857_v1 = vsub.f32 %v6837_v3, %v6853_v63 }
0x32e2   :  { %v6868_v33 = vpop.xlane.xlu1 %6867  ;;  %v6862_v48 = vmul.f32 %v6858_v56, %v6858_v56 }
0x32e3   :  { %v6876_v62 = vmul.f32 0.03125, %v6868_v33  ;;  %v6865_v54 = vpop.xlane.xlu0 %6864  ;;  %v6861_v13 = vmul.f32 %v6857_v1, %v6857_v1 }
0x32e4   :  { %v6875_v58 = vmul.f32 0.03125, %v6865_v54  ;;  %v6872_v15 = vsel %vm73_vm0, %v6862_v48, 0.0 }
0x32e5   :  { %v6880_v8 = vadd.f32 1e-05, %v6876_v62  ;;  %6873 = vadd.xlane.f32.xlu1 %v6872_v15  ;;  %v6869_v2 = vsel %vm73_vm0, %v6861_v13, 0.0 }
0x32e6   :  { %v6879_v4 = vadd.f32 1e-05, %v6875_v58  ;;  %6870 = vadd.xlane.f32.xlu0 %v6869_v2 }
0x32e7   :  { %10837 = vrsqrt.f32 %v6880_v8 }
0x32e8   :  { %10839 = vrsqrt.f32 %v6879_v4 }
0x32f1   :  { %v10838_v20 = vpop.eup %10837 }
0x32f2   :  { %v10840_v16 = vpop.eup %10839  ;;  %v6888_v57 = vmul.f32 %v10838_v20, %v6856_v19 }
0x32f3   :  { %v6887_v0 = vmul.f32 %v10840_v16, %v6855_v34 }
0x32f4   :  { %v6896_v47 = vmul.f32 %v6894_v39, %v6888_v57 }
0x32f5   :  { %v6895_v5 = vmul.f32 %v6894_v39, %v6887_v0 }
0x32f6   :  { %v6904_v35 = vadd.f32 %v6902_v11, %v6896_v47 }
0x32f7   :  { %v6903_v55 = vadd.f32 %v6902_v11, %v6895_v5 }
0x32f8   :  { %6908 = vst.msk [vmem:[#allocation2 + $0x8] sm:$0xff] %vm73_vm0, %v6904_v35 }
0x32f9   :  { %6907 = vst.msk [vmem:[#allocation2] sm:$0xff] %vm73_vm0, %v6903_v55 }
0x3372   :  { %v6874_v52 = vpop.xlane.xlu1 %6873 }
0x3373   :  { %v6878_v29 = vmul.f32 0.03125, %v6874_v52  ;;  %v6871_v49 = vpop.xlane.xlu0 %6870 }
0x3374   :  { %v6877_v59 = vmul.f32 0.03125, %v6871_v49 }
0x3375   :  { %v6882_v22 = vadd.f32 1e-05, %v6878_v29 }
0x3376   :  { %v6881_v30 = vadd.f32 1e-05, %v6877_v59 }
0x3377   :  { %10841 = vrsqrt.f32 %v6882_v22 }
0x3378   :  { %10843 = vrsqrt.f32 %v6881_v30 }
0x3381   :  { %v10842_v31 = vpop.eup %10841 }
0x3382   :  { %v10844_v7 = vpop.eup %10843  ;;  %v6890_v40 = vmul.f32 %v10842_v31, %v6858_v56 }
0x3383   :  { %v6889_v53 = vmul.f32 %v10844_v7, %v6857_v1 }
0x3384   :  { %v6898_v25 = vmul.f32 %v6894_v39, %v6890_v40 }
0x3385   :  { %v6897_v6 = vmul.f32 %v6894_v39, %v6889_v53 }
0x3386   :  { %v6906_v46 = vadd.f32 %v6902_v11, %v6898_v25 }
0x3387   :  { %v6905_v17 = vadd.f32 %v6902_v11, %v6897_v6 }
0x3388   :  { %6910 = vst.msk [vmem:[#allocation2 + $0x18] sm:$0xff] %vm73_vm0, %v6906_v46 }
0x3389   :  { %6909 = vst.msk [vmem:[#allocation2 + $0x10] sm:$0xff] %vm73_vm0, %v6905_v17 }
0x338a   :  { %10876 = shalt.err (!%p10873_p4)
}
0x338b   :  { %s10877_s28 = scalar_lea.hbm %s13183_s10, 512 }
0x338c   :  { %p10878_p5 = scmp.ne.s32.totalorder %s13183_s10, %s10877_s28  ;;  %p10881_p6 = scmp.lt.u32.totalorder %s10877_s28, %s13183_s10 }
0x338e   :  { %p10883_p7 = pnand %p10881_p6, %p10878_p5 }
0x3390   :  { %10886 = shalt.err (!%p10883_p7)
}
0x3391   :  { %s10897_s18 = smov 128   ;;  %s10898_s19 = smov 8  }
0x3392   :  { %6922 = dma.vmem_to_hbm [thread:$0]  %s6917_s4, 512, %s13183_s10, [#allocation3], %s10897_s18, %s10897_s18, %s10898_s19  }
0x3393   :  { %10887 = dma.done.wait [#allocation3], 512  }
0x3394   :  { %10888 = vsyncadd [#allocation3], 4294966784 }
0x3395   :  { %6926 = vsyncpa [#allocation3], 1 }

</bundles_post_ra>
